<compile_context>
chip_gen: v5e
topology: v5e:2x2
jax: 0.10.0
libtpu: 0.0.40
codegen_flags: <defaults>
</compile_context>

<pallas_src>
import jax
import jax.numpy as jnp
import numpy as np
from jax.experimental import pallas as pl
from jax.experimental.pallas import tpu as pltpu

TAYLOR_ORDER = 12  # TODO(synk): torch.matrix_exp uses Pade/scaling-squaring; truncated Taylor used here.


def _lssm_kernel(dt_ref, x_ref, z0_ref, AkT_ref,
                 Wdec_ref, V2P_ref, bp_ref,
                 Wgru_ref, bgru_ref,
                 Wenc_ref, be_ref, beU1_ref, U2_ref,
                 xpre_ref, z_scr):
    f32 = jnp.float32
    T_BLK = dt_ref.shape[-1]
    B = z0_ref.shape[0]
    L = z0_ref.shape[-1]
    D = bp_ref.shape[-1]
    K = AkT_ref.shape[-1] // L

    # Re-init carried latent state at the start of every batch block's time loop.
    @pl.when(pl.program_id(1) == 0)
    def _():
        z_scr[...] = z0_ref[...]

    # Constants (same block every iteration -> no re-DMA).
    AkT = AkT_ref[...]                    # (L, K*L)   [A^1/1! | ... | A^K/K!]^T
    Wdec = Wdec_ref[...]                  # (L, L+D)   [V1 | P]
    V2P = V2P_ref[...]                    # (L, D)     V2 @ P
    bp = bp_ref[...]                      # (1, D)
    Wgru = Wgru_ref[...]                  # (2D, 4D)   [[Wir,Wiz,Win,0],[Whr,Whz,0,Whn]]
    bgru = bgru_ref[...]                  # (1, 4D)    [bir+bhr, biz+bhz, bin, bhn]
    Wenc = Wenc_ref[...]                  # (D, 2L)    [E | E@U1]
    be = be_ref[...]                      # (1, L)
    beU1 = beU1_ref[...]                  # (1, L)     be @ U1
    U2 = U2_ref[...]                      # (L, L)

    z = z_scr[...]                        # (B, L) carried state
    for s in range(T_BLK):                # statically unrolled time steps
        dt = dt_ref[0, :, s:s + 1]                       # (B, 1)
        x_obs = x_ref[0, :, s * D:(s + 1) * D]           # (B, D)

        # ---- System: z_pre = expm(dt*A) z  via one wide matmul over A^k/k! ----
        prod = jnp.dot(z, AkT, preferred_element_type=f32)     # (B, K*L)
        dt_b = jnp.broadcast_to(dt, (B, L))                    # hoisted broadcast
        dp = dt_b
        z_pre = z + dp * prod[:, :L]
        for k in range(1, K):
            dp = dp * dt_b
            z_pre = z_pre + dp * prod[:, k * L:(k + 1) * L]

        # ---- Decoder (fused): x_pre = z_pre@P + relu(z_pre@V1)@(V2@P) + bp ----
        dec = jnp.dot(z_pre, Wdec, preferred_element_type=f32)  # (B, L+D)
        h = jax.nn.relu(dec[:, :L])
        x_pre = dec[:, L:] + jnp.dot(h, V2P, preferred_element_type=f32) + bp

        # ---- Filter: NaN imputation + GRUCell(x_obs, hidden=x_pre), single matmul ----
        y = jnp.where(jnp.isnan(x_obs), x_pre, x_obs)
        gin = jnp.concatenate([y, x_pre], axis=-1)               # (B, 2D)
        g = jnp.dot(gin, Wgru, preferred_element_type=f32) + bgru  # (B, 4D)
        r = jax.nn.sigmoid(g[:, 0 * D:1 * D])
        zg = jax.nn.sigmoid(g[:, 1 * D:2 * D])
        n = jnp.tanh(g[:, 2 * D:3 * D] + r * g[:, 3 * D:4 * D])
        x_post = (1.0 - zg) * n + zg * x_pre

        # ---- Encoder (fused): e = x_post@E + be ; z = e + relu(x_post@(E@U1) + be@U1)@U2 ----
        enc = jnp.dot(x_post, Wenc, preferred_element_type=f32)  # (B, 2L)
        e = enc[:, :L] + be
        gg = jax.nn.relu(enc[:, L:] + beU1)
        z = e + jnp.dot(gg, U2, preferred_element_type=f32)

        # Direct lane-slice store into the lane-dense output slab.
        xpre_ref[0, :, s * D:(s + 1) * D] = x_pre.astype(xpre_ref.dtype)

    z_scr[...] = z


def lssm_forward(T, X, params, t_blk=16):
    """T: (B, LEN) timestamps.  X: (B, LEN, D) observations (NaN = missing).
    Returns yhat = xhat_pre[..., :output_size] with shape (B, LEN, D)."""
    B, LEN = T.shape
    D = X.shape[-1]
    L = params["kernel"].shape[0]
    K = TAYLOR_ORDER

    # ---- wrapper-side precompute ----
    t0 = T[..., :1]
    DT = jnp.diff(T, prepend=t0, axis=-1).astype(jnp.float32)       # (B, LEN)
    Xf = X.astype(jnp.float32)                                      # (B, LEN, D)

    # pad LEN up to a multiple of t_blk (dt=0, x=NaN padding steps; dropped at the end)
    NB = -(-LEN // t_blk)
    LEN_pad = NB * t_blk
    if LEN_pad != LEN:
        pad = LEN_pad - LEN
        DT = jnp.concatenate([DT, jnp.zeros((B, pad), jnp.float32)], axis=-1)
        Xf = jnp.concatenate([Xf, jnp.full((B, pad, D), jnp.nan, jnp.float32)], axis=1)

    # Lane-dense slabs: one dense (B, t_blk[*D]) tile per grid step.
    DTs = jnp.transpose(DT.reshape(B, NB, t_blk), (1, 0, 2))                     # (NB, B, t_blk)
    Xs = jnp.transpose(Xf.reshape(B, NB, t_blk, D), (1, 0, 2, 3)).reshape(NB, B, t_blk * D)

    z0b = jnp.broadcast_to(params["z0"][None, :], (B, L)).astype(jnp.float32)

    # Taylor stack: column block k-1 holds (A^k / k!)^T, so z_row @ block == (A^k/k! z)^T.
    At = params["kernel"].T.astype(jnp.float32)
    term = jnp.eye(L, dtype=jnp.float32)
    blocks = []
    for k in range(1, K + 1):
        term = (term @ At) / float(k)
        blocks.append(term)
    AkT = jnp.concatenate(blocks, axis=1)                            # (L, K*L)

    # Fused decoder weights.
    Wdec = jnp.concatenate([params["V1"], params["P"]], axis=1)      # (L, L+D)
    V2P = params["V2"] @ params["P"]                                 # (L, D)

    # Fused (single-matmul) GRU weights / biases.
    zeros_D = jnp.zeros((D, D), jnp.float32)
    Wgru_top = jnp.concatenate([params["Wir"], params["Wiz"], params["Win"], zeros_D], axis=1)
    Wgru_bot = jnp.concatenate([params["Whr"], params["Whz"], zeros_D, params["Whn"]], axis=1)
    Wgru = jnp.concatenate([Wgru_top, Wgru_bot], axis=0)             # (2D, 4D)
    bgru = jnp.concatenate([params["bir"] + params["bhr"],
                            params["biz"] + params["bhz"],
                            params["bin"], params["bhn"]], axis=1)   # (1, 4D)

    # Fused encoder weights.
    Wenc = jnp.concatenate([params["E"], params["E"] @ params["U1"]], axis=1)  # (D, 2L)
    beU1 = params["be"] @ params["U1"]                                          # (1, L)

    # Batch blocking: size-1 axis for small batches; enables TC-sharding for big batches.
    b_blk = 8 if (B > 8 and B % 8 == 0) else B
    n_bblk = B // b_blk

    def const(shape):
        return pl.BlockSpec(shape, lambda b, t: (0,) * len(shape))

    in_specs = [
        pl.BlockSpec((1, b_blk, t_blk), lambda b, t: (t, b, 0)),       # DT slab
        pl.BlockSpec((1, b_blk, t_blk * D), lambda b, t: (t, b, 0)),   # X slab
        pl.BlockSpec((b_blk, L), lambda b, t: (b, 0)),                 # z0
        const((L, K * L)),                                             # Taylor stack
        const((L, L + D)), const((L, D)), const((1, D)),               # Wdec, V2P, bp
        const((2 * D, 4 * D)), const((1, 4 * D)),                      # Wgru, bgru
        const((D, 2 * L)), const((1, L)), const((1, L)),               # Wenc, be, beU1
        const((L, L)),                                                 # U2
    ]

    xhat = pl.pallas_call(
        _lssm_kernel,
        out_shape=jax.ShapeDtypeStruct((NB, B, t_blk * D), jnp.float32),
        grid_spec=pltpu.PrefetchScalarGridSpec(
            num_scalar_prefetch=0,
            grid=(n_bblk, NB),
            in_specs=in_specs,
            out_specs=pl.BlockSpec((1, b_blk, t_blk * D), lambda b, t: (t, b, 0)),
            scratch_shapes=[pltpu.VMEM((b_blk, L), jnp.float32)],
        ),
        compiler_params=pltpu.CompilerParams(
            dimension_semantics=("parallel", "arbitrary")),
    )(DTs, Xs, z0b, AkT,
      Wdec, V2P, params["bp"],
      Wgru, bgru,
      Wenc, params["be"], beU1, params["U2"])

    # (NB, B, t_blk*D) -> (B, LEN, D)   (torch.stack(..., dim=-2) convention)
    yhat = xhat.reshape(NB, B, t_blk, D)
    yhat = jnp.transpose(yhat, (1, 0, 2, 3)).reshape(B, LEN_pad, D)[:, :LEN, :]
    return yhat[..., :D]   # output_size == D (padding_size = 0)


def lssm_reference(T, X, params):
    """Pure-JAX reference with identical math (lax.scan over time)."""
    B, LEN = T.shape
    L = params["kernel"].shape[0]
    t0 = T[..., :1]
    DT = jnp.diff(T, prepend=t0, axis=-1)
    At = params["kernel"].T
    z0 = jnp.broadcast_to(params["z0"][None, :], (B, L)).astype(jnp.float32)

    def step(z_post, inputs):
        dt, x_obs = inputs
        dt = dt[:, None]
        term, z_pre = z_post, z_post
        for k in range(1, TAYLOR_ORDER + 1):
            term = (dt / float(k)) * (term @ At)
            z_pre = z_pre + term
        u = z_pre + jax.nn.relu(z_pre @ params["V1"]) @ params["V2"]
        x_pre = u @ params["P"] + params["bp"]
        y = jnp.where(jnp.isnan(x_obs), x_pre, x_obs)
        r = jax.nn.sigmoid(y @ params["Wir"] + params["bir"] + x_pre @ params["Whr"] + params["bhr"])
        zg = jax.nn.sigmoid(y @ params["Wiz"] + params["biz"] + x_pre @ params["Whz"] + params["bhz"])
        n = jnp.tanh(y @ params["Win"] + params["bin"] + r * (x_pre @ params["Whn"] + params["bhn"]))
        x_post = (1.0 - zg) * n + zg * x_pre
        e = x_post @ params["E"] + params["be"]
        z_new = e + jax.nn.relu(e @ params["U1"]) @ params["U2"]
        return z_new, x_pre

    _, xhat_pre = jax.lax.scan(step, z0, (jnp.moveaxis(DT, -1, 0), jnp.moveaxis(X, -2, 0)))
    return jnp.moveaxis(xhat_pre, 0, -2)


def init_params(key, D, L):
    ks = jax.random.split(key, 32)

    def rn(k, shape, scale):
        return (scale * jax.random.normal(k, shape)).astype(jnp.float32)

    A = rn(ks[0], (L, L), 0.05)
    A = 0.5 * (A - A.T)  # skew-symmetric init, matching LinODECell's default
    sD, sL = 1.0 / np.sqrt(D), 1.0 / np.sqrt(L)
    return dict(
        kernel=A,
        z0=rn(ks[1], (L,), 1.0),
        V1=rn(ks[2], (L, L), sL), V2=rn(ks[3], (L, L), sL),
        P=rn(ks[4], (L, D), sL), bp=rn(ks[5], (1, D), 0.1),
        Wir=rn(ks[6], (D, D), sD), Wiz=rn(ks[7], (D, D), sD), Win=rn(ks[8], (D, D), sD),
        Whr=rn(ks[9], (D, D), sD), Whz=rn(ks[10], (D, D), sD), Whn=rn(ks[11], (D, D), sD),
        bir=rn(ks[12], (1, D), 0.1), biz=rn(ks[13], (1, D), 0.1), bin=rn(ks[14], (1, D), 0.1),
        bhr=rn(ks[15], (1, D), 0.1), bhz=rn(ks[16], (1, D), 0.1), bhn=rn(ks[17], (1, D), 0.1),
        E=rn(ks[18], (D, L), sD), be=rn(ks[19], (1, L), 0.1),
        U1=rn(ks[20], (L, L), sL), U2=rn(ks[21], (L, L), sL),
    )


if __name__ == "__main__":
    B, LEN, D, L = 8, 32, 16, 32   # t_blk=16 -> lane-dense (B, 256) slabs, grid=(1, 2)

    key = jax.random.PRNGKey(0)
    kp, kt, kx, km = jax.random.split(key, 4)

    params = init_params(kp, D, L)

    # strictly increasing timestamps per batch element
    dts = jax.random.uniform(kt, (B, LEN), minval=0.05, maxval=0.2)
    T = jnp.cumsum(dts, axis=-1).astype(jnp.float32)

    X = jax.random.normal(kx, (B, LEN, D), dtype=jnp.float32)
    miss = jax.random.bernoulli(km, 0.2, (B, LEN, D))
    X = jnp.where(miss, jnp.nan, X)  # NaN marks missing observations

    out = jax.block_until_ready(lssm_forward(T, X, params))
    ref = jax.block_until_ready(lssm_reference(T, X, params))

    assert out.shape == (B, LEN, D)
    assert bool(jnp.all(jnp.isfinite(out)))
    np.testing.assert_allclose(np.asarray(out), np.asarray(ref), rtol=2e-3, atol=2e-3)

    print("KERNEL_OK")
</pallas_src>

<mosaic_0001>
module attributes {stable_mosaic.version = 11 : i64} {
  func.func @_lssm_kernel(%arg0: i32, %arg1: i32, %arg2: memref<1x8x16xf32, #tpu.memory_space<vmem>>, %arg3: memref<1x8x256xf32, #tpu.memory_space<vmem>>, %arg4: memref<8x32xf32, #tpu.memory_space<vmem>>, %arg5: memref<32x384xf32, #tpu.memory_space<vmem>>, %arg6: memref<32x48xf32, #tpu.memory_space<vmem>>, %arg7: memref<32x16xf32, #tpu.memory_space<vmem>>, %arg8: memref<1x16xf32, #tpu.memory_space<vmem>>, %arg9: memref<32x64xf32, #tpu.memory_space<vmem>>, %arg10: memref<1x64xf32, #tpu.memory_space<vmem>>, %arg11: memref<16x64xf32, #tpu.memory_space<vmem>>, %arg12: memref<1x32xf32, #tpu.memory_space<vmem>>, %arg13: memref<1x32xf32, #tpu.memory_space<vmem>>, %arg14: memref<32x32xf32, #tpu.memory_space<vmem>>, %arg15: memref<1x8x256xf32, #tpu.memory_space<vmem>>, %arg16: memref<8x32xf32, #tpu.memory_space<vmem>>) attributes {dimension_semantics = [#tpu.dimension_semantics<parallel>, #tpu.dimension_semantics<arbitrary>], iteration_bounds = array<i64: 1, 2>, scalar_prefetch = 0 : i64, scratch_operands = 1 : i64, tpu.core_type = #tpu.core_type<tc>, window_params = [{transform_indices = @transform_0, window_bounds = array<i64: 1, 8, 16>}, {transform_indices = @transform_1, window_bounds = array<i64: 1, 8, 256>}, {transform_indices = @transform_2, window_bounds = array<i64: 8, 32>}, {pipeline_mode = #tpu.pipeline_mode<synchronous>, transform_indices = @transform_3, window_bounds = array<i64: 32, 384>}, {pipeline_mode = #tpu.pipeline_mode<synchronous>, transform_indices = @transform_4, window_bounds = array<i64: 32, 48>}, {pipeline_mode = #tpu.pipeline_mode<synchronous>, transform_indices = @transform_5, window_bounds = array<i64: 32, 16>}, {pipeline_mode = #tpu.pipeline_mode<synchronous>, transform_indices = @transform_6, window_bounds = array<i64: 1, 16>}, {pipeline_mode = #tpu.pipeline_mode<synchronous>, transform_indices = @transform_7, window_bounds = array<i64: 32, 64>}, {pipeline_mode = #tpu.pipeline_mode<synchronous>, transform_indices = @transform_8, window_bounds = array<i64: 1, 64>}, {pipeline_mode = #tpu.pipeline_mode<synchronous>, transform_indices = @transform_9, window_bounds = array<i64: 16, 64>}, {pipeline_mode = #tpu.pipeline_mode<synchronous>, transform_indices = @transform_10, window_bounds = array<i64: 1, 32>}, {pipeline_mode = #tpu.pipeline_mode<synchronous>, transform_indices = @transform_11, window_bounds = array<i64: 1, 32>}, {pipeline_mode = #tpu.pipeline_mode<synchronous>, transform_indices = @transform_12, window_bounds = array<i64: 32, 32>}, {transform_indices = @transform_13, window_bounds = array<i64: 1, 8, 256>}]} {
    %c0_i32 = arith.constant 0 : i32
    %0 = arith.cmpi eq, %arg1, %c0_i32 : i32
    %1 = arith.extui %0 : i1 to i32
    %c0_i32_0 = arith.constant 0 : i32
    %2 = arith.cmpi ne, %1, %c0_i32_0 : i32
    scf.if %2 {
      %c0_313 = arith.constant 0 : index
      %c0_314 = arith.constant 0 : index
      %1695 = vector.load %arg4[%c0_313, %c0_314] : memref<8x32xf32, #tpu.memory_space<vmem>>, vector<8x32xf32>
      %c0_315 = arith.constant 0 : index
      %c0_316 = arith.constant 0 : index
      %1696 = vector.load %arg16[%c0_315, %c0_316] : memref<8x32xf32, #tpu.memory_space<vmem>>, vector<8x32xf32>
      tpu.vector_store %arg16[%c0_315, %c0_316], %1695 {strides = array<i32>} : memref<8x32xf32, #tpu.memory_space<vmem>>, vector<8x32xf32>,
    } else {
    }
    %c0 = arith.constant 0 : index
    %c0_1 = arith.constant 0 : index
    %3 = vector.load %arg5[%c0, %c0_1] : memref<32x384xf32, #tpu.memory_space<vmem>>, vector<32x384xf32>
    %c0_2 = arith.constant 0 : index
    %c0_3 = arith.constant 0 : index
    %4 = vector.load %arg6[%c0_2, %c0_3] : memref<32x48xf32, #tpu.memory_space<vmem>>, vector<32x48xf32>
    %c0_4 = arith.constant 0 : index
    %c0_5 = arith.constant 0 : index
    %5 = vector.load %arg7[%c0_4, %c0_5] : memref<32x16xf32, #tpu.memory_space<vmem>>, vector<32x16xf32>
    %c0_6 = arith.constant 0 : index
    %c0_7 = arith.constant 0 : index
    %6 = vector.load %arg8[%c0_6, %c0_7] : memref<1x16xf32, #tpu.memory_space<vmem>>, vector<1x16xf32>
    %c0_8 = arith.constant 0 : index
    %c0_9 = arith.constant 0 : index
    %7 = vector.load %arg9[%c0_8, %c0_9] : memref<32x64xf32, #tpu.memory_space<vmem>>, vector<32x64xf32>
    %c0_10 = arith.constant 0 : index
    %c0_11 = arith.constant 0 : index
    %8 = vector.load %arg10[%c0_10, %c0_11] : memref<1x64xf32, #tpu.memory_space<vmem>>, vector<1x64xf32>
    %c0_12 = arith.constant 0 : index
    %c0_13 = arith.constant 0 : index
    %9 = vector.load %arg11[%c0_12, %c0_13] : memref<16x64xf32, #tpu.memory_space<vmem>>, vector<16x64xf32>
    %c0_14 = arith.constant 0 : index
    %c0_15 = arith.constant 0 : index
    %10 = vector.load %arg12[%c0_14, %c0_15] : memref<1x32xf32, #tpu.memory_space<vmem>>, vector<1x32xf32>
    %c0_16 = arith.constant 0 : index
    %c0_17 = arith.constant 0 : index
    %11 = vector.load %arg13[%c0_16, %c0_17] : memref<1x32xf32, #tpu.memory_space<vmem>>, vector<1x32xf32>
    %c0_18 = arith.constant 0 : index
    %c0_19 = arith.constant 0 : index
    %12 = vector.load %arg14[%c0_18, %c0_19] : memref<32x32xf32, #tpu.memory_space<vmem>>, vector<32x32xf32>
    %c0_20 = arith.constant 0 : index
    %c0_21 = arith.constant 0 : index
    %13 = vector.load %arg16[%c0_20, %c0_21] : memref<8x32xf32, #tpu.memory_space<vmem>>, vector<8x32xf32>
    %c0_22 = arith.constant 0 : index
    %c0_23 = arith.constant 0 : index
    %c0_24 = arith.constant 0 : index
    %14 = vector.load %arg2[%c0_22, %c0_23, %c0_24] : memref<1x8x16xf32, #tpu.memory_space<vmem>>, vector<1x8x1xf32>
    %15 = vector.shape_cast %14 : vector<1x8x1xf32> to vector<8x1xf32>
    %c0_25 = arith.constant 0 : index
    %c0_26 = arith.constant 0 : index
    %c0_27 = arith.constant 0 : index
    %16 = vector.load %arg3[%c0_25, %c0_26, %c0_27] : memref<1x8x256xf32, #tpu.memory_space<vmem>>, vector<1x8x16xf32>
    %17 = vector.shape_cast %16 : vector<1x8x16xf32> to vector<8x16xf32>
    %cst = arith.constant dense<0.000000e+00> : vector<8x384xf32>
    %18 = tpu.matmul %13, %3, %cst {dimension_numbers = #tpu.dot_dimension_numbers<[1], [0], [0], [1], [0, 0, 1, 1], [], []>} : vector<8x32xf32>, vector<32x384xf32>, vector<8x384xf32> -> vector<8x384xf32>
    %19 = vector.shape_cast %15 : vector<8x1xf32> to vector<8x1xf32>
    %20 = vector.broadcast %19 : vector<8x1xf32> to vector<8x32xf32>
    %21 = vector.extract_strided_slice %18 {offsets = [0, 0], sizes = [8, 32], strides = [1, 1]} : vector<8x384xf32> to vector<8x32xf32>
    %22 = arith.mulf %20, %21 : vector<8x32xf32>
    %23 = arith.addf %13, %22 : vector<8x32xf32>
    %24 = arith.mulf %20, %20 : vector<8x32xf32>
    %25 = vector.extract_strided_slice %18 {offsets = [0, 32], sizes = [8, 32], strides = [1, 1]} : vector<8x384xf32> to vector<8x32xf32>
    %26 = arith.mulf %24, %25 : vector<8x32xf32>
    %27 = arith.addf %23, %26 : vector<8x32xf32>
    %28 = arith.mulf %24, %20 : vector<8x32xf32>
    %29 = vector.extract_strided_slice %18 {offsets = [0, 64], sizes = [8, 32], strides = [1, 1]} : vector<8x384xf32> to vector<8x32xf32>
    %30 = arith.mulf %28, %29 : vector<8x32xf32>
    %31 = arith.addf %27, %30 : vector<8x32xf32>
    %32 = arith.mulf %28, %20 : vector<8x32xf32>
    %33 = vector.extract_strided_slice %18 {offsets = [0, 96], sizes = [8, 32], strides = [1, 1]} : vector<8x384xf32> to vector<8x32xf32>
    %34 = arith.mulf %32, %33 : vector<8x32xf32>
    %35 = arith.addf %31, %34 : vector<8x32xf32>
    %36 = arith.mulf %32, %20 : vector<8x32xf32>
    %37 = vector.extract_strided_slice %18 {offsets = [0, 128], sizes = [8, 32], strides = [1, 1]} : vector<8x384xf32> to vector<8x32xf32>
    %38 = arith.mulf %36, %37 : vector<8x32xf32>
    %39 = arith.addf %35, %38 : vector<8x32xf32>
    %40 = arith.mulf %36, %20 : vector<8x32xf32>
    %41 = vector.extract_strided_slice %18 {offsets = [0, 160], sizes = [8, 32], strides = [1, 1]} : vector<8x384xf32> to vector<8x32xf32>
    %42 = arith.mulf %40, %41 : vector<8x32xf32>
    %43 = arith.addf %39, %42 : vector<8x32xf32>
    %44 = arith.mulf %40, %20 : vector<8x32xf32>
    %45 = vector.extract_strided_slice %18 {offsets = [0, 192], sizes = [8, 32], strides = [1, 1]} : vector<8x384xf32> to vector<8x32xf32>
    %46 = arith.mulf %44, %45 : vector<8x32xf32>
    %47 = arith.addf %43, %46 : vector<8x32xf32>
    %48 = arith.mulf %44, %20 : vector<8x32xf32>
    %49 = vector.extract_strided_slice %18 {offsets = [0, 224], sizes = [8, 32], strides = [1, 1]} : vector<8x384xf32> to vector<8x32xf32>
    %50 = arith.mulf %48, %49 : vector<8x32xf32>
    %51 = arith.addf %47, %50 : vector<8x32xf32>
    %52 = arith.mulf %48, %20 : vector<8x32xf32>
    %53 = vector.extract_strided_slice %18 {offsets = [0, 256], sizes = [8, 32], strides = [1, 1]} : vector<8x384xf32> to vector<8x32xf32>
    %54 = arith.mulf %52, %53 : vector<8x32xf32>
    %55 = arith.addf %51, %54 : vector<8x32xf32>
    %56 = arith.mulf %52, %20 : vector<8x32xf32>
    %57 = vector.extract_strided_slice %18 {offsets = [0, 288], sizes = [8, 32], strides = [1, 1]} : vector<8x384xf32> to vector<8x32xf32>
    %58 = arith.mulf %56, %57 : vector<8x32xf32>
    %59 = arith.addf %55, %58 : vector<8x32xf32>
    %60 = arith.mulf %56, %20 : vector<8x32xf32>
    %61 = vector.extract_strided_slice %18 {offsets = [0, 320], sizes = [8, 32], strides = [1, 1]} : vector<8x384xf32> to vector<8x32xf32>
    %62 = arith.mulf %60, %61 : vector<8x32xf32>
    %63 = arith.addf %59, %62 : vector<8x32xf32>
    %64 = arith.mulf %60, %20 : vector<8x32xf32>
    %65 = vector.extract_strided_slice %18 {offsets = [0, 352], sizes = [8, 32], strides = [1, 1]} : vector<8x384xf32> to vector<8x32xf32>
    %66 = arith.mulf %64, %65 : vector<8x32xf32>
    %67 = arith.addf %63, %66 : vector<8x32xf32>
    %cst_28 = arith.constant dense<0.000000e+00> : vector<8x48xf32>
    %68 = tpu.matmul %67, %4, %cst_28 {dimension_numbers = #tpu.dot_dimension_numbers<[1], [0], [0], [1], [0, 0, 1, 1], [], []>} : vector<8x32xf32>, vector<32x48xf32>, vector<8x48xf32> -> vector<8x48xf32>
    %69 = vector.extract_strided_slice %68 {offsets = [0, 0], sizes = [8, 32], strides = [1, 1]} : vector<8x48xf32> to vector<8x32xf32>
    %cst_29 = arith.constant 0.000000e+00 : f32
    %70 = vector.broadcast %cst_29 : f32 to vector<8x32xf32>
    %71 = arith.maximumf %69, %70 : vector<8x32xf32>
    %72 = vector.extract_strided_slice %68 {offsets = [0, 32], sizes = [8, 16], strides = [1, 1]} : vector<8x48xf32> to vector<8x16xf32>
    %cst_30 = arith.constant dense<0.000000e+00> : vector<8x16xf32>
    %73 = tpu.matmul %71, %5, %cst_30 {dimension_numbers = #tpu.dot_dimension_numbers<[1], [0], [0], [1], [0, 0, 1, 1], [], []>} : vector<8x32xf32>, vector<32x16xf32>, vector<8x16xf32> -> vector<8x16xf32>
    %74 = arith.addf %72, %73 : vector<8x16xf32>
    %75 = vector.broadcast %6 : vector<1x16xf32> to vector<8x16xf32>
    %76 = arith.addf %74, %75 : vector<8x16xf32>
    %77 = arith.cmpf one, %17, %17 : vector<8x16xf32>
    %78 = arith.select %77, %76, %17 : vector<8x16xi1>, vector<8x16xf32>
    %79 = tpu.concatenate %78, %76 in 1 : vector<8x16xf32>, vector<8x16xf32> -> vector<8x32xf32>
    %cst_31 = arith.constant dense<0.000000e+00> : vector<8x64xf32>
    %80 = tpu.matmul %79, %7, %cst_31 {dimension_numbers = #tpu.dot_dimension_numbers<[1], [0], [0], [1], [0, 0, 1, 1], [], []>} : vector<8x32xf32>, vector<32x64xf32>, vector<8x64xf32> -> vector<8x64xf32>
    %81 = vector.broadcast %8 : vector<1x64xf32> to vector<8x64xf32>
    %82 = arith.addf %80, %81 : vector<8x64xf32>
    %83 = vector.extract_strided_slice %82 {offsets = [0, 0], sizes = [8, 16], strides = [1, 1]} : vector<8x64xf32> to vector<8x16xf32>
    %84 = arith.negf %83 : vector<8x16xf32>
    %85 = math.exp %84 : vector<8x16xf32>
    %cst_32 = arith.constant 1.000000e+00 : f32
    %86 = vector.broadcast %cst_32 : f32 to vector<8x16xf32>
    %87 = arith.addf %86, %85 : vector<8x16xf32>
    %88 = arith.divf %86, %87 : vector<8x16xf32>
    %89 = vector.extract_strided_slice %82 {offsets = [0, 16], sizes = [8, 16], strides = [1, 1]} : vector<8x64xf32> to vector<8x16xf32>
    %90 = arith.negf %89 : vector<8x16xf32>
    %91 = math.exp %90 : vector<8x16xf32>
    %cst_33 = arith.constant 1.000000e+00 : f32
    %92 = vector.broadcast %cst_33 : f32 to vector<8x16xf32>
    %93 = arith.addf %92, %91 : vector<8x16xf32>
    %94 = arith.divf %92, %93 : vector<8x16xf32>
    %95 = vector.extract_strided_slice %82 {offsets = [0, 32], sizes = [8, 16], strides = [1, 1]} : vector<8x64xf32> to vector<8x16xf32>
    %96 = vector.extract_strided_slice %82 {offsets = [0, 48], sizes = [8, 16], strides = [1, 1]} : vector<8x64xf32> to vector<8x16xf32>
    %97 = arith.mulf %88, %96 : vector<8x16xf32>
    %98 = arith.addf %95, %97 : vector<8x16xf32>
    %99 = math.tanh %98 : vector<8x16xf32>
    %cst_34 = arith.constant 1.000000e+00 : f32
    %100 = vector.broadcast %cst_34 : f32 to vector<8x16xf32>
    %101 = arith.subf %100, %94 : vector<8x16xf32>
    %102 = arith.mulf %101, %99 : vector<8x16xf32>
    %103 = arith.mulf %94, %76 : vector<8x16xf32>
    %104 = arith.addf %102, %103 : vector<8x16xf32>
    %cst_35 = arith.constant dense<0.000000e+00> : vector<8x64xf32>
    %105 = tpu.matmul %104, %9, %cst_35 {dimension_numbers = #tpu.dot_dimension_numbers<[1], [0], [0], [1], [0, 0, 1, 1], [], []>} : vector<8x16xf32>, vector<16x64xf32>, vector<8x64xf32> -> vector<8x64xf32>
    %106 = vector.extract_strided_slice %105 {offsets = [0, 0], sizes = [8, 32], strides = [1, 1]} : vector<8x64xf32> to vector<8x32xf32>
    %107 = vector.broadcast %10 : vector<1x32xf32> to vector<8x32xf32>
    %108 = arith.addf %106, %107 : vector<8x32xf32>
    %109 = vector.extract_strided_slice %105 {offsets = [0, 32], sizes = [8, 32], strides = [1, 1]} : vector<8x64xf32> to vector<8x32xf32>
    %110 = vector.broadcast %11 : vector<1x32xf32> to vector<8x32xf32>
    %111 = arith.addf %109, %110 : vector<8x32xf32>
    %cst_36 = arith.constant 0.000000e+00 : f32
    %112 = vector.broadcast %cst_36 : f32 to vector<8x32xf32>
    %113 = arith.maximumf %111, %112 : vector<8x32xf32>
    %cst_37 = arith.constant dense<0.000000e+00> : vector<8x32xf32>
    %114 = tpu.matmul %113, %12, %cst_37 {dimension_numbers = #tpu.dot_dimension_numbers<[1], [0], [0], [1], [0, 0, 1, 1], [], []>} : vector<8x32xf32>, vector<32x32xf32>, vector<8x32xf32> -> vector<8x32xf32>
    %115 = arith.addf %108, %114 : vector<8x32xf32>
    %c0_38 = arith.constant 0 : index
    %c0_39 = arith.constant 0 : index
    %c0_40 = arith.constant 0 : index
    %116 = vector.load %arg15[%c0_38, %c0_39, %c0_40] : memref<1x8x256xf32, #tpu.memory_space<vmem>>, vector<1x8x16xf32>
    %117 = vector.shape_cast %116 : vector<1x8x16xf32> to vector<8x16xf32>
    %118 = vector.shape_cast %76 : vector<8x16xf32> to vector<1x8x16xf32>
    tpu.vector_store %arg15[%c0_38, %c0_39, %c0_40], %118 {strides = array<i32>} : memref<1x8x256xf32, #tpu.memory_space<vmem>>, vector<1x8x16xf32>,
    %c0_41 = arith.constant 0 : index
    %c0_42 = arith.constant 0 : index
    %c1 = arith.constant 1 : index
    %119 = vector.load %arg2[%c0_41, %c0_42, %c1] : memref<1x8x16xf32, #tpu.memory_space<vmem>>, vector<1x8x1xf32>
    %120 = vector.shape_cast %119 : vector<1x8x1xf32> to vector<8x1xf32>
    %c0_43 = arith.constant 0 : index
    %c0_44 = arith.constant 0 : index
    %c16 = arith.constant 16 : index
    %121 = vector.load %arg3[%c0_43, %c0_44, %c16] : memref<1x8x256xf32, #tpu.memory_space<vmem>>, vector<1x8x16xf32>
    %122 = vector.shape_cast %121 : vector<1x8x16xf32> to vector<8x16xf32>
    %cst_45 = arith.constant dense<0.000000e+00> : vector<8x384xf32>
    %123 = tpu.matmul %115, %3, %cst_45 {dimension_numbers = #tpu.dot_dimension_numbers<[1], [0], [0], [1], [0, 0, 1, 1], [], []>} : vector<8x32xf32>, vector<32x384xf32>, vector<8x384xf32> -> vector<8x384xf32>
    %124 = vector.shape_cast %120 : vector<8x1xf32> to vector<8x1xf32>
    %125 = vector.broadcast %124 : vector<8x1xf32> to vector<8x32xf32>
    %126 = vector.extract_strided_slice %123 {offsets = [0, 0], sizes = [8, 32], strides = [1, 1]} : vector<8x384xf32> to vector<8x32xf32>
    %127 = arith.mulf %125, %126 : vector<8x32xf32>
    %128 = arith.addf %115, %127 : vector<8x32xf32>
    %129 = arith.mulf %125, %125 : vector<8x32xf32>
    %130 = vector.extract_strided_slice %123 {offsets = [0, 32], sizes = [8, 32], strides = [1, 1]} : vector<8x384xf32> to vector<8x32xf32>
    %131 = arith.mulf %129, %130 : vector<8x32xf32>
    %132 = arith.addf %128, %131 : vector<8x32xf32>
    %133 = arith.mulf %129, %125 : vector<8x32xf32>
    %134 = vector.extract_strided_slice %123 {offsets = [0, 64], sizes = [8, 32], strides = [1, 1]} : vector<8x384xf32> to vector<8x32xf32>
    %135 = arith.mulf %133, %134 : vector<8x32xf32>
    %136 = arith.addf %132, %135 : vector<8x32xf32>
    %137 = arith.mulf %133, %125 : vector<8x32xf32>
    %138 = vector.extract_strided_slice %123 {offsets = [0, 96], sizes = [8, 32], strides = [1, 1]} : vector<8x384xf32> to vector<8x32xf32>
    %139 = arith.mulf %137, %138 : vector<8x32xf32>
    %140 = arith.addf %136, %139 : vector<8x32xf32>
    %141 = arith.mulf %137, %125 : vector<8x32xf32>
    %142 = vector.extract_strided_slice %123 {offsets = [0, 128], sizes = [8, 32], strides = [1, 1]} : vector<8x384xf32> to vector<8x32xf32>
    %143 = arith.mulf %141, %142 : vector<8x32xf32>
    %144 = arith.addf %140, %143 : vector<8x32xf32>
    %145 = arith.mulf %141, %125 : vector<8x32xf32>
    %146 = vector.extract_strided_slice %123 {offsets = [0, 160], sizes = [8, 32], strides = [1, 1]} : vector<8x384xf32> to vector<8x32xf32>
    %147 = arith.mulf %145, %146 : vector<8x32xf32>
    %148 = arith.addf %144, %147 : vector<8x32xf32>
    %149 = arith.mulf %145, %125 : vector<8x32xf32>
    %150 = vector.extract_strided_slice %123 {offsets = [0, 192], sizes = [8, 32], strides = [1, 1]} : vector<8x384xf32> to vector<8x32xf32>
    %151 = arith.mulf %149, %150 : vector<8x32xf32>
    %152 = arith.addf %148, %151 : vector<8x32xf32>
    %153 = arith.mulf %149, %125 : vector<8x32xf32>
    %154 = vector.extract_strided_slice %123 {offsets = [0, 224], sizes = [8, 32], strides = [1, 1]} : vector<8x384xf32> to vector<8x32xf32>
    %155 = arith.mulf %153, %154 : vector<8x32xf32>
    %156 = arith.addf %152, %155 : vector<8x32xf32>
    %157 = arith.mulf %153, %125 : vector<8x32xf32>
    %158 = vector.extract_strided_slice %123 {offsets = [0, 256], sizes = [8, 32], strides = [1, 1]} : vector<8x384xf32> to vector<8x32xf32>
    %159 = arith.mulf %157, %158 : vector<8x32xf32>
    %160 = arith.addf %156, %159 : vector<8x32xf32>
    %161 = arith.mulf %157, %125 : vector<8x32xf32>
    %162 = vector.extract_strided_slice %123 {offsets = [0, 288], sizes = [8, 32], strides = [1, 1]} : vector<8x384xf32> to vector<8x32xf32>
    %163 = arith.mulf %161, %162 : vector<8x32xf32>
    %164 = arith.addf %160, %163 : vector<8x32xf32>
    %165 = arith.mulf %161, %125 : vector<8x32xf32>
    %166 = vector.extract_strided_slice %123 {offsets = [0, 320], sizes = [8, 32], strides = [1, 1]} : vector<8x384xf32> to vector<8x32xf32>
    %167 = arith.mulf %165, %166 : vector<8x32xf32>
    %168 = arith.addf %164, %167 : vector<8x32xf32>
    %169 = arith.mulf %165, %125 : vector<8x32xf32>
    %170 = vector.extract_strided_slice %123 {offsets = [0, 352], sizes = [8, 32], strides = [1, 1]} : vector<8x384xf32> to vector<8x32xf32>
    %171 = arith.mulf %169, %170 : vector<8x32xf32>
    %172 = arith.addf %168, %171 : vector<8x32xf32>
    %cst_46 = arith.constant dense<0.000000e+00> : vector<8x48xf32>
    %173 = tpu.matmul %172, %4, %cst_46 {dimension_numbers = #tpu.dot_dimension_numbers<[1], [0], [0], [1], [0, 0, 1, 1], [], []>} : vector<8x32xf32>, vector<32x48xf32>, vector<8x48xf32> -> vector<8x48xf32>
    %174 = vector.extract_strided_slice %173 {offsets = [0, 0], sizes = [8, 32], strides = [1, 1]} : vector<8x48xf32> to vector<8x32xf32>
    %cst_47 = arith.constant 0.000000e+00 : f32
    %175 = vector.broadcast %cst_47 : f32 to vector<8x32xf32>
    %176 = arith.maximumf %174, %175 : vector<8x32xf32>
    %177 = vector.extract_strided_slice %173 {offsets = [0, 32], sizes = [8, 16], strides = [1, 1]} : vector<8x48xf32> to vector<8x16xf32>
    %cst_48 = arith.constant dense<0.000000e+00> : vector<8x16xf32>
    %178 = tpu.matmul %176, %5, %cst_48 {dimension_numbers = #tpu.dot_dimension_numbers<[1], [0], [0], [1], [0, 0, 1, 1], [], []>} : vector<8x32xf32>, vector<32x16xf32>, vector<8x16xf32> -> vector<8x16xf32>
    %179 = arith.addf %177, %178 : vector<8x16xf32>
    %180 = vector.broadcast %6 : vector<1x16xf32> to vector<8x16xf32>
    %181 = arith.addf %179, %180 : vector<8x16xf32>
    %182 = arith.cmpf one, %122, %122 : vector<8x16xf32>
    %183 = arith.select %182, %181, %122 : vector<8x16xi1>, vector<8x16xf32>
    %184 = tpu.concatenate %183, %181 in 1 : vector<8x16xf32>, vector<8x16xf32> -> vector<8x32xf32>
    %cst_49 = arith.constant dense<0.000000e+00> : vector<8x64xf32>
    %185 = tpu.matmul %184, %7, %cst_49 {dimension_numbers = #tpu.dot_dimension_numbers<[1], [0], [0], [1], [0, 0, 1, 1], [], []>} : vector<8x32xf32>, vector<32x64xf32>, vector<8x64xf32> -> vector<8x64xf32>
    %186 = vector.broadcast %8 : vector<1x64xf32> to vector<8x64xf32>
    %187 = arith.addf %185, %186 : vector<8x64xf32>
    %188 = vector.extract_strided_slice %187 {offsets = [0, 0], sizes = [8, 16], strides = [1, 1]} : vector<8x64xf32> to vector<8x16xf32>
    %189 = arith.negf %188 : vector<8x16xf32>
    %190 = math.exp %189 : vector<8x16xf32>
    %cst_50 = arith.constant 1.000000e+00 : f32
    %191 = vector.broadcast %cst_50 : f32 to vector<8x16xf32>
    %192 = arith.addf %191, %190 : vector<8x16xf32>
    %193 = arith.divf %191, %192 : vector<8x16xf32>
    %194 = vector.extract_strided_slice %187 {offsets = [0, 16], sizes = [8, 16], strides = [1, 1]} : vector<8x64xf32> to vector<8x16xf32>
    %195 = arith.negf %194 : vector<8x16xf32>
    %196 = math.exp %195 : vector<8x16xf32>
    %cst_51 = arith.constant 1.000000e+00 : f32
    %197 = vector.broadcast %cst_51 : f32 to vector<8x16xf32>
    %198 = arith.addf %197, %196 : vector<8x16xf32>
    %199 = arith.divf %197, %198 : vector<8x16xf32>
    %200 = vector.extract_strided_slice %187 {offsets = [0, 32], sizes = [8, 16], strides = [1, 1]} : vector<8x64xf32> to vector<8x16xf32>
    %201 = vector.extract_strided_slice %187 {offsets = [0, 48], sizes = [8, 16], strides = [1, 1]} : vector<8x64xf32> to vector<8x16xf32>
    %202 = arith.mulf %193, %201 : vector<8x16xf32>
    %203 = arith.addf %200, %202 : vector<8x16xf32>
    %204 = math.tanh %203 : vector<8x16xf32>
    %cst_52 = arith.constant 1.000000e+00 : f32
    %205 = vector.broadcast %cst_52 : f32 to vector<8x16xf32>
    %206 = arith.subf %205, %199 : vector<8x16xf32>
    %207 = arith.mulf %206, %204 : vector<8x16xf32>
    %208 = arith.mulf %199, %181 : vector<8x16xf32>
    %209 = arith.addf %207, %208 : vector<8x16xf32>
    %cst_53 = arith.constant dense<0.000000e+00> : vector<8x64xf32>
    %210 = tpu.matmul %209, %9, %cst_53 {dimension_numbers = #tpu.dot_dimension_numbers<[1], [0], [0], [1], [0, 0, 1, 1], [], []>} : vector<8x16xf32>, vector<16x64xf32>, vector<8x64xf32> -> vector<8x64xf32>
    %211 = vector.extract_strided_slice %210 {offsets = [0, 0], sizes = [8, 32], strides = [1, 1]} : vector<8x64xf32> to vector<8x32xf32>
    %212 = vector.broadcast %10 : vector<1x32xf32> to vector<8x32xf32>
    %213 = arith.addf %211, %212 : vector<8x32xf32>
    %214 = vector.extract_strided_slice %210 {offsets = [0, 32], sizes = [8, 32], strides = [1, 1]} : vector<8x64xf32> to vector<8x32xf32>
    %215 = vector.broadcast %11 : vector<1x32xf32> to vector<8x32xf32>
    %216 = arith.addf %214, %215 : vector<8x32xf32>
    %cst_54 = arith.constant 0.000000e+00 : f32
    %217 = vector.broadcast %cst_54 : f32 to vector<8x32xf32>
    %218 = arith.maximumf %216, %217 : vector<8x32xf32>
    %cst_55 = arith.constant dense<0.000000e+00> : vector<8x32xf32>
    %219 = tpu.matmul %218, %12, %cst_55 {dimension_numbers = #tpu.dot_dimension_numbers<[1], [0], [0], [1], [0, 0, 1, 1], [], []>} : vector<8x32xf32>, vector<32x32xf32>, vector<8x32xf32> -> vector<8x32xf32>
    %220 = arith.addf %213, %219 : vector<8x32xf32>
    %c0_56 = arith.constant 0 : index
    %c0_57 = arith.constant 0 : index
    %c16_58 = arith.constant 16 : index
    %221 = vector.load %arg15[%c0_56, %c0_57, %c16_58] : memref<1x8x256xf32, #tpu.memory_space<vmem>>, vector<1x8x16xf32>
    %222 = vector.shape_cast %221 : vector<1x8x16xf32> to vector<8x16xf32>
    %223 = vector.shape_cast %181 : vector<8x16xf32> to vector<1x8x16xf32>
    tpu.vector_store %arg15[%c0_56, %c0_57, %c16_58], %223 {strides = array<i32>} : memref<1x8x256xf32, #tpu.memory_space<vmem>>, vector<1x8x16xf32>,
    %c0_59 = arith.constant 0 : index
    %c0_60 = arith.constant 0 : index
    %c2 = arith.constant 2 : index
    %224 = vector.load %arg2[%c0_59, %c0_60, %c2] : memref<1x8x16xf32, #tpu.memory_space<vmem>>, vector<1x8x1xf32>
    %225 = vector.shape_cast %224 : vector<1x8x1xf32> to vector<8x1xf32>
    %c0_61 = arith.constant 0 : index
    %c0_62 = arith.constant 0 : index
    %c32 = arith.constant 32 : index
    %226 = vector.load %arg3[%c0_61, %c0_62, %c32] : memref<1x8x256xf32, #tpu.memory_space<vmem>>, vector<1x8x16xf32>
    %227 = vector.shape_cast %226 : vector<1x8x16xf32> to vector<8x16xf32>
    %cst_63 = arith.constant dense<0.000000e+00> : vector<8x384xf32>
    %228 = tpu.matmul %220, %3, %cst_63 {dimension_numbers = #tpu.dot_dimension_numbers<[1], [0], [0], [1], [0, 0, 1, 1], [], []>} : vector<8x32xf32>, vector<32x384xf32>, vector<8x384xf32> -> vector<8x384xf32>
    %229 = vector.shape_cast %225 : vector<8x1xf32> to vector<8x1xf32>
    %230 = vector.broadcast %229 : vector<8x1xf32> to vector<8x32xf32>
    %231 = vector.extract_strided_slice %228 {offsets = [0, 0], sizes = [8, 32], strides = [1, 1]} : vector<8x384xf32> to vector<8x32xf32>
    %232 = arith.mulf %230, %231 : vector<8x32xf32>
    %233 = arith.addf %220, %232 : vector<8x32xf32>
    %234 = arith.mulf %230, %230 : vector<8x32xf32>
    %235 = vector.extract_strided_slice %228 {offsets = [0, 32], sizes = [8, 32], strides = [1, 1]} : vector<8x384xf32> to vector<8x32xf32>
    %236 = arith.mulf %234, %235 : vector<8x32xf32>
    %237 = arith.addf %233, %236 : vector<8x32xf32>
    %238 = arith.mulf %234, %230 : vector<8x32xf32>
    %239 = vector.extract_strided_slice %228 {offsets = [0, 64], sizes = [8, 32], strides = [1, 1]} : vector<8x384xf32> to vector<8x32xf32>
    %240 = arith.mulf %238, %239 : vector<8x32xf32>
    %241 = arith.addf %237, %240 : vector<8x32xf32>
    %242 = arith.mulf %238, %230 : vector<8x32xf32>
    %243 = vector.extract_strided_slice %228 {offsets = [0, 96], sizes = [8, 32], strides = [1, 1]} : vector<8x384xf32> to vector<8x32xf32>
    %244 = arith.mulf %242, %243 : vector<8x32xf32>
    %245 = arith.addf %241, %244 : vector<8x32xf32>
    %246 = arith.mulf %242, %230 : vector<8x32xf32>
    %247 = vector.extract_strided_slice %228 {offsets = [0, 128], sizes = [8, 32], strides = [1, 1]} : vector<8x384xf32> to vector<8x32xf32>
    %248 = arith.mulf %246, %247 : vector<8x32xf32>
    %249 = arith.addf %245, %248 : vector<8x32xf32>
    %250 = arith.mulf %246, %230 : vector<8x32xf32>
    %251 = vector.extract_strided_slice %228 {offsets = [0, 160], sizes = [8, 32], strides = [1, 1]} : vector<8x384xf32> to vector<8x32xf32>
    %252 = arith.mulf %250, %251 : vector<8x32xf32>
    %253 = arith.addf %249, %252 : vector<8x32xf32>
    %254 = arith.mulf %250, %230 : vector<8x32xf32>
    %255 = vector.extract_strided_slice %228 {offsets = [0, 192], sizes = [8, 32], strides = [1, 1]} : vector<8x384xf32> to vector<8x32xf32>
    %256 = arith.mulf %254, %255 : vector<8x32xf32>
    %257 = arith.addf %253, %256 : vector<8x32xf32>
    %258 = arith.mulf %254, %230 : vector<8x32xf32>
    %259 = vector.extract_strided_slice %228 {offsets = [0, 224], sizes = [8, 32], strides = [1, 1]} : vector<8x384xf32> to vector<8x32xf32>
    %260 = arith.mulf %258, %259 : vector<8x32xf32>
    %261 = arith.addf %257, %260 : vector<8x32xf32>
    %262 = arith.mulf %258, %230 : vector<8x32xf32>
    %263 = vector.extract_strided_slice %228 {offsets = [0, 256], sizes = [8, 32], strides = [1, 1]} : vector<8x384xf32> to vector<8x32xf32>
    %264 = arith.mulf %262, %263 : vector<8x32xf32>
    %265 = arith.addf %261, %264 : vector<8x32xf32>
    %266 = arith.mulf %262, %230 : vector<8x32xf32>
    %267 = vector.extract_strided_slice %228 {offsets = [0, 288], sizes = [8, 32], strides = [1, 1]} : vector<8x384xf32> to vector<8x32xf32>
    %268 = arith.mulf %266, %267 : vector<8x32xf32>
    %269 = arith.addf %265, %268 : vector<8x32xf32>
    %270 = arith.mulf %266, %230 : vector<8x32xf32>
    %271 = vector.extract_strided_slice %228 {offsets = [0, 320], sizes = [8, 32], strides = [1, 1]} : vector<8x384xf32> to vector<8x32xf32>
    %272 = arith.mulf %270, %271 : vector<8x32xf32>
    %273 = arith.addf %269, %272 : vector<8x32xf32>
    %274 = arith.mulf %270, %230 : vector<8x32xf32>
    %275 = vector.extract_strided_slice %228 {offsets = [0, 352], sizes = [8, 32], strides = [1, 1]} : vector<8x384xf32> to vector<8x32xf32>
    %276 = arith.mulf %274, %275 : vector<8x32xf32>
    %277 = arith.addf %273, %276 : vector<8x32xf32>
    %cst_64 = arith.constant dense<0.000000e+00> : vector<8x48xf32>
    %278 = tpu.matmul %277, %4, %cst_64 {dimension_numbers = #tpu.dot_dimension_numbers<[1], [0], [0], [1], [0, 0, 1, 1], [], []>} : vector<8x32xf32>, vector<32x48xf32>, vector<8x48xf32> -> vector<8x48xf32>
    %279 = vector.extract_strided_slice %278 {offsets = [0, 0], sizes = [8, 32], strides = [1, 1]} : vector<8x48xf32> to vector<8x32xf32>
    %cst_65 = arith.constant 0.000000e+00 : f32
    %280 = vector.broadcast %cst_65 : f32 to vector<8x32xf32>
    %281 = arith.maximumf %279, %280 : vector<8x32xf32>
    %282 = vector.extract_strided_slice %278 {offsets = [0, 32], sizes = [8, 16], strides = [1, 1]} : vector<8x48xf32> to vector<8x16xf32>
    %cst_66 = arith.constant dense<0.000000e+00> : vector<8x16xf32>
    %283 = tpu.matmul %281, %5, %cst_66 {dimension_numbers = #tpu.dot_dimension_numbers<[1], [0], [0], [1], [0, 0, 1, 1], [], []>} : vector<8x32xf32>, vector<32x16xf32>, vector<8x16xf32> -> vector<8x16xf32>
    %284 = arith.addf %282, %283 : vector<8x16xf32>
    %285 = vector.broadcast %6 : vector<1x16xf32> to vector<8x16xf32>
    %286 = arith.addf %284, %285 : vector<8x16xf32>
    %287 = arith.cmpf one, %227, %227 : vector<8x16xf32>
    %288 = arith.select %287, %286, %227 : vector<8x16xi1>, vector<8x16xf32>
    %289 = tpu.concatenate %288, %286 in 1 : vector<8x16xf32>, vector<8x16xf32> -> vector<8x32xf32>
    %cst_67 = arith.constant dense<0.000000e+00> : vector<8x64xf32>
    %290 = tpu.matmul %289, %7, %cst_67 {dimension_numbers = #tpu.dot_dimension_numbers<[1], [0], [0], [1], [0, 0, 1, 1], [], []>} : vector<8x32xf32>, vector<32x64xf32>, vector<8x64xf32> -> vector<8x64xf32>
    %291 = vector.broadcast %8 : vector<1x64xf32> to vector<8x64xf32>
    %292 = arith.addf %290, %291 : vector<8x64xf32>
    %293 = vector.extract_strided_slice %292 {offsets = [0, 0], sizes = [8, 16], strides = [1, 1]} : vector<8x64xf32> to vector<8x16xf32>
    %294 = arith.negf %293 : vector<8x16xf32>
    %295 = math.exp %294 : vector<8x16xf32>
    %cst_68 = arith.constant 1.000000e+00 : f32
    %296 = vector.broadcast %cst_68 : f32 to vector<8x16xf32>
    %297 = arith.addf %296, %295 : vector<8x16xf32>
    %298 = arith.divf %296, %297 : vector<8x16xf32>
    %299 = vector.extract_strided_slice %292 {offsets = [0, 16], sizes = [8, 16], strides = [1, 1]} : vector<8x64xf32> to vector<8x16xf32>
    %300 = arith.negf %299 : vector<8x16xf32>
    %301 = math.exp %300 : vector<8x16xf32>
    %cst_69 = arith.constant 1.000000e+00 : f32
    %302 = vector.broadcast %cst_69 : f32 to vector<8x16xf32>
    %303 = arith.addf %302, %301 : vector<8x16xf32>
    %304 = arith.divf %302, %303 : vector<8x16xf32>
    %305 = vector.extract_strided_slice %292 {offsets = [0, 32], sizes = [8, 16], strides = [1, 1]} : vector<8x64xf32> to vector<8x16xf32>
    %306 = vector.extract_strided_slice %292 {offsets = [0, 48], sizes = [8, 16], strides = [1, 1]} : vector<8x64xf32> to vector<8x16xf32>
    %307 = arith.mulf %298, %306 : vector<8x16xf32>
    %308 = arith.addf %305, %307 : vector<8x16xf32>
    %309 = math.tanh %308 : vector<8x16xf32>
    %cst_70 = arith.constant 1.000000e+00 : f32
    %310 = vector.broadcast %cst_70 : f32 to vector<8x16xf32>
    %311 = arith.subf %310, %304 : vector<8x16xf32>
    %312 = arith.mulf %311, %309 : vector<8x16xf32>
    %313 = arith.mulf %304, %286 : vector<8x16xf32>
    %314 = arith.addf %312, %313 : vector<8x16xf32>
    %cst_71 = arith.constant dense<0.000000e+00> : vector<8x64xf32>
    %315 = tpu.matmul %314, %9, %cst_71 {dimension_numbers = #tpu.dot_dimension_numbers<[1], [0], [0], [1], [0, 0, 1, 1], [], []>} : vector<8x16xf32>, vector<16x64xf32>, vector<8x64xf32> -> vector<8x64xf32>
    %316 = vector.extract_strided_slice %315 {offsets = [0, 0], sizes = [8, 32], strides = [1, 1]} : vector<8x64xf32> to vector<8x32xf32>
    %317 = vector.broadcast %10 : vector<1x32xf32> to vector<8x32xf32>
    %318 = arith.addf %316, %317 : vector<8x32xf32>
    %319 = vector.extract_strided_slice %315 {offsets = [0, 32], sizes = [8, 32], strides = [1, 1]} : vector<8x64xf32> to vector<8x32xf32>
    %320 = vector.broadcast %11 : vector<1x32xf32> to vector<8x32xf32>
    %321 = arith.addf %319, %320 : vector<8x32xf32>
    %cst_72 = arith.constant 0.000000e+00 : f32
    %322 = vector.broadcast %cst_72 : f32 to vector<8x32xf32>
    %323 = arith.maximumf %321, %322 : vector<8x32xf32>
    %cst_73 = arith.constant dense<0.000000e+00> : vector<8x32xf32>
    %324 = tpu.matmul %323, %12, %cst_73 {dimension_numbers = #tpu.dot_dimension_numbers<[1], [0], [0], [1], [0, 0, 1, 1], [], []>} : vector<8x32xf32>, vector<32x32xf32>, vector<8x32xf32> -> vector<8x32xf32>
    %325 = arith.addf %318, %324 : vector<8x32xf32>
    %c0_74 = arith.constant 0 : index
    %c0_75 = arith.constant 0 : index
    %c32_76 = arith.constant 32 : index
    %326 = vector.load %arg15[%c0_74, %c0_75, %c32_76] : memref<1x8x256xf32, #tpu.memory_space<vmem>>, vector<1x8x16xf32>
    %327 = vector.shape_cast %326 : vector<1x8x16xf32> to vector<8x16xf32>
    %328 = vector.shape_cast %286 : vector<8x16xf32> to vector<1x8x16xf32>
    tpu.vector_store %arg15[%c0_74, %c0_75, %c32_76], %328 {strides = array<i32>} : memref<1x8x256xf32, #tpu.memory_space<vmem>>, vector<1x8x16xf32>,
    %c0_77 = arith.constant 0 : index
    %c0_78 = arith.constant 0 : index
    %c3 = arith.constant 3 : index
    %329 = vector.load %arg2[%c0_77, %c0_78, %c3] : memref<1x8x16xf32, #tpu.memory_space<vmem>>, vector<1x8x1xf32>
    %330 = vector.shape_cast %329 : vector<1x8x1xf32> to vector<8x1xf32>
    %c0_79 = arith.constant 0 : index
    %c0_80 = arith.constant 0 : index
    %c48 = arith.constant 48 : index
    %331 = vector.load %arg3[%c0_79, %c0_80, %c48] : memref<1x8x256xf32, #tpu.memory_space<vmem>>, vector<1x8x16xf32>
    %332 = vector.shape_cast %331 : vector<1x8x16xf32> to vector<8x16xf32>
    %cst_81 = arith.constant dense<0.000000e+00> : vector<8x384xf32>
    %333 = tpu.matmul %325, %3, %cst_81 {dimension_numbers = #tpu.dot_dimension_numbers<[1], [0], [0], [1], [0, 0, 1, 1], [], []>} : vector<8x32xf32>, vector<32x384xf32>, vector<8x384xf32> -> vector<8x384xf32>
    %334 = vector.shape_cast %330 : vector<8x1xf32> to vector<8x1xf32>
    %335 = vector.broadcast %334 : vector<8x1xf32> to vector<8x32xf32>
    %336 = vector.extract_strided_slice %333 {offsets = [0, 0], sizes = [8, 32], strides = [1, 1]} : vector<8x384xf32> to vector<8x32xf32>
    %337 = arith.mulf %335, %336 : vector<8x32xf32>
    %338 = arith.addf %325, %337 : vector<8x32xf32>
    %339 = arith.mulf %335, %335 : vector<8x32xf32>
    %340 = vector.extract_strided_slice %333 {offsets = [0, 32], sizes = [8, 32], strides = [1, 1]} : vector<8x384xf32> to vector<8x32xf32>
    %341 = arith.mulf %339, %340 : vector<8x32xf32>
    %342 = arith.addf %338, %341 : vector<8x32xf32>
    %343 = arith.mulf %339, %335 : vector<8x32xf32>
    %344 = vector.extract_strided_slice %333 {offsets = [0, 64], sizes = [8, 32], strides = [1, 1]} : vector<8x384xf32> to vector<8x32xf32>
    %345 = arith.mulf %343, %344 : vector<8x32xf32>
    %346 = arith.addf %342, %345 : vector<8x32xf32>
    %347 = arith.mulf %343, %335 : vector<8x32xf32>
    %348 = vector.extract_strided_slice %333 {offsets = [0, 96], sizes = [8, 32], strides = [1, 1]} : vector<8x384xf32> to vector<8x32xf32>
    %349 = arith.mulf %347, %348 : vector<8x32xf32>
    %350 = arith.addf %346, %349 : vector<8x32xf32>
    %351 = arith.mulf %347, %335 : vector<8x32xf32>
    %352 = vector.extract_strided_slice %333 {offsets = [0, 128], sizes = [8, 32], strides = [1, 1]} : vector<8x384xf32> to vector<8x32xf32>
    %353 = arith.mulf %351, %352 : vector<8x32xf32>
    %354 = arith.addf %350, %353 : vector<8x32xf32>
    %355 = arith.mulf %351, %335 : vector<8x32xf32>
    %356 = vector.extract_strided_slice %333 {offsets = [0, 160], sizes = [8, 32], strides = [1, 1]} : vector<8x384xf32> to vector<8x32xf32>
    %357 = arith.mulf %355, %356 : vector<8x32xf32>
    %358 = arith.addf %354, %357 : vector<8x32xf32>
    %359 = arith.mulf %355, %335 : vector<8x32xf32>
    %360 = vector.extract_strided_slice %333 {offsets = [0, 192], sizes = [8, 32], strides = [1, 1]} : vector<8x384xf32> to vector<8x32xf32>
    %361 = arith.mulf %359, %360 : vector<8x32xf32>
    %362 = arith.addf %358, %361 : vector<8x32xf32>
    %363 = arith.mulf %359, %335 : vector<8x32xf32>
    %364 = vector.extract_strided_slice %333 {offsets = [0, 224], sizes = [8, 32], strides = [1, 1]} : vector<8x384xf32> to vector<8x32xf32>
    %365 = arith.mulf %363, %364 : vector<8x32xf32>
    %366 = arith.addf %362, %365 : vector<8x32xf32>
    %367 = arith.mulf %363, %335 : vector<8x32xf32>
    %368 = vector.extract_strided_slice %333 {offsets = [0, 256], sizes = [8, 32], strides = [1, 1]} : vector<8x384xf32> to vector<8x32xf32>
    %369 = arith.mulf %367, %368 : vector<8x32xf32>
    %370 = arith.addf %366, %369 : vector<8x32xf32>
    %371 = arith.mulf %367, %335 : vector<8x32xf32>
    %372 = vector.extract_strided_slice %333 {offsets = [0, 288], sizes = [8, 32], strides = [1, 1]} : vector<8x384xf32> to vector<8x32xf32>
    %373 = arith.mulf %371, %372 : vector<8x32xf32>
    %374 = arith.addf %370, %373 : vector<8x32xf32>
    %375 = arith.mulf %371, %335 : vector<8x32xf32>
    %376 = vector.extract_strided_slice %333 {offsets = [0, 320], sizes = [8, 32], strides = [1, 1]} : vector<8x384xf32> to vector<8x32xf32>
    %377 = arith.mulf %375, %376 : vector<8x32xf32>
    %378 = arith.addf %374, %377 : vector<8x32xf32>
    %379 = arith.mulf %375, %335 : vector<8x32xf32>
    %380 = vector.extract_strided_slice %333 {offsets = [0, 352], sizes = [8, 32], strides = [1, 1]} : vector<8x384xf32> to vector<8x32xf32>
    %381 = arith.mulf %379, %380 : vector<8x32xf32>
    %382 = arith.addf %378, %381 : vector<8x32xf32>
    %cst_82 = arith.constant dense<0.000000e+00> : vector<8x48xf32>
    %383 = tpu.matmul %382, %4, %cst_82 {dimension_numbers = #tpu.dot_dimension_numbers<[1], [0], [0], [1], [0, 0, 1, 1], [], []>} : vector<8x32xf32>, vector<32x48xf32>, vector<8x48xf32> -> vector<8x48xf32>
    %384 = vector.extract_strided_slice %383 {offsets = [0, 0], sizes = [8, 32], strides = [1, 1]} : vector<8x48xf32> to vector<8x32xf32>
    %cst_83 = arith.constant 0.000000e+00 : f32
    %385 = vector.broadcast %cst_83 : f32 to vector<8x32xf32>
    %386 = arith.maximumf %384, %385 : vector<8x32xf32>
    %387 = vector.extract_strided_slice %383 {offsets = [0, 32], sizes = [8, 16], strides = [1, 1]} : vector<8x48xf32> to vector<8x16xf32>
    %cst_84 = arith.constant dense<0.000000e+00> : vector<8x16xf32>
    %388 = tpu.matmul %386, %5, %cst_84 {dimension_numbers = #tpu.dot_dimension_numbers<[1], [0], [0], [1], [0, 0, 1, 1], [], []>} : vector<8x32xf32>, vector<32x16xf32>, vector<8x16xf32> -> vector<8x16xf32>
    %389 = arith.addf %387, %388 : vector<8x16xf32>
    %390 = vector.broadcast %6 : vector<1x16xf32> to vector<8x16xf32>
    %391 = arith.addf %389, %390 : vector<8x16xf32>
    %392 = arith.cmpf one, %332, %332 : vector<8x16xf32>
    %393 = arith.select %392, %391, %332 : vector<8x16xi1>, vector<8x16xf32>
    %394 = tpu.concatenate %393, %391 in 1 : vector<8x16xf32>, vector<8x16xf32> -> vector<8x32xf32>
    %cst_85 = arith.constant dense<0.000000e+00> : vector<8x64xf32>
    %395 = tpu.matmul %394, %7, %cst_85 {dimension_numbers = #tpu.dot_dimension_numbers<[1], [0], [0], [1], [0, 0, 1, 1], [], []>} : vector<8x32xf32>, vector<32x64xf32>, vector<8x64xf32> -> vector<8x64xf32>
    %396 = vector.broadcast %8 : vector<1x64xf32> to vector<8x64xf32>
    %397 = arith.addf %395, %396 : vector<8x64xf32>
    %398 = vector.extract_strided_slice %397 {offsets = [0, 0], sizes = [8, 16], strides = [1, 1]} : vector<8x64xf32> to vector<8x16xf32>
    %399 = arith.negf %398 : vector<8x16xf32>
    %400 = math.exp %399 : vector<8x16xf32>
    %cst_86 = arith.constant 1.000000e+00 : f32
    %401 = vector.broadcast %cst_86 : f32 to vector<8x16xf32>
    %402 = arith.addf %401, %400 : vector<8x16xf32>
    %403 = arith.divf %401, %402 : vector<8x16xf32>
    %404 = vector.extract_strided_slice %397 {offsets = [0, 16], sizes = [8, 16], strides = [1, 1]} : vector<8x64xf32> to vector<8x16xf32>
    %405 = arith.negf %404 : vector<8x16xf32>
    %406 = math.exp %405 : vector<8x16xf32>
    %cst_87 = arith.constant 1.000000e+00 : f32
    %407 = vector.broadcast %cst_87 : f32 to vector<8x16xf32>
    %408 = arith.addf %407, %406 : vector<8x16xf32>
    %409 = arith.divf %407, %408 : vector<8x16xf32>
    %410 = vector.extract_strided_slice %397 {offsets = [0, 32], sizes = [8, 16], strides = [1, 1]} : vector<8x64xf32> to vector<8x16xf32>
    %411 = vector.extract_strided_slice %397 {offsets = [0, 48], sizes = [8, 16], strides = [1, 1]} : vector<8x64xf32> to vector<8x16xf32>
    %412 = arith.mulf %403, %411 : vector<8x16xf32>
    %413 = arith.addf %410, %412 : vector<8x16xf32>
    %414 = math.tanh %413 : vector<8x16xf32>
    %cst_88 = arith.constant 1.000000e+00 : f32
    %415 = vector.broadcast %cst_88 : f32 to vector<8x16xf32>
    %416 = arith.subf %415, %409 : vector<8x16xf32>
    %417 = arith.mulf %416, %414 : vector<8x16xf32>
    %418 = arith.mulf %409, %391 : vector<8x16xf32>
    %419 = arith.addf %417, %418 : vector<8x16xf32>
    %cst_89 = arith.constant dense<0.000000e+00> : vector<8x64xf32>
    %420 = tpu.matmul %419, %9, %cst_89 {dimension_numbers = #tpu.dot_dimension_numbers<[1], [0], [0], [1], [0, 0, 1, 1], [], []>} : vector<8x16xf32>, vector<16x64xf32>, vector<8x64xf32> -> vector<8x64xf32>
    %421 = vector.extract_strided_slice %420 {offsets = [0, 0], sizes = [8, 32], strides = [1, 1]} : vector<8x64xf32> to vector<8x32xf32>
    %422 = vector.broadcast %10 : vector<1x32xf32> to vector<8x32xf32>
    %423 = arith.addf %421, %422 : vector<8x32xf32>
    %424 = vector.extract_strided_slice %420 {offsets = [0, 32], sizes = [8, 32], strides = [1, 1]} : vector<8x64xf32> to vector<8x32xf32>
    %425 = vector.broadcast %11 : vector<1x32xf32> to vector<8x32xf32>
    %426 = arith.addf %424, %425 : vector<8x32xf32>
    %cst_90 = arith.constant 0.000000e+00 : f32
    %427 = vector.broadcast %cst_90 : f32 to vector<8x32xf32>
    %428 = arith.maximumf %426, %427 : vector<8x32xf32>
    %cst_91 = arith.constant dense<0.000000e+00> : vector<8x32xf32>
    %429 = tpu.matmul %428, %12, %cst_91 {dimension_numbers = #tpu.dot_dimension_numbers<[1], [0], [0], [1], [0, 0, 1, 1], [], []>} : vector<8x32xf32>, vector<32x32xf32>, vector<8x32xf32> -> vector<8x32xf32>
    %430 = arith.addf %423, %429 : vector<8x32xf32>
    %c0_92 = arith.constant 0 : index
    %c0_93 = arith.constant 0 : index
    %c48_94 = arith.constant 48 : index
    %431 = vector.load %arg15[%c0_92, %c0_93, %c48_94] : memref<1x8x256xf32, #tpu.memory_space<vmem>>, vector<1x8x16xf32>
    %432 = vector.shape_cast %431 : vector<1x8x16xf32> to vector<8x16xf32>
    %433 = vector.shape_cast %391 : vector<8x16xf32> to vector<1x8x16xf32>
    tpu.vector_store %arg15[%c0_92, %c0_93, %c48_94], %433 {strides = array<i32>} : memref<1x8x256xf32, #tpu.memory_space<vmem>>, vector<1x8x16xf32>,
    %c0_95 = arith.constant 0 : index
    %c0_96 = arith.constant 0 : index
    %c4 = arith.constant 4 : index
    %434 = vector.load %arg2[%c0_95, %c0_96, %c4] : memref<1x8x16xf32, #tpu.memory_space<vmem>>, vector<1x8x1xf32>
    %435 = vector.shape_cast %434 : vector<1x8x1xf32> to vector<8x1xf32>
    %c0_97 = arith.constant 0 : index
    %c0_98 = arith.constant 0 : index
    %c64 = arith.constant 64 : index
    %436 = vector.load %arg3[%c0_97, %c0_98, %c64] : memref<1x8x256xf32, #tpu.memory_space<vmem>>, vector<1x8x16xf32>
    %437 = vector.shape_cast %436 : vector<1x8x16xf32> to vector<8x16xf32>
    %cst_99 = arith.constant dense<0.000000e+00> : vector<8x384xf32>
    %438 = tpu.matmul %430, %3, %cst_99 {dimension_numbers = #tpu.dot_dimension_numbers<[1], [0], [0], [1], [0, 0, 1, 1], [], []>} : vector<8x32xf32>, vector<32x384xf32>, vector<8x384xf32> -> vector<8x384xf32>
    %439 = vector.shape_cast %435 : vector<8x1xf32> to vector<8x1xf32>
    %440 = vector.broadcast %439 : vector<8x1xf32> to vector<8x32xf32>
    %441 = vector.extract_strided_slice %438 {offsets = [0, 0], sizes = [8, 32], strides = [1, 1]} : vector<8x384xf32> to vector<8x32xf32>
    %442 = arith.mulf %440, %441 : vector<8x32xf32>
    %443 = arith.addf %430, %442 : vector<8x32xf32>
    %444 = arith.mulf %440, %440 : vector<8x32xf32>
    %445 = vector.extract_strided_slice %438 {offsets = [0, 32], sizes = [8, 32], strides = [1, 1]} : vector<8x384xf32> to vector<8x32xf32>
    %446 = arith.mulf %444, %445 : vector<8x32xf32>
    %447 = arith.addf %443, %446 : vector<8x32xf32>
    %448 = arith.mulf %444, %440 : vector<8x32xf32>
    %449 = vector.extract_strided_slice %438 {offsets = [0, 64], sizes = [8, 32], strides = [1, 1]} : vector<8x384xf32> to vector<8x32xf32>
    %450 = arith.mulf %448, %449 : vector<8x32xf32>
    %451 = arith.addf %447, %450 : vector<8x32xf32>
    %452 = arith.mulf %448, %440 : vector<8x32xf32>
    %453 = vector.extract_strided_slice %438 {offsets = [0, 96], sizes = [8, 32], strides = [1, 1]} : vector<8x384xf32> to vector<8x32xf32>
    %454 = arith.mulf %452, %453 : vector<8x32xf32>
    %455 = arith.addf %451, %454 : vector<8x32xf32>
    %456 = arith.mulf %452, %440 : vector<8x32xf32>
    %457 = vector.extract_strided_slice %438 {offsets = [0, 128], sizes = [8, 32], strides = [1, 1]} : vector<8x384xf32> to vector<8x32xf32>
    %458 = arith.mulf %456, %457 : vector<8x32xf32>
    %459 = arith.addf %455, %458 : vector<8x32xf32>
    %460 = arith.mulf %456, %440 : vector<8x32xf32>
    %461 = vector.extract_strided_slice %438 {offsets = [0, 160], sizes = [8, 32], strides = [1, 1]} : vector<8x384xf32> to vector<8x32xf32>
    %462 = arith.mulf %460, %461 : vector<8x32xf32>
    %463 = arith.addf %459, %462 : vector<8x32xf32>
    %464 = arith.mulf %460, %440 : vector<8x32xf32>
    %465 = vector.extract_strided_slice %438 {offsets = [0, 192], sizes = [8, 32], strides = [1, 1]} : vector<8x384xf32> to vector<8x32xf32>
    %466 = arith.mulf %464, %465 : vector<8x32xf32>
    %467 = arith.addf %463, %466 : vector<8x32xf32>
    %468 = arith.mulf %464, %440 : vector<8x32xf32>
    %469 = vector.extract_strided_slice %438 {offsets = [0, 224], sizes = [8, 32], strides = [1, 1]} : vector<8x384xf32> to vector<8x32xf32>
    %470 = arith.mulf %468, %469 : vector<8x32xf32>
    %471 = arith.addf %467, %470 : vector<8x32xf32>
    %472 = arith.mulf %468, %440 : vector<8x32xf32>
    %473 = vector.extract_strided_slice %438 {offsets = [0, 256], sizes = [8, 32], strides = [1, 1]} : vector<8x384xf32> to vector<8x32xf32>
    %474 = arith.mulf %472, %473 : vector<8x32xf32>
    %475 = arith.addf %471, %474 : vector<8x32xf32>
    %476 = arith.mulf %472, %440 : vector<8x32xf32>
    %477 = vector.extract_strided_slice %438 {offsets = [0, 288], sizes = [8, 32], strides = [1, 1]} : vector<8x384xf32> to vector<8x32xf32>
    %478 = arith.mulf %476, %477 : vector<8x32xf32>
    %479 = arith.addf %475, %478 : vector<8x32xf32>
    %480 = arith.mulf %476, %440 : vector<8x32xf32>
    %481 = vector.extract_strided_slice %438 {offsets = [0, 320], sizes = [8, 32], strides = [1, 1]} : vector<8x384xf32> to vector<8x32xf32>
    %482 = arith.mulf %480, %481 : vector<8x32xf32>
    %483 = arith.addf %479, %482 : vector<8x32xf32>
    %484 = arith.mulf %480, %440 : vector<8x32xf32>
    %485 = vector.extract_strided_slice %438 {offsets = [0, 352], sizes = [8, 32], strides = [1, 1]} : vector<8x384xf32> to vector<8x32xf32>
    %486 = arith.mulf %484, %485 : vector<8x32xf32>
    %487 = arith.addf %483, %486 : vector<8x32xf32>
    %cst_100 = arith.constant dense<0.000000e+00> : vector<8x48xf32>
    %488 = tpu.matmul %487, %4, %cst_100 {dimension_numbers = #tpu.dot_dimension_numbers<[1], [0], [0], [1], [0, 0, 1, 1], [], []>} : vector<8x32xf32>, vector<32x48xf32>, vector<8x48xf32> -> vector<8x48xf32>
    %489 = vector.extract_strided_slice %488 {offsets = [0, 0], sizes = [8, 32], strides = [1, 1]} : vector<8x48xf32> to vector<8x32xf32>
    %cst_101 = arith.constant 0.000000e+00 : f32
    %490 = vector.broadcast %cst_101 : f32 to vector<8x32xf32>
    %491 = arith.maximumf %489, %490 : vector<8x32xf32>
    %492 = vector.extract_strided_slice %488 {offsets = [0, 32], sizes = [8, 16], strides = [1, 1]} : vector<8x48xf32> to vector<8x16xf32>
    %cst_102 = arith.constant dense<0.000000e+00> : vector<8x16xf32>
    %493 = tpu.matmul %491, %5, %cst_102 {dimension_numbers = #tpu.dot_dimension_numbers<[1], [0], [0], [1], [0, 0, 1, 1], [], []>} : vector<8x32xf32>, vector<32x16xf32>, vector<8x16xf32> -> vector<8x16xf32>
    %494 = arith.addf %492, %493 : vector<8x16xf32>
    %495 = vector.broadcast %6 : vector<1x16xf32> to vector<8x16xf32>
    %496 = arith.addf %494, %495 : vector<8x16xf32>
    %497 = arith.cmpf one, %437, %437 : vector<8x16xf32>
    %498 = arith.select %497, %496, %437 : vector<8x16xi1>, vector<8x16xf32>
    %499 = tpu.concatenate %498, %496 in 1 : vector<8x16xf32>, vector<8x16xf32> -> vector<8x32xf32>
    %cst_103 = arith.constant dense<0.000000e+00> : vector<8x64xf32>
    %500 = tpu.matmul %499, %7, %cst_103 {dimension_numbers = #tpu.dot_dimension_numbers<[1], [0], [0], [1], [0, 0, 1, 1], [], []>} : vector<8x32xf32>, vector<32x64xf32>, vector<8x64xf32> -> vector<8x64xf32>
    %501 = vector.broadcast %8 : vector<1x64xf32> to vector<8x64xf32>
    %502 = arith.addf %500, %501 : vector<8x64xf32>
    %503 = vector.extract_strided_slice %502 {offsets = [0, 0], sizes = [8, 16], strides = [1, 1]} : vector<8x64xf32> to vector<8x16xf32>
    %504 = arith.negf %503 : vector<8x16xf32>
    %505 = math.exp %504 : vector<8x16xf32>
    %cst_104 = arith.constant 1.000000e+00 : f32
    %506 = vector.broadcast %cst_104 : f32 to vector<8x16xf32>
    %507 = arith.addf %506, %505 : vector<8x16xf32>
    %508 = arith.divf %506, %507 : vector<8x16xf32>
    %509 = vector.extract_strided_slice %502 {offsets = [0, 16], sizes = [8, 16], strides = [1, 1]} : vector<8x64xf32> to vector<8x16xf32>
    %510 = arith.negf %509 : vector<8x16xf32>
    %511 = math.exp %510 : vector<8x16xf32>
    %cst_105 = arith.constant 1.000000e+00 : f32
    %512 = vector.broadcast %cst_105 : f32 to vector<8x16xf32>
    %513 = arith.addf %512, %511 : vector<8x16xf32>
    %514 = arith.divf %512, %513 : vector<8x16xf32>
    %515 = vector.extract_strided_slice %502 {offsets = [0, 32], sizes = [8, 16], strides = [1, 1]} : vector<8x64xf32> to vector<8x16xf32>
    %516 = vector.extract_strided_slice %502 {offsets = [0, 48], sizes = [8, 16], strides = [1, 1]} : vector<8x64xf32> to vector<8x16xf32>
    %517 = arith.mulf %508, %516 : vector<8x16xf32>
    %518 = arith.addf %515, %517 : vector<8x16xf32>
    %519 = math.tanh %518 : vector<8x16xf32>
    %cst_106 = arith.constant 1.000000e+00 : f32
    %520 = vector.broadcast %cst_106 : f32 to vector<8x16xf32>
    %521 = arith.subf %520, %514 : vector<8x16xf32>
    %522 = arith.mulf %521, %519 : vector<8x16xf32>
    %523 = arith.mulf %514, %496 : vector<8x16xf32>
    %524 = arith.addf %522, %523 : vector<8x16xf32>
    %cst_107 = arith.constant dense<0.000000e+00> : vector<8x64xf32>
    %525 = tpu.matmul %524, %9, %cst_107 {dimension_numbers = #tpu.dot_dimension_numbers<[1], [0], [0], [1], [0, 0, 1, 1], [], []>} : vector<8x16xf32>, vector<16x64xf32>, vector<8x64xf32> -> vector<8x64xf32>
    %526 = vector.extract_strided_slice %525 {offsets = [0, 0], sizes = [8, 32], strides = [1, 1]} : vector<8x64xf32> to vector<8x32xf32>
    %527 = vector.broadcast %10 : vector<1x32xf32> to vector<8x32xf32>
    %528 = arith.addf %526, %527 : vector<8x32xf32>
    %529 = vector.extract_strided_slice %525 {offsets = [0, 32], sizes = [8, 32], strides = [1, 1]} : vector<8x64xf32> to vector<8x32xf32>
    %530 = vector.broadcast %11 : vector<1x32xf32> to vector<8x32xf32>
    %531 = arith.addf %529, %530 : vector<8x32xf32>
    %cst_108 = arith.constant 0.000000e+00 : f32
    %532 = vector.broadcast %cst_108 : f32 to vector<8x32xf32>
    %533 = arith.maximumf %531, %532 : vector<8x32xf32>
    %cst_109 = arith.constant dense<0.000000e+00> : vector<8x32xf32>
    %534 = tpu.matmul %533, %12, %cst_109 {dimension_numbers = #tpu.dot_dimension_numbers<[1], [0], [0], [1], [0, 0, 1, 1], [], []>} : vector<8x32xf32>, vector<32x32xf32>, vector<8x32xf32> -> vector<8x32xf32>
    %535 = arith.addf %528, %534 : vector<8x32xf32>
    %c0_110 = arith.constant 0 : index
    %c0_111 = arith.constant 0 : index
    %c64_112 = arith.constant 64 : index
    %536 = vector.load %arg15[%c0_110, %c0_111, %c64_112] : memref<1x8x256xf32, #tpu.memory_space<vmem>>, vector<1x8x16xf32>
    %537 = vector.shape_cast %536 : vector<1x8x16xf32> to vector<8x16xf32>
    %538 = vector.shape_cast %496 : vector<8x16xf32> to vector<1x8x16xf32>
    tpu.vector_store %arg15[%c0_110, %c0_111, %c64_112], %538 {strides = array<i32>} : memref<1x8x256xf32, #tpu.memory_space<vmem>>, vector<1x8x16xf32>,
    %c0_113 = arith.constant 0 : index
    %c0_114 = arith.constant 0 : index
    %c5 = arith.constant 5 : index
    %539 = vector.load %arg2[%c0_113, %c0_114, %c5] : memref<1x8x16xf32, #tpu.memory_space<vmem>>, vector<1x8x1xf32>
    %540 = vector.shape_cast %539 : vector<1x8x1xf32> to vector<8x1xf32>
    %c0_115 = arith.constant 0 : index
    %c0_116 = arith.constant 0 : index
    %c80 = arith.constant 80 : index
    %541 = vector.load %arg3[%c0_115, %c0_116, %c80] : memref<1x8x256xf32, #tpu.memory_space<vmem>>, vector<1x8x16xf32>
    %542 = vector.shape_cast %541 : vector<1x8x16xf32> to vector<8x16xf32>
    %cst_117 = arith.constant dense<0.000000e+00> : vector<8x384xf32>
    %543 = tpu.matmul %535, %3, %cst_117 {dimension_numbers = #tpu.dot_dimension_numbers<[1], [0], [0], [1], [0, 0, 1, 1], [], []>} : vector<8x32xf32>, vector<32x384xf32>, vector<8x384xf32> -> vector<8x384xf32>
    %544 = vector.shape_cast %540 : vector<8x1xf32> to vector<8x1xf32>
    %545 = vector.broadcast %544 : vector<8x1xf32> to vector<8x32xf32>
    %546 = vector.extract_strided_slice %543 {offsets = [0, 0], sizes = [8, 32], strides = [1, 1]} : vector<8x384xf32> to vector<8x32xf32>
    %547 = arith.mulf %545, %546 : vector<8x32xf32>
    %548 = arith.addf %535, %547 : vector<8x32xf32>
    %549 = arith.mulf %545, %545 : vector<8x32xf32>
    %550 = vector.extract_strided_slice %543 {offsets = [0, 32], sizes = [8, 32], strides = [1, 1]} : vector<8x384xf32> to vector<8x32xf32>
    %551 = arith.mulf %549, %550 : vector<8x32xf32>
    %552 = arith.addf %548, %551 : vector<8x32xf32>
    %553 = arith.mulf %549, %545 : vector<8x32xf32>
    %554 = vector.extract_strided_slice %543 {offsets = [0, 64], sizes = [8, 32], strides = [1, 1]} : vector<8x384xf32> to vector<8x32xf32>
    %555 = arith.mulf %553, %554 : vector<8x32xf32>
    %556 = arith.addf %552, %555 : vector<8x32xf32>
    %557 = arith.mulf %553, %545 : vector<8x32xf32>
    %558 = vector.extract_strided_slice %543 {offsets = [0, 96], sizes = [8, 32], strides = [1, 1]} : vector<8x384xf32> to vector<8x32xf32>
    %559 = arith.mulf %557, %558 : vector<8x32xf32>
    %560 = arith.addf %556, %559 : vector<8x32xf32>
    %561 = arith.mulf %557, %545 : vector<8x32xf32>
    %562 = vector.extract_strided_slice %543 {offsets = [0, 128], sizes = [8, 32], strides = [1, 1]} : vector<8x384xf32> to vector<8x32xf32>
    %563 = arith.mulf %561, %562 : vector<8x32xf32>
    %564 = arith.addf %560, %563 : vector<8x32xf32>
    %565 = arith.mulf %561, %545 : vector<8x32xf32>
    %566 = vector.extract_strided_slice %543 {offsets = [0, 160], sizes = [8, 32], strides = [1, 1]} : vector<8x384xf32> to vector<8x32xf32>
    %567 = arith.mulf %565, %566 : vector<8x32xf32>
    %568 = arith.addf %564, %567 : vector<8x32xf32>
    %569 = arith.mulf %565, %545 : vector<8x32xf32>
    %570 = vector.extract_strided_slice %543 {offsets = [0, 192], sizes = [8, 32], strides = [1, 1]} : vector<8x384xf32> to vector<8x32xf32>
    %571 = arith.mulf %569, %570 : vector<8x32xf32>
    %572 = arith.addf %568, %571 : vector<8x32xf32>
    %573 = arith.mulf %569, %545 : vector<8x32xf32>
    %574 = vector.extract_strided_slice %543 {offsets = [0, 224], sizes = [8, 32], strides = [1, 1]} : vector<8x384xf32> to vector<8x32xf32>
    %575 = arith.mulf %573, %574 : vector<8x32xf32>
    %576 = arith.addf %572, %575 : vector<8x32xf32>
    %577 = arith.mulf %573, %545 : vector<8x32xf32>
    %578 = vector.extract_strided_slice %543 {offsets = [0, 256], sizes = [8, 32], strides = [1, 1]} : vector<8x384xf32> to vector<8x32xf32>
    %579 = arith.mulf %577, %578 : vector<8x32xf32>
    %580 = arith.addf %576, %579 : vector<8x32xf32>
    %581 = arith.mulf %577, %545 : vector<8x32xf32>
    %582 = vector.extract_strided_slice %543 {offsets = [0, 288], sizes = [8, 32], strides = [1, 1]} : vector<8x384xf32> to vector<8x32xf32>
    %583 = arith.mulf %581, %582 : vector<8x32xf32>
    %584 = arith.addf %580, %583 : vector<8x32xf32>
    %585 = arith.mulf %581, %545 : vector<8x32xf32>
    %586 = vector.extract_strided_slice %543 {offsets = [0, 320], sizes = [8, 32], strides = [1, 1]} : vector<8x384xf32> to vector<8x32xf32>
    %587 = arith.mulf %585, %586 : vector<8x32xf32>
    %588 = arith.addf %584, %587 : vector<8x32xf32>
    %589 = arith.mulf %585, %545 : vector<8x32xf32>
    %590 = vector.extract_strided_slice %543 {offsets = [0, 352], sizes = [8, 32], strides = [1, 1]} : vector<8x384xf32> to vector<8x32xf32>
    %591 = arith.mulf %589, %590 : vector<8x32xf32>
    %592 = arith.addf %588, %591 : vector<8x32xf32>
    %cst_118 = arith.constant dense<0.000000e+00> : vector<8x48xf32>
    %593 = tpu.matmul %592, %4, %cst_118 {dimension_numbers = #tpu.dot_dimension_numbers<[1], [0], [0], [1], [0, 0, 1, 1], [], []>} : vector<8x32xf32>, vector<32x48xf32>, vector<8x48xf32> -> vector<8x48xf32>
    %594 = vector.extract_strided_slice %593 {offsets = [0, 0], sizes = [8, 32], strides = [1, 1]} : vector<8x48xf32> to vector<8x32xf32>
    %cst_119 = arith.constant 0.000000e+00 : f32
    %595 = vector.broadcast %cst_119 : f32 to vector<8x32xf32>
    %596 = arith.maximumf %594, %595 : vector<8x32xf32>
    %597 = vector.extract_strided_slice %593 {offsets = [0, 32], sizes = [8, 16], strides = [1, 1]} : vector<8x48xf32> to vector<8x16xf32>
    %cst_120 = arith.constant dense<0.000000e+00> : vector<8x16xf32>
    %598 = tpu.matmul %596, %5, %cst_120 {dimension_numbers = #tpu.dot_dimension_numbers<[1], [0], [0], [1], [0, 0, 1, 1], [], []>} : vector<8x32xf32>, vector<32x16xf32>, vector<8x16xf32> -> vector<8x16xf32>
    %599 = arith.addf %597, %598 : vector<8x16xf32>
    %600 = vector.broadcast %6 : vector<1x16xf32> to vector<8x16xf32>
    %601 = arith.addf %599, %600 : vector<8x16xf32>
    %602 = arith.cmpf one, %542, %542 : vector<8x16xf32>
    %603 = arith.select %602, %601, %542 : vector<8x16xi1>, vector<8x16xf32>
    %604 = tpu.concatenate %603, %601 in 1 : vector<8x16xf32>, vector<8x16xf32> -> vector<8x32xf32>
    %cst_121 = arith.constant dense<0.000000e+00> : vector<8x64xf32>
    %605 = tpu.matmul %604, %7, %cst_121 {dimension_numbers = #tpu.dot_dimension_numbers<[1], [0], [0], [1], [0, 0, 1, 1], [], []>} : vector<8x32xf32>, vector<32x64xf32>, vector<8x64xf32> -> vector<8x64xf32>
    %606 = vector.broadcast %8 : vector<1x64xf32> to vector<8x64xf32>
    %607 = arith.addf %605, %606 : vector<8x64xf32>
    %608 = vector.extract_strided_slice %607 {offsets = [0, 0], sizes = [8, 16], strides = [1, 1]} : vector<8x64xf32> to vector<8x16xf32>
    %609 = arith.negf %608 : vector<8x16xf32>
    %610 = math.exp %609 : vector<8x16xf32>
    %cst_122 = arith.constant 1.000000e+00 : f32
    %611 = vector.broadcast %cst_122 : f32 to vector<8x16xf32>
    %612 = arith.addf %611, %610 : vector<8x16xf32>
    %613 = arith.divf %611, %612 : vector<8x16xf32>
    %614 = vector.extract_strided_slice %607 {offsets = [0, 16], sizes = [8, 16], strides = [1, 1]} : vector<8x64xf32> to vector<8x16xf32>
    %615 = arith.negf %614 : vector<8x16xf32>
    %616 = math.exp %615 : vector<8x16xf32>
    %cst_123 = arith.constant 1.000000e+00 : f32
    %617 = vector.broadcast %cst_123 : f32 to vector<8x16xf32>
    %618 = arith.addf %617, %616 : vector<8x16xf32>
    %619 = arith.divf %617, %618 : vector<8x16xf32>
    %620 = vector.extract_strided_slice %607 {offsets = [0, 32], sizes = [8, 16], strides = [1, 1]} : vector<8x64xf32> to vector<8x16xf32>
    %621 = vector.extract_strided_slice %607 {offsets = [0, 48], sizes = [8, 16], strides = [1, 1]} : vector<8x64xf32> to vector<8x16xf32>
    %622 = arith.mulf %613, %621 : vector<8x16xf32>
    %623 = arith.addf %620, %622 : vector<8x16xf32>
    %624 = math.tanh %623 : vector<8x16xf32>
    %cst_124 = arith.constant 1.000000e+00 : f32
    %625 = vector.broadcast %cst_124 : f32 to vector<8x16xf32>
    %626 = arith.subf %625, %619 : vector<8x16xf32>
    %627 = arith.mulf %626, %624 : vector<8x16xf32>
    %628 = arith.mulf %619, %601 : vector<8x16xf32>
    %629 = arith.addf %627, %628 : vector<8x16xf32>
    %cst_125 = arith.constant dense<0.000000e+00> : vector<8x64xf32>
    %630 = tpu.matmul %629, %9, %cst_125 {dimension_numbers = #tpu.dot_dimension_numbers<[1], [0], [0], [1], [0, 0, 1, 1], [], []>} : vector<8x16xf32>, vector<16x64xf32>, vector<8x64xf32> -> vector<8x64xf32>
    %631 = vector.extract_strided_slice %630 {offsets = [0, 0], sizes = [8, 32], strides = [1, 1]} : vector<8x64xf32> to vector<8x32xf32>
    %632 = vector.broadcast %10 : vector<1x32xf32> to vector<8x32xf32>
    %633 = arith.addf %631, %632 : vector<8x32xf32>
    %634 = vector.extract_strided_slice %630 {offsets = [0, 32], sizes = [8, 32], strides = [1, 1]} : vector<8x64xf32> to vector<8x32xf32>
    %635 = vector.broadcast %11 : vector<1x32xf32> to vector<8x32xf32>
    %636 = arith.addf %634, %635 : vector<8x32xf32>
    %cst_126 = arith.constant 0.000000e+00 : f32
    %637 = vector.broadcast %cst_126 : f32 to vector<8x32xf32>
    %638 = arith.maximumf %636, %637 : vector<8x32xf32>
    %cst_127 = arith.constant dense<0.000000e+00> : vector<8x32xf32>
    %639 = tpu.matmul %638, %12, %cst_127 {dimension_numbers = #tpu.dot_dimension_numbers<[1], [0], [0], [1], [0, 0, 1, 1], [], []>} : vector<8x32xf32>, vector<32x32xf32>, vector<8x32xf32> -> vector<8x32xf32>
    %640 = arith.addf %633, %639 : vector<8x32xf32>
    %c0_128 = arith.constant 0 : index
    %c0_129 = arith.constant 0 : index
    %c80_130 = arith.constant 80 : index
    %641 = vector.load %arg15[%c0_128, %c0_129, %c80_130] : memref<1x8x256xf32, #tpu.memory_space<vmem>>, vector<1x8x16xf32>
    %642 = vector.shape_cast %641 : vector<1x8x16xf32> to vector<8x16xf32>
    %643 = vector.shape_cast %601 : vector<8x16xf32> to vector<1x8x16xf32>
    tpu.vector_store %arg15[%c0_128, %c0_129, %c80_130], %643 {strides = array<i32>} : memref<1x8x256xf32, #tpu.memory_space<vmem>>, vector<1x8x16xf32>,
    %c0_131 = arith.constant 0 : index
    %c0_132 = arith.constant 0 : index
    %c6 = arith.constant 6 : index
    %644 = vector.load %arg2[%c0_131, %c0_132, %c6] : memref<1x8x16xf32, #tpu.memory_space<vmem>>, vector<1x8x1xf32>
    %645 = vector.shape_cast %644 : vector<1x8x1xf32> to vector<8x1xf32>
    %c0_133 = arith.constant 0 : index
    %c0_134 = arith.constant 0 : index
    %c96 = arith.constant 96 : index
    %646 = vector.load %arg3[%c0_133, %c0_134, %c96] : memref<1x8x256xf32, #tpu.memory_space<vmem>>, vector<1x8x16xf32>
    %647 = vector.shape_cast %646 : vector<1x8x16xf32> to vector<8x16xf32>
    %cst_135 = arith.constant dense<0.000000e+00> : vector<8x384xf32>
    %648 = tpu.matmul %640, %3, %cst_135 {dimension_numbers = #tpu.dot_dimension_numbers<[1], [0], [0], [1], [0, 0, 1, 1], [], []>} : vector<8x32xf32>, vector<32x384xf32>, vector<8x384xf32> -> vector<8x384xf32>
    %649 = vector.shape_cast %645 : vector<8x1xf32> to vector<8x1xf32>
    %650 = vector.broadcast %649 : vector<8x1xf32> to vector<8x32xf32>
    %651 = vector.extract_strided_slice %648 {offsets = [0, 0], sizes = [8, 32], strides = [1, 1]} : vector<8x384xf32> to vector<8x32xf32>
    %652 = arith.mulf %650, %651 : vector<8x32xf32>
    %653 = arith.addf %640, %652 : vector<8x32xf32>
    %654 = arith.mulf %650, %650 : vector<8x32xf32>
    %655 = vector.extract_strided_slice %648 {offsets = [0, 32], sizes = [8, 32], strides = [1, 1]} : vector<8x384xf32> to vector<8x32xf32>
    %656 = arith.mulf %654, %655 : vector<8x32xf32>
    %657 = arith.addf %653, %656 : vector<8x32xf32>
    %658 = arith.mulf %654, %650 : vector<8x32xf32>
    %659 = vector.extract_strided_slice %648 {offsets = [0, 64], sizes = [8, 32], strides = [1, 1]} : vector<8x384xf32> to vector<8x32xf32>
    %660 = arith.mulf %658, %659 : vector<8x32xf32>
    %661 = arith.addf %657, %660 : vector<8x32xf32>
    %662 = arith.mulf %658, %650 : vector<8x32xf32>
    %663 = vector.extract_strided_slice %648 {offsets = [0, 96], sizes = [8, 32], strides = [1, 1]} : vector<8x384xf32> to vector<8x32xf32>
    %664 = arith.mulf %662, %663 : vector<8x32xf32>
    %665 = arith.addf %661, %664 : vector<8x32xf32>
    %666 = arith.mulf %662, %650 : vector<8x32xf32>
    %667 = vector.extract_strided_slice %648 {offsets = [0, 128], sizes = [8, 32], strides = [1, 1]} : vector<8x384xf32> to vector<8x32xf32>
    %668 = arith.mulf %666, %667 : vector<8x32xf32>
    %669 = arith.addf %665, %668 : vector<8x32xf32>
    %670 = arith.mulf %666, %650 : vector<8x32xf32>
    %671 = vector.extract_strided_slice %648 {offsets = [0, 160], sizes = [8, 32], strides = [1, 1]} : vector<8x384xf32> to vector<8x32xf32>
    %672 = arith.mulf %670, %671 : vector<8x32xf32>
    %673 = arith.addf %669, %672 : vector<8x32xf32>
    %674 = arith.mulf %670, %650 : vector<8x32xf32>
    %675 = vector.extract_strided_slice %648 {offsets = [0, 192], sizes = [8, 32], strides = [1, 1]} : vector<8x384xf32> to vector<8x32xf32>
    %676 = arith.mulf %674, %675 : vector<8x32xf32>
    %677 = arith.addf %673, %676 : vector<8x32xf32>
    %678 = arith.mulf %674, %650 : vector<8x32xf32>
    %679 = vector.extract_strided_slice %648 {offsets = [0, 224], sizes = [8, 32], strides = [1, 1]} : vector<8x384xf32> to vector<8x32xf32>
    %680 = arith.mulf %678, %679 : vector<8x32xf32>
    %681 = arith.addf %677, %680 : vector<8x32xf32>
    %682 = arith.mulf %678, %650 : vector<8x32xf32>
    %683 = vector.extract_strided_slice %648 {offsets = [0, 256], sizes = [8, 32], strides = [1, 1]} : vector<8x384xf32> to vector<8x32xf32>
    %684 = arith.mulf %682, %683 : vector<8x32xf32>
    %685 = arith.addf %681, %684 : vector<8x32xf32>
    %686 = arith.mulf %682, %650 : vector<8x32xf32>
    %687 = vector.extract_strided_slice %648 {offsets = [0, 288], sizes = [8, 32], strides = [1, 1]} : vector<8x384xf32> to vector<8x32xf32>
    %688 = arith.mulf %686, %687 : vector<8x32xf32>
    %689 = arith.addf %685, %688 : vector<8x32xf32>
    %690 = arith.mulf %686, %650 : vector<8x32xf32>
    %691 = vector.extract_strided_slice %648 {offsets = [0, 320], sizes = [8, 32], strides = [1, 1]} : vector<8x384xf32> to vector<8x32xf32>
    %692 = arith.mulf %690, %691 : vector<8x32xf32>
    %693 = arith.addf %689, %692 : vector<8x32xf32>
    %694 = arith.mulf %690, %650 : vector<8x32xf32>
    %695 = vector.extract_strided_slice %648 {offsets = [0, 352], sizes = [8, 32], strides = [1, 1]} : vector<8x384xf32> to vector<8x32xf32>
    %696 = arith.mulf %694, %695 : vector<8x32xf32>
    %697 = arith.addf %693, %696 : vector<8x32xf32>
    %cst_136 = arith.constant dense<0.000000e+00> : vector<8x48xf32>
    %698 = tpu.matmul %697, %4, %cst_136 {dimension_numbers = #tpu.dot_dimension_numbers<[1], [0], [0], [1], [0, 0, 1, 1], [], []>} : vector<8x32xf32>, vector<32x48xf32>, vector<8x48xf32> -> vector<8x48xf32>
    %699 = vector.extract_strided_slice %698 {offsets = [0, 0], sizes = [8, 32], strides = [1, 1]} : vector<8x48xf32> to vector<8x32xf32>
    %cst_137 = arith.constant 0.000000e+00 : f32
    %700 = vector.broadcast %cst_137 : f32 to vector<8x32xf32>
    %701 = arith.maximumf %699, %700 : vector<8x32xf32>
    %702 = vector.extract_strided_slice %698 {offsets = [0, 32], sizes = [8, 16], strides = [1, 1]} : vector<8x48xf32> to vector<8x16xf32>
    %cst_138 = arith.constant dense<0.000000e+00> : vector<8x16xf32>
    %703 = tpu.matmul %701, %5, %cst_138 {dimension_numbers = #tpu.dot_dimension_numbers<[1], [0], [0], [1], [0, 0, 1, 1], [], []>} : vector<8x32xf32>, vector<32x16xf32>, vector<8x16xf32> -> vector<8x16xf32>
    %704 = arith.addf %702, %703 : vector<8x16xf32>
    %705 = vector.broadcast %6 : vector<1x16xf32> to vector<8x16xf32>
    %706 = arith.addf %704, %705 : vector<8x16xf32>
    %707 = arith.cmpf one, %647, %647 : vector<8x16xf32>
    %708 = arith.select %707, %706, %647 : vector<8x16xi1>, vector<8x16xf32>
    %709 = tpu.concatenate %708, %706 in 1 : vector<8x16xf32>, vector<8x16xf32> -> vector<8x32xf32>
    %cst_139 = arith.constant dense<0.000000e+00> : vector<8x64xf32>
    %710 = tpu.matmul %709, %7, %cst_139 {dimension_numbers = #tpu.dot_dimension_numbers<[1], [0], [0], [1], [0, 0, 1, 1], [], []>} : vector<8x32xf32>, vector<32x64xf32>, vector<8x64xf32> -> vector<8x64xf32>
    %711 = vector.broadcast %8 : vector<1x64xf32> to vector<8x64xf32>
    %712 = arith.addf %710, %711 : vector<8x64xf32>
    %713 = vector.extract_strided_slice %712 {offsets = [0, 0], sizes = [8, 16], strides = [1, 1]} : vector<8x64xf32> to vector<8x16xf32>
    %714 = arith.negf %713 : vector<8x16xf32>
    %715 = math.exp %714 : vector<8x16xf32>
    %cst_140 = arith.constant 1.000000e+00 : f32
    %716 = vector.broadcast %cst_140 : f32 to vector<8x16xf32>
    %717 = arith.addf %716, %715 : vector<8x16xf32>
    %718 = arith.divf %716, %717 : vector<8x16xf32>
    %719 = vector.extract_strided_slice %712 {offsets = [0, 16], sizes = [8, 16], strides = [1, 1]} : vector<8x64xf32> to vector<8x16xf32>
    %720 = arith.negf %719 : vector<8x16xf32>
    %721 = math.exp %720 : vector<8x16xf32>
    %cst_141 = arith.constant 1.000000e+00 : f32
    %722 = vector.broadcast %cst_141 : f32 to vector<8x16xf32>
    %723 = arith.addf %722, %721 : vector<8x16xf32>
    %724 = arith.divf %722, %723 : vector<8x16xf32>
    %725 = vector.extract_strided_slice %712 {offsets = [0, 32], sizes = [8, 16], strides = [1, 1]} : vector<8x64xf32> to vector<8x16xf32>
    %726 = vector.extract_strided_slice %712 {offsets = [0, 48], sizes = [8, 16], strides = [1, 1]} : vector<8x64xf32> to vector<8x16xf32>
    %727 = arith.mulf %718, %726 : vector<8x16xf32>
    %728 = arith.addf %725, %727 : vector<8x16xf32>
    %729 = math.tanh %728 : vector<8x16xf32>
    %cst_142 = arith.constant 1.000000e+00 : f32
    %730 = vector.broadcast %cst_142 : f32 to vector<8x16xf32>
    %731 = arith.subf %730, %724 : vector<8x16xf32>
    %732 = arith.mulf %731, %729 : vector<8x16xf32>
    %733 = arith.mulf %724, %706 : vector<8x16xf32>
    %734 = arith.addf %732, %733 : vector<8x16xf32>
    %cst_143 = arith.constant dense<0.000000e+00> : vector<8x64xf32>
    %735 = tpu.matmul %734, %9, %cst_143 {dimension_numbers = #tpu.dot_dimension_numbers<[1], [0], [0], [1], [0, 0, 1, 1], [], []>} : vector<8x16xf32>, vector<16x64xf32>, vector<8x64xf32> -> vector<8x64xf32>
    %736 = vector.extract_strided_slice %735 {offsets = [0, 0], sizes = [8, 32], strides = [1, 1]} : vector<8x64xf32> to vector<8x32xf32>
    %737 = vector.broadcast %10 : vector<1x32xf32> to vector<8x32xf32>
    %738 = arith.addf %736, %737 : vector<8x32xf32>
    %739 = vector.extract_strided_slice %735 {offsets = [0, 32], sizes = [8, 32], strides = [1, 1]} : vector<8x64xf32> to vector<8x32xf32>
    %740 = vector.broadcast %11 : vector<1x32xf32> to vector<8x32xf32>
    %741 = arith.addf %739, %740 : vector<8x32xf32>
    %cst_144 = arith.constant 0.000000e+00 : f32
    %742 = vector.broadcast %cst_144 : f32 to vector<8x32xf32>
    %743 = arith.maximumf %741, %742 : vector<8x32xf32>
    %cst_145 = arith.constant dense<0.000000e+00> : vector<8x32xf32>
    %744 = tpu.matmul %743, %12, %cst_145 {dimension_numbers = #tpu.dot_dimension_numbers<[1], [0], [0], [1], [0, 0, 1, 1], [], []>} : vector<8x32xf32>, vector<32x32xf32>, vector<8x32xf32> -> vector<8x32xf32>
    %745 = arith.addf %738, %744 : vector<8x32xf32>
    %c0_146 = arith.constant 0 : index
    %c0_147 = arith.constant 0 : index
    %c96_148 = arith.constant 96 : index
    %746 = vector.load %arg15[%c0_146, %c0_147, %c96_148] : memref<1x8x256xf32, #tpu.memory_space<vmem>>, vector<1x8x16xf32>
    %747 = vector.shape_cast %746 : vector<1x8x16xf32> to vector<8x16xf32>
    %748 = vector.shape_cast %706 : vector<8x16xf32> to vector<1x8x16xf32>
    tpu.vector_store %arg15[%c0_146, %c0_147, %c96_148], %748 {strides = array<i32>} : memref<1x8x256xf32, #tpu.memory_space<vmem>>, vector<1x8x16xf32>,
    %c0_149 = arith.constant 0 : index
    %c0_150 = arith.constant 0 : index
    %c7 = arith.constant 7 : index
    %749 = vector.load %arg2[%c0_149, %c0_150, %c7] : memref<1x8x16xf32, #tpu.memory_space<vmem>>, vector<1x8x1xf32>
    %750 = vector.shape_cast %749 : vector<1x8x1xf32> to vector<8x1xf32>
    %c0_151 = arith.constant 0 : index
    %c0_152 = arith.constant 0 : index
    %c112 = arith.constant 112 : index
    %751 = vector.load %arg3[%c0_151, %c0_152, %c112] : memref<1x8x256xf32, #tpu.memory_space<vmem>>, vector<1x8x16xf32>
    %752 = vector.shape_cast %751 : vector<1x8x16xf32> to vector<8x16xf32>
    %cst_153 = arith.constant dense<0.000000e+00> : vector<8x384xf32>
    %753 = tpu.matmul %745, %3, %cst_153 {dimension_numbers = #tpu.dot_dimension_numbers<[1], [0], [0], [1], [0, 0, 1, 1], [], []>} : vector<8x32xf32>, vector<32x384xf32>, vector<8x384xf32> -> vector<8x384xf32>
    %754 = vector.shape_cast %750 : vector<8x1xf32> to vector<8x1xf32>
    %755 = vector.broadcast %754 : vector<8x1xf32> to vector<8x32xf32>
    %756 = vector.extract_strided_slice %753 {offsets = [0, 0], sizes = [8, 32], strides = [1, 1]} : vector<8x384xf32> to vector<8x32xf32>
    %757 = arith.mulf %755, %756 : vector<8x32xf32>
    %758 = arith.addf %745, %757 : vector<8x32xf32>
    %759 = arith.mulf %755, %755 : vector<8x32xf32>
    %760 = vector.extract_strided_slice %753 {offsets = [0, 32], sizes = [8, 32], strides = [1, 1]} : vector<8x384xf32> to vector<8x32xf32>
    %761 = arith.mulf %759, %760 : vector<8x32xf32>
    %762 = arith.addf %758, %761 : vector<8x32xf32>
    %763 = arith.mulf %759, %755 : vector<8x32xf32>
    %764 = vector.extract_strided_slice %753 {offsets = [0, 64], sizes = [8, 32], strides = [1, 1]} : vector<8x384xf32> to vector<8x32xf32>
    %765 = arith.mulf %763, %764 : vector<8x32xf32>
    %766 = arith.addf %762, %765 : vector<8x32xf32>
    %767 = arith.mulf %763, %755 : vector<8x32xf32>
    %768 = vector.extract_strided_slice %753 {offsets = [0, 96], sizes = [8, 32], strides = [1, 1]} : vector<8x384xf32> to vector<8x32xf32>
    %769 = arith.mulf %767, %768 : vector<8x32xf32>
    %770 = arith.addf %766, %769 : vector<8x32xf32>
    %771 = arith.mulf %767, %755 : vector<8x32xf32>
    %772 = vector.extract_strided_slice %753 {offsets = [0, 128], sizes = [8, 32], strides = [1, 1]} : vector<8x384xf32> to vector<8x32xf32>
    %773 = arith.mulf %771, %772 : vector<8x32xf32>
    %774 = arith.addf %770, %773 : vector<8x32xf32>
    %775 = arith.mulf %771, %755 : vector<8x32xf32>
    %776 = vector.extract_strided_slice %753 {offsets = [0, 160], sizes = [8, 32], strides = [1, 1]} : vector<8x384xf32> to vector<8x32xf32>
    %777 = arith.mulf %775, %776 : vector<8x32xf32>
    %778 = arith.addf %774, %777 : vector<8x32xf32>
    %779 = arith.mulf %775, %755 : vector<8x32xf32>
    %780 = vector.extract_strided_slice %753 {offsets = [0, 192], sizes = [8, 32], strides = [1, 1]} : vector<8x384xf32> to vector<8x32xf32>
    %781 = arith.mulf %779, %780 : vector<8x32xf32>
    %782 = arith.addf %778, %781 : vector<8x32xf32>
    %783 = arith.mulf %779, %755 : vector<8x32xf32>
    %784 = vector.extract_strided_slice %753 {offsets = [0, 224], sizes = [8, 32], strides = [1, 1]} : vector<8x384xf32> to vector<8x32xf32>
    %785 = arith.mulf %783, %784 : vector<8x32xf32>
    %786 = arith.addf %782, %785 : vector<8x32xf32>
    %787 = arith.mulf %783, %755 : vector<8x32xf32>
    %788 = vector.extract_strided_slice %753 {offsets = [0, 256], sizes = [8, 32], strides = [1, 1]} : vector<8x384xf32> to vector<8x32xf32>
    %789 = arith.mulf %787, %788 : vector<8x32xf32>
    %790 = arith.addf %786, %789 : vector<8x32xf32>
    %791 = arith.mulf %787, %755 : vector<8x32xf32>
    %792 = vector.extract_strided_slice %753 {offsets = [0, 288], sizes = [8, 32], strides = [1, 1]} : vector<8x384xf32> to vector<8x32xf32>
    %793 = arith.mulf %791, %792 : vector<8x32xf32>
    %794 = arith.addf %790, %793 : vector<8x32xf32>
    %795 = arith.mulf %791, %755 : vector<8x32xf32>
    %796 = vector.extract_strided_slice %753 {offsets = [0, 320], sizes = [8, 32], strides = [1, 1]} : vector<8x384xf32> to vector<8x32xf32>
    %797 = arith.mulf %795, %796 : vector<8x32xf32>
    %798 = arith.addf %794, %797 : vector<8x32xf32>
    %799 = arith.mulf %795, %755 : vector<8x32xf32>
    %800 = vector.extract_strided_slice %753 {offsets = [0, 352], sizes = [8, 32], strides = [1, 1]} : vector<8x384xf32> to vector<8x32xf32>
    %801 = arith.mulf %799, %800 : vector<8x32xf32>
    %802 = arith.addf %798, %801 : vector<8x32xf32>
    %cst_154 = arith.constant dense<0.000000e+00> : vector<8x48xf32>
    %803 = tpu.matmul %802, %4, %cst_154 {dimension_numbers = #tpu.dot_dimension_numbers<[1], [0], [0], [1], [0, 0, 1, 1], [], []>} : vector<8x32xf32>, vector<32x48xf32>, vector<8x48xf32> -> vector<8x48xf32>
    %804 = vector.extract_strided_slice %803 {offsets = [0, 0], sizes = [8, 32], strides = [1, 1]} : vector<8x48xf32> to vector<8x32xf32>
    %cst_155 = arith.constant 0.000000e+00 : f32
    %805 = vector.broadcast %cst_155 : f32 to vector<8x32xf32>
    %806 = arith.maximumf %804, %805 : vector<8x32xf32>
    %807 = vector.extract_strided_slice %803 {offsets = [0, 32], sizes = [8, 16], strides = [1, 1]} : vector<8x48xf32> to vector<8x16xf32>
    %cst_156 = arith.constant dense<0.000000e+00> : vector<8x16xf32>
    %808 = tpu.matmul %806, %5, %cst_156 {dimension_numbers = #tpu.dot_dimension_numbers<[1], [0], [0], [1], [0, 0, 1, 1], [], []>} : vector<8x32xf32>, vector<32x16xf32>, vector<8x16xf32> -> vector<8x16xf32>
    %809 = arith.addf %807, %808 : vector<8x16xf32>
    %810 = vector.broadcast %6 : vector<1x16xf32> to vector<8x16xf32>
    %811 = arith.addf %809, %810 : vector<8x16xf32>
    %812 = arith.cmpf one, %752, %752 : vector<8x16xf32>
    %813 = arith.select %812, %811, %752 : vector<8x16xi1>, vector<8x16xf32>
    %814 = tpu.concatenate %813, %811 in 1 : vector<8x16xf32>, vector<8x16xf32> -> vector<8x32xf32>
    %cst_157 = arith.constant dense<0.000000e+00> : vector<8x64xf32>
    %815 = tpu.matmul %814, %7, %cst_157 {dimension_numbers = #tpu.dot_dimension_numbers<[1], [0], [0], [1], [0, 0, 1, 1], [], []>} : vector<8x32xf32>, vector<32x64xf32>, vector<8x64xf32> -> vector<8x64xf32>
    %816 = vector.broadcast %8 : vector<1x64xf32> to vector<8x64xf32>
    %817 = arith.addf %815, %816 : vector<8x64xf32>
    %818 = vector.extract_strided_slice %817 {offsets = [0, 0], sizes = [8, 16], strides = [1, 1]} : vector<8x64xf32> to vector<8x16xf32>
    %819 = arith.negf %818 : vector<8x16xf32>
    %820 = math.exp %819 : vector<8x16xf32>
    %cst_158 = arith.constant 1.000000e+00 : f32
    %821 = vector.broadcast %cst_158 : f32 to vector<8x16xf32>
    %822 = arith.addf %821, %820 : vector<8x16xf32>
    %823 = arith.divf %821, %822 : vector<8x16xf32>
    %824 = vector.extract_strided_slice %817 {offsets = [0, 16], sizes = [8, 16], strides = [1, 1]} : vector<8x64xf32> to vector<8x16xf32>
    %825 = arith.negf %824 : vector<8x16xf32>
    %826 = math.exp %825 : vector<8x16xf32>
    %cst_159 = arith.constant 1.000000e+00 : f32
    %827 = vector.broadcast %cst_159 : f32 to vector<8x16xf32>
    %828 = arith.addf %827, %826 : vector<8x16xf32>
    %829 = arith.divf %827, %828 : vector<8x16xf32>
    %830 = vector.extract_strided_slice %817 {offsets = [0, 32], sizes = [8, 16], strides = [1, 1]} : vector<8x64xf32> to vector<8x16xf32>
    %831 = vector.extract_strided_slice %817 {offsets = [0, 48], sizes = [8, 16], strides = [1, 1]} : vector<8x64xf32> to vector<8x16xf32>
    %832 = arith.mulf %823, %831 : vector<8x16xf32>
    %833 = arith.addf %830, %832 : vector<8x16xf32>
    %834 = math.tanh %833 : vector<8x16xf32>
    %cst_160 = arith.constant 1.000000e+00 : f32
    %835 = vector.broadcast %cst_160 : f32 to vector<8x16xf32>
    %836 = arith.subf %835, %829 : vector<8x16xf32>
    %837 = arith.mulf %836, %834 : vector<8x16xf32>
    %838 = arith.mulf %829, %811 : vector<8x16xf32>
    %839 = arith.addf %837, %838 : vector<8x16xf32>
    %cst_161 = arith.constant dense<0.000000e+00> : vector<8x64xf32>
    %840 = tpu.matmul %839, %9, %cst_161 {dimension_numbers = #tpu.dot_dimension_numbers<[1], [0], [0], [1], [0, 0, 1, 1], [], []>} : vector<8x16xf32>, vector<16x64xf32>, vector<8x64xf32> -> vector<8x64xf32>
    %841 = vector.extract_strided_slice %840 {offsets = [0, 0], sizes = [8, 32], strides = [1, 1]} : vector<8x64xf32> to vector<8x32xf32>
    %842 = vector.broadcast %10 : vector<1x32xf32> to vector<8x32xf32>
    %843 = arith.addf %841, %842 : vector<8x32xf32>
    %844 = vector.extract_strided_slice %840 {offsets = [0, 32], sizes = [8, 32], strides = [1, 1]} : vector<8x64xf32> to vector<8x32xf32>
    %845 = vector.broadcast %11 : vector<1x32xf32> to vector<8x32xf32>
    %846 = arith.addf %844, %845 : vector<8x32xf32>
    %cst_162 = arith.constant 0.000000e+00 : f32
    %847 = vector.broadcast %cst_162 : f32 to vector<8x32xf32>
    %848 = arith.maximumf %846, %847 : vector<8x32xf32>
    %cst_163 = arith.constant dense<0.000000e+00> : vector<8x32xf32>
    %849 = tpu.matmul %848, %12, %cst_163 {dimension_numbers = #tpu.dot_dimension_numbers<[1], [0], [0], [1], [0, 0, 1, 1], [], []>} : vector<8x32xf32>, vector<32x32xf32>, vector<8x32xf32> -> vector<8x32xf32>
    %850 = arith.addf %843, %849 : vector<8x32xf32>
    %c0_164 = arith.constant 0 : index
    %c0_165 = arith.constant 0 : index
    %c112_166 = arith.constant 112 : index
    %851 = vector.load %arg15[%c0_164, %c0_165, %c112_166] : memref<1x8x256xf32, #tpu.memory_space<vmem>>, vector<1x8x16xf32>
    %852 = vector.shape_cast %851 : vector<1x8x16xf32> to vector<8x16xf32>
    %853 = vector.shape_cast %811 : vector<8x16xf32> to vector<1x8x16xf32>
    tpu.vector_store %arg15[%c0_164, %c0_165, %c112_166], %853 {strides = array<i32>} : memref<1x8x256xf32, #tpu.memory_space<vmem>>, vector<1x8x16xf32>,
    %c0_167 = arith.constant 0 : index
    %c0_168 = arith.constant 0 : index
    %c8 = arith.constant 8 : index
    %854 = vector.load %arg2[%c0_167, %c0_168, %c8] : memref<1x8x16xf32, #tpu.memory_space<vmem>>, vector<1x8x1xf32>
    %855 = vector.shape_cast %854 : vector<1x8x1xf32> to vector<8x1xf32>
    %c0_169 = arith.constant 0 : index
    %c0_170 = arith.constant 0 : index
    %c128 = arith.constant 128 : index
    %856 = vector.load %arg3[%c0_169, %c0_170, %c128] : memref<1x8x256xf32, #tpu.memory_space<vmem>>, vector<1x8x16xf32>
    %857 = vector.shape_cast %856 : vector<1x8x16xf32> to vector<8x16xf32>
    %cst_171 = arith.constant dense<0.000000e+00> : vector<8x384xf32>
    %858 = tpu.matmul %850, %3, %cst_171 {dimension_numbers = #tpu.dot_dimension_numbers<[1], [0], [0], [1], [0, 0, 1, 1], [], []>} : vector<8x32xf32>, vector<32x384xf32>, vector<8x384xf32> -> vector<8x384xf32>
    %859 = vector.shape_cast %855 : vector<8x1xf32> to vector<8x1xf32>
    %860 = vector.broadcast %859 : vector<8x1xf32> to vector<8x32xf32>
    %861 = vector.extract_strided_slice %858 {offsets = [0, 0], sizes = [8, 32], strides = [1, 1]} : vector<8x384xf32> to vector<8x32xf32>
    %862 = arith.mulf %860, %861 : vector<8x32xf32>
    %863 = arith.addf %850, %862 : vector<8x32xf32>
    %864 = arith.mulf %860, %860 : vector<8x32xf32>
    %865 = vector.extract_strided_slice %858 {offsets = [0, 32], sizes = [8, 32], strides = [1, 1]} : vector<8x384xf32> to vector<8x32xf32>
    %866 = arith.mulf %864, %865 : vector<8x32xf32>
    %867 = arith.addf %863, %866 : vector<8x32xf32>
    %868 = arith.mulf %864, %860 : vector<8x32xf32>
    %869 = vector.extract_strided_slice %858 {offsets = [0, 64], sizes = [8, 32], strides = [1, 1]} : vector<8x384xf32> to vector<8x32xf32>
    %870 = arith.mulf %868, %869 : vector<8x32xf32>
    %871 = arith.addf %867, %870 : vector<8x32xf32>
    %872 = arith.mulf %868, %860 : vector<8x32xf32>
    %873 = vector.extract_strided_slice %858 {offsets = [0, 96], sizes = [8, 32], strides = [1, 1]} : vector<8x384xf32> to vector<8x32xf32>
    %874 = arith.mulf %872, %873 : vector<8x32xf32>
    %875 = arith.addf %871, %874 : vector<8x32xf32>
    %876 = arith.mulf %872, %860 : vector<8x32xf32>
    %877 = vector.extract_strided_slice %858 {offsets = [0, 128], sizes = [8, 32], strides = [1, 1]} : vector<8x384xf32> to vector<8x32xf32>
    %878 = arith.mulf %876, %877 : vector<8x32xf32>
    %879 = arith.addf %875, %878 : vector<8x32xf32>
    %880 = arith.mulf %876, %860 : vector<8x32xf32>
    %881 = vector.extract_strided_slice %858 {offsets = [0, 160], sizes = [8, 32], strides = [1, 1]} : vector<8x384xf32> to vector<8x32xf32>
    %882 = arith.mulf %880, %881 : vector<8x32xf32>
    %883 = arith.addf %879, %882 : vector<8x32xf32>
    %884 = arith.mulf %880, %860 : vector<8x32xf32>
    %885 = vector.extract_strided_slice %858 {offsets = [0, 192], sizes = [8, 32], strides = [1, 1]} : vector<8x384xf32> to vector<8x32xf32>
    %886 = arith.mulf %884, %885 : vector<8x32xf32>
    %887 = arith.addf %883, %886 : vector<8x32xf32>
    %888 = arith.mulf %884, %860 : vector<8x32xf32>
    %889 = vector.extract_strided_slice %858 {offsets = [0, 224], sizes = [8, 32], strides = [1, 1]} : vector<8x384xf32> to vector<8x32xf32>
    %890 = arith.mulf %888, %889 : vector<8x32xf32>
    %891 = arith.addf %887, %890 : vector<8x32xf32>
    %892 = arith.mulf %888, %860 : vector<8x32xf32>
    %893 = vector.extract_strided_slice %858 {offsets = [0, 256], sizes = [8, 32], strides = [1, 1]} : vector<8x384xf32> to vector<8x32xf32>
    %894 = arith.mulf %892, %893 : vector<8x32xf32>
    %895 = arith.addf %891, %894 : vector<8x32xf32>
    %896 = arith.mulf %892, %860 : vector<8x32xf32>
    %897 = vector.extract_strided_slice %858 {offsets = [0, 288], sizes = [8, 32], strides = [1, 1]} : vector<8x384xf32> to vector<8x32xf32>
    %898 = arith.mulf %896, %897 : vector<8x32xf32>
    %899 = arith.addf %895, %898 : vector<8x32xf32>
    %900 = arith.mulf %896, %860 : vector<8x32xf32>
    %901 = vector.extract_strided_slice %858 {offsets = [0, 320], sizes = [8, 32], strides = [1, 1]} : vector<8x384xf32> to vector<8x32xf32>
    %902 = arith.mulf %900, %901 : vector<8x32xf32>
    %903 = arith.addf %899, %902 : vector<8x32xf32>
    %904 = arith.mulf %900, %860 : vector<8x32xf32>
    %905 = vector.extract_strided_slice %858 {offsets = [0, 352], sizes = [8, 32], strides = [1, 1]} : vector<8x384xf32> to vector<8x32xf32>
    %906 = arith.mulf %904, %905 : vector<8x32xf32>
    %907 = arith.addf %903, %906 : vector<8x32xf32>
    %cst_172 = arith.constant dense<0.000000e+00> : vector<8x48xf32>
    %908 = tpu.matmul %907, %4, %cst_172 {dimension_numbers = #tpu.dot_dimension_numbers<[1], [0], [0], [1], [0, 0, 1, 1], [], []>} : vector<8x32xf32>, vector<32x48xf32>, vector<8x48xf32> -> vector<8x48xf32>
    %909 = vector.extract_strided_slice %908 {offsets = [0, 0], sizes = [8, 32], strides = [1, 1]} : vector<8x48xf32> to vector<8x32xf32>
    %cst_173 = arith.constant 0.000000e+00 : f32
    %910 = vector.broadcast %cst_173 : f32 to vector<8x32xf32>
    %911 = arith.maximumf %909, %910 : vector<8x32xf32>
    %912 = vector.extract_strided_slice %908 {offsets = [0, 32], sizes = [8, 16], strides = [1, 1]} : vector<8x48xf32> to vector<8x16xf32>
    %cst_174 = arith.constant dense<0.000000e+00> : vector<8x16xf32>
    %913 = tpu.matmul %911, %5, %cst_174 {dimension_numbers = #tpu.dot_dimension_numbers<[1], [0], [0], [1], [0, 0, 1, 1], [], []>} : vector<8x32xf32>, vector<32x16xf32>, vector<8x16xf32> -> vector<8x16xf32>
    %914 = arith.addf %912, %913 : vector<8x16xf32>
    %915 = vector.broadcast %6 : vector<1x16xf32> to vector<8x16xf32>
    %916 = arith.addf %914, %915 : vector<8x16xf32>
    %917 = arith.cmpf one, %857, %857 : vector<8x16xf32>
    %918 = arith.select %917, %916, %857 : vector<8x16xi1>, vector<8x16xf32>
    %919 = tpu.concatenate %918, %916 in 1 : vector<8x16xf32>, vector<8x16xf32> -> vector<8x32xf32>
    %cst_175 = arith.constant dense<0.000000e+00> : vector<8x64xf32>
    %920 = tpu.matmul %919, %7, %cst_175 {dimension_numbers = #tpu.dot_dimension_numbers<[1], [0], [0], [1], [0, 0, 1, 1], [], []>} : vector<8x32xf32>, vector<32x64xf32>, vector<8x64xf32> -> vector<8x64xf32>
    %921 = vector.broadcast %8 : vector<1x64xf32> to vector<8x64xf32>
    %922 = arith.addf %920, %921 : vector<8x64xf32>
    %923 = vector.extract_strided_slice %922 {offsets = [0, 0], sizes = [8, 16], strides = [1, 1]} : vector<8x64xf32> to vector<8x16xf32>
    %924 = arith.negf %923 : vector<8x16xf32>
    %925 = math.exp %924 : vector<8x16xf32>
    %cst_176 = arith.constant 1.000000e+00 : f32
    %926 = vector.broadcast %cst_176 : f32 to vector<8x16xf32>
    %927 = arith.addf %926, %925 : vector<8x16xf32>
    %928 = arith.divf %926, %927 : vector<8x16xf32>
    %929 = vector.extract_strided_slice %922 {offsets = [0, 16], sizes = [8, 16], strides = [1, 1]} : vector<8x64xf32> to vector<8x16xf32>
    %930 = arith.negf %929 : vector<8x16xf32>
    %931 = math.exp %930 : vector<8x16xf32>
    %cst_177 = arith.constant 1.000000e+00 : f32
    %932 = vector.broadcast %cst_177 : f32 to vector<8x16xf32>
    %933 = arith.addf %932, %931 : vector<8x16xf32>
    %934 = arith.divf %932, %933 : vector<8x16xf32>
    %935 = vector.extract_strided_slice %922 {offsets = [0, 32], sizes = [8, 16], strides = [1, 1]} : vector<8x64xf32> to vector<8x16xf32>
    %936 = vector.extract_strided_slice %922 {offsets = [0, 48], sizes = [8, 16], strides = [1, 1]} : vector<8x64xf32> to vector<8x16xf32>
    %937 = arith.mulf %928, %936 : vector<8x16xf32>
    %938 = arith.addf %935, %937 : vector<8x16xf32>
    %939 = math.tanh %938 : vector<8x16xf32>
    %cst_178 = arith.constant 1.000000e+00 : f32
    %940 = vector.broadcast %cst_178 : f32 to vector<8x16xf32>
    %941 = arith.subf %940, %934 : vector<8x16xf32>
    %942 = arith.mulf %941, %939 : vector<8x16xf32>
    %943 = arith.mulf %934, %916 : vector<8x16xf32>
    %944 = arith.addf %942, %943 : vector<8x16xf32>
    %cst_179 = arith.constant dense<0.000000e+00> : vector<8x64xf32>
    %945 = tpu.matmul %944, %9, %cst_179 {dimension_numbers = #tpu.dot_dimension_numbers<[1], [0], [0], [1], [0, 0, 1, 1], [], []>} : vector<8x16xf32>, vector<16x64xf32>, vector<8x64xf32> -> vector<8x64xf32>
    %946 = vector.extract_strided_slice %945 {offsets = [0, 0], sizes = [8, 32], strides = [1, 1]} : vector<8x64xf32> to vector<8x32xf32>
    %947 = vector.broadcast %10 : vector<1x32xf32> to vector<8x32xf32>
    %948 = arith.addf %946, %947 : vector<8x32xf32>
    %949 = vector.extract_strided_slice %945 {offsets = [0, 32], sizes = [8, 32], strides = [1, 1]} : vector<8x64xf32> to vector<8x32xf32>
    %950 = vector.broadcast %11 : vector<1x32xf32> to vector<8x32xf32>
    %951 = arith.addf %949, %950 : vector<8x32xf32>
    %cst_180 = arith.constant 0.000000e+00 : f32
    %952 = vector.broadcast %cst_180 : f32 to vector<8x32xf32>
    %953 = arith.maximumf %951, %952 : vector<8x32xf32>
    %cst_181 = arith.constant dense<0.000000e+00> : vector<8x32xf32>
    %954 = tpu.matmul %953, %12, %cst_181 {dimension_numbers = #tpu.dot_dimension_numbers<[1], [0], [0], [1], [0, 0, 1, 1], [], []>} : vector<8x32xf32>, vector<32x32xf32>, vector<8x32xf32> -> vector<8x32xf32>
    %955 = arith.addf %948, %954 : vector<8x32xf32>
    %c0_182 = arith.constant 0 : index
    %c0_183 = arith.constant 0 : index
    %c128_184 = arith.constant 128 : index
    %956 = vector.load %arg15[%c0_182, %c0_183, %c128_184] : memref<1x8x256xf32, #tpu.memory_space<vmem>>, vector<1x8x16xf32>
    %957 = vector.shape_cast %956 : vector<1x8x16xf32> to vector<8x16xf32>
    %958 = vector.shape_cast %916 : vector<8x16xf32> to vector<1x8x16xf32>
    tpu.vector_store %arg15[%c0_182, %c0_183, %c128_184], %958 {strides = array<i32>} : memref<1x8x256xf32, #tpu.memory_space<vmem>>, vector<1x8x16xf32>,
    %c0_185 = arith.constant 0 : index
    %c0_186 = arith.constant 0 : index
    %c9 = arith.constant 9 : index
    %959 = vector.load %arg2[%c0_185, %c0_186, %c9] : memref<1x8x16xf32, #tpu.memory_space<vmem>>, vector<1x8x1xf32>
    %960 = vector.shape_cast %959 : vector<1x8x1xf32> to vector<8x1xf32>
    %c0_187 = arith.constant 0 : index
    %c0_188 = arith.constant 0 : index
    %c144 = arith.constant 144 : index
    %961 = vector.load %arg3[%c0_187, %c0_188, %c144] : memref<1x8x256xf32, #tpu.memory_space<vmem>>, vector<1x8x16xf32>
    %962 = vector.shape_cast %961 : vector<1x8x16xf32> to vector<8x16xf32>
    %cst_189 = arith.constant dense<0.000000e+00> : vector<8x384xf32>
    %963 = tpu.matmul %955, %3, %cst_189 {dimension_numbers = #tpu.dot_dimension_numbers<[1], [0], [0], [1], [0, 0, 1, 1], [], []>} : vector<8x32xf32>, vector<32x384xf32>, vector<8x384xf32> -> vector<8x384xf32>
    %964 = vector.shape_cast %960 : vector<8x1xf32> to vector<8x1xf32>
    %965 = vector.broadcast %964 : vector<8x1xf32> to vector<8x32xf32>
    %966 = vector.extract_strided_slice %963 {offsets = [0, 0], sizes = [8, 32], strides = [1, 1]} : vector<8x384xf32> to vector<8x32xf32>
    %967 = arith.mulf %965, %966 : vector<8x32xf32>
    %968 = arith.addf %955, %967 : vector<8x32xf32>
    %969 = arith.mulf %965, %965 : vector<8x32xf32>
    %970 = vector.extract_strided_slice %963 {offsets = [0, 32], sizes = [8, 32], strides = [1, 1]} : vector<8x384xf32> to vector<8x32xf32>
    %971 = arith.mulf %969, %970 : vector<8x32xf32>
    %972 = arith.addf %968, %971 : vector<8x32xf32>
    %973 = arith.mulf %969, %965 : vector<8x32xf32>
    %974 = vector.extract_strided_slice %963 {offsets = [0, 64], sizes = [8, 32], strides = [1, 1]} : vector<8x384xf32> to vector<8x32xf32>
    %975 = arith.mulf %973, %974 : vector<8x32xf32>
    %976 = arith.addf %972, %975 : vector<8x32xf32>
    %977 = arith.mulf %973, %965 : vector<8x32xf32>
    %978 = vector.extract_strided_slice %963 {offsets = [0, 96], sizes = [8, 32], strides = [1, 1]} : vector<8x384xf32> to vector<8x32xf32>
    %979 = arith.mulf %977, %978 : vector<8x32xf32>
    %980 = arith.addf %976, %979 : vector<8x32xf32>
    %981 = arith.mulf %977, %965 : vector<8x32xf32>
    %982 = vector.extract_strided_slice %963 {offsets = [0, 128], sizes = [8, 32], strides = [1, 1]} : vector<8x384xf32> to vector<8x32xf32>
    %983 = arith.mulf %981, %982 : vector<8x32xf32>
    %984 = arith.addf %980, %983 : vector<8x32xf32>
    %985 = arith.mulf %981, %965 : vector<8x32xf32>
    %986 = vector.extract_strided_slice %963 {offsets = [0, 160], sizes = [8, 32], strides = [1, 1]} : vector<8x384xf32> to vector<8x32xf32>
    %987 = arith.mulf %985, %986 : vector<8x32xf32>
    %988 = arith.addf %984, %987 : vector<8x32xf32>
    %989 = arith.mulf %985, %965 : vector<8x32xf32>
    %990 = vector.extract_strided_slice %963 {offsets = [0, 192], sizes = [8, 32], strides = [1, 1]} : vector<8x384xf32> to vector<8x32xf32>
    %991 = arith.mulf %989, %990 : vector<8x32xf32>
    %992 = arith.addf %988, %991 : vector<8x32xf32>
    %993 = arith.mulf %989, %965 : vector<8x32xf32>
    %994 = vector.extract_strided_slice %963 {offsets = [0, 224], sizes = [8, 32], strides = [1, 1]} : vector<8x384xf32> to vector<8x32xf32>
    %995 = arith.mulf %993, %994 : vector<8x32xf32>
    %996 = arith.addf %992, %995 : vector<8x32xf32>
    %997 = arith.mulf %993, %965 : vector<8x32xf32>
    %998 = vector.extract_strided_slice %963 {offsets = [0, 256], sizes = [8, 32], strides = [1, 1]} : vector<8x384xf32> to vector<8x32xf32>
    %999 = arith.mulf %997, %998 : vector<8x32xf32>
    %1000 = arith.addf %996, %999 : vector<8x32xf32>
    %1001 = arith.mulf %997, %965 : vector<8x32xf32>
    %1002 = vector.extract_strided_slice %963 {offsets = [0, 288], sizes = [8, 32], strides = [1, 1]} : vector<8x384xf32> to vector<8x32xf32>
    %1003 = arith.mulf %1001, %1002 : vector<8x32xf32>
    %1004 = arith.addf %1000, %1003 : vector<8x32xf32>
    %1005 = arith.mulf %1001, %965 : vector<8x32xf32>
    %1006 = vector.extract_strided_slice %963 {offsets = [0, 320], sizes = [8, 32], strides = [1, 1]} : vector<8x384xf32> to vector<8x32xf32>
    %1007 = arith.mulf %1005, %1006 : vector<8x32xf32>
    %1008 = arith.addf %1004, %1007 : vector<8x32xf32>
    %1009 = arith.mulf %1005, %965 : vector<8x32xf32>
    %1010 = vector.extract_strided_slice %963 {offsets = [0, 352], sizes = [8, 32], strides = [1, 1]} : vector<8x384xf32> to vector<8x32xf32>
    %1011 = arith.mulf %1009, %1010 : vector<8x32xf32>
    %1012 = arith.addf %1008, %1011 : vector<8x32xf32>
    %cst_190 = arith.constant dense<0.000000e+00> : vector<8x48xf32>
    %1013 = tpu.matmul %1012, %4, %cst_190 {dimension_numbers = #tpu.dot_dimension_numbers<[1], [0], [0], [1], [0, 0, 1, 1], [], []>} : vector<8x32xf32>, vector<32x48xf32>, vector<8x48xf32> -> vector<8x48xf32>
    %1014 = vector.extract_strided_slice %1013 {offsets = [0, 0], sizes = [8, 32], strides = [1, 1]} : vector<8x48xf32> to vector<8x32xf32>
    %cst_191 = arith.constant 0.000000e+00 : f32
    %1015 = vector.broadcast %cst_191 : f32 to vector<8x32xf32>
    %1016 = arith.maximumf %1014, %1015 : vector<8x32xf32>
    %1017 = vector.extract_strided_slice %1013 {offsets = [0, 32], sizes = [8, 16], strides = [1, 1]} : vector<8x48xf32> to vector<8x16xf32>
    %cst_192 = arith.constant dense<0.000000e+00> : vector<8x16xf32>
    %1018 = tpu.matmul %1016, %5, %cst_192 {dimension_numbers = #tpu.dot_dimension_numbers<[1], [0], [0], [1], [0, 0, 1, 1], [], []>} : vector<8x32xf32>, vector<32x16xf32>, vector<8x16xf32> -> vector<8x16xf32>
    %1019 = arith.addf %1017, %1018 : vector<8x16xf32>
    %1020 = vector.broadcast %6 : vector<1x16xf32> to vector<8x16xf32>
    %1021 = arith.addf %1019, %1020 : vector<8x16xf32>
    %1022 = arith.cmpf one, %962, %962 : vector<8x16xf32>
    %1023 = arith.select %1022, %1021, %962 : vector<8x16xi1>, vector<8x16xf32>
    %1024 = tpu.concatenate %1023, %1021 in 1 : vector<8x16xf32>, vector<8x16xf32> -> vector<8x32xf32>
    %cst_193 = arith.constant dense<0.000000e+00> : vector<8x64xf32>
    %1025 = tpu.matmul %1024, %7, %cst_193 {dimension_numbers = #tpu.dot_dimension_numbers<[1], [0], [0], [1], [0, 0, 1, 1], [], []>} : vector<8x32xf32>, vector<32x64xf32>, vector<8x64xf32> -> vector<8x64xf32>
    %1026 = vector.broadcast %8 : vector<1x64xf32> to vector<8x64xf32>
    %1027 = arith.addf %1025, %1026 : vector<8x64xf32>
    %1028 = vector.extract_strided_slice %1027 {offsets = [0, 0], sizes = [8, 16], strides = [1, 1]} : vector<8x64xf32> to vector<8x16xf32>
    %1029 = arith.negf %1028 : vector<8x16xf32>
    %1030 = math.exp %1029 : vector<8x16xf32>
    %cst_194 = arith.constant 1.000000e+00 : f32
    %1031 = vector.broadcast %cst_194 : f32 to vector<8x16xf32>
    %1032 = arith.addf %1031, %1030 : vector<8x16xf32>
    %1033 = arith.divf %1031, %1032 : vector<8x16xf32>
    %1034 = vector.extract_strided_slice %1027 {offsets = [0, 16], sizes = [8, 16], strides = [1, 1]} : vector<8x64xf32> to vector<8x16xf32>
    %1035 = arith.negf %1034 : vector<8x16xf32>
    %1036 = math.exp %1035 : vector<8x16xf32>
    %cst_195 = arith.constant 1.000000e+00 : f32
    %1037 = vector.broadcast %cst_195 : f32 to vector<8x16xf32>
    %1038 = arith.addf %1037, %1036 : vector<8x16xf32>
    %1039 = arith.divf %1037, %1038 : vector<8x16xf32>
    %1040 = vector.extract_strided_slice %1027 {offsets = [0, 32], sizes = [8, 16], strides = [1, 1]} : vector<8x64xf32> to vector<8x16xf32>
    %1041 = vector.extract_strided_slice %1027 {offsets = [0, 48], sizes = [8, 16], strides = [1, 1]} : vector<8x64xf32> to vector<8x16xf32>
    %1042 = arith.mulf %1033, %1041 : vector<8x16xf32>
    %1043 = arith.addf %1040, %1042 : vector<8x16xf32>
    %1044 = math.tanh %1043 : vector<8x16xf32>
    %cst_196 = arith.constant 1.000000e+00 : f32
    %1045 = vector.broadcast %cst_196 : f32 to vector<8x16xf32>
    %1046 = arith.subf %1045, %1039 : vector<8x16xf32>
    %1047 = arith.mulf %1046, %1044 : vector<8x16xf32>
    %1048 = arith.mulf %1039, %1021 : vector<8x16xf32>
    %1049 = arith.addf %1047, %1048 : vector<8x16xf32>
    %cst_197 = arith.constant dense<0.000000e+00> : vector<8x64xf32>
    %1050 = tpu.matmul %1049, %9, %cst_197 {dimension_numbers = #tpu.dot_dimension_numbers<[1], [0], [0], [1], [0, 0, 1, 1], [], []>} : vector<8x16xf32>, vector<16x64xf32>, vector<8x64xf32> -> vector<8x64xf32>
    %1051 = vector.extract_strided_slice %1050 {offsets = [0, 0], sizes = [8, 32], strides = [1, 1]} : vector<8x64xf32> to vector<8x32xf32>
    %1052 = vector.broadcast %10 : vector<1x32xf32> to vector<8x32xf32>
    %1053 = arith.addf %1051, %1052 : vector<8x32xf32>
    %1054 = vector.extract_strided_slice %1050 {offsets = [0, 32], sizes = [8, 32], strides = [1, 1]} : vector<8x64xf32> to vector<8x32xf32>
    %1055 = vector.broadcast %11 : vector<1x32xf32> to vector<8x32xf32>
    %1056 = arith.addf %1054, %1055 : vector<8x32xf32>
    %cst_198 = arith.constant 0.000000e+00 : f32
    %1057 = vector.broadcast %cst_198 : f32 to vector<8x32xf32>
    %1058 = arith.maximumf %1056, %1057 : vector<8x32xf32>
    %cst_199 = arith.constant dense<0.000000e+00> : vector<8x32xf32>
    %1059 = tpu.matmul %1058, %12, %cst_199 {dimension_numbers = #tpu.dot_dimension_numbers<[1], [0], [0], [1], [0, 0, 1, 1], [], []>} : vector<8x32xf32>, vector<32x32xf32>, vector<8x32xf32> -> vector<8x32xf32>
    %1060 = arith.addf %1053, %1059 : vector<8x32xf32>
    %c0_200 = arith.constant 0 : index
    %c0_201 = arith.constant 0 : index
    %c144_202 = arith.constant 144 : index
    %1061 = vector.load %arg15[%c0_200, %c0_201, %c144_202] : memref<1x8x256xf32, #tpu.memory_space<vmem>>, vector<1x8x16xf32>
    %1062 = vector.shape_cast %1061 : vector<1x8x16xf32> to vector<8x16xf32>
    %1063 = vector.shape_cast %1021 : vector<8x16xf32> to vector<1x8x16xf32>
    tpu.vector_store %arg15[%c0_200, %c0_201, %c144_202], %1063 {strides = array<i32>} : memref<1x8x256xf32, #tpu.memory_space<vmem>>, vector<1x8x16xf32>,
    %c0_203 = arith.constant 0 : index
    %c0_204 = arith.constant 0 : index
    %c10 = arith.constant 10 : index
    %1064 = vector.load %arg2[%c0_203, %c0_204, %c10] : memref<1x8x16xf32, #tpu.memory_space<vmem>>, vector<1x8x1xf32>
    %1065 = vector.shape_cast %1064 : vector<1x8x1xf32> to vector<8x1xf32>
    %c0_205 = arith.constant 0 : index
    %c0_206 = arith.constant 0 : index
    %c160 = arith.constant 160 : index
    %1066 = vector.load %arg3[%c0_205, %c0_206, %c160] : memref<1x8x256xf32, #tpu.memory_space<vmem>>, vector<1x8x16xf32>
    %1067 = vector.shape_cast %1066 : vector<1x8x16xf32> to vector<8x16xf32>
    %cst_207 = arith.constant dense<0.000000e+00> : vector<8x384xf32>
    %1068 = tpu.matmul %1060, %3, %cst_207 {dimension_numbers = #tpu.dot_dimension_numbers<[1], [0], [0], [1], [0, 0, 1, 1], [], []>} : vector<8x32xf32>, vector<32x384xf32>, vector<8x384xf32> -> vector<8x384xf32>
    %1069 = vector.shape_cast %1065 : vector<8x1xf32> to vector<8x1xf32>
    %1070 = vector.broadcast %1069 : vector<8x1xf32> to vector<8x32xf32>
    %1071 = vector.extract_strided_slice %1068 {offsets = [0, 0], sizes = [8, 32], strides = [1, 1]} : vector<8x384xf32> to vector<8x32xf32>
    %1072 = arith.mulf %1070, %1071 : vector<8x32xf32>
    %1073 = arith.addf %1060, %1072 : vector<8x32xf32>
    %1074 = arith.mulf %1070, %1070 : vector<8x32xf32>
    %1075 = vector.extract_strided_slice %1068 {offsets = [0, 32], sizes = [8, 32], strides = [1, 1]} : vector<8x384xf32> to vector<8x32xf32>
    %1076 = arith.mulf %1074, %1075 : vector<8x32xf32>
    %1077 = arith.addf %1073, %1076 : vector<8x32xf32>
    %1078 = arith.mulf %1074, %1070 : vector<8x32xf32>
    %1079 = vector.extract_strided_slice %1068 {offsets = [0, 64], sizes = [8, 32], strides = [1, 1]} : vector<8x384xf32> to vector<8x32xf32>
    %1080 = arith.mulf %1078, %1079 : vector<8x32xf32>
    %1081 = arith.addf %1077, %1080 : vector<8x32xf32>
    %1082 = arith.mulf %1078, %1070 : vector<8x32xf32>
    %1083 = vector.extract_strided_slice %1068 {offsets = [0, 96], sizes = [8, 32], strides = [1, 1]} : vector<8x384xf32> to vector<8x32xf32>
    %1084 = arith.mulf %1082, %1083 : vector<8x32xf32>
    %1085 = arith.addf %1081, %1084 : vector<8x32xf32>
    %1086 = arith.mulf %1082, %1070 : vector<8x32xf32>
    %1087 = vector.extract_strided_slice %1068 {offsets = [0, 128], sizes = [8, 32], strides = [1, 1]} : vector<8x384xf32> to vector<8x32xf32>
    %1088 = arith.mulf %1086, %1087 : vector<8x32xf32>
    %1089 = arith.addf %1085, %1088 : vector<8x32xf32>
    %1090 = arith.mulf %1086, %1070 : vector<8x32xf32>
    %1091 = vector.extract_strided_slice %1068 {offsets = [0, 160], sizes = [8, 32], strides = [1, 1]} : vector<8x384xf32> to vector<8x32xf32>
    %1092 = arith.mulf %1090, %1091 : vector<8x32xf32>
    %1093 = arith.addf %1089, %1092 : vector<8x32xf32>
    %1094 = arith.mulf %1090, %1070 : vector<8x32xf32>
    %1095 = vector.extract_strided_slice %1068 {offsets = [0, 192], sizes = [8, 32], strides = [1, 1]} : vector<8x384xf32> to vector<8x32xf32>
    %1096 = arith.mulf %1094, %1095 : vector<8x32xf32>
    %1097 = arith.addf %1093, %1096 : vector<8x32xf32>
    %1098 = arith.mulf %1094, %1070 : vector<8x32xf32>
    %1099 = vector.extract_strided_slice %1068 {offsets = [0, 224], sizes = [8, 32], strides = [1, 1]} : vector<8x384xf32> to vector<8x32xf32>
    %1100 = arith.mulf %1098, %1099 : vector<8x32xf32>
    %1101 = arith.addf %1097, %1100 : vector<8x32xf32>
    %1102 = arith.mulf %1098, %1070 : vector<8x32xf32>
    %1103 = vector.extract_strided_slice %1068 {offsets = [0, 256], sizes = [8, 32], strides = [1, 1]} : vector<8x384xf32> to vector<8x32xf32>
    %1104 = arith.mulf %1102, %1103 : vector<8x32xf32>
    %1105 = arith.addf %1101, %1104 : vector<8x32xf32>
    %1106 = arith.mulf %1102, %1070 : vector<8x32xf32>
    %1107 = vector.extract_strided_slice %1068 {offsets = [0, 288], sizes = [8, 32], strides = [1, 1]} : vector<8x384xf32> to vector<8x32xf32>
    %1108 = arith.mulf %1106, %1107 : vector<8x32xf32>
    %1109 = arith.addf %1105, %1108 : vector<8x32xf32>
    %1110 = arith.mulf %1106, %1070 : vector<8x32xf32>
    %1111 = vector.extract_strided_slice %1068 {offsets = [0, 320], sizes = [8, 32], strides = [1, 1]} : vector<8x384xf32> to vector<8x32xf32>
    %1112 = arith.mulf %1110, %1111 : vector<8x32xf32>
    %1113 = arith.addf %1109, %1112 : vector<8x32xf32>
    %1114 = arith.mulf %1110, %1070 : vector<8x32xf32>
    %1115 = vector.extract_strided_slice %1068 {offsets = [0, 352], sizes = [8, 32], strides = [1, 1]} : vector<8x384xf32> to vector<8x32xf32>
    %1116 = arith.mulf %1114, %1115 : vector<8x32xf32>
    %1117 = arith.addf %1113, %1116 : vector<8x32xf32>
    %cst_208 = arith.constant dense<0.000000e+00> : vector<8x48xf32>
    %1118 = tpu.matmul %1117, %4, %cst_208 {dimension_numbers = #tpu.dot_dimension_numbers<[1], [0], [0], [1], [0, 0, 1, 1], [], []>} : vector<8x32xf32>, vector<32x48xf32>, vector<8x48xf32> -> vector<8x48xf32>
    %1119 = vector.extract_strided_slice %1118 {offsets = [0, 0], sizes = [8, 32], strides = [1, 1]} : vector<8x48xf32> to vector<8x32xf32>
    %cst_209 = arith.constant 0.000000e+00 : f32
    %1120 = vector.broadcast %cst_209 : f32 to vector<8x32xf32>
    %1121 = arith.maximumf %1119, %1120 : vector<8x32xf32>
    %1122 = vector.extract_strided_slice %1118 {offsets = [0, 32], sizes = [8, 16], strides = [1, 1]} : vector<8x48xf32> to vector<8x16xf32>
    %cst_210 = arith.constant dense<0.000000e+00> : vector<8x16xf32>
    %1123 = tpu.matmul %1121, %5, %cst_210 {dimension_numbers = #tpu.dot_dimension_numbers<[1], [0], [0], [1], [0, 0, 1, 1], [], []>} : vector<8x32xf32>, vector<32x16xf32>, vector<8x16xf32> -> vector<8x16xf32>
    %1124 = arith.addf %1122, %1123 : vector<8x16xf32>
    %1125 = vector.broadcast %6 : vector<1x16xf32> to vector<8x16xf32>
    %1126 = arith.addf %1124, %1125 : vector<8x16xf32>
    %1127 = arith.cmpf one, %1067, %1067 : vector<8x16xf32>
    %1128 = arith.select %1127, %1126, %1067 : vector<8x16xi1>, vector<8x16xf32>
    %1129 = tpu.concatenate %1128, %1126 in 1 : vector<8x16xf32>, vector<8x16xf32> -> vector<8x32xf32>
    %cst_211 = arith.constant dense<0.000000e+00> : vector<8x64xf32>
    %1130 = tpu.matmul %1129, %7, %cst_211 {dimension_numbers = #tpu.dot_dimension_numbers<[1], [0], [0], [1], [0, 0, 1, 1], [], []>} : vector<8x32xf32>, vector<32x64xf32>, vector<8x64xf32> -> vector<8x64xf32>
    %1131 = vector.broadcast %8 : vector<1x64xf32> to vector<8x64xf32>
    %1132 = arith.addf %1130, %1131 : vector<8x64xf32>
    %1133 = vector.extract_strided_slice %1132 {offsets = [0, 0], sizes = [8, 16], strides = [1, 1]} : vector<8x64xf32> to vector<8x16xf32>
    %1134 = arith.negf %1133 : vector<8x16xf32>
    %1135 = math.exp %1134 : vector<8x16xf32>
    %cst_212 = arith.constant 1.000000e+00 : f32
    %1136 = vector.broadcast %cst_212 : f32 to vector<8x16xf32>
    %1137 = arith.addf %1136, %1135 : vector<8x16xf32>
    %1138 = arith.divf %1136, %1137 : vector<8x16xf32>
    %1139 = vector.extract_strided_slice %1132 {offsets = [0, 16], sizes = [8, 16], strides = [1, 1]} : vector<8x64xf32> to vector<8x16xf32>
    %1140 = arith.negf %1139 : vector<8x16xf32>
    %1141 = math.exp %1140 : vector<8x16xf32>
    %cst_213 = arith.constant 1.000000e+00 : f32
    %1142 = vector.broadcast %cst_213 : f32 to vector<8x16xf32>
    %1143 = arith.addf %1142, %1141 : vector<8x16xf32>
    %1144 = arith.divf %1142, %1143 : vector<8x16xf32>
    %1145 = vector.extract_strided_slice %1132 {offsets = [0, 32], sizes = [8, 16], strides = [1, 1]} : vector<8x64xf32> to vector<8x16xf32>
    %1146 = vector.extract_strided_slice %1132 {offsets = [0, 48], sizes = [8, 16], strides = [1, 1]} : vector<8x64xf32> to vector<8x16xf32>
    %1147 = arith.mulf %1138, %1146 : vector<8x16xf32>
    %1148 = arith.addf %1145, %1147 : vector<8x16xf32>
    %1149 = math.tanh %1148 : vector<8x16xf32>
    %cst_214 = arith.constant 1.000000e+00 : f32
    %1150 = vector.broadcast %cst_214 : f32 to vector<8x16xf32>
    %1151 = arith.subf %1150, %1144 : vector<8x16xf32>
    %1152 = arith.mulf %1151, %1149 : vector<8x16xf32>
    %1153 = arith.mulf %1144, %1126 : vector<8x16xf32>
    %1154 = arith.addf %1152, %1153 : vector<8x16xf32>
    %cst_215 = arith.constant dense<0.000000e+00> : vector<8x64xf32>
    %1155 = tpu.matmul %1154, %9, %cst_215 {dimension_numbers = #tpu.dot_dimension_numbers<[1], [0], [0], [1], [0, 0, 1, 1], [], []>} : vector<8x16xf32>, vector<16x64xf32>, vector<8x64xf32> -> vector<8x64xf32>
    %1156 = vector.extract_strided_slice %1155 {offsets = [0, 0], sizes = [8, 32], strides = [1, 1]} : vector<8x64xf32> to vector<8x32xf32>
    %1157 = vector.broadcast %10 : vector<1x32xf32> to vector<8x32xf32>
    %1158 = arith.addf %1156, %1157 : vector<8x32xf32>
    %1159 = vector.extract_strided_slice %1155 {offsets = [0, 32], sizes = [8, 32], strides = [1, 1]} : vector<8x64xf32> to vector<8x32xf32>
    %1160 = vector.broadcast %11 : vector<1x32xf32> to vector<8x32xf32>
    %1161 = arith.addf %1159, %1160 : vector<8x32xf32>
    %cst_216 = arith.constant 0.000000e+00 : f32
    %1162 = vector.broadcast %cst_216 : f32 to vector<8x32xf32>
    %1163 = arith.maximumf %1161, %1162 : vector<8x32xf32>
    %cst_217 = arith.constant dense<0.000000e+00> : vector<8x32xf32>
    %1164 = tpu.matmul %1163, %12, %cst_217 {dimension_numbers = #tpu.dot_dimension_numbers<[1], [0], [0], [1], [0, 0, 1, 1], [], []>} : vector<8x32xf32>, vector<32x32xf32>, vector<8x32xf32> -> vector<8x32xf32>
    %1165 = arith.addf %1158, %1164 : vector<8x32xf32>
    %c0_218 = arith.constant 0 : index
    %c0_219 = arith.constant 0 : index
    %c160_220 = arith.constant 160 : index
    %1166 = vector.load %arg15[%c0_218, %c0_219, %c160_220] : memref<1x8x256xf32, #tpu.memory_space<vmem>>, vector<1x8x16xf32>
    %1167 = vector.shape_cast %1166 : vector<1x8x16xf32> to vector<8x16xf32>
    %1168 = vector.shape_cast %1126 : vector<8x16xf32> to vector<1x8x16xf32>
    tpu.vector_store %arg15[%c0_218, %c0_219, %c160_220], %1168 {strides = array<i32>} : memref<1x8x256xf32, #tpu.memory_space<vmem>>, vector<1x8x16xf32>,
    %c0_221 = arith.constant 0 : index
    %c0_222 = arith.constant 0 : index
    %c11 = arith.constant 11 : index
    %1169 = vector.load %arg2[%c0_221, %c0_222, %c11] : memref<1x8x16xf32, #tpu.memory_space<vmem>>, vector<1x8x1xf32>
    %1170 = vector.shape_cast %1169 : vector<1x8x1xf32> to vector<8x1xf32>
    %c0_223 = arith.constant 0 : index
    %c0_224 = arith.constant 0 : index
    %c176 = arith.constant 176 : index
    %1171 = vector.load %arg3[%c0_223, %c0_224, %c176] : memref<1x8x256xf32, #tpu.memory_space<vmem>>, vector<1x8x16xf32>
    %1172 = vector.shape_cast %1171 : vector<1x8x16xf32> to vector<8x16xf32>
    %cst_225 = arith.constant dense<0.000000e+00> : vector<8x384xf32>
    %1173 = tpu.matmul %1165, %3, %cst_225 {dimension_numbers = #tpu.dot_dimension_numbers<[1], [0], [0], [1], [0, 0, 1, 1], [], []>} : vector<8x32xf32>, vector<32x384xf32>, vector<8x384xf32> -> vector<8x384xf32>
    %1174 = vector.shape_cast %1170 : vector<8x1xf32> to vector<8x1xf32>
    %1175 = vector.broadcast %1174 : vector<8x1xf32> to vector<8x32xf32>
    %1176 = vector.extract_strided_slice %1173 {offsets = [0, 0], sizes = [8, 32], strides = [1, 1]} : vector<8x384xf32> to vector<8x32xf32>
    %1177 = arith.mulf %1175, %1176 : vector<8x32xf32>
    %1178 = arith.addf %1165, %1177 : vector<8x32xf32>
    %1179 = arith.mulf %1175, %1175 : vector<8x32xf32>
    %1180 = vector.extract_strided_slice %1173 {offsets = [0, 32], sizes = [8, 32], strides = [1, 1]} : vector<8x384xf32> to vector<8x32xf32>
    %1181 = arith.mulf %1179, %1180 : vector<8x32xf32>
    %1182 = arith.addf %1178, %1181 : vector<8x32xf32>
    %1183 = arith.mulf %1179, %1175 : vector<8x32xf32>
    %1184 = vector.extract_strided_slice %1173 {offsets = [0, 64], sizes = [8, 32], strides = [1, 1]} : vector<8x384xf32> to vector<8x32xf32>
    %1185 = arith.mulf %1183, %1184 : vector<8x32xf32>
    %1186 = arith.addf %1182, %1185 : vector<8x32xf32>
    %1187 = arith.mulf %1183, %1175 : vector<8x32xf32>
    %1188 = vector.extract_strided_slice %1173 {offsets = [0, 96], sizes = [8, 32], strides = [1, 1]} : vector<8x384xf32> to vector<8x32xf32>
    %1189 = arith.mulf %1187, %1188 : vector<8x32xf32>
    %1190 = arith.addf %1186, %1189 : vector<8x32xf32>
    %1191 = arith.mulf %1187, %1175 : vector<8x32xf32>
    %1192 = vector.extract_strided_slice %1173 {offsets = [0, 128], sizes = [8, 32], strides = [1, 1]} : vector<8x384xf32> to vector<8x32xf32>
    %1193 = arith.mulf %1191, %1192 : vector<8x32xf32>
    %1194 = arith.addf %1190, %1193 : vector<8x32xf32>
    %1195 = arith.mulf %1191, %1175 : vector<8x32xf32>
    %1196 = vector.extract_strided_slice %1173 {offsets = [0, 160], sizes = [8, 32], strides = [1, 1]} : vector<8x384xf32> to vector<8x32xf32>
    %1197 = arith.mulf %1195, %1196 : vector<8x32xf32>
    %1198 = arith.addf %1194, %1197 : vector<8x32xf32>
    %1199 = arith.mulf %1195, %1175 : vector<8x32xf32>
    %1200 = vector.extract_strided_slice %1173 {offsets = [0, 192], sizes = [8, 32], strides = [1, 1]} : vector<8x384xf32> to vector<8x32xf32>
    %1201 = arith.mulf %1199, %1200 : vector<8x32xf32>
    %1202 = arith.addf %1198, %1201 : vector<8x32xf32>
    %1203 = arith.mulf %1199, %1175 : vector<8x32xf32>
    %1204 = vector.extract_strided_slice %1173 {offsets = [0, 224], sizes = [8, 32], strides = [1, 1]} : vector<8x384xf32> to vector<8x32xf32>
    %1205 = arith.mulf %1203, %1204 : vector<8x32xf32>
    %1206 = arith.addf %1202, %1205 : vector<8x32xf32>
    %1207 = arith.mulf %1203, %1175 : vector<8x32xf32>
    %1208 = vector.extract_strided_slice %1173 {offsets = [0, 256], sizes = [8, 32], strides = [1, 1]} : vector<8x384xf32> to vector<8x32xf32>
    %1209 = arith.mulf %1207, %1208 : vector<8x32xf32>
    %1210 = arith.addf %1206, %1209 : vector<8x32xf32>
    %1211 = arith.mulf %1207, %1175 : vector<8x32xf32>
    %1212 = vector.extract_strided_slice %1173 {offsets = [0, 288], sizes = [8, 32], strides = [1, 1]} : vector<8x384xf32> to vector<8x32xf32>
    %1213 = arith.mulf %1211, %1212 : vector<8x32xf32>
    %1214 = arith.addf %1210, %1213 : vector<8x32xf32>
    %1215 = arith.mulf %1211, %1175 : vector<8x32xf32>
    %1216 = vector.extract_strided_slice %1173 {offsets = [0, 320], sizes = [8, 32], strides = [1, 1]} : vector<8x384xf32> to vector<8x32xf32>
    %1217 = arith.mulf %1215, %1216 : vector<8x32xf32>
    %1218 = arith.addf %1214, %1217 : vector<8x32xf32>
    %1219 = arith.mulf %1215, %1175 : vector<8x32xf32>
    %1220 = vector.extract_strided_slice %1173 {offsets = [0, 352], sizes = [8, 32], strides = [1, 1]} : vector<8x384xf32> to vector<8x32xf32>
    %1221 = arith.mulf %1219, %1220 : vector<8x32xf32>
    %1222 = arith.addf %1218, %1221 : vector<8x32xf32>
    %cst_226 = arith.constant dense<0.000000e+00> : vector<8x48xf32>
    %1223 = tpu.matmul %1222, %4, %cst_226 {dimension_numbers = #tpu.dot_dimension_numbers<[1], [0], [0], [1], [0, 0, 1, 1], [], []>} : vector<8x32xf32>, vector<32x48xf32>, vector<8x48xf32> -> vector<8x48xf32>
    %1224 = vector.extract_strided_slice %1223 {offsets = [0, 0], sizes = [8, 32], strides = [1, 1]} : vector<8x48xf32> to vector<8x32xf32>
    %cst_227 = arith.constant 0.000000e+00 : f32
    %1225 = vector.broadcast %cst_227 : f32 to vector<8x32xf32>
    %1226 = arith.maximumf %1224, %1225 : vector<8x32xf32>
    %1227 = vector.extract_strided_slice %1223 {offsets = [0, 32], sizes = [8, 16], strides = [1, 1]} : vector<8x48xf32> to vector<8x16xf32>
    %cst_228 = arith.constant dense<0.000000e+00> : vector<8x16xf32>
    %1228 = tpu.matmul %1226, %5, %cst_228 {dimension_numbers = #tpu.dot_dimension_numbers<[1], [0], [0], [1], [0, 0, 1, 1], [], []>} : vector<8x32xf32>, vector<32x16xf32>, vector<8x16xf32> -> vector<8x16xf32>
    %1229 = arith.addf %1227, %1228 : vector<8x16xf32>
    %1230 = vector.broadcast %6 : vector<1x16xf32> to vector<8x16xf32>
    %1231 = arith.addf %1229, %1230 : vector<8x16xf32>
    %1232 = arith.cmpf one, %1172, %1172 : vector<8x16xf32>
    %1233 = arith.select %1232, %1231, %1172 : vector<8x16xi1>, vector<8x16xf32>
    %1234 = tpu.concatenate %1233, %1231 in 1 : vector<8x16xf32>, vector<8x16xf32> -> vector<8x32xf32>
    %cst_229 = arith.constant dense<0.000000e+00> : vector<8x64xf32>
    %1235 = tpu.matmul %1234, %7, %cst_229 {dimension_numbers = #tpu.dot_dimension_numbers<[1], [0], [0], [1], [0, 0, 1, 1], [], []>} : vector<8x32xf32>, vector<32x64xf32>, vector<8x64xf32> -> vector<8x64xf32>
    %1236 = vector.broadcast %8 : vector<1x64xf32> to vector<8x64xf32>
    %1237 = arith.addf %1235, %1236 : vector<8x64xf32>
    %1238 = vector.extract_strided_slice %1237 {offsets = [0, 0], sizes = [8, 16], strides = [1, 1]} : vector<8x64xf32> to vector<8x16xf32>
    %1239 = arith.negf %1238 : vector<8x16xf32>
    %1240 = math.exp %1239 : vector<8x16xf32>
    %cst_230 = arith.constant 1.000000e+00 : f32
    %1241 = vector.broadcast %cst_230 : f32 to vector<8x16xf32>
    %1242 = arith.addf %1241, %1240 : vector<8x16xf32>
    %1243 = arith.divf %1241, %1242 : vector<8x16xf32>
    %1244 = vector.extract_strided_slice %1237 {offsets = [0, 16], sizes = [8, 16], strides = [1, 1]} : vector<8x64xf32> to vector<8x16xf32>
    %1245 = arith.negf %1244 : vector<8x16xf32>
    %1246 = math.exp %1245 : vector<8x16xf32>
    %cst_231 = arith.constant 1.000000e+00 : f32
    %1247 = vector.broadcast %cst_231 : f32 to vector<8x16xf32>
    %1248 = arith.addf %1247, %1246 : vector<8x16xf32>
    %1249 = arith.divf %1247, %1248 : vector<8x16xf32>
    %1250 = vector.extract_strided_slice %1237 {offsets = [0, 32], sizes = [8, 16], strides = [1, 1]} : vector<8x64xf32> to vector<8x16xf32>
    %1251 = vector.extract_strided_slice %1237 {offsets = [0, 48], sizes = [8, 16], strides = [1, 1]} : vector<8x64xf32> to vector<8x16xf32>
    %1252 = arith.mulf %1243, %1251 : vector<8x16xf32>
    %1253 = arith.addf %1250, %1252 : vector<8x16xf32>
    %1254 = math.tanh %1253 : vector<8x16xf32>
    %cst_232 = arith.constant 1.000000e+00 : f32
    %1255 = vector.broadcast %cst_232 : f32 to vector<8x16xf32>
    %1256 = arith.subf %1255, %1249 : vector<8x16xf32>
    %1257 = arith.mulf %1256, %1254 : vector<8x16xf32>
    %1258 = arith.mulf %1249, %1231 : vector<8x16xf32>
    %1259 = arith.addf %1257, %1258 : vector<8x16xf32>
    %cst_233 = arith.constant dense<0.000000e+00> : vector<8x64xf32>
    %1260 = tpu.matmul %1259, %9, %cst_233 {dimension_numbers = #tpu.dot_dimension_numbers<[1], [0], [0], [1], [0, 0, 1, 1], [], []>} : vector<8x16xf32>, vector<16x64xf32>, vector<8x64xf32> -> vector<8x64xf32>
    %1261 = vector.extract_strided_slice %1260 {offsets = [0, 0], sizes = [8, 32], strides = [1, 1]} : vector<8x64xf32> to vector<8x32xf32>
    %1262 = vector.broadcast %10 : vector<1x32xf32> to vector<8x32xf32>
    %1263 = arith.addf %1261, %1262 : vector<8x32xf32>
    %1264 = vector.extract_strided_slice %1260 {offsets = [0, 32], sizes = [8, 32], strides = [1, 1]} : vector<8x64xf32> to vector<8x32xf32>
    %1265 = vector.broadcast %11 : vector<1x32xf32> to vector<8x32xf32>
    %1266 = arith.addf %1264, %1265 : vector<8x32xf32>
    %cst_234 = arith.constant 0.000000e+00 : f32
    %1267 = vector.broadcast %cst_234 : f32 to vector<8x32xf32>
    %1268 = arith.maximumf %1266, %1267 : vector<8x32xf32>
    %cst_235 = arith.constant dense<0.000000e+00> : vector<8x32xf32>
    %1269 = tpu.matmul %1268, %12, %cst_235 {dimension_numbers = #tpu.dot_dimension_numbers<[1], [0], [0], [1], [0, 0, 1, 1], [], []>} : vector<8x32xf32>, vector<32x32xf32>, vector<8x32xf32> -> vector<8x32xf32>
    %1270 = arith.addf %1263, %1269 : vector<8x32xf32>
    %c0_236 = arith.constant 0 : index
    %c0_237 = arith.constant 0 : index
    %c176_238 = arith.constant 176 : index
    %1271 = vector.load %arg15[%c0_236, %c0_237, %c176_238] : memref<1x8x256xf32, #tpu.memory_space<vmem>>, vector<1x8x16xf32>
    %1272 = vector.shape_cast %1271 : vector<1x8x16xf32> to vector<8x16xf32>
    %1273 = vector.shape_cast %1231 : vector<8x16xf32> to vector<1x8x16xf32>
    tpu.vector_store %arg15[%c0_236, %c0_237, %c176_238], %1273 {strides = array<i32>} : memref<1x8x256xf32, #tpu.memory_space<vmem>>, vector<1x8x16xf32>,
    %c0_239 = arith.constant 0 : index
    %c0_240 = arith.constant 0 : index
    %c12 = arith.constant 12 : index
    %1274 = vector.load %arg2[%c0_239, %c0_240, %c12] : memref<1x8x16xf32, #tpu.memory_space<vmem>>, vector<1x8x1xf32>
    %1275 = vector.shape_cast %1274 : vector<1x8x1xf32> to vector<8x1xf32>
    %c0_241 = arith.constant 0 : index
    %c0_242 = arith.constant 0 : index
    %c192 = arith.constant 192 : index
    %1276 = vector.load %arg3[%c0_241, %c0_242, %c192] : memref<1x8x256xf32, #tpu.memory_space<vmem>>, vector<1x8x16xf32>
    %1277 = vector.shape_cast %1276 : vector<1x8x16xf32> to vector<8x16xf32>
    %cst_243 = arith.constant dense<0.000000e+00> : vector<8x384xf32>
    %1278 = tpu.matmul %1270, %3, %cst_243 {dimension_numbers = #tpu.dot_dimension_numbers<[1], [0], [0], [1], [0, 0, 1, 1], [], []>} : vector<8x32xf32>, vector<32x384xf32>, vector<8x384xf32> -> vector<8x384xf32>
    %1279 = vector.shape_cast %1275 : vector<8x1xf32> to vector<8x1xf32>
    %1280 = vector.broadcast %1279 : vector<8x1xf32> to vector<8x32xf32>
    %1281 = vector.extract_strided_slice %1278 {offsets = [0, 0], sizes = [8, 32], strides = [1, 1]} : vector<8x384xf32> to vector<8x32xf32>
    %1282 = arith.mulf %1280, %1281 : vector<8x32xf32>
    %1283 = arith.addf %1270, %1282 : vector<8x32xf32>
    %1284 = arith.mulf %1280, %1280 : vector<8x32xf32>
    %1285 = vector.extract_strided_slice %1278 {offsets = [0, 32], sizes = [8, 32], strides = [1, 1]} : vector<8x384xf32> to vector<8x32xf32>
    %1286 = arith.mulf %1284, %1285 : vector<8x32xf32>
    %1287 = arith.addf %1283, %1286 : vector<8x32xf32>
    %1288 = arith.mulf %1284, %1280 : vector<8x32xf32>
    %1289 = vector.extract_strided_slice %1278 {offsets = [0, 64], sizes = [8, 32], strides = [1, 1]} : vector<8x384xf32> to vector<8x32xf32>
    %1290 = arith.mulf %1288, %1289 : vector<8x32xf32>
    %1291 = arith.addf %1287, %1290 : vector<8x32xf32>
    %1292 = arith.mulf %1288, %1280 : vector<8x32xf32>
    %1293 = vector.extract_strided_slice %1278 {offsets = [0, 96], sizes = [8, 32], strides = [1, 1]} : vector<8x384xf32> to vector<8x32xf32>
    %1294 = arith.mulf %1292, %1293 : vector<8x32xf32>
    %1295 = arith.addf %1291, %1294 : vector<8x32xf32>
    %1296 = arith.mulf %1292, %1280 : vector<8x32xf32>
    %1297 = vector.extract_strided_slice %1278 {offsets = [0, 128], sizes = [8, 32], strides = [1, 1]} : vector<8x384xf32> to vector<8x32xf32>
    %1298 = arith.mulf %1296, %1297 : vector<8x32xf32>
    %1299 = arith.addf %1295, %1298 : vector<8x32xf32>
    %1300 = arith.mulf %1296, %1280 : vector<8x32xf32>
    %1301 = vector.extract_strided_slice %1278 {offsets = [0, 160], sizes = [8, 32], strides = [1, 1]} : vector<8x384xf32> to vector<8x32xf32>
    %1302 = arith.mulf %1300, %1301 : vector<8x32xf32>
    %1303 = arith.addf %1299, %1302 : vector<8x32xf32>
    %1304 = arith.mulf %1300, %1280 : vector<8x32xf32>
    %1305 = vector.extract_strided_slice %1278 {offsets = [0, 192], sizes = [8, 32], strides = [1, 1]} : vector<8x384xf32> to vector<8x32xf32>
    %1306 = arith.mulf %1304, %1305 : vector<8x32xf32>
    %1307 = arith.addf %1303, %1306 : vector<8x32xf32>
    %1308 = arith.mulf %1304, %1280 : vector<8x32xf32>
    %1309 = vector.extract_strided_slice %1278 {offsets = [0, 224], sizes = [8, 32], strides = [1, 1]} : vector<8x384xf32> to vector<8x32xf32>
    %1310 = arith.mulf %1308, %1309 : vector<8x32xf32>
    %1311 = arith.addf %1307, %1310 : vector<8x32xf32>
    %1312 = arith.mulf %1308, %1280 : vector<8x32xf32>
    %1313 = vector.extract_strided_slice %1278 {offsets = [0, 256], sizes = [8, 32], strides = [1, 1]} : vector<8x384xf32> to vector<8x32xf32>
    %1314 = arith.mulf %1312, %1313 : vector<8x32xf32>
    %1315 = arith.addf %1311, %1314 : vector<8x32xf32>
    %1316 = arith.mulf %1312, %1280 : vector<8x32xf32>
    %1317 = vector.extract_strided_slice %1278 {offsets = [0, 288], sizes = [8, 32], strides = [1, 1]} : vector<8x384xf32> to vector<8x32xf32>
    %1318 = arith.mulf %1316, %1317 : vector<8x32xf32>
    %1319 = arith.addf %1315, %1318 : vector<8x32xf32>
    %1320 = arith.mulf %1316, %1280 : vector<8x32xf32>
    %1321 = vector.extract_strided_slice %1278 {offsets = [0, 320], sizes = [8, 32], strides = [1, 1]} : vector<8x384xf32> to vector<8x32xf32>
    %1322 = arith.mulf %1320, %1321 : vector<8x32xf32>
    %1323 = arith.addf %1319, %1322 : vector<8x32xf32>
    %1324 = arith.mulf %1320, %1280 : vector<8x32xf32>
    %1325 = vector.extract_strided_slice %1278 {offsets = [0, 352], sizes = [8, 32], strides = [1, 1]} : vector<8x384xf32> to vector<8x32xf32>
    %1326 = arith.mulf %1324, %1325 : vector<8x32xf32>
    %1327 = arith.addf %1323, %1326 : vector<8x32xf32>
    %cst_244 = arith.constant dense<0.000000e+00> : vector<8x48xf32>
    %1328 = tpu.matmul %1327, %4, %cst_244 {dimension_numbers = #tpu.dot_dimension_numbers<[1], [0], [0], [1], [0, 0, 1, 1], [], []>} : vector<8x32xf32>, vector<32x48xf32>, vector<8x48xf32> -> vector<8x48xf32>
    %1329 = vector.extract_strided_slice %1328 {offsets = [0, 0], sizes = [8, 32], strides = [1, 1]} : vector<8x48xf32> to vector<8x32xf32>
    %cst_245 = arith.constant 0.000000e+00 : f32
    %1330 = vector.broadcast %cst_245 : f32 to vector<8x32xf32>
    %1331 = arith.maximumf %1329, %1330 : vector<8x32xf32>
    %1332 = vector.extract_strided_slice %1328 {offsets = [0, 32], sizes = [8, 16], strides = [1, 1]} : vector<8x48xf32> to vector<8x16xf32>
    %cst_246 = arith.constant dense<0.000000e+00> : vector<8x16xf32>
    %1333 = tpu.matmul %1331, %5, %cst_246 {dimension_numbers = #tpu.dot_dimension_numbers<[1], [0], [0], [1], [0, 0, 1, 1], [], []>} : vector<8x32xf32>, vector<32x16xf32>, vector<8x16xf32> -> vector<8x16xf32>
    %1334 = arith.addf %1332, %1333 : vector<8x16xf32>
    %1335 = vector.broadcast %6 : vector<1x16xf32> to vector<8x16xf32>
    %1336 = arith.addf %1334, %1335 : vector<8x16xf32>
    %1337 = arith.cmpf one, %1277, %1277 : vector<8x16xf32>
    %1338 = arith.select %1337, %1336, %1277 : vector<8x16xi1>, vector<8x16xf32>
    %1339 = tpu.concatenate %1338, %1336 in 1 : vector<8x16xf32>, vector<8x16xf32> -> vector<8x32xf32>
    %cst_247 = arith.constant dense<0.000000e+00> : vector<8x64xf32>
    %1340 = tpu.matmul %1339, %7, %cst_247 {dimension_numbers = #tpu.dot_dimension_numbers<[1], [0], [0], [1], [0, 0, 1, 1], [], []>} : vector<8x32xf32>, vector<32x64xf32>, vector<8x64xf32> -> vector<8x64xf32>
    %1341 = vector.broadcast %8 : vector<1x64xf32> to vector<8x64xf32>
    %1342 = arith.addf %1340, %1341 : vector<8x64xf32>
    %1343 = vector.extract_strided_slice %1342 {offsets = [0, 0], sizes = [8, 16], strides = [1, 1]} : vector<8x64xf32> to vector<8x16xf32>
    %1344 = arith.negf %1343 : vector<8x16xf32>
    %1345 = math.exp %1344 : vector<8x16xf32>
    %cst_248 = arith.constant 1.000000e+00 : f32
    %1346 = vector.broadcast %cst_248 : f32 to vector<8x16xf32>
    %1347 = arith.addf %1346, %1345 : vector<8x16xf32>
    %1348 = arith.divf %1346, %1347 : vector<8x16xf32>
    %1349 = vector.extract_strided_slice %1342 {offsets = [0, 16], sizes = [8, 16], strides = [1, 1]} : vector<8x64xf32> to vector<8x16xf32>
    %1350 = arith.negf %1349 : vector<8x16xf32>
    %1351 = math.exp %1350 : vector<8x16xf32>
    %cst_249 = arith.constant 1.000000e+00 : f32
    %1352 = vector.broadcast %cst_249 : f32 to vector<8x16xf32>
    %1353 = arith.addf %1352, %1351 : vector<8x16xf32>
    %1354 = arith.divf %1352, %1353 : vector<8x16xf32>
    %1355 = vector.extract_strided_slice %1342 {offsets = [0, 32], sizes = [8, 16], strides = [1, 1]} : vector<8x64xf32> to vector<8x16xf32>
    %1356 = vector.extract_strided_slice %1342 {offsets = [0, 48], sizes = [8, 16], strides = [1, 1]} : vector<8x64xf32> to vector<8x16xf32>
    %1357 = arith.mulf %1348, %1356 : vector<8x16xf32>
    %1358 = arith.addf %1355, %1357 : vector<8x16xf32>
    %1359 = math.tanh %1358 : vector<8x16xf32>
    %cst_250 = arith.constant 1.000000e+00 : f32
    %1360 = vector.broadcast %cst_250 : f32 to vector<8x16xf32>
    %1361 = arith.subf %1360, %1354 : vector<8x16xf32>
    %1362 = arith.mulf %1361, %1359 : vector<8x16xf32>
    %1363 = arith.mulf %1354, %1336 : vector<8x16xf32>
    %1364 = arith.addf %1362, %1363 : vector<8x16xf32>
    %cst_251 = arith.constant dense<0.000000e+00> : vector<8x64xf32>
    %1365 = tpu.matmul %1364, %9, %cst_251 {dimension_numbers = #tpu.dot_dimension_numbers<[1], [0], [0], [1], [0, 0, 1, 1], [], []>} : vector<8x16xf32>, vector<16x64xf32>, vector<8x64xf32> -> vector<8x64xf32>
    %1366 = vector.extract_strided_slice %1365 {offsets = [0, 0], sizes = [8, 32], strides = [1, 1]} : vector<8x64xf32> to vector<8x32xf32>
    %1367 = vector.broadcast %10 : vector<1x32xf32> to vector<8x32xf32>
    %1368 = arith.addf %1366, %1367 : vector<8x32xf32>
    %1369 = vector.extract_strided_slice %1365 {offsets = [0, 32], sizes = [8, 32], strides = [1, 1]} : vector<8x64xf32> to vector<8x32xf32>
    %1370 = vector.broadcast %11 : vector<1x32xf32> to vector<8x32xf32>
    %1371 = arith.addf %1369, %1370 : vector<8x32xf32>
    %cst_252 = arith.constant 0.000000e+00 : f32
    %1372 = vector.broadcast %cst_252 : f32 to vector<8x32xf32>
    %1373 = arith.maximumf %1371, %1372 : vector<8x32xf32>
    %cst_253 = arith.constant dense<0.000000e+00> : vector<8x32xf32>
    %1374 = tpu.matmul %1373, %12, %cst_253 {dimension_numbers = #tpu.dot_dimension_numbers<[1], [0], [0], [1], [0, 0, 1, 1], [], []>} : vector<8x32xf32>, vector<32x32xf32>, vector<8x32xf32> -> vector<8x32xf32>
    %1375 = arith.addf %1368, %1374 : vector<8x32xf32>
    %c0_254 = arith.constant 0 : index
    %c0_255 = arith.constant 0 : index
    %c192_256 = arith.constant 192 : index
    %1376 = vector.load %arg15[%c0_254, %c0_255, %c192_256] : memref<1x8x256xf32, #tpu.memory_space<vmem>>, vector<1x8x16xf32>
    %1377 = vector.shape_cast %1376 : vector<1x8x16xf32> to vector<8x16xf32>
    %1378 = vector.shape_cast %1336 : vector<8x16xf32> to vector<1x8x16xf32>
    tpu.vector_store %arg15[%c0_254, %c0_255, %c192_256], %1378 {strides = array<i32>} : memref<1x8x256xf32, #tpu.memory_space<vmem>>, vector<1x8x16xf32>,
    %c0_257 = arith.constant 0 : index
    %c0_258 = arith.constant 0 : index
    %c13 = arith.constant 13 : index
    %1379 = vector.load %arg2[%c0_257, %c0_258, %c13] : memref<1x8x16xf32, #tpu.memory_space<vmem>>, vector<1x8x1xf32>
    %1380 = vector.shape_cast %1379 : vector<1x8x1xf32> to vector<8x1xf32>
    %c0_259 = arith.constant 0 : index
    %c0_260 = arith.constant 0 : index
    %c208 = arith.constant 208 : index
    %1381 = vector.load %arg3[%c0_259, %c0_260, %c208] : memref<1x8x256xf32, #tpu.memory_space<vmem>>, vector<1x8x16xf32>
    %1382 = vector.shape_cast %1381 : vector<1x8x16xf32> to vector<8x16xf32>
    %cst_261 = arith.constant dense<0.000000e+00> : vector<8x384xf32>
    %1383 = tpu.matmul %1375, %3, %cst_261 {dimension_numbers = #tpu.dot_dimension_numbers<[1], [0], [0], [1], [0, 0, 1, 1], [], []>} : vector<8x32xf32>, vector<32x384xf32>, vector<8x384xf32> -> vector<8x384xf32>
    %1384 = vector.shape_cast %1380 : vector<8x1xf32> to vector<8x1xf32>
    %1385 = vector.broadcast %1384 : vector<8x1xf32> to vector<8x32xf32>
    %1386 = vector.extract_strided_slice %1383 {offsets = [0, 0], sizes = [8, 32], strides = [1, 1]} : vector<8x384xf32> to vector<8x32xf32>
    %1387 = arith.mulf %1385, %1386 : vector<8x32xf32>
    %1388 = arith.addf %1375, %1387 : vector<8x32xf32>
    %1389 = arith.mulf %1385, %1385 : vector<8x32xf32>
    %1390 = vector.extract_strided_slice %1383 {offsets = [0, 32], sizes = [8, 32], strides = [1, 1]} : vector<8x384xf32> to vector<8x32xf32>
    %1391 = arith.mulf %1389, %1390 : vector<8x32xf32>
    %1392 = arith.addf %1388, %1391 : vector<8x32xf32>
    %1393 = arith.mulf %1389, %1385 : vector<8x32xf32>
    %1394 = vector.extract_strided_slice %1383 {offsets = [0, 64], sizes = [8, 32], strides = [1, 1]} : vector<8x384xf32> to vector<8x32xf32>
    %1395 = arith.mulf %1393, %1394 : vector<8x32xf32>
    %1396 = arith.addf %1392, %1395 : vector<8x32xf32>
    %1397 = arith.mulf %1393, %1385 : vector<8x32xf32>
    %1398 = vector.extract_strided_slice %1383 {offsets = [0, 96], sizes = [8, 32], strides = [1, 1]} : vector<8x384xf32> to vector<8x32xf32>
    %1399 = arith.mulf %1397, %1398 : vector<8x32xf32>
    %1400 = arith.addf %1396, %1399 : vector<8x32xf32>
    %1401 = arith.mulf %1397, %1385 : vector<8x32xf32>
    %1402 = vector.extract_strided_slice %1383 {offsets = [0, 128], sizes = [8, 32], strides = [1, 1]} : vector<8x384xf32> to vector<8x32xf32>
    %1403 = arith.mulf %1401, %1402 : vector<8x32xf32>
    %1404 = arith.addf %1400, %1403 : vector<8x32xf32>
    %1405 = arith.mulf %1401, %1385 : vector<8x32xf32>
    %1406 = vector.extract_strided_slice %1383 {offsets = [0, 160], sizes = [8, 32], strides = [1, 1]} : vector<8x384xf32> to vector<8x32xf32>
    %1407 = arith.mulf %1405, %1406 : vector<8x32xf32>
    %1408 = arith.addf %1404, %1407 : vector<8x32xf32>
    %1409 = arith.mulf %1405, %1385 : vector<8x32xf32>
    %1410 = vector.extract_strided_slice %1383 {offsets = [0, 192], sizes = [8, 32], strides = [1, 1]} : vector<8x384xf32> to vector<8x32xf32>
    %1411 = arith.mulf %1409, %1410 : vector<8x32xf32>
    %1412 = arith.addf %1408, %1411 : vector<8x32xf32>
    %1413 = arith.mulf %1409, %1385 : vector<8x32xf32>
    %1414 = vector.extract_strided_slice %1383 {offsets = [0, 224], sizes = [8, 32], strides = [1, 1]} : vector<8x384xf32> to vector<8x32xf32>
    %1415 = arith.mulf %1413, %1414 : vector<8x32xf32>
    %1416 = arith.addf %1412, %1415 : vector<8x32xf32>
    %1417 = arith.mulf %1413, %1385 : vector<8x32xf32>
    %1418 = vector.extract_strided_slice %1383 {offsets = [0, 256], sizes = [8, 32], strides = [1, 1]} : vector<8x384xf32> to vector<8x32xf32>
    %1419 = arith.mulf %1417, %1418 : vector<8x32xf32>
    %1420 = arith.addf %1416, %1419 : vector<8x32xf32>
    %1421 = arith.mulf %1417, %1385 : vector<8x32xf32>
    %1422 = vector.extract_strided_slice %1383 {offsets = [0, 288], sizes = [8, 32], strides = [1, 1]} : vector<8x384xf32> to vector<8x32xf32>
    %1423 = arith.mulf %1421, %1422 : vector<8x32xf32>
    %1424 = arith.addf %1420, %1423 : vector<8x32xf32>
    %1425 = arith.mulf %1421, %1385 : vector<8x32xf32>
    %1426 = vector.extract_strided_slice %1383 {offsets = [0, 320], sizes = [8, 32], strides = [1, 1]} : vector<8x384xf32> to vector<8x32xf32>
    %1427 = arith.mulf %1425, %1426 : vector<8x32xf32>
    %1428 = arith.addf %1424, %1427 : vector<8x32xf32>
    %1429 = arith.mulf %1425, %1385 : vector<8x32xf32>
    %1430 = vector.extract_strided_slice %1383 {offsets = [0, 352], sizes = [8, 32], strides = [1, 1]} : vector<8x384xf32> to vector<8x32xf32>
    %1431 = arith.mulf %1429, %1430 : vector<8x32xf32>
    %1432 = arith.addf %1428, %1431 : vector<8x32xf32>
    %cst_262 = arith.constant dense<0.000000e+00> : vector<8x48xf32>
    %1433 = tpu.matmul %1432, %4, %cst_262 {dimension_numbers = #tpu.dot_dimension_numbers<[1], [0], [0], [1], [0, 0, 1, 1], [], []>} : vector<8x32xf32>, vector<32x48xf32>, vector<8x48xf32> -> vector<8x48xf32>
    %1434 = vector.extract_strided_slice %1433 {offsets = [0, 0], sizes = [8, 32], strides = [1, 1]} : vector<8x48xf32> to vector<8x32xf32>
    %cst_263 = arith.constant 0.000000e+00 : f32
    %1435 = vector.broadcast %cst_263 : f32 to vector<8x32xf32>
    %1436 = arith.maximumf %1434, %1435 : vector<8x32xf32>
    %1437 = vector.extract_strided_slice %1433 {offsets = [0, 32], sizes = [8, 16], strides = [1, 1]} : vector<8x48xf32> to vector<8x16xf32>
    %cst_264 = arith.constant dense<0.000000e+00> : vector<8x16xf32>
    %1438 = tpu.matmul %1436, %5, %cst_264 {dimension_numbers = #tpu.dot_dimension_numbers<[1], [0], [0], [1], [0, 0, 1, 1], [], []>} : vector<8x32xf32>, vector<32x16xf32>, vector<8x16xf32> -> vector<8x16xf32>
    %1439 = arith.addf %1437, %1438 : vector<8x16xf32>
    %1440 = vector.broadcast %6 : vector<1x16xf32> to vector<8x16xf32>
    %1441 = arith.addf %1439, %1440 : vector<8x16xf32>
    %1442 = arith.cmpf one, %1382, %1382 : vector<8x16xf32>
    %1443 = arith.select %1442, %1441, %1382 : vector<8x16xi1>, vector<8x16xf32>
    %1444 = tpu.concatenate %1443, %1441 in 1 : vector<8x16xf32>, vector<8x16xf32> -> vector<8x32xf32>
    %cst_265 = arith.constant dense<0.000000e+00> : vector<8x64xf32>
    %1445 = tpu.matmul %1444, %7, %cst_265 {dimension_numbers = #tpu.dot_dimension_numbers<[1], [0], [0], [1], [0, 0, 1, 1], [], []>} : vector<8x32xf32>, vector<32x64xf32>, vector<8x64xf32> -> vector<8x64xf32>
    %1446 = vector.broadcast %8 : vector<1x64xf32> to vector<8x64xf32>
    %1447 = arith.addf %1445, %1446 : vector<8x64xf32>
    %1448 = vector.extract_strided_slice %1447 {offsets = [0, 0], sizes = [8, 16], strides = [1, 1]} : vector<8x64xf32> to vector<8x16xf32>
    %1449 = arith.negf %1448 : vector<8x16xf32>
    %1450 = math.exp %1449 : vector<8x16xf32>
    %cst_266 = arith.constant 1.000000e+00 : f32
    %1451 = vector.broadcast %cst_266 : f32 to vector<8x16xf32>
    %1452 = arith.addf %1451, %1450 : vector<8x16xf32>
    %1453 = arith.divf %1451, %1452 : vector<8x16xf32>
    %1454 = vector.extract_strided_slice %1447 {offsets = [0, 16], sizes = [8, 16], strides = [1, 1]} : vector<8x64xf32> to vector<8x16xf32>
    %1455 = arith.negf %1454 : vector<8x16xf32>
    %1456 = math.exp %1455 : vector<8x16xf32>
    %cst_267 = arith.constant 1.000000e+00 : f32
    %1457 = vector.broadcast %cst_267 : f32 to vector<8x16xf32>
    %1458 = arith.addf %1457, %1456 : vector<8x16xf32>
    %1459 = arith.divf %1457, %1458 : vector<8x16xf32>
    %1460 = vector.extract_strided_slice %1447 {offsets = [0, 32], sizes = [8, 16], strides = [1, 1]} : vector<8x64xf32> to vector<8x16xf32>
    %1461 = vector.extract_strided_slice %1447 {offsets = [0, 48], sizes = [8, 16], strides = [1, 1]} : vector<8x64xf32> to vector<8x16xf32>
    %1462 = arith.mulf %1453, %1461 : vector<8x16xf32>
    %1463 = arith.addf %1460, %1462 : vector<8x16xf32>
    %1464 = math.tanh %1463 : vector<8x16xf32>
    %cst_268 = arith.constant 1.000000e+00 : f32
    %1465 = vector.broadcast %cst_268 : f32 to vector<8x16xf32>
    %1466 = arith.subf %1465, %1459 : vector<8x16xf32>
    %1467 = arith.mulf %1466, %1464 : vector<8x16xf32>
    %1468 = arith.mulf %1459, %1441 : vector<8x16xf32>
    %1469 = arith.addf %1467, %1468 : vector<8x16xf32>
    %cst_269 = arith.constant dense<0.000000e+00> : vector<8x64xf32>
    %1470 = tpu.matmul %1469, %9, %cst_269 {dimension_numbers = #tpu.dot_dimension_numbers<[1], [0], [0], [1], [0, 0, 1, 1], [], []>} : vector<8x16xf32>, vector<16x64xf32>, vector<8x64xf32> -> vector<8x64xf32>
    %1471 = vector.extract_strided_slice %1470 {offsets = [0, 0], sizes = [8, 32], strides = [1, 1]} : vector<8x64xf32> to vector<8x32xf32>
    %1472 = vector.broadcast %10 : vector<1x32xf32> to vector<8x32xf32>
    %1473 = arith.addf %1471, %1472 : vector<8x32xf32>
    %1474 = vector.extract_strided_slice %1470 {offsets = [0, 32], sizes = [8, 32], strides = [1, 1]} : vector<8x64xf32> to vector<8x32xf32>
    %1475 = vector.broadcast %11 : vector<1x32xf32> to vector<8x32xf32>
    %1476 = arith.addf %1474, %1475 : vector<8x32xf32>
    %cst_270 = arith.constant 0.000000e+00 : f32
    %1477 = vector.broadcast %cst_270 : f32 to vector<8x32xf32>
    %1478 = arith.maximumf %1476, %1477 : vector<8x32xf32>
    %cst_271 = arith.constant dense<0.000000e+00> : vector<8x32xf32>
    %1479 = tpu.matmul %1478, %12, %cst_271 {dimension_numbers = #tpu.dot_dimension_numbers<[1], [0], [0], [1], [0, 0, 1, 1], [], []>} : vector<8x32xf32>, vector<32x32xf32>, vector<8x32xf32> -> vector<8x32xf32>
    %1480 = arith.addf %1473, %1479 : vector<8x32xf32>
    %c0_272 = arith.constant 0 : index
    %c0_273 = arith.constant 0 : index
    %c208_274 = arith.constant 208 : index
    %1481 = vector.load %arg15[%c0_272, %c0_273, %c208_274] : memref<1x8x256xf32, #tpu.memory_space<vmem>>, vector<1x8x16xf32>
    %1482 = vector.shape_cast %1481 : vector<1x8x16xf32> to vector<8x16xf32>
    %1483 = vector.shape_cast %1441 : vector<8x16xf32> to vector<1x8x16xf32>
    tpu.vector_store %arg15[%c0_272, %c0_273, %c208_274], %1483 {strides = array<i32>} : memref<1x8x256xf32, #tpu.memory_space<vmem>>, vector<1x8x16xf32>,
    %c0_275 = arith.constant 0 : index
    %c0_276 = arith.constant 0 : index
    %c14 = arith.constant 14 : index
    %1484 = vector.load %arg2[%c0_275, %c0_276, %c14] : memref<1x8x16xf32, #tpu.memory_space<vmem>>, vector<1x8x1xf32>
    %1485 = vector.shape_cast %1484 : vector<1x8x1xf32> to vector<8x1xf32>
    %c0_277 = arith.constant 0 : index
    %c0_278 = arith.constant 0 : index
    %c224 = arith.constant 224 : index
    %1486 = vector.load %arg3[%c0_277, %c0_278, %c224] : memref<1x8x256xf32, #tpu.memory_space<vmem>>, vector<1x8x16xf32>
    %1487 = vector.shape_cast %1486 : vector<1x8x16xf32> to vector<8x16xf32>
    %cst_279 = arith.constant dense<0.000000e+00> : vector<8x384xf32>
    %1488 = tpu.matmul %1480, %3, %cst_279 {dimension_numbers = #tpu.dot_dimension_numbers<[1], [0], [0], [1], [0, 0, 1, 1], [], []>} : vector<8x32xf32>, vector<32x384xf32>, vector<8x384xf32> -> vector<8x384xf32>
    %1489 = vector.shape_cast %1485 : vector<8x1xf32> to vector<8x1xf32>
    %1490 = vector.broadcast %1489 : vector<8x1xf32> to vector<8x32xf32>
    %1491 = vector.extract_strided_slice %1488 {offsets = [0, 0], sizes = [8, 32], strides = [1, 1]} : vector<8x384xf32> to vector<8x32xf32>
    %1492 = arith.mulf %1490, %1491 : vector<8x32xf32>
    %1493 = arith.addf %1480, %1492 : vector<8x32xf32>
    %1494 = arith.mulf %1490, %1490 : vector<8x32xf32>
    %1495 = vector.extract_strided_slice %1488 {offsets = [0, 32], sizes = [8, 32], strides = [1, 1]} : vector<8x384xf32> to vector<8x32xf32>
    %1496 = arith.mulf %1494, %1495 : vector<8x32xf32>
    %1497 = arith.addf %1493, %1496 : vector<8x32xf32>
    %1498 = arith.mulf %1494, %1490 : vector<8x32xf32>
    %1499 = vector.extract_strided_slice %1488 {offsets = [0, 64], sizes = [8, 32], strides = [1, 1]} : vector<8x384xf32> to vector<8x32xf32>
    %1500 = arith.mulf %1498, %1499 : vector<8x32xf32>
    %1501 = arith.addf %1497, %1500 : vector<8x32xf32>
    %1502 = arith.mulf %1498, %1490 : vector<8x32xf32>
    %1503 = vector.extract_strided_slice %1488 {offsets = [0, 96], sizes = [8, 32], strides = [1, 1]} : vector<8x384xf32> to vector<8x32xf32>
    %1504 = arith.mulf %1502, %1503 : vector<8x32xf32>
    %1505 = arith.addf %1501, %1504 : vector<8x32xf32>
    %1506 = arith.mulf %1502, %1490 : vector<8x32xf32>
    %1507 = vector.extract_strided_slice %1488 {offsets = [0, 128], sizes = [8, 32], strides = [1, 1]} : vector<8x384xf32> to vector<8x32xf32>
    %1508 = arith.mulf %1506, %1507 : vector<8x32xf32>
    %1509 = arith.addf %1505, %1508 : vector<8x32xf32>
    %1510 = arith.mulf %1506, %1490 : vector<8x32xf32>
    %1511 = vector.extract_strided_slice %1488 {offsets = [0, 160], sizes = [8, 32], strides = [1, 1]} : vector<8x384xf32> to vector<8x32xf32>
    %1512 = arith.mulf %1510, %1511 : vector<8x32xf32>
    %1513 = arith.addf %1509, %1512 : vector<8x32xf32>
    %1514 = arith.mulf %1510, %1490 : vector<8x32xf32>
    %1515 = vector.extract_strided_slice %1488 {offsets = [0, 192], sizes = [8, 32], strides = [1, 1]} : vector<8x384xf32> to vector<8x32xf32>
    %1516 = arith.mulf %1514, %1515 : vector<8x32xf32>
    %1517 = arith.addf %1513, %1516 : vector<8x32xf32>
    %1518 = arith.mulf %1514, %1490 : vector<8x32xf32>
    %1519 = vector.extract_strided_slice %1488 {offsets = [0, 224], sizes = [8, 32], strides = [1, 1]} : vector<8x384xf32> to vector<8x32xf32>
    %1520 = arith.mulf %1518, %1519 : vector<8x32xf32>
    %1521 = arith.addf %1517, %1520 : vector<8x32xf32>
    %1522 = arith.mulf %1518, %1490 : vector<8x32xf32>
    %1523 = vector.extract_strided_slice %1488 {offsets = [0, 256], sizes = [8, 32], strides = [1, 1]} : vector<8x384xf32> to vector<8x32xf32>
    %1524 = arith.mulf %1522, %1523 : vector<8x32xf32>
    %1525 = arith.addf %1521, %1524 : vector<8x32xf32>
    %1526 = arith.mulf %1522, %1490 : vector<8x32xf32>
    %1527 = vector.extract_strided_slice %1488 {offsets = [0, 288], sizes = [8, 32], strides = [1, 1]} : vector<8x384xf32> to vector<8x32xf32>
    %1528 = arith.mulf %1526, %1527 : vector<8x32xf32>
    %1529 = arith.addf %1525, %1528 : vector<8x32xf32>
    %1530 = arith.mulf %1526, %1490 : vector<8x32xf32>
    %1531 = vector.extract_strided_slice %1488 {offsets = [0, 320], sizes = [8, 32], strides = [1, 1]} : vector<8x384xf32> to vector<8x32xf32>
    %1532 = arith.mulf %1530, %1531 : vector<8x32xf32>
    %1533 = arith.addf %1529, %1532 : vector<8x32xf32>
    %1534 = arith.mulf %1530, %1490 : vector<8x32xf32>
    %1535 = vector.extract_strided_slice %1488 {offsets = [0, 352], sizes = [8, 32], strides = [1, 1]} : vector<8x384xf32> to vector<8x32xf32>
    %1536 = arith.mulf %1534, %1535 : vector<8x32xf32>
    %1537 = arith.addf %1533, %1536 : vector<8x32xf32>
    %cst_280 = arith.constant dense<0.000000e+00> : vector<8x48xf32>
    %1538 = tpu.matmul %1537, %4, %cst_280 {dimension_numbers = #tpu.dot_dimension_numbers<[1], [0], [0], [1], [0, 0, 1, 1], [], []>} : vector<8x32xf32>, vector<32x48xf32>, vector<8x48xf32> -> vector<8x48xf32>
    %1539 = vector.extract_strided_slice %1538 {offsets = [0, 0], sizes = [8, 32], strides = [1, 1]} : vector<8x48xf32> to vector<8x32xf32>
    %cst_281 = arith.constant 0.000000e+00 : f32
    %1540 = vector.broadcast %cst_281 : f32 to vector<8x32xf32>
    %1541 = arith.maximumf %1539, %1540 : vector<8x32xf32>
    %1542 = vector.extract_strided_slice %1538 {offsets = [0, 32], sizes = [8, 16], strides = [1, 1]} : vector<8x48xf32> to vector<8x16xf32>
    %cst_282 = arith.constant dense<0.000000e+00> : vector<8x16xf32>
    %1543 = tpu.matmul %1541, %5, %cst_282 {dimension_numbers = #tpu.dot_dimension_numbers<[1], [0], [0], [1], [0, 0, 1, 1], [], []>} : vector<8x32xf32>, vector<32x16xf32>, vector<8x16xf32> -> vector<8x16xf32>
    %1544 = arith.addf %1542, %1543 : vector<8x16xf32>
    %1545 = vector.broadcast %6 : vector<1x16xf32> to vector<8x16xf32>
    %1546 = arith.addf %1544, %1545 : vector<8x16xf32>
    %1547 = arith.cmpf one, %1487, %1487 : vector<8x16xf32>
    %1548 = arith.select %1547, %1546, %1487 : vector<8x16xi1>, vector<8x16xf32>
    %1549 = tpu.concatenate %1548, %1546 in 1 : vector<8x16xf32>, vector<8x16xf32> -> vector<8x32xf32>
    %cst_283 = arith.constant dense<0.000000e+00> : vector<8x64xf32>
    %1550 = tpu.matmul %1549, %7, %cst_283 {dimension_numbers = #tpu.dot_dimension_numbers<[1], [0], [0], [1], [0, 0, 1, 1], [], []>} : vector<8x32xf32>, vector<32x64xf32>, vector<8x64xf32> -> vector<8x64xf32>
    %1551 = vector.broadcast %8 : vector<1x64xf32> to vector<8x64xf32>
    %1552 = arith.addf %1550, %1551 : vector<8x64xf32>
    %1553 = vector.extract_strided_slice %1552 {offsets = [0, 0], sizes = [8, 16], strides = [1, 1]} : vector<8x64xf32> to vector<8x16xf32>
    %1554 = arith.negf %1553 : vector<8x16xf32>
    %1555 = math.exp %1554 : vector<8x16xf32>
    %cst_284 = arith.constant 1.000000e+00 : f32
    %1556 = vector.broadcast %cst_284 : f32 to vector<8x16xf32>
    %1557 = arith.addf %1556, %1555 : vector<8x16xf32>
    %1558 = arith.divf %1556, %1557 : vector<8x16xf32>
    %1559 = vector.extract_strided_slice %1552 {offsets = [0, 16], sizes = [8, 16], strides = [1, 1]} : vector<8x64xf32> to vector<8x16xf32>
    %1560 = arith.negf %1559 : vector<8x16xf32>
    %1561 = math.exp %1560 : vector<8x16xf32>
    %cst_285 = arith.constant 1.000000e+00 : f32
    %1562 = vector.broadcast %cst_285 : f32 to vector<8x16xf32>
    %1563 = arith.addf %1562, %1561 : vector<8x16xf32>
    %1564 = arith.divf %1562, %1563 : vector<8x16xf32>
    %1565 = vector.extract_strided_slice %1552 {offsets = [0, 32], sizes = [8, 16], strides = [1, 1]} : vector<8x64xf32> to vector<8x16xf32>
    %1566 = vector.extract_strided_slice %1552 {offsets = [0, 48], sizes = [8, 16], strides = [1, 1]} : vector<8x64xf32> to vector<8x16xf32>
    %1567 = arith.mulf %1558, %1566 : vector<8x16xf32>
    %1568 = arith.addf %1565, %1567 : vector<8x16xf32>
    %1569 = math.tanh %1568 : vector<8x16xf32>
    %cst_286 = arith.constant 1.000000e+00 : f32
    %1570 = vector.broadcast %cst_286 : f32 to vector<8x16xf32>
    %1571 = arith.subf %1570, %1564 : vector<8x16xf32>
    %1572 = arith.mulf %1571, %1569 : vector<8x16xf32>
    %1573 = arith.mulf %1564, %1546 : vector<8x16xf32>
    %1574 = arith.addf %1572, %1573 : vector<8x16xf32>
    %cst_287 = arith.constant dense<0.000000e+00> : vector<8x64xf32>
    %1575 = tpu.matmul %1574, %9, %cst_287 {dimension_numbers = #tpu.dot_dimension_numbers<[1], [0], [0], [1], [0, 0, 1, 1], [], []>} : vector<8x16xf32>, vector<16x64xf32>, vector<8x64xf32> -> vector<8x64xf32>
    %1576 = vector.extract_strided_slice %1575 {offsets = [0, 0], sizes = [8, 32], strides = [1, 1]} : vector<8x64xf32> to vector<8x32xf32>
    %1577 = vector.broadcast %10 : vector<1x32xf32> to vector<8x32xf32>
    %1578 = arith.addf %1576, %1577 : vector<8x32xf32>
    %1579 = vector.extract_strided_slice %1575 {offsets = [0, 32], sizes = [8, 32], strides = [1, 1]} : vector<8x64xf32> to vector<8x32xf32>
    %1580 = vector.broadcast %11 : vector<1x32xf32> to vector<8x32xf32>
    %1581 = arith.addf %1579, %1580 : vector<8x32xf32>
    %cst_288 = arith.constant 0.000000e+00 : f32
    %1582 = vector.broadcast %cst_288 : f32 to vector<8x32xf32>
    %1583 = arith.maximumf %1581, %1582 : vector<8x32xf32>
    %cst_289 = arith.constant dense<0.000000e+00> : vector<8x32xf32>
    %1584 = tpu.matmul %1583, %12, %cst_289 {dimension_numbers = #tpu.dot_dimension_numbers<[1], [0], [0], [1], [0, 0, 1, 1], [], []>} : vector<8x32xf32>, vector<32x32xf32>, vector<8x32xf32> -> vector<8x32xf32>
    %1585 = arith.addf %1578, %1584 : vector<8x32xf32>
    %c0_290 = arith.constant 0 : index
    %c0_291 = arith.constant 0 : index
    %c224_292 = arith.constant 224 : index
    %1586 = vector.load %arg15[%c0_290, %c0_291, %c224_292] : memref<1x8x256xf32, #tpu.memory_space<vmem>>, vector<1x8x16xf32>
    %1587 = vector.shape_cast %1586 : vector<1x8x16xf32> to vector<8x16xf32>
    %1588 = vector.shape_cast %1546 : vector<8x16xf32> to vector<1x8x16xf32>
    tpu.vector_store %arg15[%c0_290, %c0_291, %c224_292], %1588 {strides = array<i32>} : memref<1x8x256xf32, #tpu.memory_space<vmem>>, vector<1x8x16xf32>,
    %c0_293 = arith.constant 0 : index
    %c0_294 = arith.constant 0 : index
    %c15 = arith.constant 15 : index
    %1589 = vector.load %arg2[%c0_293, %c0_294, %c15] : memref<1x8x16xf32, #tpu.memory_space<vmem>>, vector<1x8x1xf32>
    %1590 = vector.shape_cast %1589 : vector<1x8x1xf32> to vector<8x1xf32>
    %c0_295 = arith.constant 0 : index
    %c0_296 = arith.constant 0 : index
    %c240 = arith.constant 240 : index
    %1591 = vector.load %arg3[%c0_295, %c0_296, %c240] : memref<1x8x256xf32, #tpu.memory_space<vmem>>, vector<1x8x16xf32>
    %1592 = vector.shape_cast %1591 : vector<1x8x16xf32> to vector<8x16xf32>
    %cst_297 = arith.constant dense<0.000000e+00> : vector<8x384xf32>
    %1593 = tpu.matmul %1585, %3, %cst_297 {dimension_numbers = #tpu.dot_dimension_numbers<[1], [0], [0], [1], [0, 0, 1, 1], [], []>} : vector<8x32xf32>, vector<32x384xf32>, vector<8x384xf32> -> vector<8x384xf32>
    %1594 = vector.shape_cast %1590 : vector<8x1xf32> to vector<8x1xf32>
    %1595 = vector.broadcast %1594 : vector<8x1xf32> to vector<8x32xf32>
    %1596 = vector.extract_strided_slice %1593 {offsets = [0, 0], sizes = [8, 32], strides = [1, 1]} : vector<8x384xf32> to vector<8x32xf32>
    %1597 = arith.mulf %1595, %1596 : vector<8x32xf32>
    %1598 = arith.addf %1585, %1597 : vector<8x32xf32>
    %1599 = arith.mulf %1595, %1595 : vector<8x32xf32>
    %1600 = vector.extract_strided_slice %1593 {offsets = [0, 32], sizes = [8, 32], strides = [1, 1]} : vector<8x384xf32> to vector<8x32xf32>
    %1601 = arith.mulf %1599, %1600 : vector<8x32xf32>
    %1602 = arith.addf %1598, %1601 : vector<8x32xf32>
    %1603 = arith.mulf %1599, %1595 : vector<8x32xf32>
    %1604 = vector.extract_strided_slice %1593 {offsets = [0, 64], sizes = [8, 32], strides = [1, 1]} : vector<8x384xf32> to vector<8x32xf32>
    %1605 = arith.mulf %1603, %1604 : vector<8x32xf32>
    %1606 = arith.addf %1602, %1605 : vector<8x32xf32>
    %1607 = arith.mulf %1603, %1595 : vector<8x32xf32>
    %1608 = vector.extract_strided_slice %1593 {offsets = [0, 96], sizes = [8, 32], strides = [1, 1]} : vector<8x384xf32> to vector<8x32xf32>
    %1609 = arith.mulf %1607, %1608 : vector<8x32xf32>
    %1610 = arith.addf %1606, %1609 : vector<8x32xf32>
    %1611 = arith.mulf %1607, %1595 : vector<8x32xf32>
    %1612 = vector.extract_strided_slice %1593 {offsets = [0, 128], sizes = [8, 32], strides = [1, 1]} : vector<8x384xf32> to vector<8x32xf32>
    %1613 = arith.mulf %1611, %1612 : vector<8x32xf32>
    %1614 = arith.addf %1610, %1613 : vector<8x32xf32>
    %1615 = arith.mulf %1611, %1595 : vector<8x32xf32>
    %1616 = vector.extract_strided_slice %1593 {offsets = [0, 160], sizes = [8, 32], strides = [1, 1]} : vector<8x384xf32> to vector<8x32xf32>
    %1617 = arith.mulf %1615, %1616 : vector<8x32xf32>
    %1618 = arith.addf %1614, %1617 : vector<8x32xf32>
    %1619 = arith.mulf %1615, %1595 : vector<8x32xf32>
    %1620 = vector.extract_strided_slice %1593 {offsets = [0, 192], sizes = [8, 32], strides = [1, 1]} : vector<8x384xf32> to vector<8x32xf32>
    %1621 = arith.mulf %1619, %1620 : vector<8x32xf32>
    %1622 = arith.addf %1618, %1621 : vector<8x32xf32>
    %1623 = arith.mulf %1619, %1595 : vector<8x32xf32>
    %1624 = vector.extract_strided_slice %1593 {offsets = [0, 224], sizes = [8, 32], strides = [1, 1]} : vector<8x384xf32> to vector<8x32xf32>
    %1625 = arith.mulf %1623, %1624 : vector<8x32xf32>
    %1626 = arith.addf %1622, %1625 : vector<8x32xf32>
    %1627 = arith.mulf %1623, %1595 : vector<8x32xf32>
    %1628 = vector.extract_strided_slice %1593 {offsets = [0, 256], sizes = [8, 32], strides = [1, 1]} : vector<8x384xf32> to vector<8x32xf32>
    %1629 = arith.mulf %1627, %1628 : vector<8x32xf32>
    %1630 = arith.addf %1626, %1629 : vector<8x32xf32>
    %1631 = arith.mulf %1627, %1595 : vector<8x32xf32>
    %1632 = vector.extract_strided_slice %1593 {offsets = [0, 288], sizes = [8, 32], strides = [1, 1]} : vector<8x384xf32> to vector<8x32xf32>
    %1633 = arith.mulf %1631, %1632 : vector<8x32xf32>
    %1634 = arith.addf %1630, %1633 : vector<8x32xf32>
    %1635 = arith.mulf %1631, %1595 : vector<8x32xf32>
    %1636 = vector.extract_strided_slice %1593 {offsets = [0, 320], sizes = [8, 32], strides = [1, 1]} : vector<8x384xf32> to vector<8x32xf32>
    %1637 = arith.mulf %1635, %1636 : vector<8x32xf32>
    %1638 = arith.addf %1634, %1637 : vector<8x32xf32>
    %1639 = arith.mulf %1635, %1595 : vector<8x32xf32>
    %1640 = vector.extract_strided_slice %1593 {offsets = [0, 352], sizes = [8, 32], strides = [1, 1]} : vector<8x384xf32> to vector<8x32xf32>
    %1641 = arith.mulf %1639, %1640 : vector<8x32xf32>
    %1642 = arith.addf %1638, %1641 : vector<8x32xf32>
    %cst_298 = arith.constant dense<0.000000e+00> : vector<8x48xf32>
    %1643 = tpu.matmul %1642, %4, %cst_298 {dimension_numbers = #tpu.dot_dimension_numbers<[1], [0], [0], [1], [0, 0, 1, 1], [], []>} : vector<8x32xf32>, vector<32x48xf32>, vector<8x48xf32> -> vector<8x48xf32>
    %1644 = vector.extract_strided_slice %1643 {offsets = [0, 0], sizes = [8, 32], strides = [1, 1]} : vector<8x48xf32> to vector<8x32xf32>
    %cst_299 = arith.constant 0.000000e+00 : f32
    %1645 = vector.broadcast %cst_299 : f32 to vector<8x32xf32>
    %1646 = arith.maximumf %1644, %1645 : vector<8x32xf32>
    %1647 = vector.extract_strided_slice %1643 {offsets = [0, 32], sizes = [8, 16], strides = [1, 1]} : vector<8x48xf32> to vector<8x16xf32>
    %cst_300 = arith.constant dense<0.000000e+00> : vector<8x16xf32>
    %1648 = tpu.matmul %1646, %5, %cst_300 {dimension_numbers = #tpu.dot_dimension_numbers<[1], [0], [0], [1], [0, 0, 1, 1], [], []>} : vector<8x32xf32>, vector<32x16xf32>, vector<8x16xf32> -> vector<8x16xf32>
    %1649 = arith.addf %1647, %1648 : vector<8x16xf32>
    %1650 = vector.broadcast %6 : vector<1x16xf32> to vector<8x16xf32>
    %1651 = arith.addf %1649, %1650 : vector<8x16xf32>
    %1652 = arith.cmpf one, %1592, %1592 : vector<8x16xf32>
    %1653 = arith.select %1652, %1651, %1592 : vector<8x16xi1>, vector<8x16xf32>
    %1654 = tpu.concatenate %1653, %1651 in 1 : vector<8x16xf32>, vector<8x16xf32> -> vector<8x32xf32>
    %cst_301 = arith.constant dense<0.000000e+00> : vector<8x64xf32>
    %1655 = tpu.matmul %1654, %7, %cst_301 {dimension_numbers = #tpu.dot_dimension_numbers<[1], [0], [0], [1], [0, 0, 1, 1], [], []>} : vector<8x32xf32>, vector<32x64xf32>, vector<8x64xf32> -> vector<8x64xf32>
    %1656 = vector.broadcast %8 : vector<1x64xf32> to vector<8x64xf32>
    %1657 = arith.addf %1655, %1656 : vector<8x64xf32>
    %1658 = vector.extract_strided_slice %1657 {offsets = [0, 0], sizes = [8, 16], strides = [1, 1]} : vector<8x64xf32> to vector<8x16xf32>
    %1659 = arith.negf %1658 : vector<8x16xf32>
    %1660 = math.exp %1659 : vector<8x16xf32>
    %cst_302 = arith.constant 1.000000e+00 : f32
    %1661 = vector.broadcast %cst_302 : f32 to vector<8x16xf32>
    %1662 = arith.addf %1661, %1660 : vector<8x16xf32>
    %1663 = arith.divf %1661, %1662 : vector<8x16xf32>
    %1664 = vector.extract_strided_slice %1657 {offsets = [0, 16], sizes = [8, 16], strides = [1, 1]} : vector<8x64xf32> to vector<8x16xf32>
    %1665 = arith.negf %1664 : vector<8x16xf32>
    %1666 = math.exp %1665 : vector<8x16xf32>
    %cst_303 = arith.constant 1.000000e+00 : f32
    %1667 = vector.broadcast %cst_303 : f32 to vector<8x16xf32>
    %1668 = arith.addf %1667, %1666 : vector<8x16xf32>
    %1669 = arith.divf %1667, %1668 : vector<8x16xf32>
    %1670 = vector.extract_strided_slice %1657 {offsets = [0, 32], sizes = [8, 16], strides = [1, 1]} : vector<8x64xf32> to vector<8x16xf32>
    %1671 = vector.extract_strided_slice %1657 {offsets = [0, 48], sizes = [8, 16], strides = [1, 1]} : vector<8x64xf32> to vector<8x16xf32>
    %1672 = arith.mulf %1663, %1671 : vector<8x16xf32>
    %1673 = arith.addf %1670, %1672 : vector<8x16xf32>
    %1674 = math.tanh %1673 : vector<8x16xf32>
    %cst_304 = arith.constant 1.000000e+00 : f32
    %1675 = vector.broadcast %cst_304 : f32 to vector<8x16xf32>
    %1676 = arith.subf %1675, %1669 : vector<8x16xf32>
    %1677 = arith.mulf %1676, %1674 : vector<8x16xf32>
    %1678 = arith.mulf %1669, %1651 : vector<8x16xf32>
    %1679 = arith.addf %1677, %1678 : vector<8x16xf32>
    %cst_305 = arith.constant dense<0.000000e+00> : vector<8x64xf32>
    %1680 = tpu.matmul %1679, %9, %cst_305 {dimension_numbers = #tpu.dot_dimension_numbers<[1], [0], [0], [1], [0, 0, 1, 1], [], []>} : vector<8x16xf32>, vector<16x64xf32>, vector<8x64xf32> -> vector<8x64xf32>
    %1681 = vector.extract_strided_slice %1680 {offsets = [0, 0], sizes = [8, 32], strides = [1, 1]} : vector<8x64xf32> to vector<8x32xf32>
    %1682 = vector.broadcast %10 : vector<1x32xf32> to vector<8x32xf32>
    %1683 = arith.addf %1681, %1682 : vector<8x32xf32>
    %1684 = vector.extract_strided_slice %1680 {offsets = [0, 32], sizes = [8, 32], strides = [1, 1]} : vector<8x64xf32> to vector<8x32xf32>
    %1685 = vector.broadcast %11 : vector<1x32xf32> to vector<8x32xf32>
    %1686 = arith.addf %1684, %1685 : vector<8x32xf32>
    %cst_306 = arith.constant 0.000000e+00 : f32
    %1687 = vector.broadcast %cst_306 : f32 to vector<8x32xf32>
    %1688 = arith.maximumf %1686, %1687 : vector<8x32xf32>
    %cst_307 = arith.constant dense<0.000000e+00> : vector<8x32xf32>
    %1689 = tpu.matmul %1688, %12, %cst_307 {dimension_numbers = #tpu.dot_dimension_numbers<[1], [0], [0], [1], [0, 0, 1, 1], [], []>} : vector<8x32xf32>, vector<32x32xf32>, vector<8x32xf32> -> vector<8x32xf32>
    %1690 = arith.addf %1683, %1689 : vector<8x32xf32>
    %c0_308 = arith.constant 0 : index
    %c0_309 = arith.constant 0 : index
    %c240_310 = arith.constant 240 : index
    %1691 = vector.load %arg15[%c0_308, %c0_309, %c240_310] : memref<1x8x256xf32, #tpu.memory_space<vmem>>, vector<1x8x16xf32>
    %1692 = vector.shape_cast %1691 : vector<1x8x16xf32> to vector<8x16xf32>
    %1693 = vector.shape_cast %1651 : vector<8x16xf32> to vector<1x8x16xf32>
    tpu.vector_store %arg15[%c0_308, %c0_309, %c240_310], %1693 {strides = array<i32>} : memref<1x8x256xf32, #tpu.memory_space<vmem>>, vector<1x8x16xf32>,
    %c0_311 = arith.constant 0 : index
    %c0_312 = arith.constant 0 : index
    %1694 = vector.load %arg16[%c0_311, %c0_312] : memref<8x32xf32, #tpu.memory_space<vmem>>, vector<8x32xf32>
    tpu.vector_store %arg16[%c0_311, %c0_312], %1690 {strides = array<i32>} : memref<8x32xf32, #tpu.memory_space<vmem>>, vector<8x32xf32>,
    return
  }
  func.func @transform_0(%arg0: i32, %arg1: i32) -> (i32, i32, i32) {
    %c0_i32 = arith.constant 0 : i32
    %c0_i32_0 = arith.constant 0 : i32
    return %arg1, %arg0, %c0_i32 : i32, i32, i32
  }
  func.func @transform_1(%arg0: i32, %arg1: i32) -> (i32, i32, i32) {
    %c0_i32 = arith.constant 0 : i32
    %c0_i32_0 = arith.constant 0 : i32
    return %arg1, %arg0, %c0_i32 : i32, i32, i32
  }
  func.func @transform_2(%arg0: i32, %arg1: i32) -> (i32, i32) {
    %c0_i32 = arith.constant 0 : i32
    %c0_i32_0 = arith.constant 0 : i32
    return %arg0, %c0_i32 : i32, i32
  }
  func.func @transform_3(%arg0: i32, %arg1: i32) -> (i32, i32) {
    %c0_i32 = arith.constant 0 : i32
    %c0_i32_0 = arith.constant 0 : i32
    %c0_i32_1 = arith.constant 0 : i32
    return %c0_i32, %c0_i32_0 : i32, i32
  }
  func.func @transform_4(%arg0: i32, %arg1: i32) -> (i32, i32) {
    %c0_i32 = arith.constant 0 : i32
    %c0_i32_0 = arith.constant 0 : i32
    %c0_i32_1 = arith.constant 0 : i32
    return %c0_i32, %c0_i32_0 : i32, i32
  }
  func.func @transform_5(%arg0: i32, %arg1: i32) -> (i32, i32) {
    %c0_i32 = arith.constant 0 : i32
    %c0_i32_0 = arith.constant 0 : i32
    %c0_i32_1 = arith.constant 0 : i32
    return %c0_i32, %c0_i32_0 : i32, i32
  }
  func.func @transform_6(%arg0: i32, %arg1: i32) -> (i32, i32) {
    %c0_i32 = arith.constant 0 : i32
    %c0_i32_0 = arith.constant 0 : i32
    %c0_i32_1 = arith.constant 0 : i32
    return %c0_i32, %c0_i32_0 : i32, i32
  }
  func.func @transform_7(%arg0: i32, %arg1: i32) -> (i32, i32) {
    %c0_i32 = arith.constant 0 : i32
    %c0_i32_0 = arith.constant 0 : i32
    %c0_i32_1 = arith.constant 0 : i32
    return %c0_i32, %c0_i32_0 : i32, i32
  }
  func.func @transform_8(%arg0: i32, %arg1: i32) -> (i32, i32) {
    %c0_i32 = arith.constant 0 : i32
    %c0_i32_0 = arith.constant 0 : i32
    %c0_i32_1 = arith.constant 0 : i32
    return %c0_i32, %c0_i32_0 : i32, i32
  }
  func.func @transform_9(%arg0: i32, %arg1: i32) -> (i32, i32) {
    %c0_i32 = arith.constant 0 : i32
    %c0_i32_0 = arith.constant 0 : i32
    %c0_i32_1 = arith.constant 0 : i32
    return %c0_i32, %c0_i32_0 : i32, i32
  }
  func.func @transform_10(%arg0: i32, %arg1: i32) -> (i32, i32) {
    %c0_i32 = arith.constant 0 : i32
    %c0_i32_0 = arith.constant 0 : i32
    %c0_i32_1 = arith.constant 0 : i32
    return %c0_i32, %c0_i32_0 : i32, i32
  }
  func.func @transform_11(%arg0: i32, %arg1: i32) -> (i32, i32) {
    %c0_i32 = arith.constant 0 : i32
    %c0_i32_0 = arith.constant 0 : i32
    %c0_i32_1 = arith.constant 0 : i32
    return %c0_i32, %c0_i32_0 : i32, i32
  }
  func.func @transform_12(%arg0: i32, %arg1: i32) -> (i32, i32) {
    %c0_i32 = arith.constant 0 : i32
    %c0_i32_0 = arith.constant 0 : i32
    %c0_i32_1 = arith.constant 0 : i32
    return %c0_i32, %c0_i32_0 : i32, i32
  }
  func.func @transform_13(%arg0: i32, %arg1: i32) -> (i32, i32, i32) {
    %c0_i32 = arith.constant 0 : i32
    %c0_i32_0 = arith.constant 0 : i32
    return %arg1, %arg0, %c0_i32 : i32, i32, i32
  }
}

</mosaic_0001>

<bundles_post_ra>
// kernel: tpu_custom_call.1
= control target key start
LH: loop header
LB: loop body
LE: loop exit
PB: predicated region body
PF: predicated region fallthrough
CT: control target
= control target key end

     0   :  { %s8563_s0 = inlined_call_operand.vmem [shape: f32[2,8,16], index: 0, kind: input, shape index: {}]   ;;  %s8564_s1 = inlined_call_operand.vmem [shape: f32[2,8,256], index: 1, kind: input, shape index: {}]   ;;  %s8565_s2 = inlined_call_operand.hbm [shape: f32[8,32], index: 2, kind: input, shape index: {}]   ;;  %s8566_s3 = inlined_call_operand.hbm [shape: f32[32,384], index: 3, kind: input, shape index: {}]   ;;  %s8567_s4 = inlined_call_operand.hbm [shape: f32[32,48], index: 4, kind: input, shape index: {}]   ;;  %s8568_s5 = inlined_call_operand.vmem [shape: f32[32,16], index: 5, kind: input, shape index: {}]   ;;  %s8569_s6 = inlined_call_operand.vmem [shape: f32[1,16], index: 6, kind: input, shape index: {}]   ;;  %s8570_s7 = inlined_call_operand.hbm [shape: f32[32,64], index: 7, kind: input, shape index: {}]   ;;  %s8571_s8 = inlined_call_operand.vmem [shape: f32[1,64], index: 8, kind: input, shape index: {}]   ;;  %s8572_s9 = inlined_call_operand.hbm [shape: f32[16,64], index: 9, kind: input, shape index: {}]   ;;  %s8573_s10 = inlined_call_operand.vmem [shape: f32[1,32], index: 10, kind: input, shape index: {}]   ;;  %s8574_s11 = inlined_call_operand.vmem [shape: f32[1,32], index: 11, kind: input, shape index: {}]   ;;  %s8575_s12 = inlined_call_operand.hbm [shape: f32[32,32], index: 12, kind: input, shape index: {}]   ;;  %s8576_s13 = inlined_call_operand.hbm [shape: f32[2,8,256], index: 13, kind: output, shape index: {}]  }
   0x1   :  { %8587 = sst [smem:[#allocation28_spill]] %s8565_s2 }
   0x2   :  { %8588 = sst [smem:[#allocation29_spill]] %s8566_s3 }
   0x3   :  { %8589 = sst [smem:[#allocation30_spill]] %s8576_s13 }
   0x4   :  { %18 = vsyncpa [#allocation4], 0 }
   0x5   :  { %19 = vsyncpa [#allocation7], 0 }
   0x6   :  { %20 = vsyncpa [#allocation10], 0 }
   0x7   :  { %21 = vsyncpa [#allocation13], 0 }
   0x8   :  { %22 = vsyncpa [#allocation5], 0 }
   0x9   :  { %24 = vsyncpa [#allocation5 + $0x1], 0  ;;  %s6914_s25 = smov 0   ;;  %s6916_s26 = smov 0  }
   0xa   :  { %s6918_s27 = smov 0   ;;  %s6920_s28 = smov 0  }
   0xb   :  { %s6922_s29 = smov 0   ;;  %s6924_s30 = smov 0  }
   0xc LB: > { %8590 = sst [smem:[#allocation20_spill]] %s6789_s25  ;;  %s6007_s14 = sadd.s32 4294967295, %s6809_s30   ;;  %s6809_s30 = sphi %s6924_s30, %s30_s30   ;;  %s6805_s29 = sphi %s6922_s29, %s8613_s29   ;;  %s6801_s28 = sphi %s6920_s28, %s8612_s28   ;;  %s6797_s27 = sphi %s6918_s27, %s8611_s27   ;;  %s6793_s26 = sphi %s6916_s26, %s8615_s26   ;;  %s6789_s25 = sphi %s6914_s25, %s8614_s25  }
   0xd   : > { %8591 = sst [smem:[#allocation21_spill]] %s6797_s27  ;;  %s6008_s15 = sadd.s32 4294967294, %s6809_s30  }
   0xe   : > { %8592 = sst [smem:[#allocation22_spill]] %s6805_s29  ;;  %s39_s16 = sadd.s32 1, %s6805_s29 }
   0xf   : > { %8593 = sst [smem:[#allocation23_spill]] %s6809_s30  ;;  %s343_s17 = sadd.s32 1, %s6797_s27 }
  0x10   : > { %p40_p0 = scmp.ge.s32.totalorder %s39_s16, 2  ;;  %p353_p1 = scmp.ne.s32.totalorder %s6797_s27, %s6793_s26 }
  0x11   : > { %p354_p2 = scmp.eq.s32.totalorder %s6007_s14, 1  ;;  %p359_p3 = scmp.ne.s32.totalorder %s6793_s26, %s6789_s25 }
  0x12   : > { %s8617_s16 = smov (%p40_p0, %s39_s16), 0  ;;  %p360_p5 = scmp.eq.s32.totalorder %s6008_s15, 1 }
  0x13   : > { %8594 = sst [smem:[#allocation24_spill]] %s8617_s16  ;;  %p6954_p4 = por %p354_p2, %p353_p1 }
  0x14   : > { %s338_s19 = ssub.s32 %s6805_s29, %s8617_s16  ;;  %p6009_p6 = scmp.ge.s32.totalorder %s6809_s30, 1 }
  0x15   : > { %s8595_s18 = scalar_select %p6954_p4, 1, 0 }
  0x16   : > { %p341_p7 = scmp.eq.s32.totalorder %s338_s19, 0  ;;  %p6961_p8 = por %p360_p5, %p359_p3 }
  0x17   : > { %8596 = sst [smem:[#allocation25_spill]] %s8595_s18  ;;  %p367_p9 = scmp.lt.s32.totalorder %s6809_s30, 3 }
  0x18   : > { %s8597_s20 = scalar_select %p6961_p8, 1, 0 }
  0x19   : > { %s6967_s21 = scalar_select %p341_p7, %s6797_s27, %s343_s17  }
  0x1a   : > { %8598 = sst [smem:[#allocation26_spill]] %s8597_s20  ;;  %p6969_p10 = pnand %p6009_p6, %p367_p9 }
  0x1b   : > { %8599 = sst [smem:[#allocation27_spill]] %s6967_s21  ;;  %p6973_p11 = scmp.eq.s32.totalorder %s6007_s14, 0 }
  0x1c   : > { %s8602_s3 = sld [smem:[#allocation29_spill]]  ;;  %p6206_p12 = pneg %p6969_p10 }
  0x1d   : > { %s6811_s16 = smov [#allocation6]   ;;  %s6812_s14 = smov 384  }
  0x1e   : > { %s394_s17 = sshll.u32 %s6811_s16, 4  ;;  %p6984_p13 = pnand %p6973_p11, %p6206_p12  ;;  %s395_s17 = int_to_ptr.vmem [resolvable:$true] %s394_s17 }
  0x1f   : > { %s6813_s21 = smov 24   ;;  %s6814_s27 = smov [#allocation9]  }
  0x20   : > { %s428_s16 = sshll.u32 %s6814_s27, 4  ;;  %s6815_s20 = smov 128   ;;  %s429_s16 = int_to_ptr.vmem [resolvable:$true] %s428_s16 }
  0x21   : > { %s6816_s25 = smov 8   ;;  %s8604_s2 = sld [smem:[#allocation28_spill]] }
  0x22   : > { %s392_s19 = sshll.u32 %s8602_s3, 4  ;;  %s426_s3 = sshll.u32 %s8570_s7, 4  ;;  %s393_s19 = int_to_ptr.hbm [resolvable:$true] %s392_s19  ;;  %s427_s3 = int_to_ptr.hbm [resolvable:$true] %s426_s3 }
  0x23   : > { %6212 = dma.hbm_to_vmem [thread:$0]  (!%p6984_p13), %s393_s19, 1536, %s395_s17, [#allocation7], %s6812_s14, %s6812_s14, %s6813_s21  }
  0x24   : > { %6218 = dma.hbm_to_vmem [thread:$0]  (!%p6984_p13), %s427_s3, 512, %s429_s16, [#allocation10], %s6815_s20, %s6815_s20, %s6816_s25  }
  0x25   : > { %s6817_s21 = smov [#allocation3]   ;;  %s406_s24 = sshll.u32 %s8567_s4, 4  ;;  %s407_s24 = int_to_ptr.hbm [resolvable:$true] %s406_s24 }
  0x26   : > { %s383_s19 = sshll.u32 %s6817_s21, 4  ;;  %s443_s3 = sshll.u32 %s8572_s9, 4  ;;  %s384_s19 = int_to_ptr.vmem [resolvable:$true] %s383_s19  ;;  %s444_s3 = int_to_ptr.hbm [resolvable:$true] %s443_s3 }
  0x27   : > { %s381_s18 = sshll.u32 %s8604_s2, 4  ;;  %s6818_s16 = smov [#allocation8]   ;;  %s382_s18 = int_to_ptr.hbm [resolvable:$true] %s381_s18 }
  0x28   : > { %6209 = dma.hbm_to_vmem [thread:$0]  (!%p6984_p13), %s382_s18, 128, %s384_s19, [#allocation4]  }
  0x29   : > { %s408_s13 = sshll.u32 %s6818_s16, 4  ;;  %s6819_s30 = smov [#allocation11]   ;;  %s409_s13 = int_to_ptr.vmem [resolvable:$true] %s408_s13 }
  0x2a   : > { %6215 = dma.hbm_to_vmem [thread:$0]  (!%p6984_p13), %s407_s24, 512, %s409_s13, [#allocation7], %s6815_s20, %s6815_s20, %s6816_s25  }
  0x2b   : > { %s445_s21 = sshll.u32 %s6819_s30, 4  ;;  %s463_s14 = sshll.u32 %s8575_s12, 4  ;;  %s446_s21 = int_to_ptr.vmem [resolvable:$true] %s445_s21  ;;  %s464_s14 = int_to_ptr.hbm [resolvable:$true] %s463_s14 }
  0x2c   : > { %6221 = dma.hbm_to_vmem [thread:$0]  (!%p6984_p13), %s444_s3, 256, %s446_s21, [#allocation10], %s6815_s20, %s6815_s20, %s6816_s25  }
  0x2d   : > { %s6820_s18 = smov [#allocation12]   ;;  %503 = sbr.rel (%p6969_p10) target bundleno = 28532 (0x6f74), region = 72 }
  0x2e   : > { %s465_s19 = sshll.u32 %s6820_s18, 4  ;;  %s466_s19 = int_to_ptr.vmem [resolvable:$true] %s465_s19 }
  0x2f   : > { %6224 = dma.hbm_to_vmem [thread:$0]  (!%p6984_p13), %s464_s14, 512, %s466_s19, [#allocation13], %s6815_s20, %s6815_s20, %s6816_s25  }
  0x32   : > { %6768 = dma.done.wait (%p6973_p11), [#allocation4], 128  }
  0x33   : > { %6770 = vsyncadd (%p6973_p11), [#allocation4], 4294967168 }
  0x34   : > { %6772 = dma.done.wait (%p6973_p11), [#allocation7], 2048  }
  0x35   : > { %6774 = vsyncadd (%p6973_p11), [#allocation7], 4294965248 }
  0x36   : > { %6776 = dma.done.wait (%p6973_p11), [#allocation10], 768  }
  0x37   : > { %6778 = vsyncadd (%p6973_p11), [#allocation10], 4294966528 }
  0x38   : > { %6780 = dma.done.wait (%p6973_p11), [#allocation13], 512  }
  0x39   : > { %6782 = vsyncadd (%p6973_p11), [#allocation13], 4294966784  ;;  %s581_s2 = sand.u32 1, %s6793_s26   ;;  %p584_p0 = scmp.lt.s32.totalorder %s6801_s28, 1 }
  0x3a   : > { %s6024_s25 = sshll.u32 %s581_s2, 4  ;;  %p6028_p1 = scmp.ne.s32.totalorder %s6801_s28, 0 }
  0x3b   : > { %s585_s29 = scalar_select %p584_p0, %s6801_s28, 1 }
  0x3c   : > { %s7048_s13 = scalar_lea.vmem [#allocation14], %s6024_s25  ;;  %603 = sbr.rel (%p6028_p1) target bundleno = 67 (0x43), region = 100 }
  0x3d   : > { %s6025_s20 = sshll.u32 %s585_s29, 3  ;;  %s6178_s22 = sshll.u32 %s585_s29, 4 }
  0x3e   : > { %s7041_s15 = scalar_lea.vmem %s8563_s0, %s6025_s20  ;;  %s7046_s23 = scalar_lea.vmem %s8564_s1, %s6178_s22 }
  0x41   : > { %v604_v0 = vld [vmem:[#allocation3] sm:$0xff]  ;;  %vm605_vm0 = vcmask 261120  }
  0x42   : > { %606 = vst.msk [vmem:[#allocation2] sm:$0xff] %vm605_vm0, %v604_v0 }
  0x43 PF: > { %v7051_v1 = vld [vmem:[#allocation6 + $0x48] sm:$0xff]  ;;  %v7053_v2 = vld [vmem:[#allocation6 + $0x50] sm:$0xff]  ;;  %v7055_v3 = vld [vmem:[#allocation6 + $0x58] sm:$0xff]  ;;  %v6821_v4 = vmov 0   ;;  %vm644_vm1 = vcmask 261120   ;;  %s6822_s30 = smov 96  }
  0x44   : > { %6323 = vset.pattern.permute.xlu0 %v6821_v4  ;;  %660 = vmatpush.msra.mxu0 %v7051_v1  ;;  %v7059_v5 = vld [vmem:[%s7041_s15] sm:$0xff]  ;;  %v7063_v7 = vld [vmem:[#allocation6 + $0x38] sm:$0xff]  ;;  %v7067_v8 = vld [vmem:[#allocation6 + $0x40] sm:$0xff]  ;;  %s6823_s21 = smov 64   ;;  %s6824_s17 = smov 32   ;;  %vm851_vm3 = vcmask 130048  }
  0x45   : > { %v7061_v6 = vld [vmem:[#allocation6 + $0x30] sm:$0xff]  ;;  %680 = vmatpush.msra.mxu1 %v7053_v2  ;;  %700 = vmatpush.msra.mxu2 %v7055_v3  ;;  %v7069_v9 = vld [vmem:[#allocation6 + $0x18] sm:$0xff]  ;;  %v7073_v10 = vld [vmem:[#allocation6 + $0x20] sm:$0xff]  ;;  %s6825_s16 = smov 112   ;;  %s6826_s19 = smov 80   ;;  %vm1300_vm8 = vcmask 261248  }
  0x46   : > { %710 = vperm.xlu0 %6323, %v7059_v5   ;;  %661 = vmatpush.msra.mxu0 %v7061_v6  ;;  %v7075_v11 = vld [vmem:[#allocation6 + $0x28] sm:$0xff]  ;;  %v7077_v12 = vld [vmem:[#allocation6] sm:$0xff]  ;;  %v7083_v14 = vld [vmem:[#allocation6 + $0x10] sm:$0xff]  ;;  %vm1622_vm13 = vcmask 392448   ;;  %s6830_s22 = smov 16   ;;  %s6833_s18 = smov 48  }
  0x47   : > { %681 = vmatpush.msra.mxu1 %v7063_v7  ;;  %701 = vmatpush.msra.mxu2 %v7067_v8  ;;  %v7081_v13 = vld [vmem:[#allocation6 + $0x8] sm:$0xff]  ;;  %v7103_v40 = vld [vmem:[#allocation8 + $0x18] sm:$0xff]  ;;  %v7106_v41 = vld [vmem:[#allocation8 + $0x10] sm:$0xff]  ;;  %s5848_s20 = sshll.u32 %s7048_s13, 4  ;;  %s5833_s24 = scalar_lea.sflag [#allocation5], %s581_s2  ;;  %s5849_s20 = int_to_ptr.vmem [resolvable:$true] %s5848_s20 }
  0x48   : > { %662 = vmatpush.msra.mxu0 %v7069_v9  ;;  %799 = vmatpush.msra.mxu3 %v7103_v40  ;;  %v7109_v42 = vld [vmem:[#allocation8 + $0x8] sm:$0xff]  ;;  %v7111_v43 = vld [vmem:[#allocation8] sm:$0xff]  ;;  %v7129_v47 = vld [vmem:[%s8568_s5 + $0x8] sm:$0xff] }
  0x49   : > { %682 = vmatpush.msra.mxu1 %v7073_v10  ;;  %702 = vmatpush.msra.mxu2 %v7075_v11  ;;  %v641_v15 = vld [vmem:[#allocation2] sm:$0xff]  ;;  %v7117_v44 = vld [vmem:[%s8568_s5 + $0x18] sm:$0xff]  ;;  %v7122_v45 = vld [vmem:[%s8568_s5 + $0x10] sm:$0xff] }
  0x4a   : > { %663 = vmatpush.msra.mxu0 %v7077_v12  ;;  %800 = vmatpush.msra.mxu3 %v7106_v41 }
  0x4b   : > { %683 = vmatpush.msra.mxu1 %v7081_v13  ;;  %703 = vmatpush.msra.mxu2 %v7083_v14 }
  0x4c   : > { %6029 = vmatmul.msk.f32.vlgmr.msra.gmra.mxu0 %vm644_vm1, %v641_v15  ;;  %6030 = vmatmul.msk.f32.vlgmr.msra.gmra.mxu1 %vm644_vm1, %v641_v15 }
  0x4d   : > { %6031 = vmatmul.msk.f32.vlgmr.msra.gmra.mxu2 %vm644_vm1, %v641_v15  ;;  %801 = vmatpush.msra.mxu3 %v7109_v42 }
  0x4e   : > { %823 = vmatpush.msrb.mxu0 %v7117_v44 }
  0x4f   : > { %802 = vmatpush.msra.mxu3 %v7111_v43 }
  0x50   : > { %824 = vmatpush.msrb.mxu0 %v7122_v45 }
  0x52   : > { %825 = vmatpush.msrb.mxu0 %v7129_v47 }
  0xb8   : > { %v711_v16 = vpop.permute.xlu0 %710 }
  0xb9   : > { %v715_v17 = vmul.f32 %v711_v16, %v711_v16 }
  0xbb   : > { %v722_v18 = vmul.f32 %v715_v17, %v711_v16 }
  0xbd   : > { %v729_v19 = vmul.f32 %v722_v18, %v711_v16 }
  0xbf   : > { %v736_v20 = vmul.f32 %v729_v19, %v711_v16 }
  0xc1   : > { %v739_v21 = vmul.f32 %v736_v20, %v711_v16 }
  0xc3   : > { %v746_v22 = vmul.f32 %v739_v21, %v711_v16 }
  0xc5   : > { %v753_v23 = vmul.f32 %v746_v22, %v711_v16 }
  0xc7   : > { %v760_v29 = vmul.f32 %v753_v23, %v711_v16 }
  0xc9   : > { %v665_v24 = vpop.f32.mrf.mxu0  ;;  %v685_v25 = vpop.f32.mrf.mxu1  ;;  %v763_v30 = vmul.f32 %v760_v29, %v711_v16 }
  0xca   : > { %v740_v26 = vmul.f32 %v739_v21, %v685_v25  ;;  %v723_v27 = vmul.f32 %v722_v18, %v665_v24  ;;  %v716_v28 = vmul.f32 %v715_v17, %v665_v24  ;;  %v747_v31 = vmul.f32 %v746_v22, %v685_v25 }
  0xcb   : > { %v730_v32 = vmul.f32 %v729_v19, %v665_v24  ;;  %v754_v33 = vmul.f32 %v753_v23, %v685_v25  ;;  %v770_v34 = vmul.f32 %v763_v30, %v711_v16  ;;  %v713_v46 = vmul.f32 %v711_v16, %v665_v24  ;;  %v6339_v23 = vld [vmem:[%s8569_s6] ss:$0 sm:$0xff] }
  0xcc   : > { %742 = vrot.lane.b32.xlu2 %v740_v26, %s6822_s30  ;;  %725 = vrot.lane.b32.xlu1 %v723_v27, %s6823_s21  ;;  %v737_v55 = vmul.f32 %v736_v20, %v685_v25  ;;  %v7137_v20 = vld [vmem:[%s8568_s5] sm:$0xff]  ;;  %v7154_v25 = vld [vmem:[#allocation9 + $0x18] sm:$0xff]  ;;  %v7159_v27 = vld [vmem:[#allocation9 + $0x8] sm:$0xff] }
  0xcd   : > { %718 = vrot.lane.b32.xlu0 %v716_v28, %s6822_s30  ;;  %v777_v36 = vmul.f32 %v770_v34, %v711_v16  ;;  %v714_v50 = vadd.f32 %v713_v46, %v641_v15  ;;  %826 = vmatpush.msrb.mxu0 %v7137_v20  ;;  %v7156_v26 = vld [vmem:[#allocation9 + $0x10] sm:$0xff] }
  0xce   : > { %871 = vmatpush.msrb.mxu1 %v7154_v25 }
  0xcf   : > { %997 = vmatpush.msra.mxu0 %v7051_v1 }
  0xd0   : > { %v705_v35 = vpop.f32.mrf.mxu2  ;;  %872 = vmatpush.msrb.mxu1 %v7156_v26 }
  0xd1   : > { %v771_v37 = vmul.f32 %v770_v34, %v705_v35  ;;  %v764_v38 = vmul.f32 %v763_v30, %v705_v35  ;;  %v778_v39 = vmul.f32 %v777_v36, %v705_v35  ;;  %v761_v63 = vmul.f32 %v760_v29, %v705_v35  ;;  %998 = vmatpush.msra.mxu0 %v7061_v6 }
  0xd2   : > { %873 = vmatpush.msrb.mxu1 %v7159_v27 }
  0xd3   : > { %999 = vmatpush.msra.mxu0 %v7069_v9 }
  0xd4   : > { %749 = vrot.lane.b32.xlu2 %v747_v31, %s6823_s21  ;;  %732 = vrot.lane.b32.xlu1 %v730_v32, %s6824_s17  ;;  %v7168_v32 = vld [vmem:[#allocation9] sm:$0xff] }
  0xd5   : > { %756 = vrot.lane.b32.xlu0 %v754_v33, %s6824_s17  ;;  %1000 = vmatpush.msra.mxu0 %v7077_v12  ;;  %v7176_v33 = vld [vmem:[%s7046_s23] sm:$0xff] }
  0xd6   : > { %874 = vmatpush.msrb.mxu1 %v7168_v32  ;;  %vm842_vm2 = vcmp.ne.f32.partialorder %v7176_v33, %v7176_v33 }
  0xd8   : > { %1017 = vmatpush.msra.mxu1 %v7053_v2 }
  0xda   : > { %1018 = vmatpush.msra.mxu1 %v7063_v7 }
  0xdc   : > { %773 = vrot.lane.b32.xlu2 %v771_v37, %s6823_s21  ;;  %766 = vrot.lane.b32.xlu1 %v764_v38, %s6822_s30  ;;  %v7195_v38 = vld [vmem:[%s8571_s8] ss:$0 sm:$0xff] }
  0xdd   : > { %780 = vrot.lane.b32.xlu0 %v778_v39, %s6824_s17  ;;  %1019 = vmatpush.msra.mxu1 %v7073_v10 }
  0xdf   : > { %1020 = vmatpush.msra.mxu1 %v7081_v13 }
  0xe4   : > { %838 = vrot.lane.b32.xlu2 %v6339_v23, %s6824_s17  ;;  %v6341_v23 = vld [vmem:[%s8574_s11] ss:$0 sm:$0xff] }
 0x126   : > { %v743_v51 = vpop.permute.xlu2 %742 }
 0x12e   : > { %v750_v58 = vpop.permute.xlu2 %749 }
 0x136   : > { %v774_v17 = vpop.permute.xlu2 %773 }
 0x13e   : > { %v726_v48 = vpop.permute.xlu1 %725  ;;  %v7163_v29 = vpop.permute.xlu2 %838 }
 0x13f   : > { %v719_v49 = vpop.permute.xlu0 %718 }
 0x140   : > { %v721_v52 = vadd.f32 %v719_v49, %v714_v50 }
 0x142   : > { %v728_v53 = vadd.f32 %v726_v48, %v721_v52 }
 0x146   : > { %v733_v54 = vpop.permute.xlu1 %732 }
 0x147   : > { %v735_v56 = vadd.f32 %v733_v54, %v728_v53  ;;  %v757_v60 = vpop.permute.xlu0 %756 }
 0x149   : > { %v738_v57 = vadd.f32 %v737_v55, %v735_v56 }
 0x14b   : > { %v745_v59 = vadd.f32 %v743_v51, %v738_v57 }
 0x14d   : > { %v752_v61 = vadd.f32 %v750_v58, %v745_v59 }
 0x14e   : > { %v767_v4 = vpop.permute.xlu1 %766 }
 0x14f   : > { %v759_v62 = vadd.f32 %v757_v60, %v752_v61  ;;  %v781_v19 = vpop.permute.xlu0 %780 }
 0x151   : > { %v762_v0 = vadd.f32 %v761_v63, %v759_v62 }
 0x153   : > { %v769_v16 = vadd.f32 %v767_v4, %v762_v0 }
 0x155   : > { %v776_v18 = vadd.f32 %v774_v17, %v769_v16  ;;  %v7201_v16 = vld [vmem:[#allocation11 + $0x8] sm:$0xff]  ;;  %v7203_v17 = vld [vmem:[#allocation11] sm:$0xff] }
 0x156   : > { %936 = vmatpush.msrb.mxu2 %v7201_v16 }
 0x157   : > { %v783_v15 = vadd.f32 %v781_v19, %v776_v18 }
 0x158   : > { %937 = vmatpush.msrb.mxu2 %v7203_v17 }
 0x159   : > { %6032 = vmatmul.msk.f32.vlgmr.msra.gmra.mxu3 %vm644_vm1, %v783_v15 }
 0x15a   : > { %1037 = vmatpush.msra.mxu2 %v7055_v3 }
 0x15c   : > { %1038 = vmatpush.msra.mxu2 %v7067_v8 }
 0x15e   : > { %1039 = vmatpush.msra.mxu2 %v7075_v11 }
 0x160   : > { %1040 = vmatpush.msra.mxu2 %v7083_v14 }
 0x1dc   : > { %v804_v21 = vpop.f32.mrf.mxu3 }
 0x1dd   : > { %v807_v22 = vmax.f32 %v804_v21, 0.0 }
 0x1df   : > { %6033 = vmatmul.msk.f32.vlgmr.msrb.gmra.mxu0 %vm644_vm1, %v807_v22 }
 0x1e0   : > { %1160 = vmatpush.msrb.mxu0 %v7117_v44 }
 0x1e2   : > { %1161 = vmatpush.msrb.mxu0 %v7122_v45 }
 0x1e4   : > { %1162 = vmatpush.msrb.mxu0 %v7129_v47 }
 0x1e6   : > { %1163 = vmatpush.msrb.mxu0 %v7137_v20 }
 0x25c   : > { %v828_v24 = vpop.f32.mrf.mxu0 }
 0x25d   : > { %832 = vrot.lane.b32.xlu1 %v828_v24, %s6824_s17 }
 0x2cf   : > { %v833_v28 = vpop.permute.xlu1 %832 }
 0x2d0   : > { %v835_v30 = vadd.f32 %v833_v28, %v804_v21  ;;  %v7219_v28 = vld [vmem:[#allocation12 + $0x18] sm:$0xff] }
 0x2d1   : > { %970 = vmatpush.msrb.mxu3 %v7219_v28 }
 0x2d2   : > { %v841_v31 = vadd.f32 %v7163_v29, %v835_v30  ;;  %v7221_v30 = vld [vmem:[#allocation12 + $0x10] sm:$0xff] }
 0x2d3   : > { %971 = vmatpush.msrb.mxu3 %v7221_v30 }
 0x2d4   : > { %848 = vrot.lane.b32.xlu1 %v841_v31, %s6825_s16  ;;  %844 = vrot.lane.b32.xlu0 %v841_v31, %s6822_s30  ;;  %v7224_v31 = vld [vmem:[#allocation12 + $0x8] sm:$0xff] }
 0x2d5   : > { %972 = vmatpush.msrb.mxu3 %v7224_v31 }
 0x346   : > { %v849_v34 = vpop.permute.xlu1 %848  ;;  %v845_v35 = vpop.permute.xlu0 %844 }
 0x347   : > { %v847_v36 = vsel %vm842_vm2, %v845_v35, %v7176_v33  ;;  %979 = vst.msk [vmem:[%s7048_s13] sm:$0xff] %vm851_vm3, %v845_v35 }
 0x348   : > { %v852_v37 = vsel %vm851_vm3, %v847_v36, %v849_v34 }
 0x349   : > { %6034 = vmatmul.msk.f32.vlgmr.msrb.gmra.mxu1 %vm644_vm1, %v852_v37 }
 0x34a   : > { %1200 = vmatpush.msrb.mxu1 %v7154_v25 }
 0x34c   : > { %1201 = vmatpush.msrb.mxu1 %v7156_v26 }
 0x34e   : > { %1202 = vmatpush.msrb.mxu1 %v7159_v27 }
 0x350   : > { %1203 = vmatpush.msrb.mxu1 %v7168_v32 }
 0x3c6   : > { %v876_v39 = vpop.f32.mrf.mxu1 }
 0x3c7   : > { %v877_v46 = vadd.f32 %v7195_v38, %v876_v39 }
 0x3c9   : > { %899 = vrot.lane.b32.xlu2 %v877_v46, %s6826_s19  ;;  %v6035_v48 = vmul.f32 -1.442695, %v877_v46 }
 0x3cb   : > { %6343 = vpow2.f32 %v6035_v48  ;;  %v6827_v48 = vmov 1  }
 0x3cc   : > { %6324 = vset.pattern.permute.xlu2 %v6827_v48 }
 0x3d1   : > { %v6344_v49 = vpop.eup %6343 }
 0x3d2   : > { %v882_v50 = vadd.f32 1.0, %v6344_v49  ;;  %v7248_v49 = vld [vmem:[%s8573_s10] ss:$0 sm:$0xff] }
 0x3d4   : > { %6345 = vrcp.f32 %v882_v50  ;;  %v894_v56 = vand.u32 2147483648, %v882_v50  ;;  %vm888_vm5 = vweird.f32 %v882_v50  ;;  %v892_v57 = vand.u32 2147483647, %v882_v50 }
 0x3d6   : > { %v895_v59 = vor.u32 1.1754944e-38, %v894_v56  ;;  %vm893_vm7 = vcmp.eq.f32.partialorder %v892_v57, 8.507059e+37 }
 0x3da   : > { %v6346_v51 = vpop.eup %6345 }
 0x3db   : > { %v884_v52 = vmul.f32 %v6346_v51, %v882_v50  ;;  %vm889_vm4 = vweird.f32 %v6346_v51 }
 0x3dc   : > { %vm890_vm6 = vmor %vm888_vm5, %vm889_vm4  ;;  %vm1947_vm5 = vcmask 523648  }
 0x3dd   : > { %v885_v53 = vsub.f32 1.0, %v884_v52 }
 0x3df   : > { %v886_v54 = vmul.f32 %v6346_v51, %v885_v53 }
 0x3e1   : > { %v887_v55 = vadd.f32 %v6346_v51, %v886_v54 }
 0x3e3   : > { %v891_v58 = vsel %vm890_vm6, %v6346_v51, %v887_v55 }
 0x3e4   : > { %v896_v61 = vsel %vm893_vm7, %v895_v59, %v891_v58 }
 0x3e5   : > { %v909_v18 = vsub.f32 1.0, %v896_v61  ;;  %v915_v15 = vmul.f32 %v896_v61, %v849_v34  ;;  %v7227_v34 = vld [vmem:[#allocation12] sm:$0xff] }
 0x3e6   : > { %973 = vmatpush.msrb.mxu3 %v7227_v34 }
 0x3e8   : > { %1136 = vmatpush.msra.mxu3 %v7103_v40 }
 0x3ea   : > { %1137 = vmatpush.msra.mxu3 %v7106_v41 }
 0x3ec   : > { %1138 = vmatpush.msra.mxu3 %v7109_v42 }
 0x3ee   : > { %1139 = vmatpush.msra.mxu3 %v7111_v43 }
 0x423   : > { %v900_v60 = vpop.permute.xlu2 %899 }
 0x424   : > { %v902_v62 = vmul.f32 %v900_v60, %v896_v61 }
 0x426   : > { %904 = vrot.lane.b32.xlu0 %v902_v62, %s6824_s17 }
 0x42e   : > { %948 = vrot.lane.b32.xlu0 %v6341_v23, %s6824_s17 }
 0x498   : > { %v905_v63 = vpop.permute.xlu0 %904 }
 0x499   : > { %v907_v0 = vadd.f32 %v905_v63, %v877_v46 }
 0x49b   : > { %6347 = vtanh.f32 %v907_v0 }
 0x4a0   : > { %v7235_v35 = vpop.permute.xlu0 %948 }
 0x4a1   : > { %v6348_v4 = vpop.eup %6347 }
 0x4a2   : > { %911 = vrot.lane.b32.xlu1 %v6348_v4, %s6825_s16 }
 0x514   : > { %v912_v19 = vpop.permute.xlu1 %911 }
 0x515   : > { %v914_v21 = vmul.f32 %v912_v19, %v909_v18 }
 0x517   : > { %v916_v22 = vadd.f32 %v915_v15, %v914_v21 }
 0x519   : > { %918 = vrot.lane.b32.xlu2 %v916_v22, %s6825_s16 }
 0x521   : > { %1047 = vperm.xlu2 %6324, %v7059_v5  }
 0x573   : > { %v919_v24 = vpop.permute.xlu2 %918 }
 0x574   : > { %6036 = vmatmul.msk.f32.vlgmr.msrb.gmra.mxu2 %vm851_vm3, %v919_v24 }
 0x575   : > { %1265 = vmatpush.msrb.mxu2 %v7201_v16 }
 0x577   : > { %1266 = vmatpush.msrb.mxu2 %v7203_v17 }
 0x57b   : > { %v1048_v53 = vpop.permute.xlu2 %1047 }
 0x57c   : > { %v1052_v54 = vmul.f32 %v1048_v53, %v1048_v53 }
 0x57e   : > { %v1059_v55 = vmul.f32 %v1052_v54, %v1048_v53 }
 0x580   : > { %v1066_v56 = vmul.f32 %v1059_v55, %v1048_v53 }
 0x582   : > { %v1073_v57 = vmul.f32 %v1066_v56, %v1048_v53 }
 0x584   : > { %v1076_v58 = vmul.f32 %v1073_v57, %v1048_v53 }
 0x586   : > { %v1083_v59 = vmul.f32 %v1076_v58, %v1048_v53 }
 0x588   : > { %v1090_v60 = vmul.f32 %v1083_v59, %v1048_v53 }
 0x58a   : > { %v1097_v4 = vmul.f32 %v1090_v60, %v1048_v53 }
 0x58c   : > { %v1100_v19 = vmul.f32 %v1097_v4, %v1048_v53 }
 0x58e   : > { %v1107_v23 = vmul.f32 %v1100_v19, %v1048_v53 }
 0x5f7   : > { %v939_v36 = vpop.f32.mrf.mxu2 }
 0x5f8   : > { %v951_v37 = vadd.f32 %v7235_v35, %v939_v36  ;;  %v945_v50 = vadd.f32 %v7248_v49, %v939_v36  ;;  %v1114_v36 = vmul.f32 %v1107_v23, %v1048_v53 }
 0x5fa   : > { %v952_v39 = vmax.f32 %v951_v37, 0.0 }
 0x5fc   : > { %954 = vrot.lane.b32.xlu1 %v952_v39, %s6822_s30 }
 0x66e   : > { %v955_v46 = vpop.permute.xlu1 %954 }
 0x66f   : > { %6037 = vmatmul.msk.f32.vlgmr.msrb.gmra.mxu3 %vm644_vm1, %v955_v46 }
 0x670   : > { %1291 = vmatpush.msrb.mxu3 %v7219_v28 }
 0x672   : > { %1292 = vmatpush.msrb.mxu3 %v7221_v30 }
 0x674   : > { %1293 = vmatpush.msrb.mxu3 %v7224_v31 }
 0x676   : > { %1294 = vmatpush.msrb.mxu3 %v7227_v34 }
 0x6f2   : > { %v975_v51 = vpop.f32.mrf.mxu3 }
 0x6f3   : > { %v978_v52 = vadd.f32 %v975_v51, %v945_v50 }
 0x6f5   : > { %6038 = vmatmul.msk.f32.vlgmr.msra.gmra.mxu0 %vm644_vm1, %v978_v52  ;;  %6039 = vmatmul.msk.f32.vlgmr.msra.gmra.mxu1 %vm644_vm1, %v978_v52 }
 0x6f6   : > { %6040 = vmatmul.msk.f32.vlgmr.msra.gmra.mxu2 %vm644_vm1, %v978_v52  ;;  %1319 = vmatpush.msra.mxu0 %v7051_v1 }
 0x6f7   : > { %1339 = vmatpush.msra.mxu1 %v7053_v2  ;;  %1359 = vmatpush.msra.mxu2 %v7055_v3 }
 0x6f8   : > { %1320 = vmatpush.msra.mxu0 %v7061_v6 }
 0x6f9   : > { %1340 = vmatpush.msra.mxu1 %v7063_v7  ;;  %1360 = vmatpush.msra.mxu2 %v7067_v8 }
 0x6fa   : > { %1321 = vmatpush.msra.mxu0 %v7069_v9 }
 0x6fb   : > { %1341 = vmatpush.msra.mxu1 %v7073_v10  ;;  %1361 = vmatpush.msra.mxu2 %v7075_v11 }
 0x6fc   : > { %1322 = vmatpush.msra.mxu0 %v7077_v12 }
 0x6fd   : > { %1342 = vmatpush.msra.mxu1 %v7081_v13  ;;  %1362 = vmatpush.msra.mxu2 %v7083_v14 }
 0x772   : > { %v1002_v61 = vpop.f32.mrf.mxu0  ;;  %v1022_v18 = vpop.f32.mrf.mxu1 }
 0x773   : > { %v1067_v62 = vmul.f32 %v1066_v56, %v1002_v61  ;;  %v1060_v63 = vmul.f32 %v1059_v55, %v1002_v61  ;;  %v1053_v0 = vmul.f32 %v1052_v54, %v1002_v61  ;;  %v1091_v15 = vmul.f32 %v1090_v60, %v1022_v18 }
 0x774   : > { %v1084_v21 = vmul.f32 %v1083_v59, %v1022_v18  ;;  %v1077_v22 = vmul.f32 %v1076_v58, %v1022_v18  ;;  %v1050_v48 = vmul.f32 %v1048_v53, %v1002_v61  ;;  %v1074_v59 = vmul.f32 %v1073_v57, %v1022_v18 }
 0x775   : > { %1069 = vrot.lane.b32.xlu2 %v1067_v62, %s6824_s17  ;;  %1062 = vrot.lane.b32.xlu1 %v1060_v63, %s6823_s21 }
 0x776   : > { %1055 = vrot.lane.b32.xlu0 %v1053_v0, %s6822_s30  ;;  %v1051_v51 = vadd.f32 %v1050_v48, %v978_v52 }
 0x779   : > { %v1042_v24 = vpop.f32.mrf.mxu2 }
 0x77a   : > { %v1115_v37 = vmul.f32 %v1114_v36, %v1042_v24  ;;  %v1108_v39 = vmul.f32 %v1107_v23, %v1042_v24  ;;  %v1101_v46 = vmul.f32 %v1100_v19, %v1042_v24 }
 0x77d   : > { %1093 = vrot.lane.b32.xlu2 %v1091_v15, %s6824_s17  ;;  %1086 = vrot.lane.b32.xlu1 %v1084_v21, %s6823_s21 }
 0x77e   : > { %1079 = vrot.lane.b32.xlu0 %v1077_v22, %s6822_s30  ;;  %v1098_v22 = vmul.f32 %v1097_v4, %v1042_v24 }
 0x785   : > { %1117 = vrot.lane.b32.xlu2 %v1115_v37, %s6824_s17  ;;  %1110 = vrot.lane.b32.xlu1 %v1108_v39, %s6823_s21 }
 0x786   : > { %1103 = vrot.lane.b32.xlu0 %v1101_v46, %s6822_s30 }
 0x7cf   : > { %v1070_v54 = vpop.permute.xlu2 %1069 }
 0x7d7   : > { %v1094_v19 = vpop.permute.xlu2 %1093 }
 0x7df   : > { %v1118_v52 = vpop.permute.xlu2 %1117 }
 0x7e7   : > { %v1063_v50 = vpop.permute.xlu1 %1062 }
 0x7e8   : > { %v1056_v55 = vpop.permute.xlu0 %1055 }
 0x7e9   : > { %v1058_v56 = vadd.f32 %v1056_v55, %v1051_v51 }
 0x7eb   : > { %v1065_v58 = vadd.f32 %v1063_v50, %v1058_v56 }
 0x7ed   : > { %v1072_v60 = vadd.f32 %v1070_v54, %v1065_v58 }
 0x7ef   : > { %v1075_v62 = vadd.f32 %v1074_v59, %v1072_v60  ;;  %v1087_v63 = vpop.permute.xlu1 %1086 }
 0x7f0   : > { %v1080_v0 = vpop.permute.xlu0 %1079 }
 0x7f1   : > { %v1082_v15 = vadd.f32 %v1080_v0, %v1075_v62 }
 0x7f3   : > { %v1089_v21 = vadd.f32 %v1087_v63, %v1082_v15 }
 0x7f5   : > { %v1096_v23 = vadd.f32 %v1094_v19, %v1089_v21 }
 0x7f7   : > { %v1099_v36 = vadd.f32 %v1098_v22, %v1096_v23  ;;  %v1111_v53 = vpop.permute.xlu1 %1110 }
 0x7f8   : > { %v1104_v37 = vpop.permute.xlu0 %1103 }
 0x7f9   : > { %v1106_v39 = vadd.f32 %v1104_v37, %v1099_v36 }
 0x7fb   : > { %v1113_v61 = vadd.f32 %v1111_v53, %v1106_v39 }
 0x7fd   : > { %v1120_v46 = vadd.f32 %v1118_v52, %v1113_v61 }
 0x7ff   : > { %6041 = vmatmul.msk.f32.vlgmr.msra.gmra.mxu3 %vm644_vm1, %v1120_v46 }
 0x800   : > { %1458 = vmatpush.msra.mxu3 %v7103_v40 }
 0x802   : > { %1459 = vmatpush.msra.mxu3 %v7106_v41 }
 0x804   : > { %1460 = vmatpush.msra.mxu3 %v7109_v42 }
 0x806   : > { %1461 = vmatpush.msra.mxu3 %v7111_v43 }
 0x882   : > { %v1141_v57 = vpop.f32.mrf.mxu3 }
 0x883   : > { %v1144_v4 = vmax.f32 %v1141_v57, 0.0 }
 0x885   : > { %6042 = vmatmul.msk.f32.vlgmr.msrb.gmra.mxu0 %vm644_vm1, %v1144_v4 }
 0x886   : > { %1482 = vmatpush.msrb.mxu0 %v7117_v44 }
 0x888   : > { %1483 = vmatpush.msrb.mxu0 %v7122_v45 }
 0x88a   : > { %1484 = vmatpush.msrb.mxu0 %v7129_v47 }
 0x88c   : > { %1485 = vmatpush.msrb.mxu0 %v7137_v20 }
 0x902   : > { %v1165_v18 = vpop.f32.mrf.mxu0 }
 0x903   : > { %1169 = vrot.lane.b32.xlu0 %v1165_v18, %s6824_s17 }
 0x975   : > { %v1170_v24 = vpop.permute.xlu0 %1169 }
 0x976   : > { %v1172_v48 = vadd.f32 %v1170_v24, %v1141_v57 }
 0x978   : > { %v1173_v50 = vadd.f32 %v1172_v48, %v7163_v29 }
 0x97a   : > { %1176 = vrot.lane.b32.xlu1 %v1173_v50, %s6825_s16 }
 0x9ec   : > { %v1177_v51 = vpop.permute.xlu1 %1176 }
 0x9ed   : > { %v1179_v54 = vsel %vm842_vm2, %v1177_v51, %v7176_v33  ;;  %1301 = vst.msk [vmem:[%s7048_s13] sm:$0xff] %vm1300_vm8, %v1177_v51 }
 0x9ee   : > { %1181 = vrot.lane.b32.xlu2 %v1179_v54, %s6825_s16 }
 0xa48   : > { %v1182_v55 = vpop.permute.xlu2 %1181 }
 0xa49   : > { %v1184_v56 = vsel %vm851_vm3, %v1182_v55, %v1177_v51 }
 0xa4a   : > { %6043 = vmatmul.msk.f32.vlgmr.msrb.gmra.mxu1 %vm644_vm1, %v1184_v56 }
 0xa4b   : > { %1522 = vmatpush.msrb.mxu1 %v7154_v25 }
 0xa4d   : > { %1523 = vmatpush.msrb.mxu1 %v7156_v26 }
 0xa4f   : > { %1524 = vmatpush.msrb.mxu1 %v7159_v27 }
 0xa51   : > { %1525 = vmatpush.msrb.mxu1 %v7168_v32 }
 0xac7   : > { %v1205_v58 = vpop.f32.mrf.mxu1 }
 0xac8   : > { %v1206_v59 = vadd.f32 %v7195_v38, %v1205_v58 }
 0xaca   : > { %1228 = vrot.lane.b32.xlu0 %v1206_v59, %s6826_s19  ;;  %v6044_v60 = vmul.f32 -1.442695, %v1206_v59 }
 0xacc   : > { %6349 = vpow2.f32 %v6044_v60 }
 0xad2   : > { %v6350_v62 = vpop.eup %6349 }
 0xad3   : > { %v1211_v63 = vadd.f32 1.0, %v6350_v62 }
 0xad5   : > { %6351 = vrcp.f32 %v1211_v63  ;;  %v1223_v23 = vand.u32 2147483648, %v1211_v63  ;;  %vm1217_vm10 = vweird.f32 %v1211_v63  ;;  %v1221_v36 = vand.u32 2147483647, %v1211_v63 }
 0xad7   : > { %v1224_v39 = vor.u32 1.1754944e-38, %v1223_v23  ;;  %vm1222_vm12 = vcmp.eq.f32.partialorder %v1221_v36, 8.507059e+37 }
 0xadb   : > { %v6352_v0 = vpop.eup %6351 }
 0xadc   : > { %v1213_v15 = vmul.f32 %v6352_v0, %v1211_v63  ;;  %vm1218_vm9 = vweird.f32 %v6352_v0 }
 0xadd   : > { %vm1219_vm11 = vmor %vm1217_vm10, %vm1218_vm9  ;;  %vm2272_vm10 = vcmask 654848  }
 0xade   : > { %v1214_v19 = vsub.f32 1.0, %v1213_v15 }
 0xae0   : > { %v1215_v21 = vmul.f32 %v6352_v0, %v1214_v19 }
 0xae2   : > { %v1216_v22 = vadd.f32 %v6352_v0, %v1215_v21 }
 0xae4   : > { %v1220_v37 = vsel %vm1219_vm11, %v6352_v0, %v1216_v22 }
 0xae5   : > { %v1225_v61 = vsel %vm1222_vm12, %v1224_v39, %v1220_v37 }
 0xae6   : > { %v1238_v18 = vsub.f32 1.0, %v1225_v61  ;;  %v1244_v48 = vmul.f32 %v1225_v61, %v1177_v51  ;;  %v6828_v51 = vmov 2  }
 0xae7   : > { %6325 = vset.pattern.permute.xlu2 %v6828_v51 }
 0xb3c   : > { %v1229_v53 = vpop.permute.xlu0 %1228 }
 0xb3d   : > { %v1231_v52 = vmul.f32 %v1229_v53, %v1225_v61 }
 0xb3f   : > { %1233 = vrot.lane.b32.xlu1 %v1231_v52, %s6824_s17 }
 0xbb1   : > { %v1234_v46 = vpop.permute.xlu1 %1233 }
 0xbb2   : > { %v1236_v57 = vadd.f32 %v1234_v46, %v1206_v59 }
 0xbb4   : > { %6353 = vtanh.f32 %v1236_v57 }
 0xbba   : > { %v6354_v4 = vpop.eup %6353 }
 0xbbb   : > { %1240 = vrot.lane.b32.xlu2 %v6354_v4, %s6825_s16 }
 0xbc3   : > { %1369 = vperm.xlu2 %6325, %v7059_v5  }
 0xc15   : > { %v1241_v24 = vpop.permute.xlu2 %1240 }
 0xc16   : > { %v1243_v50 = vmul.f32 %v1241_v24, %v1238_v18 }
 0xc18   : > { %v1245_v54 = vadd.f32 %v1244_v48, %v1243_v50 }
 0xc1a   : > { %1247 = vrot.lane.b32.xlu0 %v1245_v54, %s6825_s16 }
 0xc8c   : > { %v1248_v55 = vpop.permute.xlu0 %1247 }
 0xc8d   : > { %6045 = vmatmul.msk.f32.vlgmr.msrb.gmra.mxu2 %vm851_vm3, %v1248_v55 }
 0xc8e   : > { %1587 = vmatpush.msrb.mxu2 %v7201_v16 }
 0xc90   : > { %1588 = vmatpush.msrb.mxu2 %v7203_v17 }
 0xd10   : > { %v1268_v56 = vpop.f32.mrf.mxu2 }
 0xd11   : > { %v1272_v58 = vadd.f32 %v1268_v56, %v7235_v35  ;;  %v1271_v62 = vadd.f32 %v7248_v49, %v1268_v56 }
 0xd13   : > { %v1273_v59 = vmax.f32 %v1272_v58, 0.0 }
 0xd15   : > { %1275 = vrot.lane.b32.xlu1 %v1273_v59, %s6822_s30 }
 0xd87   : > { %v1276_v60 = vpop.permute.xlu1 %1275 }
 0xd88   : > { %6046 = vmatmul.msk.f32.vlgmr.msrb.gmra.mxu3 %vm644_vm1, %v1276_v60 }
 0xd89   : > { %1613 = vmatpush.msrb.mxu3 %v7219_v28 }
 0xd8b   : > { %1614 = vmatpush.msrb.mxu3 %v7221_v30 }
 0xd8d   : > { %1615 = vmatpush.msrb.mxu3 %v7224_v31 }
 0xd8f   : > { %1616 = vmatpush.msrb.mxu3 %v7227_v34 }
 0xe0b   : > { %v1296_v63 = vpop.f32.mrf.mxu3 }
 0xe0c   : > { %v1299_v0 = vadd.f32 %v1296_v63, %v1271_v62 }
 0xe0e   : > { %6047 = vmatmul.msk.f32.vlgmr.msra.gmra.mxu0 %vm644_vm1, %v1299_v0  ;;  %6048 = vmatmul.msk.f32.vlgmr.msra.gmra.mxu1 %vm644_vm1, %v1299_v0 }
 0xe0f   : > { %6049 = vmatmul.msk.f32.vlgmr.msra.gmra.mxu2 %vm644_vm1, %v1299_v0  ;;  %1641 = vmatpush.msra.mxu0 %v7051_v1  ;;  %v1370_v1 = vpop.permute.xlu2 %1369 }
 0xe10   : > { %1661 = vmatpush.msra.mxu1 %v7053_v2  ;;  %1681 = vmatpush.msra.mxu2 %v7055_v3  ;;  %v1374_v2 = vmul.f32 %v1370_v1, %v1370_v1 }
 0xe11   : > { %1642 = vmatpush.msra.mxu0 %v7061_v6 }
 0xe12   : > { %1662 = vmatpush.msra.mxu1 %v7063_v7  ;;  %1682 = vmatpush.msra.mxu2 %v7067_v8  ;;  %v1381_v3 = vmul.f32 %v1374_v2, %v1370_v1 }
 0xe13   : > { %1643 = vmatpush.msra.mxu0 %v7069_v9 }
 0xe14   : > { %1663 = vmatpush.msra.mxu1 %v7073_v10  ;;  %1683 = vmatpush.msra.mxu2 %v7075_v11  ;;  %v1388_v5 = vmul.f32 %v1381_v3, %v1370_v1 }
 0xe15   : > { %1644 = vmatpush.msra.mxu0 %v7077_v12 }
 0xe16   : > { %1664 = vmatpush.msra.mxu1 %v7081_v13  ;;  %1684 = vmatpush.msra.mxu2 %v7083_v14  ;;  %v1395_v6 = vmul.f32 %v1388_v5, %v1370_v1 }
 0xe18   : > { %v1398_v7 = vmul.f32 %v1395_v6, %v1370_v1 }
 0xe1a   : > { %v1405_v15 = vmul.f32 %v1398_v7, %v1370_v1 }
 0xe1c   : > { %v1412_v8 = vmul.f32 %v1405_v15, %v1370_v1 }
 0xe1e   : > { %v1419_v11 = vmul.f32 %v1412_v8, %v1370_v1 }
 0xe20   : > { %v1422_v13 = vmul.f32 %v1419_v11, %v1370_v1 }
 0xe22   : > { %v1429_v36 = vmul.f32 %v1422_v13, %v1370_v1 }
 0xe24   : > { %v1436_v39 = vmul.f32 %v1429_v36, %v1370_v1 }
 0xe8b   : > { %v1324_v19 = vpop.f32.mrf.mxu0  ;;  %v1344_v12 = vpop.f32.mrf.mxu1 }
 0xe8c   : > { %v1389_v9 = vmul.f32 %v1388_v5, %v1324_v19  ;;  %v1382_v21 = vmul.f32 %v1381_v3, %v1324_v19  ;;  %v1375_v10 = vmul.f32 %v1374_v2, %v1324_v19  ;;  %v1413_v14 = vmul.f32 %v1412_v8, %v1344_v12 }
 0xe8d   : > { %v1406_v22 = vmul.f32 %v1405_v15, %v1344_v12  ;;  %v1399_v23 = vmul.f32 %v1398_v7, %v1344_v12  ;;  %v1372_v46 = vmul.f32 %v1370_v1, %v1324_v19  ;;  %v1396_v54 = vmul.f32 %v1395_v6, %v1344_v12 }
 0xe8e   : > { %1391 = vrot.lane.b32.xlu2 %v1389_v9, %s6824_s17  ;;  %1384 = vrot.lane.b32.xlu1 %v1382_v21, %s6823_s21 }
 0xe8f   : > { %1377 = vrot.lane.b32.xlu0 %v1375_v10, %s6822_s30  ;;  %v1373_v4 = vadd.f32 %v1372_v46, %v1299_v0 }
 0xe92   : > { %v1364_v37 = vpop.f32.mrf.mxu2 }
 0xe93   : > { %v1437_v53 = vmul.f32 %v1436_v39, %v1364_v37  ;;  %v1430_v61 = vmul.f32 %v1429_v36, %v1364_v37  ;;  %v1423_v52 = vmul.f32 %v1422_v13, %v1364_v37  ;;  %v1420_v63 = vmul.f32 %v1419_v11, %v1364_v37 }
 0xe96   : > { %1415 = vrot.lane.b32.xlu2 %v1413_v14, %s6824_s17  ;;  %1408 = vrot.lane.b32.xlu1 %v1406_v22, %s6823_s21 }
 0xe97   : > { %1401 = vrot.lane.b32.xlu0 %v1399_v23, %s6822_s30 }
 0xe9e   : > { %1439 = vrot.lane.b32.xlu2 %v1437_v53, %s6824_s17  ;;  %1432 = vrot.lane.b32.xlu1 %v1430_v61, %s6823_s21 }
 0xe9f   : > { %1425 = vrot.lane.b32.xlu0 %v1423_v52, %s6822_s30 }
 0xee8   : > { %v1392_v18 = vpop.permute.xlu2 %1391 }
 0xef0   : > { %v1416_v51 = vpop.permute.xlu2 %1415 }
 0xef8   : > { %v1440_v0 = vpop.permute.xlu2 %1439 }
 0xf00   : > { %v1385_v57 = vpop.permute.xlu1 %1384 }
 0xf01   : > { %v1378_v24 = vpop.permute.xlu0 %1377 }
 0xf02   : > { %v1380_v48 = vadd.f32 %v1378_v24, %v1373_v4 }
 0xf04   : > { %v1387_v50 = vadd.f32 %v1385_v57, %v1380_v48 }
 0xf06   : > { %v1394_v55 = vadd.f32 %v1392_v18, %v1387_v50 }
 0xf08   : > { %v1397_v56 = vadd.f32 %v1396_v54, %v1394_v55  ;;  %v1409_v58 = vpop.permute.xlu1 %1408 }
 0xf09   : > { %v1402_v59 = vpop.permute.xlu0 %1401 }
 0xf0a   : > { %v1404_v60 = vadd.f32 %v1402_v59, %v1397_v56  ;;  %v7384_v59 = vld [vmem:[%s7041_s15] sm:$0xff] }
 0xf0c   : > { %v1411_v62 = vadd.f32 %v1409_v58, %v1404_v60  ;;  %v6829_v60 = vmov 3  }
 0xf0d   : > { %6326 = vset.pattern.permute.xlu2 %v6829_v60 }
 0xf0e   : > { %v1418_v2 = vadd.f32 %v1416_v51, %v1411_v62 }
 0xf10   : > { %v1421_v3 = vadd.f32 %v1420_v63, %v1418_v2  ;;  %v1433_v1 = vpop.permute.xlu1 %1432  ;;  %v7396_v2 = vld [vmem:[#allocation6 + $0x48] sm:$0xff] }
 0xf11   : > { %v1426_v5 = vpop.permute.xlu0 %1425 }
 0xf12   : > { %v1428_v7 = vadd.f32 %v1426_v5, %v1421_v3  ;;  %v7399_v3 = vld [vmem:[#allocation6 + $0x50] sm:$0xff]  ;;  %v7402_v5 = vld [vmem:[#allocation6 + $0x58] sm:$0xff] }
 0xf14   : > { %v1435_v15 = vadd.f32 %v1433_v1, %v1428_v7  ;;  %v7405_v7 = vld [vmem:[#allocation6 + $0x30] sm:$0xff]  ;;  %v7408_v1 = vld [vmem:[#allocation6 + $0x38] sm:$0xff] }
 0xf16   : > { %v1442_v8 = vadd.f32 %v1440_v0, %v1435_v15  ;;  %v7411_v15 = vld [vmem:[#allocation6 + $0x40] sm:$0xff]  ;;  %v7414_v0 = vld [vmem:[#allocation6 + $0x18] sm:$0xff] }
 0xf18   : > { %6050 = vmatmul.msk.f32.vlgmr.msra.gmra.mxu3 %vm644_vm1, %v1442_v8  ;;  %v7417_v8 = vld [vmem:[#allocation6 + $0x20] sm:$0xff] }
 0xf19   : > { %1780 = vmatpush.msra.mxu3 %v7103_v40 }
 0xf1b   : > { %1781 = vmatpush.msra.mxu3 %v7106_v41 }
 0xf1d   : > { %1782 = vmatpush.msra.mxu3 %v7109_v42 }
 0xf1f   : > { %1783 = vmatpush.msra.mxu3 %v7111_v43 }
 0xf9b   : > { %v1463_v6 = vpop.f32.mrf.mxu3 }
 0xf9c   : > { %v1466_v19 = vmax.f32 %v1463_v6, 0.0 }
 0xf9e   : > { %6051 = vmatmul.msk.f32.vlgmr.msrb.gmra.mxu0 %vm644_vm1, %v1466_v19  ;;  %v7423_v19 = vld [vmem:[#allocation6] sm:$0xff] }
 0xf9f   : > { %1804 = vmatpush.msrb.mxu0 %v7117_v44 }
 0xfa1   : > { %1805 = vmatpush.msrb.mxu0 %v7122_v45 }
 0xfa3   : > { %1806 = vmatpush.msrb.mxu0 %v7129_v47 }
 0xfa5   : > { %1807 = vmatpush.msrb.mxu0 %v7137_v20 }
0x101b   : > { %v1487_v40 = vpop.f32.mrf.mxu0 }
0x101c   : > { %1491 = vrot.lane.b32.xlu0 %v1487_v40, %s6824_s17  ;;  %v7426_v40 = vld [vmem:[#allocation6 + $0x8] sm:$0xff] }
0x108e   : > { %v1492_v41 = vpop.permute.xlu0 %1491 }
0x108f   : > { %v1494_v42 = vadd.f32 %v1492_v41, %v1463_v6  ;;  %v7420_v6 = vld [vmem:[#allocation6 + $0x28] sm:$0xff]  ;;  %v7429_v41 = vld [vmem:[#allocation6 + $0x10] sm:$0xff] }
0x1091   : > { %v1495_v43 = vadd.f32 %v1494_v42, %v7163_v29 }
0x1093   : > { %1503 = vrot.lane.b32.xlu2 %v1495_v43, %s6825_s16  ;;  %v1497_v44 = vsel %vm842_vm2, %v1495_v43, %v7176_v33  ;;  %1623 = vst.msk [vmem:[%s7048_s13] sm:$0xff] %vm1622_vm13, %v1495_v43 }
0x1094   : > { %1499 = vrot.lane.b32.xlu1 %v1497_v44, %s6822_s30 }
0x10ed   : > { %v1504_v45 = vpop.permute.xlu2 %1503 }
0x1106   : > { %v1500_v47 = vpop.permute.xlu1 %1499 }
0x1107   : > { %v1506_v20 = vsel %vm851_vm3, %v1500_v47, %v1504_v45 }
0x1108   : > { %6052 = vmatmul.msk.f32.vlgmr.msrb.gmra.mxu1 %vm644_vm1, %v1506_v20 }
0x1109   : > { %1847 = vmatpush.msrb.mxu1 %v7154_v25 }
0x110b   : > { %1848 = vmatpush.msrb.mxu1 %v7156_v26 }
0x110d   : > { %1849 = vmatpush.msrb.mxu1 %v7159_v27 }
0x110f   : > { %1850 = vmatpush.msrb.mxu1 %v7168_v32 }
0x1185   : > { %v1527_v9 = vpop.f32.mrf.mxu1 }
0x1186   : > { %v1528_v21 = vadd.f32 %v7195_v38, %v1527_v9 }
0x1188   : > { %1550 = vrot.lane.b32.xlu0 %v1528_v21, %s6826_s19  ;;  %v6053_v10 = vmul.f32 -1.442695, %v1528_v21 }
0x118a   : > { %6355 = vpow2.f32 %v6053_v10 }
0x1190   : > { %v6356_v11 = vpop.eup %6355 }
0x1191   : > { %v1533_v12 = vadd.f32 1.0, %v6356_v11 }
0x1193   : > { %6357 = vrcp.f32 %v1533_v12  ;;  %v1545_v26 = vand.u32 2147483648, %v1533_v12  ;;  %vm1539_vm15 = vweird.f32 %v1533_v12  ;;  %v1543_v27 = vand.u32 2147483647, %v1533_v12 }
0x1195   : > { %v1546_v36 = vor.u32 1.1754944e-38, %v1545_v26  ;;  %vm1544_vm4 = vcmp.eq.f32.partialorder %v1543_v27, 8.507059e+37 }
0x1199   : > { %v6358_v13 = vpop.eup %6357 }
0x119a   : > { %v1535_v14 = vmul.f32 %v6358_v13, %v1533_v12  ;;  %vm1540_vm14 = vweird.f32 %v6358_v13 }
0x119b   : > { %vm1541_vm0 = vmor %vm1539_vm15, %vm1540_vm14 }
0x119c   : > { %v1536_v22 = vsub.f32 1.0, %v1535_v14 }
0x119e   : > { %v1537_v25 = vmul.f32 %v6358_v13, %v1536_v22 }
0x11a0   : > { %v1538_v23 = vadd.f32 %v6358_v13, %v1537_v25 }
0x11a2   : > { %v1542_v32 = vsel %vm1541_vm0, %v6358_v13, %v1538_v23 }
0x11a3   : > { %v1547_v39 = vsel %vm1544_vm4, %v1546_v36, %v1542_v32  ;;  %vm2597_vm4 = vcmask 786048  }
0x11a4   : > { %v1560_v57 = vsub.f32 1.0, %v1547_v39  ;;  %v1566_v18 = vmul.f32 %v1547_v39, %v1504_v45 }
0x11fa   : > { %v1551_v37 = vpop.permute.xlu0 %1550 }
0x11fb   : > { %v1553_v53 = vmul.f32 %v1551_v37, %v1547_v39 }
0x11fd   : > { %1555 = vrot.lane.b32.xlu1 %v1553_v53, %s6824_s17 }
0x126f   : > { %v1556_v61 = vpop.permute.xlu1 %1555 }
0x1270   : > { %v1558_v52 = vadd.f32 %v1556_v61, %v1528_v21 }
0x1272   : > { %6359 = vtanh.f32 %v1558_v52 }
0x1278   : > { %v6360_v46 = vpop.eup %6359 }
0x1279   : > { %1562 = vrot.lane.b32.xlu2 %v6360_v46, %s6825_s16 }
0x1281   : > { %1691 = vperm.xlu2 %6326, %v7384_v59  }
0x12d3   : > { %v1563_v4 = vpop.permute.xlu2 %1562 }
0x12d4   : > { %v1565_v24 = vmul.f32 %v1563_v4, %v1560_v57 }
0x12d6   : > { %v1567_v48 = vadd.f32 %v1566_v18, %v1565_v24 }
0x12d8   : > { %1569 = vrot.lane.b32.xlu0 %v1567_v48, %s6825_s16 }
0x12db   : > { %v1692_v42 = vpop.permute.xlu2 %1691 }
0x12dc   : > { %v1696_v43 = vmul.f32 %v1692_v42, %v1692_v42 }
0x12de   : > { %v1703_v44 = vmul.f32 %v1696_v43, %v1692_v42 }
0x12e0   : > { %v1710_v45 = vmul.f32 %v1703_v44, %v1692_v42 }
0x12e2   : > { %v1717_v47 = vmul.f32 %v1710_v45, %v1692_v42 }
0x12e4   : > { %v1720_v20 = vmul.f32 %v1717_v47, %v1692_v42 }
0x12e6   : > { %v1727_v9 = vmul.f32 %v1720_v20, %v1692_v42 }
0x12e8   : > { %v1734_v21 = vmul.f32 %v1727_v9, %v1692_v42 }
0x12ea   : > { %v1741_v14 = vmul.f32 %v1734_v21, %v1692_v42 }
0x12ec   : > { %v1744_v25 = vmul.f32 %v1741_v14, %v1692_v42 }
0x12ee   : > { %v1751_v32 = vmul.f32 %v1744_v25, %v1692_v42 }
0x12f0   : > { %v1758_v37 = vmul.f32 %v1751_v32, %v1692_v42 }
0x134a   : > { %v1570_v50 = vpop.permute.xlu0 %1569 }
0x134b   : > { %6054 = vmatmul.msk.f32.vlgmr.msrb.gmra.mxu2 %vm851_vm3, %v1570_v50 }
0x134c   : > { %1912 = vmatpush.msrb.mxu2 %v7201_v16 }
0x134e   : > { %1913 = vmatpush.msrb.mxu2 %v7203_v17 }
0x13ce   : > { %v1590_v54 = vpop.f32.mrf.mxu2 }
0x13cf   : > { %v1594_v55 = vadd.f32 %v1590_v54, %v7235_v35  ;;  %v1593_v51 = vadd.f32 %v7248_v49, %v1590_v54 }
0x13d1   : > { %v1595_v56 = vmax.f32 %v1594_v55, 0.0 }
0x13d3   : > { %1597 = vrot.lane.b32.xlu1 %v1595_v56, %s6822_s30 }
0x1445   : > { %v1598_v58 = vpop.permute.xlu1 %1597 }
0x1446   : > { %6055 = vmatmul.msk.f32.vlgmr.msrb.gmra.mxu3 %vm644_vm1, %v1598_v58 }
0x1447   : > { %1938 = vmatpush.msrb.mxu3 %v7219_v28 }
0x1449   : > { %1939 = vmatpush.msrb.mxu3 %v7221_v30 }
0x144b   : > { %1940 = vmatpush.msrb.mxu3 %v7224_v31 }
0x144d   : > { %1941 = vmatpush.msrb.mxu3 %v7227_v34 }
0x14c9   : > { %v1618_v62 = vpop.f32.mrf.mxu3 }
0x14ca   : > { %v7388_v63 = vadd.f32 %v1618_v62, %v1593_v51 }
0x14cc   : > { %6056 = vmatmul.msk.f32.vlgmr.msra.gmra.mxu0 %vm644_vm1, %v7388_v63  ;;  %6057 = vmatmul.msk.f32.vlgmr.msra.gmra.mxu1 %vm644_vm1, %v7388_v63 }
0x14cd   : > { %6058 = vmatmul.msk.f32.vlgmr.msra.gmra.mxu2 %vm644_vm1, %v7388_v63  ;;  %1966 = vmatpush.msra.mxu0 %v7396_v2 }
0x14ce   : > { %1986 = vmatpush.msra.mxu1 %v7399_v3  ;;  %2006 = vmatpush.msra.mxu2 %v7402_v5 }
0x14cf   : > { %1967 = vmatpush.msra.mxu0 %v7405_v7 }
0x14d0   : > { %1987 = vmatpush.msra.mxu1 %v7408_v1  ;;  %2007 = vmatpush.msra.mxu2 %v7411_v15 }
0x14d1   : > { %1968 = vmatpush.msra.mxu0 %v7414_v0 }
0x14d2   : > { %1988 = vmatpush.msra.mxu1 %v7417_v8  ;;  %2008 = vmatpush.msra.mxu2 %v7420_v6 }
0x14d3   : > { %1969 = vmatpush.msra.mxu0 %v7423_v19 }
0x14d4   : > { %1989 = vmatpush.msra.mxu1 %v7426_v40  ;;  %2009 = vmatpush.msra.mxu2 %v7429_v41 }
0x1549   : > { %v1646_v10 = vpop.f32.mrf.mxu0  ;;  %v1666_v22 = vpop.f32.mrf.mxu1 }
0x154a   : > { %v1711_v11 = vmul.f32 %v1710_v45, %v1646_v10  ;;  %v1704_v12 = vmul.f32 %v1703_v44, %v1646_v10  ;;  %v1697_v13 = vmul.f32 %v1696_v43, %v1646_v10  ;;  %v1735_v23 = vmul.f32 %v1734_v21, %v1666_v22 }
0x154b   : > { %v1728_v26 = vmul.f32 %v1727_v9, %v1666_v22  ;;  %v1721_v27 = vmul.f32 %v1720_v20, %v1666_v22  ;;  %v1694_v52 = vmul.f32 %v1692_v42, %v1646_v10  ;;  %v1718_v50 = vmul.f32 %v1717_v47, %v1666_v22  ;;  %v7446_v47 = vld [vmem:[#allocation8 + $0x10] sm:$0xff] }
0x154c   : > { %1713 = vrot.lane.b32.xlu2 %v1711_v11, %s6824_s17  ;;  %1706 = vrot.lane.b32.xlu1 %v1704_v12, %s6823_s21  ;;  %v7443_v11 = vld [vmem:[#allocation8 + $0x18] sm:$0xff]  ;;  %v7449_v12 = vld [vmem:[#allocation8 + $0x8] sm:$0xff] }
0x154d   : > { %1699 = vrot.lane.b32.xlu0 %v1697_v13, %s6822_s30  ;;  %v1695_v57 = vadd.f32 %v1694_v52, %v7388_v63  ;;  %v7452_v13 = vld [vmem:[#allocation8] sm:$0xff] }
0x1550   : > { %v1686_v36 = vpop.f32.mrf.mxu2 }
0x1551   : > { %v1759_v39 = vmul.f32 %v1758_v37, %v1686_v36  ;;  %v1752_v53 = vmul.f32 %v1751_v32, %v1686_v36  ;;  %v1745_v61 = vmul.f32 %v1744_v25, %v1686_v36  ;;  %v1742_v43 = vmul.f32 %v1741_v14, %v1686_v36  ;;  %v7459_v25 = vld [vmem:[%s8568_s5 + $0x18] sm:$0xff] }
0x1554   : > { %1737 = vrot.lane.b32.xlu2 %v1735_v23, %s6824_s17  ;;  %1730 = vrot.lane.b32.xlu1 %v1728_v26, %s6823_s21  ;;  %v7465_v23 = vld [vmem:[%s8568_s5 + $0x10] sm:$0xff]  ;;  %v7471_v26 = vld [vmem:[%s8568_s5 + $0x8] sm:$0xff] }
0x1555   : > { %1723 = vrot.lane.b32.xlu0 %v1721_v27, %s6822_s30  ;;  %v7477_v27 = vld [vmem:[%s8568_s5] sm:$0xff] }
0x155c   : > { %1761 = vrot.lane.b32.xlu2 %v1759_v39, %s6824_s17  ;;  %1754 = vrot.lane.b32.xlu1 %v1752_v53, %s6823_s21 }
0x155d   : > { %1747 = vrot.lane.b32.xlu0 %v1745_v61, %s6822_s30 }
0x15a6   : > { %v1714_v4 = vpop.permute.xlu2 %1713 }
0x15ae   : > { %v1738_v51 = vpop.permute.xlu2 %1737 }
0x15b6   : > { %v1762_v63 = vpop.permute.xlu2 %1761 }
0x15be   : > { %v1707_v46 = vpop.permute.xlu1 %1706 }
0x15bf   : > { %v1700_v18 = vpop.permute.xlu0 %1699 }
0x15c0   : > { %v1702_v24 = vadd.f32 %v1700_v18, %v1695_v57  ;;  %v7496_v18 = vld [vmem:[#allocation9 + $0x10] sm:$0xff] }
0x15c2   : > { %v1709_v48 = vadd.f32 %v1707_v46, %v1702_v24  ;;  %v7499_v24 = vld [vmem:[#allocation9 + $0x8] sm:$0xff] }
0x15c4   : > { %v1716_v54 = vadd.f32 %v1714_v4, %v1709_v48  ;;  %v7493_v4 = vld [vmem:[#allocation9 + $0x18] sm:$0xff] }
0x15c6   : > { %v1719_v55 = vadd.f32 %v1718_v50, %v1716_v54  ;;  %v1731_v56 = vpop.permute.xlu1 %1730 }
0x15c7   : > { %v1724_v58 = vpop.permute.xlu0 %1723 }
0x15c8   : > { %v1726_v60 = vadd.f32 %v1724_v58, %v1719_v55 }
0x15ca   : > { %v1733_v62 = vadd.f32 %v1731_v56, %v1726_v60 }
0x15cc   : > { %v1740_v44 = vadd.f32 %v1738_v51, %v1733_v62 }
0x15ce   : > { %v1743_v45 = vadd.f32 %v1742_v43, %v1740_v44  ;;  %v1755_v9 = vpop.permute.xlu1 %1754 }
0x15cf   : > { %v1748_v20 = vpop.permute.xlu0 %1747 }
0x15d0   : > { %v1750_v42 = vadd.f32 %v1748_v20, %v1743_v45 }
0x15d2   : > { %v1757_v21 = vadd.f32 %v1755_v9, %v1750_v42 }
0x15d4   : > { %v1764_v10 = vadd.f32 %v1762_v63, %v1757_v21 }
0x15d6   : > { %6059 = vmatmul.msk.f32.vlgmr.msra.gmra.mxu3 %vm644_vm1, %v1764_v10 }
0x15d7   : > { %2105 = vmatpush.msra.mxu3 %v7443_v11 }
0x15d9   : > { %2106 = vmatpush.msra.mxu3 %v7446_v47 }
0x15db   : > { %2107 = vmatpush.msra.mxu3 %v7449_v12 }
0x15dd   : > { %2108 = vmatpush.msra.mxu3 %v7452_v13 }
0x1659   : > { %v1785_v14 = vpop.f32.mrf.mxu3 }
0x165a   : > { %v1788_v22 = vmax.f32 %v1785_v14, 0.0 }
0x165c   : > { %6060 = vmatmul.msk.f32.vlgmr.msrb.gmra.mxu0 %vm644_vm1, %v1788_v22 }
0x165d   : > { %2129 = vmatpush.msrb.mxu0 %v7459_v25 }
0x165f   : > { %2130 = vmatpush.msrb.mxu0 %v7465_v23 }
0x1661   : > { %2131 = vmatpush.msrb.mxu0 %v7471_v26 }
0x1663   : > { %2132 = vmatpush.msrb.mxu0 %v7477_v27 }
0x16d9   : > { %v1809_v32 = vpop.f32.mrf.mxu0 }
0x16da   : > { %1813 = vrot.lane.b32.xlu0 %v1809_v32, %s6824_s17 }
0x174c   : > { %v1814_v36 = vpop.permute.xlu0 %1813 }
0x174d   : > { %v1816_v37 = vadd.f32 %v1814_v36, %v1785_v14 }
0x174f   : > { %v1817_v39 = vadd.f32 %v1816_v37, %v7163_v29 }
0x1751   : > { %1828 = vrot.lane.b32.xlu0 %v1817_v39, %s6825_s16  ;;  %1820 = vrot.lane.b32.xlu1 %v1817_v39, %s6830_s22 }
0x17c3   : > { %v1821_v53 = vpop.permute.xlu1 %1820  ;;  %v1829_v52 = vpop.permute.xlu0 %1828 }
0x17c4   : > { %1948 = vst.msk [vmem:[%s7048_s13] sm:$0xff] %vm1947_vm5, %v1821_v53  ;;  %v1823_v61 = vsel %vm842_vm2, %v1821_v53, %v7176_v33  ;;  %v7502_v33 = vld [vmem:[#allocation9] sm:$0xff] }
0x17c5   : > { %1825 = vrot.lane.b32.xlu2 %v1823_v61, %s6826_s19 }
0x181f   : > { %v1826_v46 = vpop.permute.xlu2 %1825 }
0x1820   : > { %v1831_v57 = vsel %vm851_vm3, %v1826_v46, %v1829_v52 }
0x1821   : > { %6061 = vmatmul.msk.f32.vlgmr.msrb.gmra.mxu1 %vm644_vm1, %v1831_v57 }
0x1822   : > { %2172 = vmatpush.msrb.mxu1 %v7493_v4 }
0x1824   : > { %2173 = vmatpush.msrb.mxu1 %v7496_v18 }
0x1826   : > { %2174 = vmatpush.msrb.mxu1 %v7499_v24 }
0x1828   : > { %2175 = vmatpush.msrb.mxu1 %v7502_v33 }
0x189e   : > { %v1852_v48 = vpop.f32.mrf.mxu1 }
0x189f   : > { %v1853_v50 = vadd.f32 %v7195_v38, %v1852_v48  ;;  %v6831_v48 = vmov 4  }
0x18a0   : > { %6327 = vset.pattern.permute.xlu0 %v6831_v48 }
0x18a1   : > { %1875 = vrot.lane.b32.xlu1 %v1853_v50, %s6826_s19  ;;  %v6062_v54 = vmul.f32 -1.442695, %v1853_v50 }
0x18a3   : > { %6361 = vpow2.f32 %v6062_v54 }
0x18a9   : > { %v6362_v55 = vpop.eup %6361 }
0x18aa   : > { %v1858_v56 = vadd.f32 1.0, %v6362_v55 }
0x18ac   : > { %6363 = vrcp.f32 %v1858_v56  ;;  %v1870_v44 = vand.u32 2147483648, %v1858_v56  ;;  %vm1864_vm6 = vweird.f32 %v1858_v56  ;;  %v1868_v45 = vand.u32 2147483647, %v1858_v56 }
0x18ae   : > { %v1871_v42 = vor.u32 1.1754944e-38, %v1870_v44  ;;  %vm1869_vm9 = vcmp.eq.f32.partialorder %v1868_v45, 8.507059e+37 }
0x18b2   : > { %v6364_v58 = vpop.eup %6363 }
0x18b3   : > { %v1860_v60 = vmul.f32 %v6364_v58, %v1858_v56  ;;  %vm1865_vm2 = vweird.f32 %v6364_v58 }
0x18b4   : > { %vm1866_vm7 = vmor %vm1864_vm6, %vm1865_vm2 }
0x18b5   : > { %v1861_v51 = vsub.f32 1.0, %v1860_v60 }
0x18b7   : > { %v1862_v62 = vmul.f32 %v6364_v58, %v1861_v51 }
0x18b9   : > { %v1863_v43 = vadd.f32 %v6364_v58, %v1862_v62 }
0x18bb   : > { %v1867_v20 = vsel %vm1866_vm7, %v6364_v58, %v1863_v43 }
0x18bc   : > { %v1872_v9 = vsel %vm1869_vm9, %v1871_v42, %v1867_v20 }
0x18bd   : > { %v1885_v22 = vsub.f32 1.0, %v1872_v9  ;;  %v1891_v36 = vmul.f32 %v1872_v9, %v1829_v52 }
0x1913   : > { %v1876_v38 = vpop.permute.xlu1 %1875 }
0x1914   : > { %v1878_v21 = vmul.f32 %v1876_v38, %v1872_v9 }
0x1916   : > { %1880 = vrot.lane.b32.xlu2 %v1878_v21, %s6824_s17 }
0x1970   : > { %v1881_v63 = vpop.permute.xlu2 %1880 }
0x1971   : > { %v1883_v10 = vadd.f32 %v1881_v63, %v1853_v50 }
0x1973   : > { %6365 = vtanh.f32 %v1883_v10 }
0x1979   : > { %v6366_v14 = vpop.eup %6365 }
0x197a   : > { %1887 = vrot.lane.b32.xlu0 %v6366_v14, %s6825_s16 }
0x1982   : > { %2016 = vperm.xlu0 %6327, %v7384_v59  }
0x19ec   : > { %v1888_v32 = vpop.permute.xlu0 %1887 }
0x19ed   : > { %v1890_v37 = vmul.f32 %v1888_v32, %v1885_v22 }
0x19ef   : > { %v1892_v39 = vadd.f32 %v1891_v36, %v1890_v37 }
0x19f1   : > { %1894 = vrot.lane.b32.xlu1 %v1892_v39, %s6825_s16 }
0x1a63   : > { %v1895_v53 = vpop.permute.xlu1 %1894 }
0x1a64   : > { %6063 = vmatmul.msk.f32.vlgmr.msrb.gmra.mxu2 %vm851_vm3, %v1895_v53 }
0x1a65   : > { %2237 = vmatpush.msrb.mxu2 %v7201_v16 }
0x1a67   : > { %2238 = vmatpush.msrb.mxu2 %v7203_v17 }
0x1ae7   : > { %v1915_v61 = vpop.f32.mrf.mxu2 }
0x1ae8   : > { %v1919_v46 = vadd.f32 %v1915_v61, %v7235_v35  ;;  %v1918_v16 = vadd.f32 %v7248_v49, %v1915_v61 }
0x1aea   : > { %v1920_v57 = vmax.f32 %v1919_v46, 0.0 }
0x1aec   : > { %1922 = vrot.lane.b32.xlu2 %v1920_v57, %s6822_s30 }
0x1b46   : > { %v1923_v52 = vpop.permute.xlu2 %1922 }
0x1b47   : > { %6064 = vmatmul.msk.f32.vlgmr.msrb.gmra.mxu3 %vm644_vm1, %v1923_v52 }
0x1b48   : > { %2263 = vmatpush.msrb.mxu3 %v7219_v28  ;;  %v2017_v28 = vpop.permute.xlu0 %2016 }
0x1b4a   : > { %2264 = vmatpush.msrb.mxu3 %v7221_v30  ;;  %v2021_v30 = vmul.f32 %v2017_v28, %v2017_v28 }
0x1b4c   : > { %2265 = vmatpush.msrb.mxu3 %v7224_v31  ;;  %v2028_v31 = vmul.f32 %v2021_v30, %v2017_v28 }
0x1b4e   : > { %2266 = vmatpush.msrb.mxu3 %v7227_v34  ;;  %v2035_v34 = vmul.f32 %v2028_v31, %v2017_v28 }
0x1b50   : > { %v2042_v49 = vmul.f32 %v2035_v34, %v2017_v28 }
0x1b52   : > { %v2045_v54 = vmul.f32 %v2042_v49, %v2017_v28 }
0x1b54   : > { %v2052_v55 = vmul.f32 %v2045_v54, %v2017_v28 }
0x1b56   : > { %v2059_v56 = vmul.f32 %v2052_v55, %v2017_v28 }
0x1b58   : > { %v2066_v58 = vmul.f32 %v2059_v56, %v2017_v28 }
0x1b5a   : > { %v2069_v45 = vmul.f32 %v2066_v58, %v2017_v28 }
0x1b5c   : > { %v2076_v42 = vmul.f32 %v2069_v45, %v2017_v28 }
0x1b5e   : > { %v2083_v14 = vmul.f32 %v2076_v42, %v2017_v28 }
0x1bca   : > { %v1943_v17 = vpop.f32.mrf.mxu3 }
0x1bcb   : > { %v1946_v50 = vadd.f32 %v1943_v17, %v1918_v16 }
0x1bcd   : > { %6065 = vmatmul.msk.f32.vlgmr.msra.gmra.mxu0 %vm644_vm1, %v1946_v50  ;;  %6066 = vmatmul.msk.f32.vlgmr.msra.gmra.mxu1 %vm644_vm1, %v1946_v50 }
0x1bce   : > { %6067 = vmatmul.msk.f32.vlgmr.msra.gmra.mxu2 %vm644_vm1, %v1946_v50  ;;  %2291 = vmatpush.msra.mxu0 %v7396_v2 }
0x1bcf   : > { %2311 = vmatpush.msra.mxu1 %v7399_v3  ;;  %2331 = vmatpush.msra.mxu2 %v7402_v5 }
0x1bd0   : > { %2292 = vmatpush.msra.mxu0 %v7405_v7 }
0x1bd1   : > { %2312 = vmatpush.msra.mxu1 %v7408_v1  ;;  %2332 = vmatpush.msra.mxu2 %v7411_v15 }
0x1bd2   : > { %2293 = vmatpush.msra.mxu0 %v7414_v0 }
0x1bd3   : > { %2313 = vmatpush.msra.mxu1 %v7417_v8  ;;  %2333 = vmatpush.msra.mxu2 %v7420_v6 }
0x1bd4   : > { %2294 = vmatpush.msra.mxu0 %v7423_v19 }
0x1bd5   : > { %2314 = vmatpush.msra.mxu1 %v7426_v40  ;;  %2334 = vmatpush.msra.mxu2 %v7429_v41 }
0x1c4a   : > { %v1971_v60 = vpop.f32.mrf.mxu0  ;;  %v1991_v51 = vpop.f32.mrf.mxu1 }
0x1c4b   : > { %v2053_v62 = vmul.f32 %v2052_v55, %v1991_v51  ;;  %v2029_v43 = vmul.f32 %v2028_v31, %v1971_v60  ;;  %v2022_v44 = vmul.f32 %v2021_v30, %v1971_v60  ;;  %v2046_v9 = vmul.f32 %v2045_v54, %v1991_v51 }
0x1c4c   : > { %v2036_v21 = vmul.f32 %v2035_v34, %v1971_v60  ;;  %v2060_v10 = vmul.f32 %v2059_v56, %v1991_v51  ;;  %v2019_v32 = vmul.f32 %v2017_v28, %v1971_v60  ;;  %v2043_v57 = vmul.f32 %v2042_v49, %v1991_v51 }
0x1c4d   : > { %2055 = vrot.lane.b32.xlu0 %v2053_v62, %s6823_s21  ;;  %2031 = vrot.lane.b32.xlu2 %v2029_v43, %s6823_s21 }
0x1c4e   : > { %2024 = vrot.lane.b32.xlu1 %v2022_v44, %s6822_s30  ;;  %v2020_v39 = vadd.f32 %v2019_v32, %v1946_v50  ;;  %v7581_v32 = vld [vmem:[%s8571_s8] ss:$0 sm:$0xff] }
0x1c51   : > { %v2011_v20 = vpop.f32.mrf.mxu2 }
0x1c52   : > { %v2077_v38 = vmul.f32 %v2076_v42, %v2011_v20  ;;  %v2070_v63 = vmul.f32 %v2069_v45, %v2011_v20  ;;  %v2084_v22 = vmul.f32 %v2083_v14, %v2011_v20  ;;  %v2067_v54 = vmul.f32 %v2066_v58, %v2011_v20 }
0x1c55   : > { %2079 = vrot.lane.b32.xlu0 %v2077_v38, %s6823_s21  ;;  %2048 = vrot.lane.b32.xlu2 %v2046_v9, %s6822_s30  ;;  %v7561_v38 = vld [vmem:[%s7046_s23] sm:$0xff] }
0x1c56   : > { %2038 = vrot.lane.b32.xlu1 %v2036_v21, %s6824_s17  ;;  %vm2143_vm11 = vcmp.ne.f32.partialorder %v7561_v38, %v7561_v38 }
0x1c5d   : > { %2072 = vrot.lane.b32.xlu2 %v2070_v63, %s6822_s30 }
0x1c5e   : > { %2062 = vrot.lane.b32.xlu1 %v2060_v10, %s6824_s17 }
0x1c66   : > { %2086 = vrot.lane.b32.xlu1 %v2084_v22, %s6824_s17 }
0x1ca7   : > { %v2032_v36 = vpop.permute.xlu2 %2031 }
0x1caf   : > { %v2049_v52 = vpop.permute.xlu2 %2048 }
0x1cb7   : > { %v2073_v62 = vpop.permute.xlu2 %2072 }
0x1cbf   : > { %v2056_v17 = vpop.permute.xlu0 %2055 }
0x1cc0   : > { %v2025_v37 = vpop.permute.xlu1 %2024 }
0x1cc1   : > { %v2027_v53 = vadd.f32 %v2025_v37, %v2020_v39 }
0x1cc3   : > { %v2034_v61 = vadd.f32 %v2032_v36, %v2027_v53 }
0x1cc7   : > { %v2080_v28 = vpop.permute.xlu0 %2079 }
0x1cc8   : > { %v2039_v46 = vpop.permute.xlu1 %2038 }
0x1cc9   : > { %v2041_v48 = vadd.f32 %v2039_v46, %v2034_v61 }
0x1ccb   : > { %v2044_v16 = vadd.f32 %v2043_v57, %v2041_v48 }
0x1ccd   : > { %v2051_v30 = vadd.f32 %v2049_v52, %v2044_v16 }
0x1ccf   : > { %v2058_v31 = vadd.f32 %v2056_v17, %v2051_v30 }
0x1cd0   : > { %v2063_v34 = vpop.permute.xlu1 %2062 }
0x1cd1   : > { %v2065_v55 = vadd.f32 %v2063_v34, %v2058_v31 }
0x1cd3   : > { %v2068_v56 = vadd.f32 %v2067_v54, %v2065_v55 }
0x1cd5   : > { %v2075_v43 = vadd.f32 %v2073_v62, %v2068_v56 }
0x1cd7   : > { %v2082_v60 = vadd.f32 %v2080_v28, %v2075_v43 }
0x1cd8   : > { %v2087_v44 = vpop.permute.xlu1 %2086 }
0x1cd9   : > { %v2089_v50 = vadd.f32 %v2087_v44, %v2082_v60 }
0x1cdb   : > { %6068 = vmatmul.msk.f32.vlgmr.msra.gmra.mxu3 %vm644_vm1, %v2089_v50 }
0x1cdc   : > { %2430 = vmatpush.msra.mxu3 %v7443_v11 }
0x1cde   : > { %2431 = vmatpush.msra.mxu3 %v7446_v47 }
0x1ce0   : > { %2432 = vmatpush.msra.mxu3 %v7449_v12 }
0x1ce2   : > { %2433 = vmatpush.msra.mxu3 %v7452_v13 }
0x1d5e   : > { %v2110_v49 = vpop.f32.mrf.mxu3 }
0x1d5f   : > { %v2113_v58 = vmax.f32 %v2110_v49, 0.0 }
0x1d61   : > { %6069 = vmatmul.msk.f32.vlgmr.msrb.gmra.mxu0 %vm644_vm1, %v2113_v58 }
0x1d62   : > { %2454 = vmatpush.msrb.mxu0 %v7459_v25 }
0x1d64   : > { %2455 = vmatpush.msrb.mxu0 %v7465_v23 }
0x1d66   : > { %2456 = vmatpush.msrb.mxu0 %v7471_v26 }
0x1d68   : > { %2457 = vmatpush.msrb.mxu0 %v7477_v27 }
0x1dde   : > { %v2134_v51 = vpop.f32.mrf.mxu0 }
0x1ddf   : > { %2138 = vrot.lane.b32.xlu2 %v2134_v51, %s6824_s17  ;;  %v7589_v51 = vld [vmem:[#allocation11 + $0x8] sm:$0xff] }
0x1e39   : > { %v2139_v45 = vpop.permute.xlu2 %2138 }
0x1e3a   : > { %v2141_v20 = vadd.f32 %v2139_v45, %v2110_v49  ;;  %v7592_v45 = vld [vmem:[#allocation11] sm:$0xff] }
0x1e3c   : > { %v2142_v42 = vadd.f32 %v2141_v20, %v7163_v29 }
0x1e3e   : > { %2153 = vrot.lane.b32.xlu2 %v2142_v42, %s6825_s16  ;;  %2145 = vrot.lane.b32.xlu0 %v2142_v42, %s6824_s17 }
0x1e98   : > { %v2154_v63 = vpop.permute.xlu2 %2153 }
0x1eb0   : > { %v2146_v9 = vpop.permute.xlu0 %2145 }
0x1eb1   : > { %2273 = vst.msk [vmem:[%s7048_s13] sm:$0xff] %vm2272_vm10, %v2146_v9  ;;  %v2148_v21 = vsel %vm2143_vm11, %v2146_v9, %v7561_v38 }
0x1eb2   : > { %2150 = vrot.lane.b32.xlu1 %v2148_v21, %s6823_s21 }
0x1f24   : > { %v2151_v10 = vpop.permute.xlu1 %2150 }
0x1f25   : > { %v2156_v14 = vsel %vm851_vm3, %v2151_v10, %v2154_v63  ;;  %v7601_v10 = vld [vmem:[#allocation12 + $0x10] sm:$0xff] }
0x1f26   : > { %6070 = vmatmul.msk.f32.vlgmr.msrb.gmra.mxu1 %vm644_vm1, %v2156_v14  ;;  %v7604_v14 = vld [vmem:[#allocation12 + $0x8] sm:$0xff] }
0x1f27   : > { %2497 = vmatpush.msrb.mxu1 %v7493_v4 }
0x1f29   : > { %2498 = vmatpush.msrb.mxu1 %v7496_v18 }
0x1f2b   : > { %2499 = vmatpush.msrb.mxu1 %v7499_v24 }
0x1f2d   : > { %2500 = vmatpush.msrb.mxu1 %v7502_v33 }
0x1fa3   : > { %v2177_v22 = vpop.f32.mrf.mxu1 }
0x1fa4   : > { %v2178_v36 = vadd.f32 %v7581_v32, %v2177_v22  ;;  %v7607_v22 = vld [vmem:[#allocation12] sm:$0xff] }
0x1fa6   : > { %2200 = vrot.lane.b32.xlu0 %v2178_v36, %s6826_s19  ;;  %v6071_v37 = vmul.f32 -1.442695, %v2178_v36 }
0x1fa8   : > { %6367 = vpow2.f32 %v6071_v37  ;;  %v7614_v37 = vld [vmem:[%s8573_s10] ss:$0 sm:$0xff] }
0x1fae   : > { %v6368_v39 = vpop.eup %6367 }
0x1faf   : > { %v2183_v53 = vadd.f32 1.0, %v6368_v39 }
0x1fb1   : > { %6369 = vrcp.f32 %v2183_v53  ;;  %v2195_v16 = vand.u32 2147483648, %v2183_v53  ;;  %vm2189_vm14 = vweird.f32 %v2183_v53  ;;  %v2193_v17 = vand.u32 2147483647, %v2183_v53 }
0x1fb3   : > { %v2196_v31 = vor.u32 1.1754944e-38, %v2195_v16  ;;  %vm2194_vm0 = vcmp.eq.f32.partialorder %v2193_v17, 8.507059e+37 }
0x1fb7   : > { %v6370_v61 = vpop.eup %6369 }
0x1fb8   : > { %v2185_v46 = vmul.f32 %v6370_v61, %v2183_v53  ;;  %vm2190_vm12 = vweird.f32 %v6370_v61 }
0x1fb9   : > { %vm2191_vm15 = vmor %vm2189_vm14, %vm2190_vm12  ;;  %vm2922_vm12 = vcmask 917248  }
0x1fba   : > { %v2186_v57 = vsub.f32 1.0, %v2185_v46 }
0x1fbc   : > { %v2187_v48 = vmul.f32 %v6370_v61, %v2186_v57 }
0x1fbe   : > { %v2188_v52 = vadd.f32 %v6370_v61, %v2187_v48 }
0x1fc0   : > { %v2192_v30 = vsel %vm2191_vm15, %v6370_v61, %v2188_v52 }
0x1fc1   : > { %v2197_v54 = vsel %vm2194_vm0, %v2196_v31, %v2192_v30 }
0x1fc2   : > { %v2210_v28 = vsub.f32 1.0, %v2197_v54  ;;  %v2216_v44 = vmul.f32 %v2197_v54, %v2154_v63  ;;  %v7598_v63 = vld [vmem:[#allocation12 + $0x18] sm:$0xff] }
0x2018   : > { %v2201_v34 = vpop.permute.xlu0 %2200 }
0x2019   : > { %v2203_v55 = vmul.f32 %v2201_v34, %v2197_v54 }
0x201b   : > { %2205 = vrot.lane.b32.xlu1 %v2203_v55, %s6824_s17 }
0x208d   : > { %v2206_v56 = vpop.permute.xlu1 %2205 }
0x208e   : > { %v2208_v62 = vadd.f32 %v2206_v56, %v2178_v36  ;;  %v6832_v36 = vmov 5  }
0x208f   : > { %6328 = vset.pattern.permute.xlu2 %v6832_v36 }
0x2090   : > { %6371 = vtanh.f32 %v2208_v62 }
0x2096   : > { %v6372_v43 = vpop.eup %6371 }
0x2097   : > { %2212 = vrot.lane.b32.xlu2 %v6372_v43, %s6825_s16 }
0x209f   : > { %2341 = vperm.xlu2 %6328, %v7384_v59  }
0x20f1   : > { %v2213_v60 = vpop.permute.xlu2 %2212 }
0x20f2   : > { %v2215_v50 = vmul.f32 %v2213_v60, %v2210_v28 }
0x20f4   : > { %v2217_v49 = vadd.f32 %v2216_v44, %v2215_v50 }
0x20f6   : > { %2219 = vrot.lane.b32.xlu0 %v2217_v49, %s6825_s16 }
0x20f9   : > { %v2342_v46 = vpop.permute.xlu2 %2341 }
0x20fa   : > { %v2346_v57 = vmul.f32 %v2342_v46, %v2342_v46 }
0x20fc   : > { %v2353_v48 = vmul.f32 %v2346_v57, %v2342_v46 }
0x20fe   : > { %v2360_v52 = vmul.f32 %v2353_v48, %v2342_v46 }
0x2100   : > { %v2367_v16 = vmul.f32 %v2360_v52, %v2342_v46 }
0x2102   : > { %v2370_v17 = vmul.f32 %v2367_v16, %v2342_v46 }
0x2104   : > { %v2377_v30 = vmul.f32 %v2370_v17, %v2342_v46 }
0x2106   : > { %v2384_v31 = vmul.f32 %v2377_v30, %v2342_v46 }
0x2108   : > { %v2391_v62 = vmul.f32 %v2384_v31, %v2342_v46 }
0x210a   : > { %v2394_v28 = vmul.f32 %v2391_v62, %v2342_v46 }
0x210c   : > { %v2401_v49 = vmul.f32 %v2394_v28, %v2342_v46 }
0x2168   : > { %v2220_v58 = vpop.permute.xlu0 %2219 }
0x2169   : > { %6072 = vmatmul.msk.f32.vlgmr.msrb.gmra.mxu2 %vm851_vm3, %v2220_v58 }
0x216a   : > { %2562 = vmatpush.msrb.mxu2 %v7589_v51 }
0x216c   : > { %2563 = vmatpush.msrb.mxu2 %v7592_v45 }
0x21ec   : > { %v2240_v20 = vpop.f32.mrf.mxu2 }
0x21ed   : > { %v2244_v42 = vadd.f32 %v2240_v20, %v7235_v35  ;;  %v2243_v39 = vadd.f32 %v7614_v37, %v2240_v20  ;;  %v2408_v20 = vmul.f32 %v2401_v49, %v2342_v46 }
0x21ef   : > { %v2245_v9 = vmax.f32 %v2244_v42, 0.0 }
0x21f1   : > { %2247 = vrot.lane.b32.xlu1 %v2245_v9, %s6822_s30 }
0x2263   : > { %v2248_v21 = vpop.permute.xlu1 %2247 }
0x2264   : > { %6073 = vmatmul.msk.f32.vlgmr.msrb.gmra.mxu3 %vm644_vm1, %v2248_v21 }
0x2265   : > { %2588 = vmatpush.msrb.mxu3 %v7598_v63 }
0x2267   : > { %2589 = vmatpush.msrb.mxu3 %v7601_v10 }
0x2269   : > { %2590 = vmatpush.msrb.mxu3 %v7604_v14 }
0x226b   : > { %2591 = vmatpush.msrb.mxu3 %v7607_v22 }
0x22e7   : > { %v2268_v53 = vpop.f32.mrf.mxu3 }
0x22e8   : > { %v2271_v61 = vadd.f32 %v2268_v53, %v2243_v39 }
0x22ea   : > { %6074 = vmatmul.msk.f32.vlgmr.msra.gmra.mxu0 %vm644_vm1, %v2271_v61  ;;  %6075 = vmatmul.msk.f32.vlgmr.msra.gmra.mxu1 %vm644_vm1, %v2271_v61 }
0x22eb   : > { %6076 = vmatmul.msk.f32.vlgmr.msra.gmra.mxu2 %vm644_vm1, %v2271_v61  ;;  %2616 = vmatpush.msra.mxu0 %v7396_v2 }
0x22ec   : > { %2636 = vmatpush.msra.mxu1 %v7399_v3  ;;  %2656 = vmatpush.msra.mxu2 %v7402_v5 }
0x22ed   : > { %2617 = vmatpush.msra.mxu0 %v7405_v7 }
0x22ee   : > { %2637 = vmatpush.msra.mxu1 %v7408_v1  ;;  %2657 = vmatpush.msra.mxu2 %v7411_v15 }
0x22ef   : > { %2618 = vmatpush.msra.mxu0 %v7414_v0 }
0x22f0   : > { %2638 = vmatpush.msra.mxu1 %v7417_v8  ;;  %2658 = vmatpush.msra.mxu2 %v7420_v6 }
0x22f1   : > { %2619 = vmatpush.msra.mxu0 %v7423_v19 }
0x22f2   : > { %2639 = vmatpush.msra.mxu1 %v7426_v40  ;;  %2659 = vmatpush.msra.mxu2 %v7429_v41 }
0x2367   : > { %v2296_v34 = vpop.f32.mrf.mxu0  ;;  %v2316_v43 = vpop.f32.mrf.mxu1 }
0x2368   : > { %v2361_v54 = vmul.f32 %v2360_v52, %v2296_v34  ;;  %v2354_v55 = vmul.f32 %v2353_v48, %v2296_v34  ;;  %v2347_v56 = vmul.f32 %v2346_v57, %v2296_v34  ;;  %v2385_v60 = vmul.f32 %v2384_v31, %v2316_v43 }
0x2369   : > { %v2378_v44 = vmul.f32 %v2377_v30, %v2316_v43  ;;  %v2371_v50 = vmul.f32 %v2370_v17, %v2316_v43  ;;  %v2344_v36 = vmul.f32 %v2342_v46, %v2296_v34  ;;  %v2368_v30 = vmul.f32 %v2367_v16, %v2316_v43 }
0x236a   : > { %2363 = vrot.lane.b32.xlu2 %v2361_v54, %s6824_s17  ;;  %2356 = vrot.lane.b32.xlu1 %v2354_v55, %s6823_s21 }
0x236b   : > { %2349 = vrot.lane.b32.xlu0 %v2347_v56, %s6822_s30  ;;  %v2345_v53 = vadd.f32 %v2344_v36, %v2271_v61 }
0x236e   : > { %v2336_v58 = vpop.f32.mrf.mxu2 }
0x236f   : > { %v2409_v42 = vmul.f32 %v2408_v20, %v2336_v58  ;;  %v2402_v9 = vmul.f32 %v2401_v49, %v2336_v58  ;;  %v2395_v21 = vmul.f32 %v2394_v28, %v2336_v58 }
0x2372   : > { %2387 = vrot.lane.b32.xlu2 %v2385_v60, %s6824_s17  ;;  %2380 = vrot.lane.b32.xlu1 %v2378_v44, %s6823_s21 }
0x2373   : > { %2373 = vrot.lane.b32.xlu0 %v2371_v50, %s6822_s30  ;;  %v2392_v50 = vmul.f32 %v2391_v62, %v2336_v58 }
0x237a   : > { %2411 = vrot.lane.b32.xlu2 %v2409_v42, %s6824_s17  ;;  %2404 = vrot.lane.b32.xlu1 %v2402_v9, %s6823_s21 }
0x237b   : > { %2397 = vrot.lane.b32.xlu0 %v2395_v21, %s6822_s30 }
0x23c4   : > { %v2364_v57 = vpop.permute.xlu2 %2363 }
0x23cc   : > { %v2388_v28 = vpop.permute.xlu2 %2387 }
0x23d4   : > { %v2412_v61 = vpop.permute.xlu2 %2411 }
0x23dc   : > { %v2357_v39 = vpop.permute.xlu1 %2356 }
0x23dd   : > { %v2350_v48 = vpop.permute.xlu0 %2349 }
0x23de   : > { %v2352_v52 = vadd.f32 %v2350_v48, %v2345_v53 }
0x23e0   : > { %v2359_v17 = vadd.f32 %v2357_v39, %v2352_v52 }
0x23e2   : > { %v2366_v31 = vadd.f32 %v2364_v57, %v2359_v17 }
0x23e4   : > { %v2369_v54 = vadd.f32 %v2368_v30, %v2366_v31  ;;  %v2381_v55 = vpop.permute.xlu1 %2380 }
0x23e5   : > { %v2374_v56 = vpop.permute.xlu0 %2373 }
0x23e6   : > { %v2376_v60 = vadd.f32 %v2374_v56, %v2369_v54 }
0x23e8   : > { %v2383_v44 = vadd.f32 %v2381_v55, %v2376_v60 }
0x23ea   : > { %v2390_v49 = vadd.f32 %v2388_v28, %v2383_v44 }
0x23ec   : > { %v2393_v20 = vadd.f32 %v2392_v50, %v2390_v49  ;;  %v2405_v46 = vpop.permute.xlu1 %2404 }
0x23ed   : > { %v2398_v42 = vpop.permute.xlu0 %2397 }
0x23ee   : > { %v2400_v9 = vadd.f32 %v2398_v42, %v2393_v20 }
0x23f0   : > { %v2407_v34 = vadd.f32 %v2405_v46, %v2400_v9 }
0x23f2   : > { %v2414_v21 = vadd.f32 %v2412_v61, %v2407_v34 }
0x23f4   : > { %6077 = vmatmul.msk.f32.vlgmr.msra.gmra.mxu3 %vm644_vm1, %v2414_v21 }
0x23f5   : > { %2755 = vmatpush.msra.mxu3 %v7443_v11 }
0x23f7   : > { %2756 = vmatpush.msra.mxu3 %v7446_v47 }
0x23f9   : > { %2757 = vmatpush.msra.mxu3 %v7449_v12 }
0x23fb   : > { %2758 = vmatpush.msra.mxu3 %v7452_v13 }
0x2477   : > { %v2435_v16 = vpop.f32.mrf.mxu3 }
0x2478   : > { %v2438_v62 = vmax.f32 %v2435_v16, 0.0 }
0x247a   : > { %6078 = vmatmul.msk.f32.vlgmr.msrb.gmra.mxu0 %vm644_vm1, %v2438_v62 }
0x247b   : > { %2779 = vmatpush.msrb.mxu0 %v7459_v25 }
0x247d   : > { %2780 = vmatpush.msrb.mxu0 %v7465_v23 }
0x247f   : > { %2781 = vmatpush.msrb.mxu0 %v7471_v26 }
0x2481   : > { %2782 = vmatpush.msrb.mxu0 %v7477_v27 }
0x24f7   : > { %v2459_v43 = vpop.f32.mrf.mxu0 }
0x24f8   : > { %2463 = vrot.lane.b32.xlu0 %v2459_v43, %s6824_s17 }
0x256a   : > { %v2464_v58 = vpop.permute.xlu0 %2463 }
0x256b   : > { %v2466_v36 = vadd.f32 %v2464_v58, %v2435_v16 }
0x256d   : > { %v2467_v39 = vadd.f32 %v2466_v36, %v7163_v29 }
0x256f   : > { %2478 = vrot.lane.b32.xlu0 %v2467_v39, %s6825_s16  ;;  %2470 = vrot.lane.b32.xlu1 %v2467_v39, %s6833_s18 }
0x25e1   : > { %v2471_v53 = vpop.permute.xlu1 %2470  ;;  %v2479_v48 = vpop.permute.xlu0 %2478 }
0x25e2   : > { %2598 = vst.msk [vmem:[%s7048_s13] sm:$0xff] %vm2597_vm4, %v2471_v53  ;;  %v2473_v57 = vsel %vm2143_vm11, %v2471_v53, %v7561_v38 }
0x25e3   : > { %2475 = vrot.lane.b32.xlu2 %v2473_v57, %s6833_s18 }
0x263d   : > { %v2476_v52 = vpop.permute.xlu2 %2475 }
0x263e   : > { %v2481_v17 = vsel %vm851_vm3, %v2476_v52, %v2479_v48 }
0x263f   : > { %6079 = vmatmul.msk.f32.vlgmr.msrb.gmra.mxu1 %vm644_vm1, %v2481_v17 }
0x2640   : > { %2822 = vmatpush.msrb.mxu1 %v7493_v4 }
0x2642   : > { %2823 = vmatpush.msrb.mxu1 %v7496_v18 }
0x2644   : > { %2824 = vmatpush.msrb.mxu1 %v7499_v24 }
0x2646   : > { %2825 = vmatpush.msrb.mxu1 %v7502_v33 }
0x26bc   : > { %v2502_v30 = vpop.f32.mrf.mxu1 }
0x26bd   : > { %v2503_v31 = vadd.f32 %v7581_v32, %v2502_v30 }
0x26bf   : > { %2525 = vrot.lane.b32.xlu1 %v2503_v31, %s6826_s19  ;;  %v6080_v54 = vmul.f32 -1.442695, %v2503_v31 }
0x26c1   : > { %6373 = vpow2.f32 %v6080_v54  ;;  %v6834_v54 = vmov 6  }
0x26c2   : > { %6329 = vset.pattern.permute.xlu0 %v6834_v54 }
0x26c7   : > { %v6374_v55 = vpop.eup %6373 }
0x26c8   : > { %v2508_v56 = vadd.f32 1.0, %v6374_v55 }
0x26ca   : > { %6375 = vrcp.f32 %v2508_v56  ;;  %v2520_v20 = vand.u32 2147483648, %v2508_v56  ;;  %vm2514_vm6 = vweird.f32 %v2508_v56  ;;  %v2518_v42 = vand.u32 2147483647, %v2508_v56 }
0x26cc   : > { %v2521_v46 = vor.u32 1.1754944e-38, %v2520_v20  ;;  %vm2519_vm9 = vcmp.eq.f32.partialorder %v2518_v42, 8.507059e+37 }
0x26d0   : > { %v6376_v60 = vpop.eup %6375 }
0x26d1   : > { %v2510_v28 = vmul.f32 %v6376_v60, %v2508_v56  ;;  %vm2515_vm2 = vweird.f32 %v6376_v60 }
0x26d2   : > { %vm2516_vm7 = vmor %vm2514_vm6, %vm2515_vm2  ;;  %vm3247_vm6 = vcmask 1048448  }
0x26d3   : > { %v2511_v44 = vsub.f32 1.0, %v2510_v28 }
0x26d5   : > { %v2512_v50 = vmul.f32 %v6376_v60, %v2511_v44 }
0x26d7   : > { %v2513_v49 = vadd.f32 %v6376_v60, %v2512_v50 }
0x26d9   : > { %v2517_v9 = vsel %vm2516_vm7, %v6376_v60, %v2513_v49 }
0x26da   : > { %v2522_v61 = vsel %vm2519_vm9, %v2521_v46, %v2517_v9 }
0x26db   : > { %v2535_v58 = vsub.f32 1.0, %v2522_v61  ;;  %v2541_v39 = vmul.f32 %v2522_v61, %v2479_v48 }
0x2731   : > { %v2526_v34 = vpop.permute.xlu1 %2525 }
0x2732   : > { %v2528_v21 = vmul.f32 %v2526_v34, %v2522_v61 }
0x2734   : > { %2530 = vrot.lane.b32.xlu2 %v2528_v21, %s6824_s17 }
0x278e   : > { %v2531_v16 = vpop.permute.xlu2 %2530 }
0x278f   : > { %v2533_v62 = vadd.f32 %v2531_v16, %v2503_v31 }
0x2791   : > { %6377 = vtanh.f32 %v2533_v62 }
0x2797   : > { %v6378_v43 = vpop.eup %6377 }
0x2798   : > { %2537 = vrot.lane.b32.xlu0 %v6378_v43, %s6825_s16 }
0x27a0   : > { %2666 = vperm.xlu0 %6329, %v7384_v59  }
0x280a   : > { %v2538_v36 = vpop.permute.xlu0 %2537 }
0x280b   : > { %v2540_v53 = vmul.f32 %v2538_v36, %v2535_v58 }
0x280d   : > { %v2542_v57 = vadd.f32 %v2541_v39, %v2540_v53 }
0x280f   : > { %2544 = vrot.lane.b32.xlu1 %v2542_v57, %s6825_s16 }
0x2812   : > { %v2667_v59 = vpop.permute.xlu0 %2666 }
0x2881   : > { %v2545_v52 = vpop.permute.xlu1 %2544 }
0x2882   : > { %6081 = vmatmul.msk.f32.vlgmr.msrb.gmra.mxu2 %vm851_vm3, %v2545_v52 }
0x2883   : > { %2887 = vmatpush.msrb.mxu2 %v7589_v51 }
0x2885   : > { %2888 = vmatpush.msrb.mxu2 %v7592_v45 }
0x2905   : > { %v2565_v17 = vpop.f32.mrf.mxu2 }
0x2906   : > { %v2569_v30 = vadd.f32 %v2565_v17, %v7235_v35  ;;  %v2568_v55 = vadd.f32 %v7614_v37, %v2565_v17 }
0x2908   : > { %v2570_v31 = vmax.f32 %v2569_v30, 0.0 }
0x290a   : > { %2572 = vrot.lane.b32.xlu2 %v2570_v31, %s6822_s30 }
0x2964   : > { %v2573_v48 = vpop.permute.xlu2 %2572 }
0x2965   : > { %6082 = vmatmul.msk.f32.vlgmr.msrb.gmra.mxu3 %vm644_vm1, %v2573_v48 }
0x2966   : > { %2913 = vmatpush.msrb.mxu3 %v7598_v63 }
0x2968   : > { %2914 = vmatpush.msrb.mxu3 %v7601_v10 }
0x296a   : > { %2915 = vmatpush.msrb.mxu3 %v7604_v14 }
0x296c   : > { %2916 = vmatpush.msrb.mxu3 %v7607_v22 }
0x29e8   : > { %v2593_v56 = vpop.f32.mrf.mxu3 }
0x29e9   : > { %v2596_v60 = vadd.f32 %v2593_v56, %v2568_v55 }
0x29eb   : > { %6083 = vmatmul.msk.f32.vlgmr.msra.gmra.mxu0 %vm644_vm1, %v2596_v60  ;;  %6084 = vmatmul.msk.f32.vlgmr.msra.gmra.mxu1 %vm644_vm1, %v2596_v60 }
0x29ec   : > { %6085 = vmatmul.msk.f32.vlgmr.msra.gmra.mxu2 %vm644_vm1, %v2596_v60  ;;  %2941 = vmatpush.msra.mxu0 %v7396_v2  ;;  %v2671_v2 = vmul.f32 %v2667_v59, %v2667_v59 }
0x29ed   : > { %2961 = vmatpush.msra.mxu1 %v7399_v3  ;;  %2981 = vmatpush.msra.mxu2 %v7402_v5 }
0x29ee   : > { %2942 = vmatpush.msra.mxu0 %v7405_v7  ;;  %v2678_v3 = vmul.f32 %v2671_v2, %v2667_v59 }
0x29ef   : > { %2962 = vmatpush.msra.mxu1 %v7408_v1  ;;  %2982 = vmatpush.msra.mxu2 %v7411_v15 }
0x29f0   : > { %2943 = vmatpush.msra.mxu0 %v7414_v0  ;;  %v2685_v5 = vmul.f32 %v2678_v3, %v2667_v59 }
0x29f1   : > { %2963 = vmatpush.msra.mxu1 %v7417_v8  ;;  %2983 = vmatpush.msra.mxu2 %v7420_v6 }
0x29f2   : > { %2944 = vmatpush.msra.mxu0 %v7423_v19  ;;  %v2692_v7 = vmul.f32 %v2685_v5, %v2667_v59 }
0x29f3   : > { %2964 = vmatpush.msra.mxu1 %v7426_v40  ;;  %2984 = vmatpush.msra.mxu2 %v7429_v41 }
0x29f4   : > { %v2695_v1 = vmul.f32 %v2692_v7, %v2667_v59 }
0x29f6   : > { %v2702_v28 = vmul.f32 %v2695_v1, %v2667_v59 }
0x29f8   : > { %v2709_v15 = vmul.f32 %v2702_v28, %v2667_v59 }
0x29fa   : > { %v2716_v44 = vmul.f32 %v2709_v15, %v2667_v59 }
0x29fc   : > { %v2719_v19 = vmul.f32 %v2716_v44, %v2667_v59 }
0x29fe   : > { %v2726_v41 = vmul.f32 %v2719_v19, %v2667_v59 }
0x2a00   : > { %v2733_v61 = vmul.f32 %v2726_v41, %v2667_v59 }
0x2a68   : > { %v2621_v0 = vpop.f32.mrf.mxu0  ;;  %v2641_v50 = vpop.f32.mrf.mxu1 }
0x2a69   : > { %v2703_v8 = vmul.f32 %v2702_v28, %v2641_v50  ;;  %v2679_v49 = vmul.f32 %v2678_v3, %v2621_v0  ;;  %v2672_v6 = vmul.f32 %v2671_v2, %v2621_v0  ;;  %v2696_v42 = vmul.f32 %v2695_v1, %v2641_v50 }
0x2a6a   : > { %v2686_v9 = vmul.f32 %v2685_v5, %v2621_v0  ;;  %v2710_v34 = vmul.f32 %v2709_v15, %v2641_v50  ;;  %v2669_v16 = vmul.f32 %v2667_v59, %v2621_v0  ;;  %v2693_v57 = vmul.f32 %v2692_v7, %v2641_v50 }
0x2a6b   : > { %2705 = vrot.lane.b32.xlu0 %v2703_v8, %s6823_s21  ;;  %2681 = vrot.lane.b32.xlu2 %v2679_v49, %s6823_s21 }
0x2a6c   : > { %2674 = vrot.lane.b32.xlu1 %v2672_v6, %s6822_s30  ;;  %v2670_v58 = vadd.f32 %v2669_v16, %v2596_v60 }
0x2a6f   : > { %v2661_v40 = vpop.f32.mrf.mxu2 }
0x2a70   : > { %v2727_v20 = vmul.f32 %v2726_v41, %v2661_v40  ;;  %v2720_v46 = vmul.f32 %v2719_v19, %v2661_v40  ;;  %v2734_v21 = vmul.f32 %v2733_v61, %v2661_v40  ;;  %v2717_v56 = vmul.f32 %v2716_v44, %v2661_v40 }
0x2a73   : > { %2729 = vrot.lane.b32.xlu0 %v2727_v20, %s6823_s21  ;;  %2698 = vrot.lane.b32.xlu2 %v2696_v42, %s6822_s30 }
0x2a74   : > { %2688 = vrot.lane.b32.xlu1 %v2686_v9, %s6824_s17 }
0x2a7b   : > { %2722 = vrot.lane.b32.xlu2 %v2720_v46, %s6822_s30 }
0x2a7c   : > { %2712 = vrot.lane.b32.xlu1 %v2710_v34, %s6824_s17 }
0x2a84   : > { %2736 = vrot.lane.b32.xlu1 %v2734_v21, %s6824_s17 }
0x2ac5   : > { %v2682_v62 = vpop.permute.xlu2 %2681 }
0x2acd   : > { %v2699_v17 = vpop.permute.xlu2 %2698 }
0x2ad5   : > { %v2723_v5 = vpop.permute.xlu2 %2722 }
0x2add   : > { %v2706_v31 = vpop.permute.xlu0 %2705 }
0x2ade   : > { %v2675_v43 = vpop.permute.xlu1 %2674 }
0x2adf   : > { %v2677_v36 = vadd.f32 %v2675_v43, %v2670_v58 }
0x2ae1   : > { %v2684_v39 = vadd.f32 %v2682_v62, %v2677_v36 }
0x2ae5   : > { %v2730_v59 = vpop.permute.xlu0 %2729 }
0x2ae6   : > { %v2689_v53 = vpop.permute.xlu1 %2688 }
0x2ae7   : > { %v2691_v52 = vadd.f32 %v2689_v53, %v2684_v39 }
0x2ae9   : > { %v2694_v30 = vadd.f32 %v2693_v57, %v2691_v52 }
0x2aeb   : > { %v2701_v54 = vadd.f32 %v2699_v17, %v2694_v30 }
0x2aed   : > { %v2708_v48 = vadd.f32 %v2706_v31, %v2701_v54  ;;  %v7752_v54 = vld [vmem:[%s7041_s15] sm:$0xff] }
0x2aee   : > { %v2713_v55 = vpop.permute.xlu1 %2712 }
0x2aef   : > { %v2715_v2 = vadd.f32 %v2713_v55, %v2708_v48  ;;  %v6835_v48 = vmov 7  }
0x2af0   : > { %6330 = vset.pattern.permute.xlu2 %v6835_v48 }
0x2af1   : > { %v2718_v3 = vadd.f32 %v2717_v56, %v2715_v2 }
0x2af3   : > { %v2725_v1 = vadd.f32 %v2723_v5, %v2718_v3  ;;  %v7764_v3 = vld [vmem:[#allocation6 + $0x48] sm:$0xff]  ;;  %v7767_v5 = vld [vmem:[#allocation6 + $0x50] sm:$0xff] }
0x2af5   : > { %v2732_v28 = vadd.f32 %v2730_v59, %v2725_v1  ;;  %v7770_v1 = vld [vmem:[#allocation6 + $0x58] sm:$0xff]  ;;  %v7773_v59 = vld [vmem:[#allocation6 + $0x30] sm:$0xff] }
0x2af6   : > { %v2737_v15 = vpop.permute.xlu1 %2736 }
0x2af7   : > { %v2739_v60 = vadd.f32 %v2737_v15, %v2732_v28  ;;  %v7776_v28 = vld [vmem:[#allocation6 + $0x38] sm:$0xff]  ;;  %v7779_v15 = vld [vmem:[#allocation6 + $0x40] sm:$0xff] }
0x2af9   : > { %6086 = vmatmul.msk.f32.vlgmr.msra.gmra.mxu3 %vm644_vm1, %v2739_v60  ;;  %v7782_v60 = vld [vmem:[#allocation6 + $0x18] sm:$0xff] }
0x2afa   : > { %3080 = vmatpush.msra.mxu3 %v7443_v11 }
0x2afc   : > { %3081 = vmatpush.msra.mxu3 %v7446_v47 }
0x2afe   : > { %3082 = vmatpush.msra.mxu3 %v7449_v12 }
0x2b00   : > { %3083 = vmatpush.msra.mxu3 %v7452_v13 }
0x2b7c   : > { %v2760_v7 = vpop.f32.mrf.mxu3 }
0x2b7d   : > { %v2763_v44 = vmax.f32 %v2760_v7, 0.0 }
0x2b7f   : > { %6087 = vmatmul.msk.f32.vlgmr.msrb.gmra.mxu0 %vm644_vm1, %v2763_v44  ;;  %v7788_v44 = vld [vmem:[#allocation6 + $0x28] sm:$0xff] }
0x2b80   : > { %3104 = vmatpush.msrb.mxu0 %v7459_v25 }
0x2b82   : > { %3105 = vmatpush.msrb.mxu0 %v7465_v23 }
0x2b84   : > { %3106 = vmatpush.msrb.mxu0 %v7471_v26 }
0x2b86   : > { %3107 = vmatpush.msrb.mxu0 %v7477_v27 }
0x2bfc   : > { %v2784_v11 = vpop.f32.mrf.mxu0 }
0x2bfd   : > { %2788 = vrot.lane.b32.xlu2 %v2784_v11, %s6824_s17  ;;  %v7791_v11 = vld [vmem:[#allocation6] sm:$0xff] }
0x2c57   : > { %v2789_v47 = vpop.permute.xlu2 %2788 }
0x2c58   : > { %v2791_v12 = vadd.f32 %v2789_v47, %v2760_v7  ;;  %v7785_v7 = vld [vmem:[#allocation6 + $0x20] sm:$0xff]  ;;  %v7794_v47 = vld [vmem:[#allocation6 + $0x8] sm:$0xff] }
0x2c5a   : > { %v2792_v13 = vadd.f32 %v2791_v12, %v7163_v29  ;;  %v7797_v12 = vld [vmem:[#allocation6 + $0x10] sm:$0xff] }
0x2c5c   : > { %2803 = vrot.lane.b32.xlu2 %v2792_v13, %s6825_s16  ;;  %2795 = vrot.lane.b32.xlu0 %v2792_v13, %s6823_s21 }
0x2cb6   : > { %v2804_v23 = vpop.permute.xlu2 %2803 }
0x2cce   : > { %v2796_v0 = vpop.permute.xlu0 %2795 }
0x2ccf   : > { %2923 = vst.msk [vmem:[%s7048_s13] sm:$0xff] %vm2922_vm12, %v2796_v0  ;;  %v2798_v25 = vsel %vm2143_vm11, %v2796_v0, %v7561_v38 }
0x2cd0   : > { %2800 = vrot.lane.b32.xlu1 %v2798_v25, %s6824_s17 }
0x2d42   : > { %v2801_v26 = vpop.permute.xlu1 %2800 }
0x2d43   : > { %v2806_v27 = vsel %vm851_vm3, %v2801_v26, %v2804_v23 }
0x2d44   : > { %6088 = vmatmul.msk.f32.vlgmr.msrb.gmra.mxu1 %vm644_vm1, %v2806_v27 }
0x2d45   : > { %3147 = vmatpush.msrb.mxu1 %v7493_v4 }
0x2d47   : > { %3148 = vmatpush.msrb.mxu1 %v7496_v18 }
0x2d49   : > { %3149 = vmatpush.msrb.mxu1 %v7499_v24 }
0x2d4b   : > { %3150 = vmatpush.msrb.mxu1 %v7502_v33 }
0x2dc1   : > { %v2827_v50 = vpop.f32.mrf.mxu1 }
0x2dc2   : > { %v2828_v8 = vadd.f32 %v7581_v32, %v2827_v50 }
0x2dc4   : > { %2850 = vrot.lane.b32.xlu0 %v2828_v8, %s6826_s19  ;;  %v6089_v49 = vmul.f32 -1.442695, %v2828_v8 }
0x2dc6   : > { %6379 = vpow2.f32 %v6089_v49 }
0x2dcc   : > { %v6380_v6 = vpop.eup %6379 }
0x2dcd   : > { %v2833_v19 = vadd.f32 1.0, %v6380_v6 }
0x2dcf   : > { %6381 = vrcp.f32 %v2833_v19  ;;  %v2845_v18 = vand.u32 2147483648, %v2833_v19  ;;  %vm2839_vm15 = vweird.f32 %v2833_v19  ;;  %v2843_v24 = vand.u32 2147483647, %v2833_v19 }
0x2dd1   : > { %v2846_v9 = vor.u32 1.1754944e-38, %v2845_v18  ;;  %vm2844_vm2 = vcmp.eq.f32.partialorder %v2843_v24, 8.507059e+37 }
0x2dd5   : > { %v6382_v40 = vpop.eup %6381 }
0x2dd6   : > { %v2835_v41 = vmul.f32 %v6382_v40, %v2833_v19  ;;  %vm2840_vm14 = vweird.f32 %v6382_v40 }
0x2dd7   : > { %vm2841_vm0 = vmor %vm2839_vm15, %vm2840_vm14 }
0x2dd8   : > { %v2836_v20 = vsub.f32 1.0, %v2835_v41 }
0x2dda   : > { %v2837_v4 = vmul.f32 %v6382_v40, %v2836_v20 }
0x2ddc   : > { %v2838_v42 = vadd.f32 %v6382_v40, %v2837_v4 }
0x2dde   : > { %v2842_v33 = vsel %vm2841_vm0, %v6382_v40, %v2838_v42 }
0x2ddf   : > { %v2847_v34 = vsel %vm2844_vm2, %v2846_v9, %v2842_v33 }
0x2de0   : > { %v2860_v43 = vsub.f32 1.0, %v2847_v34  ;;  %v2866_v36 = vmul.f32 %v2847_v34, %v2804_v23 }
0x2e36   : > { %v2851_v46 = vpop.permute.xlu0 %2850 }
0x2e37   : > { %v2853_v61 = vmul.f32 %v2851_v46, %v2847_v34 }
0x2e39   : > { %2855 = vrot.lane.b32.xlu1 %v2853_v61, %s6824_s17 }
0x2eab   : > { %v2856_v21 = vpop.permute.xlu1 %2855 }
0x2eac   : > { %v2858_v16 = vadd.f32 %v2856_v21, %v2828_v8 }
0x2eae   : > { %6383 = vtanh.f32 %v2858_v16 }
0x2eb4   : > { %v6384_v62 = vpop.eup %6383 }
0x2eb5   : > { %2862 = vrot.lane.b32.xlu2 %v6384_v62, %s6825_s16 }
0x2ebd   : > { %2991 = vperm.xlu2 %6330, %v7752_v54  }
0x2f0f   : > { %v2863_v58 = vpop.permute.xlu2 %2862 }
0x2f10   : > { %v2865_v39 = vmul.f32 %v2863_v58, %v2860_v43 }
0x2f12   : > { %v2867_v53 = vadd.f32 %v2866_v36, %v2865_v39 }
0x2f14   : > { %2869 = vrot.lane.b32.xlu0 %v2867_v53, %s6825_s16 }
0x2f17   : > { %v2992_v13 = vpop.permute.xlu2 %2991 }
0x2f18   : > { %v2996_v0 = vmul.f32 %v2992_v13, %v2992_v13 }
0x2f1a   : > { %v3003_v25 = vmul.f32 %v2996_v0, %v2992_v13 }
0x2f1c   : > { %v3010_v23 = vmul.f32 %v3003_v25, %v2992_v13 }
0x2f1e   : > { %v3017_v26 = vmul.f32 %v3010_v23, %v2992_v13 }
0x2f20   : > { %v3020_v27 = vmul.f32 %v3017_v26, %v2992_v13 }
0x2f22   : > { %v3027_v50 = vmul.f32 %v3020_v27, %v2992_v13 }
0x2f24   : > { %v3034_v8 = vmul.f32 %v3027_v50, %v2992_v13 }
0x2f26   : > { %v3041_v41 = vmul.f32 %v3034_v8, %v2992_v13 }
0x2f28   : > { %v3044_v4 = vmul.f32 %v3041_v41, %v2992_v13 }
0x2f2a   : > { %v3051_v33 = vmul.f32 %v3044_v4, %v2992_v13 }
0x2f2c   : > { %v3058_v46 = vmul.f32 %v3051_v33, %v2992_v13 }
0x2f86   : > { %v2870_v57 = vpop.permute.xlu0 %2869 }
0x2f87   : > { %6090 = vmatmul.msk.f32.vlgmr.msrb.gmra.mxu2 %vm851_vm3, %v2870_v57 }
0x2f88   : > { %3212 = vmatpush.msrb.mxu2 %v7589_v51 }
0x2f8a   : > { %3213 = vmatpush.msrb.mxu2 %v7592_v45 }
0x300a   : > { %v2890_v52 = vpop.f32.mrf.mxu2 }
0x300b   : > { %v2894_v17 = vadd.f32 %v2890_v52, %v7235_v35  ;;  %v2893_v55 = vadd.f32 %v7614_v37, %v2890_v52 }
0x300d   : > { %v2895_v30 = vmax.f32 %v2894_v17, 0.0 }
0x300f   : > { %2897 = vrot.lane.b32.xlu1 %v2895_v30, %s6822_s30 }
0x3081   : > { %v2898_v31 = vpop.permute.xlu1 %2897 }
0x3082   : > { %6091 = vmatmul.msk.f32.vlgmr.msrb.gmra.mxu3 %vm644_vm1, %v2898_v31 }
0x3083   : > { %3238 = vmatpush.msrb.mxu3 %v7598_v63 }
0x3085   : > { %3239 = vmatpush.msrb.mxu3 %v7601_v10 }
0x3087   : > { %3240 = vmatpush.msrb.mxu3 %v7604_v14 }
0x3089   : > { %3241 = vmatpush.msrb.mxu3 %v7607_v22 }
0x3105   : > { %v2918_v56 = vpop.f32.mrf.mxu3 }
0x3106   : > { %v7756_v2 = vadd.f32 %v2918_v56, %v2893_v55 }
0x3108   : > { %6092 = vmatmul.msk.f32.vlgmr.msra.gmra.mxu0 %vm644_vm1, %v7756_v2  ;;  %6093 = vmatmul.msk.f32.vlgmr.msra.gmra.mxu1 %vm644_vm1, %v7756_v2 }
0x3109   : > { %6094 = vmatmul.msk.f32.vlgmr.msra.gmra.mxu2 %vm644_vm1, %v7756_v2  ;;  %3266 = vmatpush.msra.mxu0 %v7764_v3 }
0x310a   : > { %3286 = vmatpush.msra.mxu1 %v7767_v5  ;;  %3306 = vmatpush.msra.mxu2 %v7770_v1 }
0x310b   : > { %3267 = vmatpush.msra.mxu0 %v7773_v59 }
0x310c   : > { %3287 = vmatpush.msra.mxu1 %v7776_v28  ;;  %3307 = vmatpush.msra.mxu2 %v7779_v15 }
0x310d   : > { %3268 = vmatpush.msra.mxu0 %v7782_v60 }
0x310e   : > { %3288 = vmatpush.msra.mxu1 %v7785_v7  ;;  %3308 = vmatpush.msra.mxu2 %v7788_v44 }
0x310f   : > { %3269 = vmatpush.msra.mxu0 %v7791_v11 }
0x3110   : > { %3289 = vmatpush.msra.mxu1 %v7794_v47  ;;  %3309 = vmatpush.msra.mxu2 %v7797_v12 }
0x3185   : > { %v2946_v49 = vpop.f32.mrf.mxu0  ;;  %v2966_v20 = vpop.f32.mrf.mxu1 }
0x3186   : > { %v3011_v6 = vmul.f32 %v3010_v23, %v2946_v49  ;;  %v3004_v19 = vmul.f32 %v3003_v25, %v2946_v49  ;;  %v2997_v40 = vmul.f32 %v2996_v0, %v2946_v49  ;;  %v3035_v42 = vmul.f32 %v3034_v8, %v2966_v20 }
0x3187   : > { %v3028_v18 = vmul.f32 %v3027_v50, %v2966_v20  ;;  %v3021_v24 = vmul.f32 %v3020_v27, %v2966_v20  ;;  %v2994_v16 = vmul.f32 %v2992_v13, %v2946_v49  ;;  %v3018_v57 = vmul.f32 %v3017_v26, %v2966_v20  ;;  %v7814_v26 = vld [vmem:[#allocation8 + $0x10] sm:$0xff] }
0x3188   : > { %3013 = vrot.lane.b32.xlu2 %v3011_v6, %s6824_s17  ;;  %3006 = vrot.lane.b32.xlu1 %v3004_v19, %s6823_s21  ;;  %v7811_v6 = vld [vmem:[#allocation8 + $0x18] sm:$0xff]  ;;  %v7817_v19 = vld [vmem:[#allocation8 + $0x8] sm:$0xff] }
0x3189   : > { %2999 = vrot.lane.b32.xlu0 %v2997_v40, %s6822_s30  ;;  %v2995_v43 = vadd.f32 %v2994_v16, %v7756_v2  ;;  %v7820_v40 = vld [vmem:[#allocation8] sm:$0xff] }
0x318c   : > { %v2986_v9 = vpop.f32.mrf.mxu2 }
0x318d   : > { %v3059_v34 = vmul.f32 %v3058_v46, %v2986_v9  ;;  %v3052_v61 = vmul.f32 %v3051_v33, %v2986_v9  ;;  %v3045_v21 = vmul.f32 %v3044_v4, %v2986_v9  ;;  %v3042_v0 = vmul.f32 %v3041_v41, %v2986_v9  ;;  %v7827_v4 = vld [vmem:[%s8568_s5 + $0x18] sm:$0xff] }
0x3190   : > { %3037 = vrot.lane.b32.xlu2 %v3035_v42, %s6824_s17  ;;  %3030 = vrot.lane.b32.xlu1 %v3028_v18, %s6823_s21  ;;  %v7833_v42 = vld [vmem:[%s8568_s5 + $0x10] sm:$0xff]  ;;  %v7839_v18 = vld [vmem:[%s8568_s5 + $0x8] sm:$0xff] }
0x3191   : > { %3023 = vrot.lane.b32.xlu0 %v3021_v24, %s6822_s30  ;;  %v7845_v24 = vld [vmem:[%s8568_s5] sm:$0xff] }
0x3198   : > { %3061 = vrot.lane.b32.xlu2 %v3059_v34, %s6824_s17  ;;  %3054 = vrot.lane.b32.xlu1 %v3052_v61, %s6823_s21 }
0x3199   : > { %3047 = vrot.lane.b32.xlu0 %v3045_v21, %s6822_s30 }
0x31e2   : > { %v3014_v58 = vpop.permute.xlu2 %3013 }
0x31ea   : > { %v3038_v55 = vpop.permute.xlu2 %3037 }
0x31f2   : > { %v3062_v2 = vpop.permute.xlu2 %3061 }
0x31fa   : > { %v3007_v62 = vpop.permute.xlu1 %3006 }
0x31fb   : > { %v3000_v36 = vpop.permute.xlu0 %2999 }
0x31fc   : > { %v3002_v39 = vadd.f32 %v3000_v36, %v2995_v43  ;;  %v7864_v36 = vld [vmem:[#allocation9 + $0x10] sm:$0xff] }
0x31fe   : > { %v3009_v53 = vadd.f32 %v3007_v62, %v3002_v39  ;;  %v7867_v39 = vld [vmem:[#allocation9 + $0x8] sm:$0xff] }
0x3200   : > { %v3016_v52 = vadd.f32 %v3014_v58, %v3009_v53  ;;  %v7861_v58 = vld [vmem:[#allocation9 + $0x18] sm:$0xff] }
0x3202   : > { %v3019_v17 = vadd.f32 %v3018_v57, %v3016_v52  ;;  %v3031_v30 = vpop.permute.xlu1 %3030 }
0x3203   : > { %v3024_v31 = vpop.permute.xlu0 %3023 }
0x3204   : > { %v3026_v48 = vadd.f32 %v3024_v31, %v3019_v17 }
0x3206   : > { %v3033_v56 = vadd.f32 %v3031_v30, %v3026_v48 }
0x3208   : > { %v3040_v25 = vadd.f32 %v3038_v55, %v3033_v56 }
0x320a   : > { %v3043_v23 = vadd.f32 %v3042_v0, %v3040_v25  ;;  %v3055_v50 = vpop.permute.xlu1 %3054 }
0x320b   : > { %v3048_v27 = vpop.permute.xlu0 %3047 }
0x320c   : > { %v3050_v13 = vadd.f32 %v3048_v27, %v3043_v23 }
0x320e   : > { %v3057_v8 = vadd.f32 %v3055_v50, %v3050_v13 }
0x3210   : > { %v3064_v49 = vadd.f32 %v3062_v2, %v3057_v8 }
0x3212   : > { %6095 = vmatmul.msk.f32.vlgmr.msra.gmra.mxu3 %vm644_vm1, %v3064_v49 }
0x3213   : > { %3405 = vmatpush.msra.mxu3 %v7811_v6 }
0x3215   : > { %3406 = vmatpush.msra.mxu3 %v7814_v26 }
0x3217   : > { %3407 = vmatpush.msra.mxu3 %v7817_v19 }
0x3219   : > { %3408 = vmatpush.msra.mxu3 %v7820_v40 }
0x3295   : > { %v3085_v41 = vpop.f32.mrf.mxu3 }
0x3296   : > { %v3088_v20 = vmax.f32 %v3085_v41, 0.0 }
0x3298   : > { %6096 = vmatmul.msk.f32.vlgmr.msrb.gmra.mxu0 %vm644_vm1, %v3088_v20 }
0x3299   : > { %3429 = vmatpush.msrb.mxu0 %v7827_v4 }
0x329b   : > { %3430 = vmatpush.msrb.mxu0 %v7833_v42 }
0x329d   : > { %3431 = vmatpush.msrb.mxu0 %v7839_v18 }
0x329f   : > { %3432 = vmatpush.msrb.mxu0 %v7845_v24 }
0x3315   : > { %v3109_v33 = vpop.f32.mrf.mxu0 }
0x3316   : > { %3113 = vrot.lane.b32.xlu0 %v3109_v33, %s6824_s17 }
0x3388   : > { %v3114_v9 = vpop.permute.xlu0 %3113 }
0x3389   : > { %v3116_v46 = vadd.f32 %v3114_v9, %v3085_v41 }
0x338b   : > { %v3117_v34 = vadd.f32 %v3116_v46, %v7163_v29 }
0x338d   : > { %3128 = vrot.lane.b32.xlu0 %v3117_v34, %s6825_s16  ;;  %3120 = vrot.lane.b32.xlu1 %v3117_v34, %s6826_s19 }
0x33ff   : > { %v3121_v61 = vpop.permute.xlu1 %3120  ;;  %v3129_v16 = vpop.permute.xlu0 %3128 }
0x3400   : > { %3248 = vst.msk [vmem:[%s7048_s13] sm:$0xff] %vm3247_vm6, %v3121_v61  ;;  %v3123_v21 = vsel %vm2143_vm11, %v3121_v61, %v7561_v38  ;;  %v7870_v38 = vld [vmem:[#allocation9] sm:$0xff] }
0x3401   : > { %3125 = vrot.lane.b32.xlu2 %v3123_v21, %s6830_s22 }
0x345b   : > { %v3126_v62 = vpop.permute.xlu2 %3125 }
0x345c   : > { %v3131_v43 = vsel %vm851_vm3, %v3126_v62, %v3129_v16 }
0x345d   : > { %6097 = vmatmul.msk.f32.vlgmr.msrb.gmra.mxu1 %vm644_vm1, %v3131_v43 }
0x345e   : > { %3468 = vmatpush.msrb.mxu1 %v7861_v58 }
0x3460   : > { %3469 = vmatpush.msrb.mxu1 %v7864_v36 }
0x3462   : > { %3470 = vmatpush.msrb.mxu1 %v7867_v39 }
0x3464   : > { %3471 = vmatpush.msrb.mxu1 %v7870_v38 }
0x34da   : > { %v3152_v53 = vpop.f32.mrf.mxu1 }
0x34db   : > { %v3153_v57 = vadd.f32 %v7581_v32, %v3152_v53  ;;  %v6836_v53 = vmov 8  }
0x34dc   : > { %6331 = vset.pattern.permute.xlu0 %v6836_v53 }
0x34dd   : > { %3175 = vrot.lane.b32.xlu1 %v3153_v57, %s6826_s19  ;;  %v6098_v52 = vmul.f32 -1.442695, %v3153_v57 }
0x34df   : > { %6385 = vpow2.f32 %v6098_v52 }
0x34e5   : > { %v6386_v17 = vpop.eup %6385 }
0x34e6   : > { %v3158_v30 = vadd.f32 1.0, %v6386_v17 }
0x34e8   : > { %6387 = vrcp.f32 %v3158_v30  ;;  %v3170_v25 = vand.u32 2147483648, %v3158_v30  ;;  %vm3164_vm7 = vweird.f32 %v3158_v30  ;;  %v3168_v23 = vand.u32 2147483647, %v3158_v30 }
0x34ea   : > { %v3171_v13 = vor.u32 1.1754944e-38, %v3170_v25  ;;  %vm3169_vm14 = vcmp.eq.f32.partialorder %v3168_v23, 8.507059e+37 }
0x34ee   : > { %v6388_v31 = vpop.eup %6387 }
0x34ef   : > { %v3160_v48 = vmul.f32 %v6388_v31, %v3158_v30  ;;  %vm3165_vm11 = vweird.f32 %v6388_v31 }
0x34f0   : > { %vm3166_vm9 = vmor %vm3164_vm7, %vm3165_vm11 }
0x34f1   : > { %v3161_v55 = vsub.f32 1.0, %v3160_v48 }
0x34f3   : > { %v3162_v56 = vmul.f32 %v6388_v31, %v3161_v55 }
0x34f5   : > { %v3163_v0 = vadd.f32 %v6388_v31, %v3162_v56 }
0x34f7   : > { %v3167_v27 = vsel %vm3166_vm9, %v6388_v31, %v3163_v0 }
0x34f8   : > { %v3172_v50 = vsel %vm3169_vm14, %v3171_v13, %v3167_v27 }
0x34f9   : > { %v3185_v20 = vsub.f32 1.0, %v3172_v50  ;;  %v3191_v9 = vmul.f32 %v3172_v50, %v3129_v16 }
0x354f   : > { %v3176_v32 = vpop.permute.xlu1 %3175 }
0x3550   : > { %v3178_v8 = vmul.f32 %v3176_v32, %v3172_v50 }
0x3552   : > { %3180 = vrot.lane.b32.xlu2 %v3178_v8, %s6824_s17 }
0x35ac   : > { %v3181_v2 = vpop.permute.xlu2 %3180 }
0x35ad   : > { %v3183_v49 = vadd.f32 %v3181_v2, %v3153_v57 }
0x35af   : > { %6389 = vtanh.f32 %v3183_v49 }
0x35b5   : > { %v6390_v41 = vpop.eup %6389 }
0x35b6   : > { %3187 = vrot.lane.b32.xlu0 %v6390_v41, %s6825_s16 }
0x35be   : > { %3316 = vperm.xlu0 %6331, %v7752_v54  }
0x3628   : > { %v3188_v33 = vpop.permute.xlu0 %3187 }
0x3629   : > { %v3190_v46 = vmul.f32 %v3188_v33, %v3185_v20 }
0x362b   : > { %v3192_v34 = vadd.f32 %v3191_v9, %v3190_v46 }
0x362d   : > { %3194 = vrot.lane.b32.xlu1 %v3192_v34, %s6825_s16 }
0x369f   : > { %v3195_v61 = vpop.permute.xlu1 %3194 }
0x36a0   : > { %6099 = vmatmul.msk.f32.vlgmr.msrb.gmra.mxu2 %vm851_vm3, %v3195_v61 }
0x36a1   : > { %3533 = vmatpush.msrb.mxu2 %v7589_v51 }
0x36a3   : > { %3534 = vmatpush.msrb.mxu2 %v7592_v45 }
0x3723   : > { %v3215_v21 = vpop.f32.mrf.mxu2 }
0x3724   : > { %v3219_v62 = vadd.f32 %v3215_v21, %v7235_v35  ;;  %v3218_v51 = vadd.f32 %v7614_v37, %v3215_v21 }
0x3726   : > { %v3220_v43 = vmax.f32 %v3219_v62, 0.0 }
0x3728   : > { %3222 = vrot.lane.b32.xlu2 %v3220_v43, %s6822_s30 }
0x3782   : > { %v3223_v16 = vpop.permute.xlu2 %3222 }
0x3783   : > { %6100 = vmatmul.msk.f32.vlgmr.msrb.gmra.mxu3 %vm644_vm1, %v3223_v16 }
0x3784   : > { %3559 = vmatpush.msrb.mxu3 %v7598_v63  ;;  %v3317_v63 = vpop.permute.xlu0 %3316 }
0x3786   : > { %3560 = vmatpush.msrb.mxu3 %v7601_v10  ;;  %v3321_v10 = vmul.f32 %v3317_v63, %v3317_v63 }
0x3788   : > { %3561 = vmatpush.msrb.mxu3 %v7604_v14  ;;  %v3328_v14 = vmul.f32 %v3321_v10, %v3317_v63 }
0x378a   : > { %3562 = vmatpush.msrb.mxu3 %v7607_v22  ;;  %v3335_v22 = vmul.f32 %v3328_v14, %v3317_v63 }
0x378c   : > { %v3342_v37 = vmul.f32 %v3335_v22, %v3317_v63 }
0x378e   : > { %v3345_v52 = vmul.f32 %v3342_v37, %v3317_v63 }
0x3790   : > { %v3352_v17 = vmul.f32 %v3345_v52, %v3317_v63 }
0x3792   : > { %v3359_v30 = vmul.f32 %v3352_v17, %v3317_v63 }
0x3794   : > { %v3366_v55 = vmul.f32 %v3359_v30, %v3317_v63 }
0x3796   : > { %v3369_v23 = vmul.f32 %v3366_v55, %v3317_v63 }
0x3798   : > { %v3376_v13 = vmul.f32 %v3369_v23, %v3317_v63 }
0x379a   : > { %v3383_v41 = vmul.f32 %v3376_v13, %v3317_v63 }
0x3806   : > { %v3243_v45 = vpop.f32.mrf.mxu3 }
0x3807   : > { %v3246_v57 = vadd.f32 %v3243_v45, %v3218_v51 }
0x3809   : > { %6101 = vmatmul.msk.f32.vlgmr.msra.gmra.mxu0 %vm644_vm1, %v3246_v57  ;;  %6102 = vmatmul.msk.f32.vlgmr.msra.gmra.mxu1 %vm644_vm1, %v3246_v57 }
0x380a   : > { %6103 = vmatmul.msk.f32.vlgmr.msra.gmra.mxu2 %vm644_vm1, %v3246_v57  ;;  %3586 = vmatpush.msra.mxu0 %v7764_v3 }
0x380b   : > { %3606 = vmatpush.msra.mxu1 %v7767_v5  ;;  %3626 = vmatpush.msra.mxu2 %v7770_v1 }
0x380c   : > { %3587 = vmatpush.msra.mxu0 %v7773_v59 }
0x380d   : > { %3607 = vmatpush.msra.mxu1 %v7776_v28  ;;  %3627 = vmatpush.msra.mxu2 %v7779_v15 }
0x380e   : > { %3588 = vmatpush.msra.mxu0 %v7782_v60 }
0x380f   : > { %3608 = vmatpush.msra.mxu1 %v7785_v7  ;;  %3628 = vmatpush.msra.mxu2 %v7788_v44 }
0x3810   : > { %3589 = vmatpush.msra.mxu0 %v7791_v11 }
0x3811   : > { %3609 = vmatpush.msra.mxu1 %v7794_v47  ;;  %3629 = vmatpush.msra.mxu2 %v7797_v12 }
0x3886   : > { %v3271_v31 = vpop.f32.mrf.mxu0  ;;  %v3291_v48 = vpop.f32.mrf.mxu1 }
0x3887   : > { %v3322_v56 = vmul.f32 %v3321_v10, %v3271_v31  ;;  %v3329_v0 = vmul.f32 %v3328_v14, %v3271_v31  ;;  %v3353_v25 = vmul.f32 %v3352_v17, %v3291_v48  ;;  %v3336_v32 = vmul.f32 %v3335_v22, %v3271_v31 }
0x3888   : > { %v3346_v50 = vmul.f32 %v3345_v52, %v3291_v48  ;;  %v3360_v2 = vmul.f32 %v3359_v30, %v3291_v48  ;;  %v3319_v33 = vmul.f32 %v3317_v63, %v3271_v31  ;;  %v3343_v43 = vmul.f32 %v3342_v37, %v3291_v48 }
0x3889   : > { %3331 = vrot.lane.b32.xlu2 %v3329_v0, %s6823_s21  ;;  %3324 = vrot.lane.b32.xlu1 %v3322_v56, %s6822_s30 }
0x388a   : > { %3355 = vrot.lane.b32.xlu0 %v3353_v25, %s6823_s21  ;;  %v3320_v34 = vadd.f32 %v3319_v33, %v3246_v57 }
0x388d   : > { %v3311_v27 = vpop.f32.mrf.mxu2 }
0x388e   : > { %v3377_v8 = vmul.f32 %v3376_v13, %v3311_v27  ;;  %v3370_v49 = vmul.f32 %v3369_v23, %v3311_v27  ;;  %v3384_v20 = vmul.f32 %v3383_v41, %v3311_v27  ;;  %v3367_v52 = vmul.f32 %v3366_v55, %v3311_v27 }
0x3891   : > { %3348 = vrot.lane.b32.xlu2 %v3346_v50, %s6822_s30  ;;  %3338 = vrot.lane.b32.xlu1 %v3336_v32, %s6824_s17  ;;  %v7929_v32 = vld [vmem:[%s7046_s23 + $0x8] sm:$0xff] }
0x3892   : > { %3379 = vrot.lane.b32.xlu0 %v3377_v8, %s6823_s21  ;;  %vm3443_vm15 = vcmp.ne.f32.partialorder %v7929_v32, %v7929_v32 }
0x3899   : > { %3372 = vrot.lane.b32.xlu2 %v3370_v49, %s6822_s30  ;;  %3362 = vrot.lane.b32.xlu1 %v3360_v2, %s6824_s17 }
0x38a1   : > { %3386 = vrot.lane.b32.xlu1 %v3384_v20, %s6824_s17  ;;  %v7948_v20 = vld [vmem:[%s8571_s8] ss:$0 sm:$0xff] }
0x38e3   : > { %v3332_v9 = vpop.permute.xlu2 %3331 }
0x38eb   : > { %v3349_v16 = vpop.permute.xlu2 %3348 }
0x38f3   : > { %v3373_v56 = vpop.permute.xlu2 %3372 }
0x38fb   : > { %v3325_v46 = vpop.permute.xlu1 %3324 }
0x38fc   : > { %v3327_v61 = vadd.f32 %v3325_v46, %v3320_v34  ;;  %v3356_v45 = vpop.permute.xlu0 %3355 }
0x38fe   : > { %v3334_v21 = vadd.f32 %v3332_v9, %v3327_v61 }
0x3903   : > { %v3339_v62 = vpop.permute.xlu1 %3338 }
0x3904   : > { %v3341_v53 = vadd.f32 %v3339_v62, %v3334_v21  ;;  %v3380_v63 = vpop.permute.xlu0 %3379 }
0x3906   : > { %v3344_v51 = vadd.f32 %v3343_v43, %v3341_v53 }
0x3908   : > { %v3351_v10 = vadd.f32 %v3349_v16, %v3344_v51 }
0x390a   : > { %v3358_v14 = vadd.f32 %v3356_v45, %v3351_v10 }
0x390b   : > { %v3363_v22 = vpop.permute.xlu1 %3362 }
0x390c   : > { %v3365_v17 = vadd.f32 %v3363_v22, %v3358_v14 }
0x390e   : > { %v3368_v30 = vadd.f32 %v3367_v52, %v3365_v17 }
0x3910   : > { %v3375_v0 = vadd.f32 %v3373_v56, %v3368_v30 }
0x3912   : > { %v3382_v31 = vadd.f32 %v3380_v63, %v3375_v0 }
0x3913   : > { %v3387_v25 = vpop.permute.xlu1 %3386 }
0x3914   : > { %v3389_v57 = vadd.f32 %v3387_v25, %v3382_v31 }
0x3916   : > { %6104 = vmatmul.msk.f32.vlgmr.msra.gmra.mxu3 %vm644_vm1, %v3389_v57 }
0x3917   : > { %3725 = vmatpush.msra.mxu3 %v7811_v6 }
0x3919   : > { %3726 = vmatpush.msra.mxu3 %v7814_v26 }
0x391b   : > { %3727 = vmatpush.msra.mxu3 %v7817_v19 }
0x391d   : > { %3728 = vmatpush.msra.mxu3 %v7820_v40 }
0x3999   : > { %v3410_v37 = vpop.f32.mrf.mxu3 }
0x399a   : > { %v3413_v48 = vmax.f32 %v3410_v37, 0.0 }
0x399c   : > { %6105 = vmatmul.msk.f32.vlgmr.msrb.gmra.mxu0 %vm644_vm1, %v3413_v48  ;;  %v7956_v48 = vld [vmem:[#allocation11 + $0x8] sm:$0xff] }
0x399d   : > { %3749 = vmatpush.msrb.mxu0 %v7827_v4 }
0x399f   : > { %3750 = vmatpush.msrb.mxu0 %v7833_v42 }
0x39a1   : > { %3751 = vmatpush.msrb.mxu0 %v7839_v18 }
0x39a3   : > { %3752 = vmatpush.msrb.mxu0 %v7845_v24 }
0x3a19   : > { %v3434_v55 = vpop.f32.mrf.mxu0 }
0x3a1a   : > { %3438 = vrot.lane.b32.xlu2 %v3434_v55, %s6824_s17  ;;  %v7959_v55 = vld [vmem:[#allocation11] sm:$0xff] }
0x3a74   : > { %v3439_v23 = vpop.permute.xlu2 %3438 }
0x3a75   : > { %v3441_v27 = vadd.f32 %v3439_v23, %v3410_v37 }
0x3a77   : > { %v3442_v13 = vadd.f32 %v3441_v27, %v7163_v29 }
0x3a79   : > { %3449 = vrot.lane.b32.xlu1 %v3442_v13, %s6825_s16  ;;  %3445 = vrot.lane.b32.xlu0 %v3442_v13, %s6822_s30 }
0x3aeb   : > { %v3450_v50 = vpop.permute.xlu1 %3449  ;;  %v3446_v8 = vpop.permute.xlu0 %3445 }
0x3aec   : > { %v3448_v2 = vsel %vm3443_vm15, %v3446_v8, %v7929_v32  ;;  %3568 = vst.msk [vmem:[%s7048_s13 + $0x8] sm:$0xff] %vm851_vm3, %v3446_v8 }
0x3aed   : > { %v3452_v49 = vsel %vm851_vm3, %v3448_v2, %v3450_v50  ;;  %v7966_v2 = vld [vmem:[#allocation12 + $0x18] sm:$0xff] }
0x3aee   : > { %6106 = vmatmul.msk.f32.vlgmr.msrb.gmra.mxu1 %vm644_vm1, %v3452_v49  ;;  %v7969_v49 = vld [vmem:[#allocation12 + $0x10] sm:$0xff] }
0x3aef   : > { %3789 = vmatpush.msrb.mxu1 %v7861_v58 }
0x3af1   : > { %3790 = vmatpush.msrb.mxu1 %v7864_v36 }
0x3af3   : > { %3791 = vmatpush.msrb.mxu1 %v7867_v39 }
0x3af5   : > { %3792 = vmatpush.msrb.mxu1 %v7870_v38 }
0x3b6b   : > { %v3473_v41 = vpop.f32.mrf.mxu1 }
0x3b6c   : > { %v3474_v33 = vadd.f32 %v7948_v20, %v3473_v41  ;;  %v7972_v41 = vld [vmem:[#allocation12 + $0x8] sm:$0xff] }
0x3b6e   : > { %3496 = vrot.lane.b32.xlu2 %v3474_v33, %s6826_s19  ;;  %v6107_v9 = vmul.f32 -1.442695, %v3474_v33 }
0x3b70   : > { %6391 = vpow2.f32 %v6107_v9  ;;  %v7981_v9 = vld [vmem:[%s8573_s10] ss:$0 sm:$0xff] }
0x3b76   : > { %v6392_v46 = vpop.eup %6391 }
0x3b77   : > { %v3479_v34 = vadd.f32 1.0, %v6392_v46 }
0x3b79   : > { %6393 = vrcp.f32 %v3479_v34  ;;  %v3491_v16 = vand.u32 2147483648, %v3479_v34  ;;  %vm3485_vm2 = vweird.f32 %v3479_v34  ;;  %v3489_v51 = vand.u32 2147483647, %v3479_v34 }
0x3b7b   : > { %v3492_v10 = vor.u32 1.1754944e-38, %v3491_v16  ;;  %vm3490_vm7 = vcmp.eq.f32.partialorder %v3489_v51, 8.507059e+37 }
0x3b7f   : > { %v6394_v61 = vpop.eup %6393 }
0x3b80   : > { %v3481_v21 = vmul.f32 %v6394_v61, %v3479_v34  ;;  %vm3486_vm0 = vweird.f32 %v6394_v61 }
0x3b81   : > { %vm3487_vm11 = vmor %vm3485_vm2, %vm3486_vm0 }
0x3b82   : > { %v3482_v62 = vsub.f32 1.0, %v3481_v21 }
0x3b84   : > { %v3483_v43 = vmul.f32 %v6394_v61, %v3482_v62 }
0x3b86   : > { %v3484_v53 = vadd.f32 %v6394_v61, %v3483_v43 }
0x3b88   : > { %v3488_v45 = vsel %vm3487_vm11, %v6394_v61, %v3484_v53 }
0x3b89   : > { %v3493_v22 = vsel %vm3490_vm7, %v3492_v10, %v3488_v45 }
0x3b8a   : > { %v3506_v0 = vsub.f32 1.0, %v3493_v22  ;;  %v3512_v31 = vmul.f32 %v3493_v22, %v3450_v50  ;;  %v6837_v50 = vmov 9  }
0x3b8b   : > { %6332 = vset.pattern.permute.xlu1 %v6837_v50 }
0x3bc8   : > { %v3497_v14 = vpop.permute.xlu2 %3496 }
0x3bc9   : > { %v3499_v52 = vmul.f32 %v3497_v14, %v3493_v22 }
0x3bcb   : > { %3501 = vrot.lane.b32.xlu0 %v3499_v52, %s6824_s17 }
0x3c3d   : > { %v3502_v17 = vpop.permute.xlu0 %3501 }
0x3c3e   : > { %v3504_v30 = vadd.f32 %v3502_v17, %v3474_v33  ;;  %v7975_v33 = vld [vmem:[#allocation12] sm:$0xff] }
0x3c40   : > { %6395 = vtanh.f32 %v3504_v30 }
0x3c46   : > { %v6396_v56 = vpop.eup %6395 }
0x3c47   : > { %3508 = vrot.lane.b32.xlu1 %v6396_v56, %s6825_s16 }
0x3c4f   : > { %3636 = vperm.xlu1 %6332, %v7752_v54  }
0x3cb9   : > { %v3509_v63 = vpop.permute.xlu1 %3508 }
0x3cba   : > { %v3511_v25 = vmul.f32 %v3509_v63, %v3506_v0 }
0x3cbc   : > { %v3513_v57 = vadd.f32 %v3512_v31, %v3511_v25 }
0x3cbe   : > { %3515 = vrot.lane.b32.xlu2 %v3513_v57, %s6825_s16 }
0x3cc1   : > { %v3637_v21 = vpop.permute.xlu1 %3636 }
0x3cc2   : > { %v3641_v62 = vmul.f32 %v3637_v21, %v3637_v21 }
0x3cc4   : > { %v3648_v43 = vmul.f32 %v3641_v62, %v3637_v21 }
0x3cc6   : > { %v3655_v53 = vmul.f32 %v3648_v43, %v3637_v21 }
0x3cc8   : > { %v3662_v16 = vmul.f32 %v3655_v53, %v3637_v21 }
0x3cca   : > { %v3665_v51 = vmul.f32 %v3662_v16, %v3637_v21 }
0x3ccc   : > { %v3672_v45 = vmul.f32 %v3665_v51, %v3637_v21 }
0x3cce   : > { %v3679_v10 = vmul.f32 %v3672_v45, %v3637_v21 }
0x3cd0   : > { %v3686_v30 = vmul.f32 %v3679_v10, %v3637_v21 }
0x3cd2   : > { %v3689_v0 = vmul.f32 %v3686_v30, %v3637_v21 }
0x3cd4   : > { %v3696_v57 = vmul.f32 %v3689_v0, %v3637_v21 }
0x3d18   : > { %v3516_v37 = vpop.permute.xlu2 %3515 }
0x3d19   : > { %6108 = vmatmul.msk.f32.vlgmr.msrb.gmra.mxu2 %vm851_vm3, %v3516_v37 }
0x3d1a   : > { %3854 = vmatpush.msrb.mxu2 %v7956_v48 }
0x3d1c   : > { %3855 = vmatpush.msrb.mxu2 %v7959_v55 }
0x3d9c   : > { %v3536_v23 = vpop.f32.mrf.mxu2 }
0x3d9d   : > { %v3540_v27 = vadd.f32 %v3536_v23, %v7235_v35  ;;  %v3539_v46 = vadd.f32 %v7981_v9, %v3536_v23  ;;  %v3703_v23 = vmul.f32 %v3696_v57, %v3637_v21 }
0x3d9f   : > { %v3541_v13 = vmax.f32 %v3540_v27, 0.0 }
0x3da1   : > { %3543 = vrot.lane.b32.xlu0 %v3541_v13, %s6822_s30 }
0x3e13   : > { %v3544_v8 = vpop.permute.xlu0 %3543 }
0x3e14   : > { %6109 = vmatmul.msk.f32.vlgmr.msrb.gmra.mxu3 %vm644_vm1, %v3544_v8 }
0x3e15   : > { %3880 = vmatpush.msrb.mxu3 %v7966_v2 }
0x3e17   : > { %3881 = vmatpush.msrb.mxu3 %v7969_v49 }
0x3e19   : > { %3882 = vmatpush.msrb.mxu3 %v7972_v41 }
0x3e1b   : > { %3883 = vmatpush.msrb.mxu3 %v7975_v33 }
0x3e97   : > { %v3564_v34 = vpop.f32.mrf.mxu3 }
0x3e98   : > { %v3567_v61 = vadd.f32 %v3564_v34, %v3539_v46 }
0x3e9a   : > { %6110 = vmatmul.msk.f32.vlgmr.msra.gmra.mxu0 %vm644_vm1, %v3567_v61  ;;  %6111 = vmatmul.msk.f32.vlgmr.msra.gmra.mxu1 %vm644_vm1, %v3567_v61 }
0x3e9b   : > { %6112 = vmatmul.msk.f32.vlgmr.msra.gmra.mxu2 %vm644_vm1, %v3567_v61  ;;  %3907 = vmatpush.msra.mxu0 %v7764_v3 }
0x3e9c   : > { %3927 = vmatpush.msra.mxu1 %v7767_v5  ;;  %3947 = vmatpush.msra.mxu2 %v7770_v1 }
0x3e9d   : > { %3908 = vmatpush.msra.mxu0 %v7773_v59 }
0x3e9e   : > { %3928 = vmatpush.msra.mxu1 %v7776_v28  ;;  %3948 = vmatpush.msra.mxu2 %v7779_v15 }
0x3e9f   : > { %3909 = vmatpush.msra.mxu0 %v7782_v60 }
0x3ea0   : > { %3929 = vmatpush.msra.mxu1 %v7785_v7  ;;  %3949 = vmatpush.msra.mxu2 %v7788_v44 }
0x3ea1   : > { %3910 = vmatpush.msra.mxu0 %v7791_v11 }
0x3ea2   : > { %3930 = vmatpush.msra.mxu1 %v7794_v47  ;;  %3950 = vmatpush.msra.mxu2 %v7797_v12 }
0x3f17   : > { %v3591_v14 = vpop.f32.mrf.mxu0  ;;  %v3611_v56 = vpop.f32.mrf.mxu1 }
0x3f18   : > { %v3642_v22 = vmul.f32 %v3641_v62, %v3591_v14  ;;  %v3649_v52 = vmul.f32 %v3648_v43, %v3591_v14  ;;  %v3656_v17 = vmul.f32 %v3655_v53, %v3591_v14  ;;  %v3673_v63 = vmul.f32 %v3672_v45, %v3611_v56 }
0x3f19   : > { %v3680_v31 = vmul.f32 %v3679_v10, %v3611_v56  ;;  %v3666_v25 = vmul.f32 %v3665_v51, %v3611_v56  ;;  %v3639_v8 = vmul.f32 %v3637_v21, %v3591_v14  ;;  %v3663_v45 = vmul.f32 %v3662_v16, %v3611_v56 }
0x3f1a   : > { %3658 = vrot.lane.b32.xlu1 %v3656_v17, %s6824_s17  ;;  %3651 = vrot.lane.b32.xlu0 %v3649_v52, %s6823_s21 }
0x3f1b   : > { %3644 = vrot.lane.b32.xlu2 %v3642_v22, %s6822_s30  ;;  %v3640_v34 = vadd.f32 %v3639_v8, %v3567_v61 }
0x3f1e   : > { %v3631_v37 = vpop.f32.mrf.mxu2 }
0x3f1f   : > { %v3697_v27 = vmul.f32 %v3696_v57, %v3631_v37  ;;  %v3704_v13 = vmul.f32 %v3703_v23, %v3631_v37  ;;  %v3690_v50 = vmul.f32 %v3689_v0, %v3631_v37 }
0x3f22   : > { %3682 = vrot.lane.b32.xlu1 %v3680_v31, %s6824_s17  ;;  %3675 = vrot.lane.b32.xlu0 %v3673_v63, %s6823_s21 }
0x3f23   : > { %3668 = vrot.lane.b32.xlu2 %v3666_v25, %s6822_s30  ;;  %v3687_v25 = vmul.f32 %v3686_v30, %v3631_v37 }
0x3f2a   : > { %3706 = vrot.lane.b32.xlu1 %v3704_v13, %s6824_s17  ;;  %3699 = vrot.lane.b32.xlu0 %v3697_v27, %s6823_s21 }
0x3f2b   : > { %3692 = vrot.lane.b32.xlu2 %v3690_v50, %s6822_s30 }
0x3f75   : > { %v3645_v46 = vpop.permute.xlu2 %3644 }
0x3f76   : > { %v3647_v62 = vadd.f32 %v3645_v46, %v3640_v34 }
0x3f7d   : > { %v3669_v22 = vpop.permute.xlu2 %3668 }
0x3f85   : > { %v3693_v27 = vpop.permute.xlu2 %3692 }
0x3f8c   : > { %v3659_v43 = vpop.permute.xlu1 %3658  ;;  %v3652_v53 = vpop.permute.xlu0 %3651 }
0x3f8d   : > { %v3654_v51 = vadd.f32 %v3652_v53, %v3647_v62 }
0x3f8f   : > { %v3661_v10 = vadd.f32 %v3659_v43, %v3654_v51 }
0x3f91   : > { %v3664_v52 = vadd.f32 %v3663_v45, %v3661_v10 }
0x3f93   : > { %v3671_v17 = vadd.f32 %v3669_v22, %v3664_v52 }
0x3f94   : > { %v3683_v63 = vpop.permute.xlu1 %3682  ;;  %v3676_v0 = vpop.permute.xlu0 %3675 }
0x3f95   : > { %v3678_v31 = vadd.f32 %v3676_v0, %v3671_v17 }
0x3f97   : > { %v3685_v57 = vadd.f32 %v3683_v63, %v3678_v31 }
0x3f99   : > { %v3688_v23 = vadd.f32 %v3687_v25, %v3685_v57 }
0x3f9b   : > { %v3695_v13 = vadd.f32 %v3693_v27, %v3688_v23 }
0x3f9c   : > { %v3700_v21 = vpop.permute.xlu0 %3699  ;;  %v3707_v61 = vpop.permute.xlu1 %3706 }
0x3f9d   : > { %v3702_v14 = vadd.f32 %v3700_v21, %v3695_v13 }
0x3f9f   : > { %v3709_v50 = vadd.f32 %v3707_v61, %v3702_v14 }
0x3fa1   : > { %6113 = vmatmul.msk.f32.vlgmr.msra.gmra.mxu3 %vm644_vm1, %v3709_v50 }
0x3fa2   : > { %4046 = vmatpush.msra.mxu3 %v7811_v6 }
0x3fa4   : > { %4047 = vmatpush.msra.mxu3 %v7814_v26 }
0x3fa6   : > { %4048 = vmatpush.msra.mxu3 %v7817_v19 }
0x3fa8   : > { %4049 = vmatpush.msra.mxu3 %v7820_v40 }
0x4024   : > { %v3730_v16 = vpop.f32.mrf.mxu3 }
0x4025   : > { %v3733_v30 = vmax.f32 %v3730_v16, 0.0 }
0x4027   : > { %6114 = vmatmul.msk.f32.vlgmr.msrb.gmra.mxu0 %vm644_vm1, %v3733_v30 }
0x4028   : > { %4070 = vmatpush.msrb.mxu0 %v7827_v4 }
0x402a   : > { %4071 = vmatpush.msrb.mxu0 %v7833_v42 }
0x402c   : > { %4072 = vmatpush.msrb.mxu0 %v7839_v18 }
0x402e   : > { %4073 = vmatpush.msrb.mxu0 %v7845_v24 }
0x40a4   : > { %v3754_v56 = vpop.f32.mrf.mxu0 }
0x40a5   : > { %3758 = vrot.lane.b32.xlu2 %v3754_v56, %s6824_s17 }
0x40ff   : > { %v3759_v37 = vpop.permute.xlu2 %3758 }
0x4100   : > { %v3761_v8 = vadd.f32 %v3759_v37, %v3730_v16 }
0x4102   : > { %v3762_v46 = vadd.f32 %v3761_v8, %v7163_v29 }
0x4104   : > { %3765 = vrot.lane.b32.xlu0 %v3762_v46, %s6825_s16 }
0x4176   : > { %v3766_v34 = vpop.permute.xlu0 %3765 }
0x4177   : > { %3889 = vst.msk [vmem:[%s7048_s13 + $0x8] sm:$0xff] %vm1300_vm8, %v3766_v34  ;;  %v3768_v62 = vsel %vm3443_vm15, %v3766_v34, %v7929_v32 }
0x4178   : > { %3770 = vrot.lane.b32.xlu1 %v3768_v62, %s6825_s16 }
0x41ea   : > { %v3771_v43 = vpop.permute.xlu1 %3770 }
0x41eb   : > { %v3773_v53 = vsel %vm851_vm3, %v3771_v43, %v3766_v34 }
0x41ec   : > { %6115 = vmatmul.msk.f32.vlgmr.msrb.gmra.mxu1 %vm644_vm1, %v3773_v53 }
0x41ed   : > { %4110 = vmatpush.msrb.mxu1 %v7861_v58 }
0x41ef   : > { %4111 = vmatpush.msrb.mxu1 %v7864_v36 }
0x41f1   : > { %4112 = vmatpush.msrb.mxu1 %v7867_v39 }
0x41f3   : > { %4113 = vmatpush.msrb.mxu1 %v7870_v38 }
0x4269   : > { %v3794_v51 = vpop.f32.mrf.mxu1 }
0x426a   : > { %v3795_v45 = vadd.f32 %v7948_v20, %v3794_v51 }
0x426c   : > { %3817 = vrot.lane.b32.xlu2 %v3795_v45, %s6826_s19  ;;  %v6116_v10 = vmul.f32 -1.442695, %v3795_v45 }
0x426e   : > { %6397 = vpow2.f32 %v6116_v10  ;;  %v6838_v10 = vmov 10  }
0x426f   : > { %6333 = vset.pattern.permute.xlu1 %v6838_v10 }
0x4274   : > { %v6398_v22 = vpop.eup %6397 }
0x4275   : > { %v3800_v52 = vadd.f32 1.0, %v6398_v22 }
0x4277   : > { %6399 = vrcp.f32 %v3800_v52  ;;  %v3812_v57 = vand.u32 2147483648, %v3800_v52  ;;  %vm3806_vm9 = vweird.f32 %v3800_v52  ;;  %v3810_v23 = vand.u32 2147483647, %v3800_v52 }
0x4279   : > { %v3813_v13 = vor.u32 1.1754944e-38, %v3812_v57  ;;  %vm3811_vm0 = vcmp.eq.f32.partialorder %v3810_v23, 8.507059e+37 }
0x427d   : > { %v6400_v17 = vpop.eup %6399 }
0x427e   : > { %v3802_v63 = vmul.f32 %v6400_v17, %v3800_v52  ;;  %vm3807_vm8 = vweird.f32 %v6400_v17 }
0x427f   : > { %vm3808_vm14 = vmor %vm3806_vm9, %vm3807_vm8 }
0x4280   : > { %v3803_v0 = vsub.f32 1.0, %v3802_v63 }
0x4282   : > { %v3804_v31 = vmul.f32 %v6400_v17, %v3803_v0 }
0x4284   : > { %v3805_v25 = vadd.f32 %v6400_v17, %v3804_v31 }
0x4286   : > { %v3809_v27 = vsel %vm3808_vm14, %v6400_v17, %v3805_v25 }
0x4287   : > { %v3814_v14 = vsel %vm3811_vm0, %v3813_v13, %v3809_v27 }
0x4288   : > { %v3827_v56 = vsub.f32 1.0, %v3814_v14  ;;  %v3833_v8 = vmul.f32 %v3814_v14, %v3766_v34 }
0x42c6   : > { %v3818_v21 = vpop.permute.xlu2 %3817 }
0x42c7   : > { %v3820_v61 = vmul.f32 %v3818_v21, %v3814_v14 }
0x42c9   : > { %3822 = vrot.lane.b32.xlu0 %v3820_v61, %s6824_s17 }
0x433b   : > { %v3823_v50 = vpop.permute.xlu0 %3822 }
0x433c   : > { %v3825_v16 = vadd.f32 %v3823_v50, %v3795_v45 }
0x433e   : > { %6401 = vtanh.f32 %v3825_v16 }
0x4344   : > { %v6402_v30 = vpop.eup %6401 }
0x4345   : > { %3829 = vrot.lane.b32.xlu1 %v6402_v30, %s6825_s16 }
0x434d   : > { %3957 = vperm.xlu1 %6333, %v7752_v54  }
0x43b7   : > { %v3830_v37 = vpop.permute.xlu1 %3829 }
0x43b8   : > { %v3832_v46 = vmul.f32 %v3830_v37, %v3827_v56 }
0x43ba   : > { %v3834_v62 = vadd.f32 %v3833_v8, %v3832_v46 }
0x43bc   : > { %3836 = vrot.lane.b32.xlu2 %v3834_v62, %s6825_s16 }
0x43bf   : > { %v3958_v54 = vpop.permute.xlu1 %3957 }
0x4416   : > { %v3837_v43 = vpop.permute.xlu2 %3836 }
0x4417   : > { %6117 = vmatmul.msk.f32.vlgmr.msrb.gmra.mxu2 %vm851_vm3, %v3837_v43 }
0x4418   : > { %4175 = vmatpush.msrb.mxu2 %v7956_v48 }
0x441a   : > { %4176 = vmatpush.msrb.mxu2 %v7959_v55 }
0x449a   : > { %v3857_v53 = vpop.f32.mrf.mxu2 }
0x449b   : > { %v3861_v51 = vadd.f32 %v3857_v53, %v7235_v35  ;;  %v3860_v22 = vadd.f32 %v7981_v9, %v3857_v53 }
0x449d   : > { %v3862_v45 = vmax.f32 %v3861_v51, 0.0 }
0x449f   : > { %3864 = vrot.lane.b32.xlu0 %v3862_v45, %s6822_s30 }
0x4511   : > { %v3865_v34 = vpop.permute.xlu0 %3864 }
0x4512   : > { %6118 = vmatmul.msk.f32.vlgmr.msrb.gmra.mxu3 %vm644_vm1, %v3865_v34 }
0x4513   : > { %4201 = vmatpush.msrb.mxu3 %v7966_v2 }
0x4515   : > { %4202 = vmatpush.msrb.mxu3 %v7969_v49 }
0x4517   : > { %4203 = vmatpush.msrb.mxu3 %v7972_v41 }
0x4519   : > { %4204 = vmatpush.msrb.mxu3 %v7975_v33 }
0x4595   : > { %v3885_v52 = vpop.f32.mrf.mxu3 }
0x4596   : > { %v3888_v17 = vadd.f32 %v3885_v52, %v3860_v22 }
0x4598   : > { %6119 = vmatmul.msk.f32.vlgmr.msra.gmra.mxu0 %vm644_vm1, %v3888_v17  ;;  %6120 = vmatmul.msk.f32.vlgmr.msra.gmra.mxu1 %vm644_vm1, %v3888_v17 }
0x4599   : > { %6121 = vmatmul.msk.f32.vlgmr.msra.gmra.mxu2 %vm644_vm1, %v3888_v17  ;;  %4228 = vmatpush.msra.mxu0 %v7764_v3  ;;  %v3962_v3 = vmul.f32 %v3958_v54, %v3958_v54 }
0x459a   : > { %4248 = vmatpush.msra.mxu1 %v7767_v5  ;;  %4268 = vmatpush.msra.mxu2 %v7770_v1 }
0x459b   : > { %4229 = vmatpush.msra.mxu0 %v7773_v59  ;;  %v3969_v5 = vmul.f32 %v3962_v3, %v3958_v54 }
0x459c   : > { %4249 = vmatpush.msra.mxu1 %v7776_v28  ;;  %4269 = vmatpush.msra.mxu2 %v7779_v15 }
0x459d   : > { %4230 = vmatpush.msra.mxu0 %v7782_v60  ;;  %v3976_v1 = vmul.f32 %v3969_v5, %v3958_v54 }
0x459e   : > { %4250 = vmatpush.msra.mxu1 %v7785_v7  ;;  %4270 = vmatpush.msra.mxu2 %v7788_v44 }
0x459f   : > { %4231 = vmatpush.msra.mxu0 %v7791_v11  ;;  %v3983_v59 = vmul.f32 %v3976_v1, %v3958_v54 }
0x45a0   : > { %4251 = vmatpush.msra.mxu1 %v7794_v47  ;;  %4271 = vmatpush.msra.mxu2 %v7797_v12 }
0x45a1   : > { %v3986_v28 = vmul.f32 %v3983_v59, %v3958_v54 }
0x45a3   : > { %v3993_v63 = vmul.f32 %v3986_v28, %v3958_v54 }
0x45a5   : > { %v4000_v15 = vmul.f32 %v3993_v63, %v3958_v54 }
0x45a7   : > { %v4007_v44 = vmul.f32 %v4000_v15, %v3958_v54 }
0x45a9   : > { %v4010_v47 = vmul.f32 %v4007_v44, %v3958_v54 }
0x45ab   : > { %v4017_v23 = vmul.f32 %v4010_v47, %v3958_v54 }
0x45ad   : > { %v4024_v13 = vmul.f32 %v4017_v23, %v3958_v54 }
0x4615   : > { %v3912_v0 = vpop.f32.mrf.mxu0  ;;  %v3932_v11 = vpop.f32.mrf.mxu1 }
0x4616   : > { %v3963_v60 = vmul.f32 %v3962_v3, %v3912_v0  ;;  %v3970_v31 = vmul.f32 %v3969_v5, %v3912_v0  ;;  %v3977_v7 = vmul.f32 %v3976_v1, %v3912_v0  ;;  %v3994_v12 = vmul.f32 %v3993_v63, %v3932_v11 }
0x4617   : > { %v4001_v25 = vmul.f32 %v4000_v15, %v3932_v11  ;;  %v3987_v57 = vmul.f32 %v3986_v28, %v3932_v11  ;;  %v3960_v50 = vmul.f32 %v3958_v54, %v3912_v0  ;;  %v3984_v62 = vmul.f32 %v3983_v59, %v3932_v11 }
0x4618   : > { %3979 = vrot.lane.b32.xlu1 %v3977_v7, %s6824_s17  ;;  %3972 = vrot.lane.b32.xlu0 %v3970_v31, %s6823_s21 }
0x4619   : > { %3965 = vrot.lane.b32.xlu2 %v3963_v60, %s6822_s30  ;;  %v3961_v30 = vadd.f32 %v3960_v50, %v3888_v17 }
0x461c   : > { %v3952_v27 = vpop.f32.mrf.mxu2 }
0x461d   : > { %v4018_v21 = vmul.f32 %v4017_v23, %v3952_v27  ;;  %v4025_v14 = vmul.f32 %v4024_v13, %v3952_v27  ;;  %v4011_v61 = vmul.f32 %v4010_v47, %v3952_v27  ;;  %v4008_v52 = vmul.f32 %v4007_v44, %v3952_v27 }
0x4620   : > { %4003 = vrot.lane.b32.xlu1 %v4001_v25, %s6824_s17  ;;  %3996 = vrot.lane.b32.xlu0 %v3994_v12, %s6823_s21 }
0x4621   : > { %3989 = vrot.lane.b32.xlu2 %v3987_v57, %s6822_s30 }
0x4628   : > { %4027 = vrot.lane.b32.xlu1 %v4025_v14, %s6824_s17  ;;  %4020 = vrot.lane.b32.xlu0 %v4018_v21, %s6823_s21 }
0x4629   : > { %4013 = vrot.lane.b32.xlu2 %v4011_v61, %s6822_s30 }
0x4673   : > { %v3966_v16 = vpop.permute.xlu2 %3965 }
0x4674   : > { %v3968_v56 = vadd.f32 %v3966_v16, %v3961_v30 }
0x467b   : > { %v3990_v53 = vpop.permute.xlu2 %3989 }
0x4683   : > { %v4014_v1 = vpop.permute.xlu2 %4013 }
0x468a   : > { %v3980_v37 = vpop.permute.xlu1 %3979  ;;  %v3973_v8 = vpop.permute.xlu0 %3972 }
0x468b   : > { %v3975_v46 = vadd.f32 %v3973_v8, %v3968_v56 }
0x468d   : > { %v3982_v43 = vadd.f32 %v3980_v37, %v3975_v46 }
0x468f   : > { %v3985_v51 = vadd.f32 %v3984_v62, %v3982_v43 }
0x4691   : > { %v3992_v45 = vadd.f32 %v3990_v53, %v3985_v51  ;;  %v8112_v51 = vld [vmem:[%s7041_s15] sm:$0xff] }
0x4692   : > { %v4004_v10 = vpop.permute.xlu1 %4003  ;;  %v3997_v34 = vpop.permute.xlu0 %3996 }
0x4693   : > { %v3999_v22 = vadd.f32 %v3997_v34, %v3992_v45  ;;  %v6839_v45 = vmov 11  }
0x4694   : > { %6334 = vset.pattern.permute.xlu1 %v6839_v45 }
0x4695   : > { %v4006_v3 = vadd.f32 %v4004_v10, %v3999_v22 }
0x4697   : > { %v4009_v5 = vadd.f32 %v4008_v52, %v4006_v3  ;;  %v8129_v3 = vld [vmem:[#allocation6 + $0x48] sm:$0xff] }
0x4699   : > { %v4016_v28 = vadd.f32 %v4014_v1, %v4009_v5  ;;  %v8132_v5 = vld [vmem:[#allocation6 + $0x50] sm:$0xff]  ;;  %v8135_v1 = vld [vmem:[#allocation6 + $0x58] sm:$0xff] }
0x469a   : > { %v4021_v54 = vpop.permute.xlu0 %4020  ;;  %v4028_v17 = vpop.permute.xlu1 %4027 }
0x469b   : > { %v4023_v63 = vadd.f32 %v4021_v54, %v4016_v28  ;;  %v8138_v28 = vld [vmem:[#allocation6 + $0x30] sm:$0xff]  ;;  %v8141_v54 = vld [vmem:[#allocation6 + $0x38] sm:$0xff] }
0x469d   : > { %v4030_v15 = vadd.f32 %v4028_v17, %v4023_v63  ;;  %v8144_v63 = vld [vmem:[#allocation6 + $0x40] sm:$0xff]  ;;  %v8147_v17 = vld [vmem:[#allocation6 + $0x18] sm:$0xff] }
0x469f   : > { %6122 = vmatmul.msk.f32.vlgmr.msra.gmra.mxu3 %vm644_vm1, %v4030_v15  ;;  %v8150_v15 = vld [vmem:[#allocation6 + $0x20] sm:$0xff] }
0x46a0   : > { %4367 = vmatpush.msra.mxu3 %v7811_v6 }
0x46a2   : > { %4368 = vmatpush.msra.mxu3 %v7814_v26 }
0x46a4   : > { %4369 = vmatpush.msra.mxu3 %v7817_v19 }
0x46a6   : > { %4370 = vmatpush.msra.mxu3 %v7820_v40 }
0x4722   : > { %v4051_v59 = vpop.f32.mrf.mxu3 }
0x4723   : > { %v4054_v0 = vmax.f32 %v4051_v59, 0.0 }
0x4725   : > { %6123 = vmatmul.msk.f32.vlgmr.msrb.gmra.mxu0 %vm644_vm1, %v4054_v0  ;;  %v8156_v0 = vld [vmem:[#allocation6] sm:$0xff] }
0x4726   : > { %4391 = vmatpush.msrb.mxu0 %v7827_v4 }
0x4728   : > { %4392 = vmatpush.msrb.mxu0 %v7833_v42 }
0x472a   : > { %4393 = vmatpush.msrb.mxu0 %v7839_v18 }
0x472c   : > { %4394 = vmatpush.msrb.mxu0 %v7845_v24 }
0x47a2   : > { %v4075_v6 = vpop.f32.mrf.mxu0 }
0x47a3   : > { %4079 = vrot.lane.b32.xlu2 %v4075_v6, %s6824_s17  ;;  %v8159_v6 = vld [vmem:[#allocation6 + $0x8] sm:$0xff] }
0x47fd   : > { %v4080_v26 = vpop.permute.xlu2 %4079 }
0x47fe   : > { %v4082_v60 = vadd.f32 %v4080_v26, %v4051_v59  ;;  %v8153_v59 = vld [vmem:[#allocation6 + $0x28] sm:$0xff]  ;;  %v8162_v26 = vld [vmem:[#allocation6 + $0x10] sm:$0xff] }
0x4800   : > { %v4083_v19 = vadd.f32 %v4082_v60, %v7163_v29 }
0x4802   : > { %4210 = vst.msk [vmem:[%s7048_s13 + $0x8] sm:$0xff] %vm1622_vm13, %v4083_v19  ;;  %4091 = vrot.lane.b32.xlu1 %v4083_v19, %s6825_s16  ;;  %v4085_v40 = vsel %vm3443_vm15, %v4083_v19, %v7929_v32 }
0x4803   : > { %4087 = vrot.lane.b32.xlu0 %v4085_v40, %s6822_s30 }
0x4874   : > { %v4092_v4 = vpop.permute.xlu1 %4091 }
0x4875   : > { %v4088_v42 = vpop.permute.xlu0 %4087 }
0x4876   : > { %v4094_v18 = vsel %vm851_vm3, %v4088_v42, %v4092_v4 }
0x4877   : > { %6124 = vmatmul.msk.f32.vlgmr.msrb.gmra.mxu1 %vm644_vm1, %v4094_v18 }
0x4878   : > { %4434 = vmatpush.msrb.mxu1 %v7861_v58 }
0x487a   : > { %4435 = vmatpush.msrb.mxu1 %v7864_v36 }
0x487c   : > { %4436 = vmatpush.msrb.mxu1 %v7867_v39 }
0x487e   : > { %4437 = vmatpush.msrb.mxu1 %v7870_v38 }
0x48f4   : > { %v4115_v24 = vpop.f32.mrf.mxu1 }
0x48f5   : > { %v4116_v31 = vadd.f32 %v7948_v20, %v4115_v24 }
0x48f7   : > { %4138 = vrot.lane.b32.xlu2 %v4116_v31, %s6826_s19  ;;  %v6125_v7 = vmul.f32 -1.442695, %v4116_v31 }
0x48f9   : > { %6403 = vpow2.f32 %v6125_v7 }
0x48ff   : > { %v6404_v44 = vpop.eup %6403 }
0x4900   : > { %v4121_v11 = vadd.f32 1.0, %v6404_v44 }
0x4902   : > { %6405 = vrcp.f32 %v4121_v11  ;;  %v4133_v36 = vand.u32 2147483648, %v4121_v11  ;;  %vm4127_vm2 = vweird.f32 %v4121_v11  ;;  %v4131_v39 = vand.u32 2147483647, %v4121_v11 }
0x4904   : > { %v4134_v23 = vor.u32 1.1754944e-38, %v4133_v36  ;;  %vm4132_vm7 = vcmp.eq.f32.partialorder %v4131_v39, 8.507059e+37 }
0x4908   : > { %v6406_v47 = vpop.eup %6405 }
0x4909   : > { %v4123_v12 = vmul.f32 %v6406_v47, %v4121_v11  ;;  %vm4128_vm13 = vweird.f32 %v6406_v47 }
0x490a   : > { %vm4129_vm11 = vmor %vm4127_vm2, %vm4128_vm13 }
0x490b   : > { %v4124_v25 = vsub.f32 1.0, %v4123_v12 }
0x490d   : > { %v4125_v58 = vmul.f32 %v6406_v47, %v4124_v25 }
0x490f   : > { %v4126_v57 = vadd.f32 %v6406_v47, %v4125_v58 }
0x4911   : > { %v4130_v38 = vsel %vm4129_vm11, %v6406_v47, %v4126_v57 }
0x4912   : > { %v4135_v13 = vsel %vm4132_vm7, %v4134_v23, %v4130_v38 }
0x4913   : > { %v4148_v16 = vsub.f32 1.0, %v4135_v13  ;;  %v4154_v56 = vmul.f32 %v4135_v13, %v4092_v4 }
0x4951   : > { %v4139_v27 = vpop.permute.xlu2 %4138 }
0x4952   : > { %v4141_v21 = vmul.f32 %v4139_v27, %v4135_v13 }
0x4954   : > { %4143 = vrot.lane.b32.xlu0 %v4141_v21, %s6824_s17 }
0x49c6   : > { %v4144_v14 = vpop.permute.xlu0 %4143 }
0x49c7   : > { %v4146_v61 = vadd.f32 %v4144_v14, %v4116_v31 }
0x49c9   : > { %6407 = vtanh.f32 %v4146_v61 }
0x49cf   : > { %v6408_v50 = vpop.eup %6407 }
0x49d0   : > { %4150 = vrot.lane.b32.xlu1 %v6408_v50, %s6825_s16 }
0x49d8   : > { %4278 = vperm.xlu1 %6334, %v8112_v51  }
0x4a42   : > { %v4151_v30 = vpop.permute.xlu1 %4150 }
0x4a43   : > { %v4153_v37 = vmul.f32 %v4151_v30, %v4148_v16 }
0x4a45   : > { %v4155_v8 = vadd.f32 %v4154_v56, %v4153_v37 }
0x4a47   : > { %4157 = vrot.lane.b32.xlu2 %v4155_v8, %s6825_s16 }
0x4a4a   : > { %v4279_v60 = vpop.permute.xlu1 %4278 }
0x4a4b   : > { %v4283_v19 = vmul.f32 %v4279_v60, %v4279_v60 }
0x4a4d   : > { %v4290_v40 = vmul.f32 %v4283_v19, %v4279_v60 }
0x4a4f   : > { %v4297_v4 = vmul.f32 %v4290_v40, %v4279_v60 }
0x4a51   : > { %v4304_v42 = vmul.f32 %v4297_v4, %v4279_v60 }
0x4a53   : > { %v4307_v18 = vmul.f32 %v4304_v42, %v4279_v60 }
0x4a55   : > { %v4314_v24 = vmul.f32 %v4307_v18, %v4279_v60 }
0x4a57   : > { %v4321_v31 = vmul.f32 %v4314_v24, %v4279_v60 }
0x4a59   : > { %v4328_v12 = vmul.f32 %v4321_v31, %v4279_v60 }
0x4a5b   : > { %v4331_v58 = vmul.f32 %v4328_v12, %v4279_v60 }
0x4a5d   : > { %v4338_v38 = vmul.f32 %v4331_v58, %v4279_v60 }
0x4a5f   : > { %v4345_v27 = vmul.f32 %v4338_v38, %v4279_v60 }
0x4aa1   : > { %v4158_v46 = vpop.permute.xlu2 %4157 }
0x4aa2   : > { %6126 = vmatmul.msk.f32.vlgmr.msrb.gmra.mxu2 %vm851_vm3, %v4158_v46 }
0x4aa3   : > { %4499 = vmatpush.msrb.mxu2 %v7956_v48 }
0x4aa5   : > { %4500 = vmatpush.msrb.mxu2 %v7959_v55 }
0x4b25   : > { %v4178_v62 = vpop.f32.mrf.mxu2 }
0x4b26   : > { %v4182_v43 = vadd.f32 %v4178_v62, %v7235_v35  ;;  %v4181_v34 = vadd.f32 %v7981_v9, %v4178_v62 }
0x4b28   : > { %v4183_v53 = vmax.f32 %v4182_v43, 0.0 }
0x4b2a   : > { %4185 = vrot.lane.b32.xlu0 %v4183_v53, %s6822_s30 }
0x4b9c   : > { %v4186_v10 = vpop.permute.xlu0 %4185 }
0x4b9d   : > { %6127 = vmatmul.msk.f32.vlgmr.msrb.gmra.mxu3 %vm644_vm1, %v4186_v10 }
0x4b9e   : > { %4525 = vmatpush.msrb.mxu3 %v7966_v2 }
0x4ba0   : > { %4526 = vmatpush.msrb.mxu3 %v7969_v49 }
0x4ba2   : > { %4527 = vmatpush.msrb.mxu3 %v7972_v41 }
0x4ba4   : > { %4528 = vmatpush.msrb.mxu3 %v7975_v33 }
0x4c20   : > { %v4206_v22 = vpop.f32.mrf.mxu3 }
0x4c21   : > { %v8121_v52 = vadd.f32 %v4206_v22, %v4181_v34 }
0x4c23   : > { %6128 = vmatmul.msk.f32.vlgmr.msra.gmra.mxu0 %vm644_vm1, %v8121_v52  ;;  %6129 = vmatmul.msk.f32.vlgmr.msra.gmra.mxu1 %vm644_vm1, %v8121_v52 }
0x4c24   : > { %6130 = vmatmul.msk.f32.vlgmr.msra.gmra.mxu2 %vm644_vm1, %v8121_v52  ;;  %4552 = vmatpush.msra.mxu0 %v8129_v3 }
0x4c25   : > { %4572 = vmatpush.msra.mxu1 %v8132_v5  ;;  %4592 = vmatpush.msra.mxu2 %v8135_v1 }
0x4c26   : > { %4553 = vmatpush.msra.mxu0 %v8138_v28 }
0x4c27   : > { %4573 = vmatpush.msra.mxu1 %v8141_v54  ;;  %4593 = vmatpush.msra.mxu2 %v8144_v63 }
0x4c28   : > { %4554 = vmatpush.msra.mxu0 %v8147_v17 }
0x4c29   : > { %4574 = vmatpush.msra.mxu1 %v8150_v15  ;;  %4594 = vmatpush.msra.mxu2 %v8153_v59 }
0x4c2a   : > { %4555 = vmatpush.msra.mxu0 %v8156_v0 }
0x4c2b   : > { %4575 = vmatpush.msra.mxu1 %v8159_v6  ;;  %4595 = vmatpush.msra.mxu2 %v8162_v26 }
0x4ca0   : > { %v4233_v7 = vpop.f32.mrf.mxu0  ;;  %v4253_v25 = vpop.f32.mrf.mxu1 }
0x4ca1   : > { %v4284_v44 = vmul.f32 %v4283_v19, %v4233_v7  ;;  %v4291_v11 = vmul.f32 %v4290_v40, %v4233_v7  ;;  %v4298_v47 = vmul.f32 %v4297_v4, %v4233_v7  ;;  %v4315_v57 = vmul.f32 %v4314_v24, %v4253_v25 }
0x4ca2   : > { %v4322_v36 = vmul.f32 %v4321_v31, %v4253_v25  ;;  %v4308_v39 = vmul.f32 %v4307_v18, %v4253_v25  ;;  %v4281_v61 = vmul.f32 %v4279_v60, %v4233_v7  ;;  %v4305_v46 = vmul.f32 %v4304_v42, %v4253_v25  ;;  %v8179_v42 = vld [vmem:[#allocation8 + $0x10] sm:$0xff] }
0x4ca3   : > { %4300 = vrot.lane.b32.xlu1 %v4298_v47, %s6824_s17  ;;  %4293 = vrot.lane.b32.xlu0 %v4291_v11, %s6823_s21  ;;  %v8182_v11 = vld [vmem:[#allocation8 + $0x8] sm:$0xff]  ;;  %v8185_v47 = vld [vmem:[#allocation8] sm:$0xff] }
0x4ca4   : > { %4286 = vrot.lane.b32.xlu2 %v4284_v44, %s6822_s30  ;;  %v4282_v16 = vadd.f32 %v4281_v61, %v8121_v52  ;;  %v8176_v44 = vld [vmem:[#allocation8 + $0x18] sm:$0xff] }
0x4ca7   : > { %v4273_v23 = vpop.f32.mrf.mxu2 }
0x4ca8   : > { %v4339_v13 = vmul.f32 %v4338_v38, %v4273_v23  ;;  %v4346_v21 = vmul.f32 %v4345_v27, %v4273_v23  ;;  %v4332_v14 = vmul.f32 %v4331_v58, %v4273_v23  ;;  %v4329_v19 = vmul.f32 %v4328_v12, %v4273_v23  ;;  %v8192_v58 = vld [vmem:[%s8568_s5 + $0x18] sm:$0xff] }
0x4cab   : > { %4324 = vrot.lane.b32.xlu1 %v4322_v36, %s6824_s17  ;;  %4317 = vrot.lane.b32.xlu0 %v4315_v57, %s6823_s21  ;;  %v8198_v57 = vld [vmem:[%s8568_s5 + $0x10] sm:$0xff]  ;;  %v8204_v36 = vld [vmem:[%s8568_s5 + $0x8] sm:$0xff] }
0x4cac   : > { %4310 = vrot.lane.b32.xlu2 %v4308_v39, %s6822_s30  ;;  %v8210_v39 = vld [vmem:[%s8568_s5] sm:$0xff] }
0x4cb3   : > { %4348 = vrot.lane.b32.xlu1 %v4346_v21, %s6824_s17  ;;  %4341 = vrot.lane.b32.xlu0 %v4339_v13, %s6823_s21 }
0x4cb4   : > { %4334 = vrot.lane.b32.xlu2 %v4332_v14, %s6822_s30 }
0x4cfe   : > { %v4287_v50 = vpop.permute.xlu2 %4286 }
0x4cff   : > { %v4289_v30 = vadd.f32 %v4287_v50, %v4282_v16 }
0x4d06   : > { %v4311_v43 = vpop.permute.xlu2 %4310 }
0x4d0e   : > { %v4335_v18 = vpop.permute.xlu2 %4334 }
0x4d15   : > { %v4301_v56 = vpop.permute.xlu1 %4300  ;;  %v4294_v37 = vpop.permute.xlu0 %4293 }
0x4d16   : > { %v4296_v8 = vadd.f32 %v4294_v37, %v4289_v30  ;;  %v8226_v30 = vld [vmem:[#allocation9 + $0x18] sm:$0xff]  ;;  %v8232_v37 = vld [vmem:[#allocation9 + $0x8] sm:$0xff] }
0x4d18   : > { %v4303_v62 = vadd.f32 %v4301_v56, %v4296_v8  ;;  %v8229_v56 = vld [vmem:[#allocation9 + $0x10] sm:$0xff] }
0x4d1a   : > { %v4306_v53 = vadd.f32 %v4305_v46, %v4303_v62 }
0x4d1c   : > { %v4313_v45 = vadd.f32 %v4311_v43, %v4306_v53 }
0x4d1d   : > { %v4325_v10 = vpop.permute.xlu1 %4324  ;;  %v4318_v34 = vpop.permute.xlu0 %4317 }
0x4d1e   : > { %v4320_v22 = vadd.f32 %v4318_v34, %v4313_v45 }
0x4d20   : > { %v4327_v40 = vadd.f32 %v4325_v10, %v4320_v22 }
0x4d22   : > { %v4330_v4 = vadd.f32 %v4329_v19, %v4327_v40 }
0x4d24   : > { %v4337_v60 = vadd.f32 %v4335_v18, %v4330_v4 }
0x4d25   : > { %v4342_v24 = vpop.permute.xlu0 %4341  ;;  %v4349_v52 = vpop.permute.xlu1 %4348 }
0x4d26   : > { %v4344_v31 = vadd.f32 %v4342_v24, %v4337_v60 }
0x4d28   : > { %v4351_v7 = vadd.f32 %v4349_v52, %v4344_v31 }
0x4d2a   : > { %6131 = vmatmul.msk.f32.vlgmr.msra.gmra.mxu3 %vm644_vm1, %v4351_v7 }
0x4d2b   : > { %4691 = vmatpush.msra.mxu3 %v8176_v44 }
0x4d2d   : > { %4692 = vmatpush.msra.mxu3 %v8179_v42 }
0x4d2f   : > { %4693 = vmatpush.msra.mxu3 %v8182_v11 }
0x4d31   : > { %4694 = vmatpush.msra.mxu3 %v8185_v47 }
0x4dad   : > { %v4372_v12 = vpop.f32.mrf.mxu3 }
0x4dae   : > { %v4375_v25 = vmax.f32 %v4372_v12, 0.0 }
0x4db0   : > { %6132 = vmatmul.msk.f32.vlgmr.msrb.gmra.mxu0 %vm644_vm1, %v4375_v25 }
0x4db1   : > { %4715 = vmatpush.msrb.mxu0 %v8192_v58 }
0x4db3   : > { %4716 = vmatpush.msrb.mxu0 %v8198_v57 }
0x4db5   : > { %4717 = vmatpush.msrb.mxu0 %v8204_v36 }
0x4db7   : > { %4718 = vmatpush.msrb.mxu0 %v8210_v39 }
0x4e2d   : > { %v4396_v38 = vpop.f32.mrf.mxu0 }
0x4e2e   : > { %4400 = vrot.lane.b32.xlu2 %v4396_v38, %s6824_s17 }
0x4e88   : > { %v4401_v23 = vpop.permute.xlu2 %4400 }
0x4e89   : > { %v4403_v27 = vadd.f32 %v4401_v23, %v4372_v12 }
0x4e8b   : > { %v4404_v13 = vadd.f32 %v4403_v27, %v7163_v29 }
0x4e8d   : > { %4415 = vrot.lane.b32.xlu2 %v4404_v13, %s6825_s16  ;;  %4407 = vrot.lane.b32.xlu0 %v4404_v13, %s6830_s22 }
0x4ee7   : > { %v4416_v61 = vpop.permute.xlu2 %4415 }
0x4eff   : > { %v4408_v21 = vpop.permute.xlu0 %4407 }
0x4f00   : > { %v4410_v14 = vsel %vm3443_vm15, %v4408_v21, %v7929_v32  ;;  %4534 = vst.msk [vmem:[%s7048_s13 + $0x8] sm:$0xff] %vm1947_vm5, %v4408_v21  ;;  %v8235_v32 = vld [vmem:[#allocation9] sm:$0xff] }
0x4f01   : > { %4412 = vrot.lane.b32.xlu1 %v4410_v14, %s6826_s19 }
0x4f73   : > { %v4413_v50 = vpop.permute.xlu1 %4412 }
0x4f74   : > { %v4418_v16 = vsel %vm851_vm3, %v4413_v50, %v4416_v61 }
0x4f75   : > { %6133 = vmatmul.msk.f32.vlgmr.msrb.gmra.mxu1 %vm644_vm1, %v4418_v16 }
0x4f76   : > { %4758 = vmatpush.msrb.mxu1 %v8226_v30 }
0x4f78   : > { %4759 = vmatpush.msrb.mxu1 %v8229_v56 }
0x4f7a   : > { %4760 = vmatpush.msrb.mxu1 %v8232_v37 }
0x4f7c   : > { %4761 = vmatpush.msrb.mxu1 %v8235_v32 }
0x4ff2   : > { %v4439_v8 = vpop.f32.mrf.mxu1 }
0x4ff3   : > { %v4440_v46 = vadd.f32 %v7948_v20, %v4439_v8 }
0x4ff5   : > { %4462 = vrot.lane.b32.xlu0 %v4440_v46, %s6826_s19  ;;  %v6134_v62 = vmul.f32 -1.442695, %v4440_v46 }
0x4ff7   : > { %6409 = vpow2.f32 %v6134_v62 }
0x4ffd   : > { %v6410_v43 = vpop.eup %6409 }
0x4ffe   : > { %v4445_v53 = vadd.f32 1.0, %v6410_v43 }
0x5000   : > { %6411 = vrcp.f32 %v4445_v53  ;;  %v4457_v40 = vand.u32 2147483648, %v4445_v53  ;;  %vm4451_vm15 = vweird.f32 %v4445_v53  ;;  %v4455_v4 = vand.u32 2147483647, %v4445_v53 }
0x5002   : > { %v4458_v60 = vor.u32 1.1754944e-38, %v4457_v40  ;;  %vm4456_vm9 = vcmp.eq.f32.partialorder %v4455_v4, 8.507059e+37 }
0x5006   : > { %v6412_v45 = vpop.eup %6411 }
0x5007   : > { %v4447_v10 = vmul.f32 %v6412_v45, %v4445_v53  ;;  %vm4452_vm5 = vweird.f32 %v6412_v45 }
0x5008   : > { %vm4453_vm8 = vmor %vm4451_vm15, %vm4452_vm5 }
0x5009   : > { %v4448_v34 = vsub.f32 1.0, %v4447_v10 }
0x500b   : > { %v4449_v22 = vmul.f32 %v6412_v45, %v4448_v34 }
0x500d   : > { %v4450_v19 = vadd.f32 %v6412_v45, %v4449_v22 }
0x500f   : > { %v4454_v18 = vsel %vm4453_vm8, %v6412_v45, %v4450_v19 }
0x5010   : > { %v4459_v24 = vsel %vm4456_vm9, %v4458_v60, %v4454_v18 }
0x5011   : > { %v4472_v25 = vsub.f32 1.0, %v4459_v24  ;;  %v4478_v23 = vmul.f32 %v4459_v24, %v4416_v61 }
0x5067   : > { %v4463_v20 = vpop.permute.xlu0 %4462 }
0x5068   : > { %v4465_v31 = vmul.f32 %v4463_v20, %v4459_v24 }
0x506a   : > { %4467 = vrot.lane.b32.xlu1 %v4465_v31, %s6824_s17 }
0x50dc   : > { %v4468_v52 = vpop.permute.xlu1 %4467 }
0x50dd   : > { %v4470_v7 = vadd.f32 %v4468_v52, %v4440_v46 }
0x50df   : > { %6413 = vtanh.f32 %v4470_v7 }
0x50e5   : > { %v6414_v12 = vpop.eup %6413 }
0x50e6   : > { %4474 = vrot.lane.b32.xlu2 %v6414_v12, %s6825_s16 }
0x5140   : > { %v4475_v38 = vpop.permute.xlu2 %4474 }
0x5141   : > { %v4477_v27 = vmul.f32 %v4475_v38, %v4472_v25 }
0x5143   : > { %v4479_v13 = vadd.f32 %v4478_v23, %v4477_v27 }
0x5145   : > { %4481 = vrot.lane.b32.xlu0 %v4479_v13, %s6825_s16 }
0x51b7   : > { %v4482_v21 = vpop.permute.xlu0 %4481 }
0x51b8   : > { %6135 = vmatmul.msk.f32.vlgmr.msrb.gmra.mxu2 %vm851_vm3, %v4482_v21 }
0x51b9   : > { %4823 = vmatpush.msrb.mxu2 %v7956_v48  ;;  %v6840_v48 = vmov 12  }
0x51ba   : > { %6335 = vset.pattern.permute.xlu2 %v6840_v48 }
0x51bb   : > { %4824 = vmatpush.msrb.mxu2 %v7959_v55  ;;  %4602 = vperm.xlu2 %6335, %v8112_v51  }
0x523b   : > { %v4502_v14 = vpop.f32.mrf.mxu2 }
0x523c   : > { %v4506_v50 = vadd.f32 %v4502_v14, %v7235_v35  ;;  %v4505_v55 = vadd.f32 %v7981_v9, %v4502_v14 }
0x523e   : > { %v4507_v16 = vmax.f32 %v4506_v50, 0.0 }
0x5240   : > { %4509 = vrot.lane.b32.xlu1 %v4507_v16, %s6822_s30 }
0x52b2   : > { %v4510_v8 = vpop.permute.xlu1 %4509 }
0x52b3   : > { %6136 = vmatmul.msk.f32.vlgmr.msrb.gmra.mxu3 %vm644_vm1, %v4510_v8 }
0x52b4   : > { %4849 = vmatpush.msrb.mxu3 %v7966_v2  ;;  %v4603_v2 = vpop.permute.xlu2 %4602 }
0x52b6   : > { %4850 = vmatpush.msrb.mxu3 %v7969_v49  ;;  %v4607_v49 = vmul.f32 %v4603_v2, %v4603_v2 }
0x52b8   : > { %4851 = vmatpush.msrb.mxu3 %v7972_v41  ;;  %v4614_v41 = vmul.f32 %v4607_v49, %v4603_v2 }
0x52ba   : > { %4852 = vmatpush.msrb.mxu3 %v7975_v33  ;;  %v4621_v33 = vmul.f32 %v4614_v41, %v4603_v2 }
0x52bc   : > { %v4628_v9 = vmul.f32 %v4621_v33, %v4603_v2 }
0x52be   : > { %v4631_v62 = vmul.f32 %v4628_v9, %v4603_v2 }
0x52c0   : > { %v4638_v43 = vmul.f32 %v4631_v62, %v4603_v2 }
0x52c2   : > { %v4645_v53 = vmul.f32 %v4638_v43, %v4603_v2 }
0x52c4   : > { %v4652_v19 = vmul.f32 %v4645_v53, %v4603_v2 }
0x52c6   : > { %v4655_v4 = vmul.f32 %v4652_v19, %v4603_v2 }
0x52c8   : > { %v4662_v24 = vmul.f32 %v4655_v4, %v4603_v2 }
0x52ca   : > { %v4669_v52 = vmul.f32 %v4662_v24, %v4603_v2 }
0x5336   : > { %v4530_v61 = vpop.f32.mrf.mxu3 }
0x5337   : > { %v4533_v46 = vadd.f32 %v4530_v61, %v4505_v55 }
0x5339   : > { %6137 = vmatmul.msk.f32.vlgmr.msra.gmra.mxu0 %vm644_vm1, %v4533_v46  ;;  %6138 = vmatmul.msk.f32.vlgmr.msra.gmra.mxu1 %vm644_vm1, %v4533_v46 }
0x533a   : > { %6139 = vmatmul.msk.f32.vlgmr.msra.gmra.mxu2 %vm644_vm1, %v4533_v46  ;;  %4876 = vmatpush.msra.mxu0 %v8129_v3 }
0x533b   : > { %4896 = vmatpush.msra.mxu1 %v8132_v5  ;;  %4916 = vmatpush.msra.mxu2 %v8135_v1 }
0x533c   : > { %4877 = vmatpush.msra.mxu0 %v8138_v28 }
0x533d   : > { %4897 = vmatpush.msra.mxu1 %v8141_v54  ;;  %4917 = vmatpush.msra.mxu2 %v8144_v63 }
0x533e   : > { %4878 = vmatpush.msra.mxu0 %v8147_v17 }
0x533f   : > { %4898 = vmatpush.msra.mxu1 %v8150_v15  ;;  %4918 = vmatpush.msra.mxu2 %v8153_v59 }
0x5340   : > { %4879 = vmatpush.msra.mxu0 %v8156_v0 }
0x5341   : > { %4899 = vmatpush.msra.mxu1 %v8159_v6  ;;  %4919 = vmatpush.msra.mxu2 %v8162_v26 }
0x53b6   : > { %v4557_v45 = vpop.f32.mrf.mxu0  ;;  %v4577_v40 = vpop.f32.mrf.mxu1 }
0x53b7   : > { %v4608_v10 = vmul.f32 %v4607_v49, %v4557_v45  ;;  %v4615_v34 = vmul.f32 %v4614_v41, %v4557_v45  ;;  %v4622_v22 = vmul.f32 %v4621_v33, %v4557_v45  ;;  %v4639_v18 = vmul.f32 %v4638_v43, %v4577_v40 }
0x53b8   : > { %v4646_v60 = vmul.f32 %v4645_v53, %v4577_v40  ;;  %v4632_v20 = vmul.f32 %v4631_v62, %v4577_v40  ;;  %v4605_v38 = vmul.f32 %v4603_v2, %v4557_v45  ;;  %v4629_v16 = vmul.f32 %v4628_v9, %v4577_v40 }
0x53b9   : > { %4624 = vrot.lane.b32.xlu2 %v4622_v22, %s6824_s17  ;;  %4617 = vrot.lane.b32.xlu1 %v4615_v34, %s6823_s21 }
0x53ba   : > { %4610 = vrot.lane.b32.xlu0 %v4608_v10, %s6822_s30  ;;  %v4606_v27 = vadd.f32 %v4605_v38, %v4533_v46  ;;  %v8314_v38 = vld [vmem:[%s8571_s8] ss:$0 sm:$0xff] }
0x53bd   : > { %v4597_v31 = vpop.f32.mrf.mxu2 }
0x53be   : > { %v4663_v7 = vmul.f32 %v4662_v24, %v4597_v31  ;;  %v4670_v12 = vmul.f32 %v4669_v52, %v4597_v31  ;;  %v4656_v25 = vmul.f32 %v4655_v4, %v4597_v31  ;;  %v4653_v62 = vmul.f32 %v4652_v19, %v4597_v31 }
0x53c1   : > { %4648 = vrot.lane.b32.xlu2 %v4646_v60, %s6824_s17  ;;  %4641 = vrot.lane.b32.xlu1 %v4639_v18, %s6823_s21 }
0x53c2   : > { %4634 = vrot.lane.b32.xlu0 %v4632_v20, %s6822_s30  ;;  %v8294_v20 = vld [vmem:[%s7046_s23 + $0x8] sm:$0xff] }
0x53c3   : > { %vm4729_vm14 = vcmp.ne.f32.partialorder %v8294_v20, %v8294_v20 }
0x53c9   : > { %4672 = vrot.lane.b32.xlu2 %v4670_v12, %s6824_s17  ;;  %4665 = vrot.lane.b32.xlu1 %v4663_v7, %s6823_s21 }
0x53ca   : > { %4658 = vrot.lane.b32.xlu0 %v4656_v25, %s6822_s30 }
0x5413   : > { %v4625_v13 = vpop.permute.xlu2 %4624 }
0x541b   : > { %v4649_v41 = vpop.permute.xlu2 %4648 }
0x5423   : > { %v4673_v46 = vpop.permute.xlu2 %4672 }
0x542b   : > { %v4618_v23 = vpop.permute.xlu1 %4617 }
0x542c   : > { %v4611_v21 = vpop.permute.xlu0 %4610 }
0x542d   : > { %v4613_v14 = vadd.f32 %v4611_v21, %v4606_v27 }
0x542f   : > { %v4620_v50 = vadd.f32 %v4618_v23, %v4613_v14 }
0x5431   : > { %v4627_v8 = vadd.f32 %v4625_v13, %v4620_v50 }
0x5433   : > { %v4630_v48 = vadd.f32 %v4629_v16, %v4627_v8  ;;  %v4642_v55 = vpop.permute.xlu1 %4641 }
0x5434   : > { %v4635_v61 = vpop.permute.xlu0 %4634 }
0x5435   : > { %v4637_v49 = vadd.f32 %v4635_v61, %v4630_v48 }
0x5437   : > { %v4644_v33 = vadd.f32 %v4642_v55, %v4637_v49 }
0x5439   : > { %v4651_v43 = vadd.f32 %v4649_v41, %v4644_v33 }
0x543b   : > { %v4654_v53 = vadd.f32 %v4653_v62, %v4651_v43  ;;  %v4666_v2 = vpop.permute.xlu1 %4665 }
0x543c   : > { %v4659_v10 = vpop.permute.xlu0 %4658 }
0x543d   : > { %v4661_v34 = vadd.f32 %v4659_v10, %v4654_v53 }
0x543f   : > { %v4668_v45 = vadd.f32 %v4666_v2, %v4661_v34 }
0x5441   : > { %v4675_v22 = vadd.f32 %v4673_v46, %v4668_v45 }
0x5443   : > { %6140 = vmatmul.msk.f32.vlgmr.msra.gmra.mxu3 %vm644_vm1, %v4675_v22 }
0x5444   : > { %5015 = vmatpush.msra.mxu3 %v8176_v44 }
0x5446   : > { %5016 = vmatpush.msra.mxu3 %v8179_v42 }
0x5448   : > { %5017 = vmatpush.msra.mxu3 %v8182_v11 }
0x544a   : > { %5018 = vmatpush.msra.mxu3 %v8185_v47 }
0x54c6   : > { %v4696_v9 = vpop.f32.mrf.mxu3 }
0x54c7   : > { %v4699_v19 = vmax.f32 %v4696_v9, 0.0 }
0x54c9   : > { %6141 = vmatmul.msk.f32.vlgmr.msrb.gmra.mxu0 %vm644_vm1, %v4699_v19 }
0x54ca   : > { %5039 = vmatpush.msrb.mxu0 %v8192_v58 }
0x54cc   : > { %5040 = vmatpush.msrb.mxu0 %v8198_v57 }
0x54ce   : > { %5041 = vmatpush.msrb.mxu0 %v8204_v36 }
0x54d0   : > { %5042 = vmatpush.msrb.mxu0 %v8210_v39 }
0x5546   : > { %v4720_v40 = vpop.f32.mrf.mxu0 }
0x5547   : > { %4724 = vrot.lane.b32.xlu0 %v4720_v40, %s6824_s17  ;;  %v8322_v40 = vld [vmem:[#allocation11 + $0x8] sm:$0xff] }
0x55b9   : > { %v4725_v4 = vpop.permute.xlu0 %4724 }
0x55ba   : > { %v4727_v18 = vadd.f32 %v4725_v4, %v4696_v9  ;;  %v8325_v4 = vld [vmem:[#allocation11] sm:$0xff] }
0x55bc   : > { %v4728_v60 = vadd.f32 %v4727_v18, %v7163_v29 }
0x55be   : > { %4739 = vrot.lane.b32.xlu0 %v4728_v60, %s6825_s16  ;;  %4731 = vrot.lane.b32.xlu1 %v4728_v60, %s6824_s17 }
0x5630   : > { %v4732_v24 = vpop.permute.xlu1 %4731  ;;  %v4740_v52 = vpop.permute.xlu0 %4739 }
0x5631   : > { %v4734_v31 = vsel %vm4729_vm14, %v4732_v24, %v8294_v20  ;;  %4858 = vst.msk [vmem:[%s7048_s13 + $0x8] sm:$0xff] %vm2272_vm10, %v4732_v24 }
0x5632   : > { %4736 = vrot.lane.b32.xlu2 %v4734_v31, %s6823_s21  ;;  %v6841_v31 = vmov 13  }
0x5633   : > { %6336 = vset.pattern.permute.xlu0 %v6841_v31 }
0x568c   : > { %v4737_v7 = vpop.permute.xlu2 %4736 }
0x568d   : > { %v4742_v12 = vsel %vm851_vm3, %v4737_v7, %v4740_v52  ;;  %v8332_v7 = vld [vmem:[#allocation12 + $0x18] sm:$0xff] }
0x568e   : > { %6142 = vmatmul.msk.f32.vlgmr.msrb.gmra.mxu1 %vm644_vm1, %v4742_v12  ;;  %v8335_v12 = vld [vmem:[#allocation12 + $0x10] sm:$0xff] }
0x568f   : > { %5082 = vmatpush.msrb.mxu1 %v8226_v30 }
0x5691   : > { %5083 = vmatpush.msrb.mxu1 %v8229_v56 }
0x5693   : > { %5084 = vmatpush.msrb.mxu1 %v8232_v37 }
0x5695   : > { %5085 = vmatpush.msrb.mxu1 %v8235_v32 }
0x570b   : > { %v4763_v25 = vpop.f32.mrf.mxu1 }
0x570c   : > { %v4764_v23 = vadd.f32 %v8314_v38, %v4763_v25  ;;  %v8338_v25 = vld [vmem:[#allocation12 + $0x8] sm:$0xff] }
0x570e   : > { %4786 = vrot.lane.b32.xlu1 %v4764_v23, %s6826_s19  ;;  %v6143_v27 = vmul.f32 -1.442695, %v4764_v23 }
0x5710   : > { %6415 = vpow2.f32 %v6143_v27  ;;  %v8347_v27 = vld [vmem:[%s8573_s10] ss:$0 sm:$0xff] }
0x5716   : > { %v6416_v13 = vpop.eup %6415 }
0x5717   : > { %v4769_v21 = vadd.f32 1.0, %v6416_v13 }
0x5719   : > { %6417 = vrcp.f32 %v4769_v21  ;;  %v4781_v55 = vand.u32 2147483648, %v4769_v21  ;;  %vm4775_vm0 = vweird.f32 %v4769_v21  ;;  %v4779_v61 = vand.u32 2147483647, %v4769_v21 }
0x571b   : > { %v4782_v41 = vor.u32 1.1754944e-38, %v4781_v55  ;;  %vm4780_vm2 = vcmp.eq.f32.partialorder %v4779_v61, 8.507059e+37 }
0x571f   : > { %v6418_v14 = vpop.eup %6417 }
0x5720   : > { %v4771_v50 = vmul.f32 %v6418_v14, %v4769_v21  ;;  %vm4776_vm10 = vweird.f32 %v6418_v14 }
0x5721   : > { %vm4777_vm13 = vmor %vm4775_vm0, %vm4776_vm10 }
0x5722   : > { %v4772_v16 = vsub.f32 1.0, %v4771_v50 }
0x5724   : > { %v4773_v8 = vmul.f32 %v6418_v14, %v4772_v16 }
0x5726   : > { %v4774_v48 = vadd.f32 %v6418_v14, %v4773_v8 }
0x5728   : > { %v4778_v49 = vsel %vm4777_vm13, %v6418_v14, %v4774_v48 }
0x5729   : > { %v4783_v62 = vsel %vm4780_vm2, %v4782_v41, %v4778_v49 }
0x572a   : > { %v4796_v2 = vsub.f32 1.0, %v4783_v62  ;;  %v4802_v46 = vmul.f32 %v4783_v62, %v4740_v52 }
0x5780   : > { %v4787_v33 = vpop.permute.xlu1 %4786 }
0x5781   : > { %v4789_v43 = vmul.f32 %v4787_v33, %v4783_v62 }
0x5783   : > { %4791 = vrot.lane.b32.xlu2 %v4789_v43, %s6824_s17 }
0x57dd   : > { %v4792_v53 = vpop.permute.xlu2 %4791 }
0x57de   : > { %v4794_v10 = vadd.f32 %v4792_v53, %v4764_v23  ;;  %v8341_v23 = vld [vmem:[#allocation12] sm:$0xff] }
0x57e0   : > { %6419 = vtanh.f32 %v4794_v10 }
0x57e6   : > { %v6420_v34 = vpop.eup %6419 }
0x57e7   : > { %4798 = vrot.lane.b32.xlu0 %v6420_v34, %s6825_s16 }
0x57ef   : > { %4926 = vperm.xlu0 %6336, %v8112_v51  }
0x5859   : > { %v4799_v45 = vpop.permute.xlu0 %4798 }
0x585a   : > { %v4801_v22 = vmul.f32 %v4799_v45, %v4796_v2 }
0x585c   : > { %v4803_v9 = vadd.f32 %v4802_v46, %v4801_v22 }
0x585e   : > { %4805 = vrot.lane.b32.xlu1 %v4803_v9, %s6825_s16 }
0x5861   : > { %v4927_v50 = vpop.permute.xlu0 %4926 }
0x5862   : > { %v4931_v16 = vmul.f32 %v4927_v50, %v4927_v50 }
0x5864   : > { %v4938_v8 = vmul.f32 %v4931_v16, %v4927_v50 }
0x5866   : > { %v4945_v48 = vmul.f32 %v4938_v8, %v4927_v50 }
0x5868   : > { %v4952_v55 = vmul.f32 %v4945_v48, %v4927_v50 }
0x586a   : > { %v4955_v61 = vmul.f32 %v4952_v55, %v4927_v50 }
0x586c   : > { %v4962_v49 = vmul.f32 %v4955_v61, %v4927_v50 }
0x586e   : > { %v4969_v41 = vmul.f32 %v4962_v49, %v4927_v50 }
0x5870   : > { %v4976_v43 = vmul.f32 %v4969_v41, %v4927_v50 }
0x5872   : > { %v4979_v2 = vmul.f32 %v4976_v43, %v4927_v50 }
0x5874   : > { %v4986_v46 = vmul.f32 %v4979_v2, %v4927_v50 }
0x58d0   : > { %v4806_v19 = vpop.permute.xlu1 %4805 }
0x58d1   : > { %6144 = vmatmul.msk.f32.vlgmr.msrb.gmra.mxu2 %vm851_vm3, %v4806_v19 }
0x58d2   : > { %5147 = vmatpush.msrb.mxu2 %v8322_v40 }
0x58d4   : > { %5148 = vmatpush.msrb.mxu2 %v8325_v4 }
0x5954   : > { %v4826_v18 = vpop.f32.mrf.mxu2 }
0x5955   : > { %v4830_v60 = vadd.f32 %v4826_v18, %v7235_v35  ;;  %v4829_v13 = vadd.f32 %v8347_v27, %v4826_v18 }
0x5957   : > { %v4831_v24 = vmax.f32 %v4830_v60, 0.0 }
0x5959   : > { %4833 = vrot.lane.b32.xlu2 %v4831_v24, %s6822_s30  ;;  %v4993_v24 = vmul.f32 %v4986_v46, %v4927_v50 }
0x59b3   : > { %v4834_v52 = vpop.permute.xlu2 %4833 }
0x59b4   : > { %6145 = vmatmul.msk.f32.vlgmr.msrb.gmra.mxu3 %vm644_vm1, %v4834_v52 }
0x59b5   : > { %5173 = vmatpush.msrb.mxu3 %v8332_v7 }
0x59b7   : > { %5174 = vmatpush.msrb.mxu3 %v8335_v12 }
0x59b9   : > { %5175 = vmatpush.msrb.mxu3 %v8338_v25 }
0x59bb   : > { %5176 = vmatpush.msrb.mxu3 %v8341_v23 }
0x5a37   : > { %v4854_v21 = vpop.f32.mrf.mxu3 }
0x5a38   : > { %v4857_v14 = vadd.f32 %v4854_v21, %v4829_v13 }
0x5a3a   : > { %6146 = vmatmul.msk.f32.vlgmr.msra.gmra.mxu0 %vm644_vm1, %v4857_v14  ;;  %6147 = vmatmul.msk.f32.vlgmr.msra.gmra.mxu1 %vm644_vm1, %v4857_v14 }
0x5a3b   : > { %6148 = vmatmul.msk.f32.vlgmr.msra.gmra.mxu2 %vm644_vm1, %v4857_v14  ;;  %5200 = vmatpush.msra.mxu0 %v8129_v3 }
0x5a3c   : > { %5220 = vmatpush.msra.mxu1 %v8132_v5  ;;  %5240 = vmatpush.msra.mxu2 %v8135_v1 }
0x5a3d   : > { %5201 = vmatpush.msra.mxu0 %v8138_v28 }
0x5a3e   : > { %5221 = vmatpush.msra.mxu1 %v8141_v54  ;;  %5241 = vmatpush.msra.mxu2 %v8144_v63 }
0x5a3f   : > { %5202 = vmatpush.msra.mxu0 %v8147_v17 }
0x5a40   : > { %5222 = vmatpush.msra.mxu1 %v8150_v15  ;;  %5242 = vmatpush.msra.mxu2 %v8153_v59 }
0x5a41   : > { %5203 = vmatpush.msra.mxu0 %v8156_v0 }
0x5a42   : > { %5223 = vmatpush.msra.mxu1 %v8159_v6  ;;  %5243 = vmatpush.msra.mxu2 %v8162_v26 }
0x5ab7   : > { %v4881_v33 = vpop.f32.mrf.mxu0  ;;  %v4901_v62 = vpop.f32.mrf.mxu1 }
0x5ab8   : > { %v4932_v53 = vmul.f32 %v4931_v16, %v4881_v33  ;;  %v4939_v10 = vmul.f32 %v4938_v8, %v4881_v33  ;;  %v4963_v34 = vmul.f32 %v4962_v49, %v4901_v62  ;;  %v4946_v22 = vmul.f32 %v4945_v48, %v4881_v33 }
0x5ab9   : > { %v4956_v9 = vmul.f32 %v4955_v61, %v4901_v62  ;;  %v4970_v18 = vmul.f32 %v4969_v41, %v4901_v62  ;;  %v4929_v52 = vmul.f32 %v4927_v50, %v4881_v33  ;;  %v4953_v49 = vmul.f32 %v4952_v55, %v4901_v62 }
0x5aba   : > { %4941 = vrot.lane.b32.xlu2 %v4939_v10, %s6823_s21  ;;  %4934 = vrot.lane.b32.xlu1 %v4932_v53, %s6822_s30 }
0x5abb   : > { %4965 = vrot.lane.b32.xlu0 %v4963_v34, %s6823_s21  ;;  %v4930_v16 = vadd.f32 %v4929_v52, %v4857_v14 }
0x5abe   : > { %v4921_v45 = vpop.f32.mrf.mxu2 }
0x5abf   : > { %v4987_v19 = vmul.f32 %v4986_v46, %v4921_v45  ;;  %v4980_v60 = vmul.f32 %v4979_v2, %v4921_v45  ;;  %v4994_v31 = vmul.f32 %v4993_v24, %v4921_v45 }
0x5ac2   : > { %4958 = vrot.lane.b32.xlu2 %v4956_v9, %s6822_s30  ;;  %4948 = vrot.lane.b32.xlu1 %v4946_v22, %s6824_s17 }
0x5ac3   : > { %4989 = vrot.lane.b32.xlu0 %v4987_v19, %s6823_s21  ;;  %v4977_v19 = vmul.f32 %v4976_v43, %v4921_v45 }
0x5aca   : > { %4982 = vrot.lane.b32.xlu2 %v4980_v60, %s6822_s30  ;;  %4972 = vrot.lane.b32.xlu1 %v4970_v18, %s6824_s17 }
0x5ad2   : > { %4996 = vrot.lane.b32.xlu1 %v4994_v31, %s6824_s17 }
0x5b14   : > { %v4942_v13 = vpop.permute.xlu2 %4941 }
0x5b1c   : > { %v4959_v10 = vpop.permute.xlu2 %4958 }
0x5b24   : > { %v4983_v60 = vpop.permute.xlu2 %4982 }
0x5b2c   : > { %v4935_v21 = vpop.permute.xlu1 %4934 }
0x5b2d   : > { %v4937_v8 = vadd.f32 %v4935_v21, %v4930_v16  ;;  %v4966_v34 = vpop.permute.xlu0 %4965 }
0x5b2f   : > { %v4944_v48 = vadd.f32 %v4942_v13, %v4937_v8 }
0x5b34   : > { %v4949_v61 = vpop.permute.xlu1 %4948 }
0x5b35   : > { %v4951_v53 = vadd.f32 %v4949_v61, %v4944_v48  ;;  %v4990_v50 = vpop.permute.xlu0 %4989 }
0x5b37   : > { %v4954_v41 = vadd.f32 %v4953_v49, %v4951_v53 }
0x5b39   : > { %v4961_v2 = vadd.f32 %v4959_v10, %v4954_v41 }
0x5b3b   : > { %v4968_v22 = vadd.f32 %v4966_v34, %v4961_v2 }
0x5b3c   : > { %v4973_v9 = vpop.permute.xlu1 %4972 }
0x5b3d   : > { %v4975_v46 = vadd.f32 %v4973_v9, %v4968_v22 }
0x5b3f   : > { %v4978_v18 = vadd.f32 %v4977_v19, %v4975_v46 }
0x5b41   : > { %v4985_v24 = vadd.f32 %v4983_v60, %v4978_v18 }
0x5b43   : > { %v4992_v33 = vadd.f32 %v4990_v50, %v4985_v24 }
0x5b44   : > { %v4997_v31 = vpop.permute.xlu1 %4996 }
0x5b45   : > { %v4999_v14 = vadd.f32 %v4997_v31, %v4992_v33 }
0x5b47   : > { %6149 = vmatmul.msk.f32.vlgmr.msra.gmra.mxu3 %vm644_vm1, %v4999_v14 }
0x5b48   : > { %5339 = vmatpush.msra.mxu3 %v8176_v44 }
0x5b4a   : > { %5340 = vmatpush.msra.mxu3 %v8179_v42 }
0x5b4c   : > { %5341 = vmatpush.msra.mxu3 %v8182_v11 }
0x5b4e   : > { %5342 = vmatpush.msra.mxu3 %v8185_v47 }
0x5bca   : > { %v5020_v55 = vpop.f32.mrf.mxu3 }
0x5bcb   : > { %v5023_v62 = vmax.f32 %v5020_v55, 0.0 }
0x5bcd   : > { %6150 = vmatmul.msk.f32.vlgmr.msrb.gmra.mxu0 %vm644_vm1, %v5023_v62 }
0x5bce   : > { %5363 = vmatpush.msrb.mxu0 %v8192_v58 }
0x5bd0   : > { %5364 = vmatpush.msrb.mxu0 %v8198_v57 }
0x5bd2   : > { %5365 = vmatpush.msrb.mxu0 %v8204_v36 }
0x5bd4   : > { %5366 = vmatpush.msrb.mxu0 %v8210_v39 }
0x5c4a   : > { %v5044_v43 = vpop.f32.mrf.mxu0 }
0x5c4b   : > { %5048 = vrot.lane.b32.xlu2 %v5044_v43, %s6824_s17 }
0x5ca5   : > { %v5049_v45 = vpop.permute.xlu2 %5048 }
0x5ca6   : > { %v5051_v52 = vadd.f32 %v5049_v45, %v5020_v55 }
0x5ca8   : > { %v5052_v13 = vadd.f32 %v5051_v52, %v7163_v29 }
0x5caa   : > { %5063 = vrot.lane.b32.xlu2 %v5052_v13, %s6825_s16  ;;  %5055 = vrot.lane.b32.xlu0 %v5052_v13, %s6833_s18 }
0x5d04   : > { %v5064_v8 = vpop.permute.xlu2 %5063 }
0x5d1c   : > { %v5056_v21 = vpop.permute.xlu0 %5055 }
0x5d1d   : > { %v5058_v16 = vsel %vm4729_vm14, %v5056_v21, %v8294_v20  ;;  %5182 = vst.msk [vmem:[%s7048_s13 + $0x8] sm:$0xff] %vm2597_vm4, %v5056_v21 }
0x5d1e   : > { %5060 = vrot.lane.b32.xlu1 %v5058_v16, %s6833_s18 }
0x5d90   : > { %v5061_v48 = vpop.permute.xlu1 %5060 }
0x5d91   : > { %v5066_v61 = vsel %vm851_vm3, %v5061_v48, %v5064_v8 }
0x5d92   : > { %6151 = vmatmul.msk.f32.vlgmr.msrb.gmra.mxu1 %vm644_vm1, %v5066_v61 }
0x5d93   : > { %5406 = vmatpush.msrb.mxu1 %v8226_v30 }
0x5d95   : > { %5407 = vmatpush.msrb.mxu1 %v8229_v56 }
0x5d97   : > { %5408 = vmatpush.msrb.mxu1 %v8232_v37 }
0x5d99   : > { %5409 = vmatpush.msrb.mxu1 %v8235_v32 }
0x5e0f   : > { %v5087_v49 = vpop.f32.mrf.mxu1 }
0x5e10   : > { %v5088_v53 = vadd.f32 %v8314_v38, %v5087_v49 }
0x5e12   : > { %5110 = vrot.lane.b32.xlu0 %v5088_v53, %s6826_s19  ;;  %v6152_v10 = vmul.f32 -1.442695, %v5088_v53 }
0x5e14   : > { %6421 = vpow2.f32 %v6152_v10 }
0x5e1a   : > { %v6422_v41 = vpop.eup %6421 }
0x5e1b   : > { %v5093_v34 = vadd.f32 1.0, %v6422_v41 }
0x5e1d   : > { %6423 = vrcp.f32 %v5093_v34  ;;  %v5105_v18 = vand.u32 2147483648, %v5093_v34  ;;  %vm5099_vm11 = vweird.f32 %v5093_v34  ;;  %v5103_v60 = vand.u32 2147483647, %v5093_v34 }
0x5e1f   : > { %v5106_v50 = vor.u32 1.1754944e-38, %v5105_v18  ;;  %vm5104_vm5 = vcmp.eq.f32.partialorder %v5103_v60, 8.507059e+37 }
0x5e23   : > { %v6424_v2 = vpop.eup %6423 }
0x5e24   : > { %v5095_v22 = vmul.f32 %v6424_v2, %v5093_v34  ;;  %vm5100_vm4 = vweird.f32 %v6424_v2 }
0x5e25   : > { %vm5101_vm7 = vmor %vm5099_vm11, %vm5100_vm4 }
0x5e26   : > { %v5096_v9 = vsub.f32 1.0, %v5095_v22 }
0x5e28   : > { %v5097_v19 = vmul.f32 %v6424_v2, %v5096_v9 }
0x5e2a   : > { %v5098_v46 = vadd.f32 %v6424_v2, %v5097_v19 }
0x5e2c   : > { %v5102_v24 = vsel %vm5101_vm7, %v6424_v2, %v5098_v46 }
0x5e2d   : > { %v5107_v31 = vsel %vm5104_vm5, %v5106_v50, %v5102_v24 }
0x5e2e   : > { %v5120_v45 = vsub.f32 1.0, %v5107_v31  ;;  %v5126_v13 = vmul.f32 %v5107_v31, %v5064_v8  ;;  %v6842_v8 = vmov 14  }
0x5e2f   : > { %6337 = vset.pattern.permute.xlu2 %v6842_v8 }
0x5e84   : > { %v5111_v33 = vpop.permute.xlu0 %5110 }
0x5e85   : > { %v5113_v14 = vmul.f32 %v5111_v33, %v5107_v31 }
0x5e87   : > { %5115 = vrot.lane.b32.xlu1 %v5113_v14, %s6824_s17 }
0x5ef9   : > { %v5116_v55 = vpop.permute.xlu1 %5115 }
0x5efa   : > { %v5118_v62 = vadd.f32 %v5116_v55, %v5088_v53 }
0x5efc   : > { %6425 = vtanh.f32 %v5118_v62 }
0x5f02   : > { %v6426_v43 = vpop.eup %6425 }
0x5f03   : > { %5122 = vrot.lane.b32.xlu2 %v6426_v43, %s6825_s16 }
0x5f0b   : > { %5250 = vperm.xlu2 %6337, %v8112_v51  }
0x5f5d   : > { %v5123_v52 = vpop.permute.xlu2 %5122 }
0x5f5e   : > { %v5125_v21 = vmul.f32 %v5123_v52, %v5120_v45 }
0x5f60   : > { %v5127_v16 = vadd.f32 %v5126_v13, %v5125_v21 }
0x5f62   : > { %5129 = vrot.lane.b32.xlu0 %v5127_v16, %s6825_s16 }
0x5f65   : > { %v5251_v51 = vpop.permute.xlu2 %5250 }
0x5fd4   : > { %v5130_v48 = vpop.permute.xlu0 %5129 }
0x5fd5   : > { %6153 = vmatmul.msk.f32.vlgmr.msrb.gmra.mxu2 %vm851_vm3, %v5130_v48 }
0x5fd6   : > { %5471 = vmatpush.msrb.mxu2 %v8322_v40 }
0x5fd8   : > { %5472 = vmatpush.msrb.mxu2 %v8325_v4 }
0x6058   : > { %v5150_v61 = vpop.f32.mrf.mxu2 }
0x6059   : > { %v5154_v49 = vadd.f32 %v5150_v61, %v7235_v35  ;;  %v5153_v41 = vadd.f32 %v8347_v27, %v5150_v61 }
0x605b   : > { %v5155_v53 = vmax.f32 %v5154_v49, 0.0 }
0x605d   : > { %5157 = vrot.lane.b32.xlu1 %v5155_v53, %s6822_s30 }
0x60cf   : > { %v5158_v10 = vpop.permute.xlu1 %5157 }
0x60d0   : > { %6154 = vmatmul.msk.f32.vlgmr.msrb.gmra.mxu3 %vm644_vm1, %v5158_v10 }
0x60d1   : > { %5497 = vmatpush.msrb.mxu3 %v8332_v7 }
0x60d3   : > { %5498 = vmatpush.msrb.mxu3 %v8335_v12 }
0x60d5   : > { %5499 = vmatpush.msrb.mxu3 %v8338_v25 }
0x60d7   : > { %5500 = vmatpush.msrb.mxu3 %v8341_v23 }
0x6153   : > { %v5178_v34 = vpop.f32.mrf.mxu3 }
0x6154   : > { %v5181_v2 = vadd.f32 %v5178_v34, %v5153_v41 }
0x6156   : > { %6155 = vmatmul.msk.f32.vlgmr.msra.gmra.mxu0 %vm644_vm1, %v5181_v2  ;;  %6156 = vmatmul.msk.f32.vlgmr.msra.gmra.mxu1 %vm644_vm1, %v5181_v2 }
0x6157   : > { %6157 = vmatmul.msk.f32.vlgmr.msra.gmra.mxu2 %vm644_vm1, %v5181_v2  ;;  %5524 = vmatpush.msra.mxu0 %v8129_v3  ;;  %v5255_v3 = vmul.f32 %v5251_v51, %v5251_v51 }
0x6158   : > { %5544 = vmatpush.msra.mxu1 %v8132_v5  ;;  %5564 = vmatpush.msra.mxu2 %v8135_v1 }
0x6159   : > { %5525 = vmatpush.msra.mxu0 %v8138_v28  ;;  %v5262_v5 = vmul.f32 %v5255_v3, %v5251_v51 }
0x615a   : > { %5545 = vmatpush.msra.mxu1 %v8141_v54  ;;  %5565 = vmatpush.msra.mxu2 %v8144_v63 }
0x615b   : > { %5526 = vmatpush.msra.mxu0 %v8147_v17  ;;  %v5269_v1 = vmul.f32 %v5262_v5, %v5251_v51 }
0x615c   : > { %5546 = vmatpush.msra.mxu1 %v8150_v15  ;;  %5566 = vmatpush.msra.mxu2 %v8153_v59 }
0x615d   : > { %5527 = vmatpush.msra.mxu0 %v8156_v0  ;;  %v5276_v28 = vmul.f32 %v5269_v1, %v5251_v51 }
0x615e   : > { %5547 = vmatpush.msra.mxu1 %v8159_v6  ;;  %5567 = vmatpush.msra.mxu2 %v8162_v26 }
0x615f   : > { %v5279_v54 = vmul.f32 %v5276_v28, %v5251_v51 }
0x6161   : > { %v5286_v22 = vmul.f32 %v5279_v54, %v5251_v51 }
0x6163   : > { %v5293_v63 = vmul.f32 %v5286_v22, %v5251_v51 }
0x6165   : > { %v5300_v59 = vmul.f32 %v5293_v63, %v5251_v51 }
0x6167   : > { %v5303_v6 = vmul.f32 %v5300_v59, %v5251_v51 }
0x6169   : > { %v5310_v60 = vmul.f32 %v5303_v6, %v5251_v51 }
0x616b   : > { %v5317_v50 = vmul.f32 %v5310_v60, %v5251_v51 }
0x61d3   : > { %v5205_v9 = vpop.f32.mrf.mxu0  ;;  %v5225_v0 = vpop.f32.mrf.mxu1 }
0x61d4   : > { %v5256_v17 = vmul.f32 %v5255_v3, %v5205_v9  ;;  %v5263_v19 = vmul.f32 %v5262_v5, %v5205_v9  ;;  %v5270_v15 = vmul.f32 %v5269_v1, %v5205_v9  ;;  %v5287_v26 = vmul.f32 %v5286_v22, %v5225_v0 }
0x61d5   : > { %v5294_v46 = vmul.f32 %v5293_v63, %v5225_v0  ;;  %v5280_v18 = vmul.f32 %v5279_v54, %v5225_v0  ;;  %v5253_v55 = vmul.f32 %v5251_v51, %v5205_v9  ;;  %v5277_v16 = vmul.f32 %v5276_v28, %v5225_v0 }
0x61d6   : > { %5272 = vrot.lane.b32.xlu2 %v5270_v15, %s6824_s17  ;;  %5265 = vrot.lane.b32.xlu1 %v5263_v19, %s6823_s21 }
0x61d7   : > { %5258 = vrot.lane.b32.xlu0 %v5256_v17, %s6822_s30  ;;  %v5254_v43 = vadd.f32 %v5253_v55, %v5181_v2 }
0x61da   : > { %v5245_v24 = vpop.f32.mrf.mxu2 }
0x61db   : > { %v5311_v33 = vmul.f32 %v5310_v60, %v5245_v24  ;;  %v5318_v31 = vmul.f32 %v5317_v50, %v5245_v24  ;;  %v5304_v14 = vmul.f32 %v5303_v6, %v5245_v24  ;;  %v5301_v34 = vmul.f32 %v5300_v59, %v5245_v24 }
0x61de   : > { %5296 = vrot.lane.b32.xlu2 %v5294_v46, %s6824_s17  ;;  %5289 = vrot.lane.b32.xlu1 %v5287_v26, %s6823_s21 }
0x61df   : > { %5282 = vrot.lane.b32.xlu0 %v5280_v18, %s6822_s30 }
0x61e6   : > { %5320 = vrot.lane.b32.xlu2 %v5318_v31, %s6824_s17  ;;  %5313 = vrot.lane.b32.xlu1 %v5311_v33, %s6823_s21 }
0x61e7   : > { %5306 = vrot.lane.b32.xlu0 %v5304_v14, %s6822_s30 }
0x6230   : > { %v5273_v45 = vpop.permute.xlu2 %5272 }
0x6238   : > { %v5297_v8 = vpop.permute.xlu2 %5296 }
0x6240   : > { %v5321_v2 = vpop.permute.xlu2 %5320 }
0x6248   : > { %v5266_v62 = vpop.permute.xlu1 %5265 }
0x6249   : > { %v5259_v52 = vpop.permute.xlu0 %5258 }
0x624a   : > { %v5261_v13 = vadd.f32 %v5259_v52, %v5254_v43 }
0x624c   : > { %v5268_v21 = vadd.f32 %v5266_v62, %v5261_v13 }
0x624e   : > { %v5275_v48 = vadd.f32 %v5273_v45, %v5268_v21 }
0x6250   : > { %v5278_v61 = vadd.f32 %v5277_v16, %v5275_v48  ;;  %v5290_v49 = vpop.permute.xlu1 %5289 }
0x6251   : > { %v5283_v53 = vpop.permute.xlu0 %5282 }
0x6252   : > { %v5285_v10 = vadd.f32 %v5283_v53, %v5278_v61  ;;  %v5507_v53 = vld [vmem:[%s7041_s15] sm:$0xff] }
0x6254   : > { %v5292_v41 = vadd.f32 %v5290_v49, %v5285_v10  ;;  %v6843_v10 = vmov 15  }
0x6255   : > { %6338 = vset.pattern.permute.xlu0 %v6843_v10 }
0x6256   : > { %v5299_v3 = vadd.f32 %v5297_v8, %v5292_v41 }
0x6258   : > { %v5302_v5 = vadd.f32 %v5301_v34, %v5299_v3  ;;  %v5314_v51 = vpop.permute.xlu1 %5313 }
0x6259   : > { %v5307_v1 = vpop.permute.xlu0 %5306 }
0x625a   : > { %v5309_v54 = vadd.f32 %v5307_v1, %v5302_v5 }
0x625c   : > { %v5316_v22 = vadd.f32 %v5314_v51, %v5309_v54 }
0x625e   : > { %v5323_v63 = vadd.f32 %v5321_v2, %v5316_v22 }
0x6260   : > { %6158 = vmatmul.msk.f32.vlgmr.msra.gmra.mxu3 %vm644_vm1, %v5323_v63 }
0x6261   : > { %5663 = vmatpush.msra.mxu3 %v8176_v44 }
0x6263   : > { %5664 = vmatpush.msra.mxu3 %v8179_v42 }
0x6265   : > { %5665 = vmatpush.msra.mxu3 %v8182_v11 }
0x6267   : > { %5666 = vmatpush.msra.mxu3 %v8185_v47 }
0x62e3   : > { %v5344_v28 = vpop.f32.mrf.mxu3 }
0x62e4   : > { %v5347_v9 = vmax.f32 %v5344_v28, 0.0 }
0x62e6   : > { %6159 = vmatmul.msk.f32.vlgmr.msrb.gmra.mxu0 %vm644_vm1, %v5347_v9 }
0x62e7   : > { %5687 = vmatpush.msrb.mxu0 %v8192_v58 }
0x62e9   : > { %5688 = vmatpush.msrb.mxu0 %v8198_v57 }
0x62eb   : > { %5689 = vmatpush.msrb.mxu0 %v8204_v36 }
0x62ed   : > { %5690 = vmatpush.msrb.mxu0 %v8210_v39 }
0x6363   : > { %v5368_v44 = vpop.f32.mrf.mxu0 }
0x6364   : > { %5372 = vrot.lane.b32.xlu0 %v5368_v44, %s6824_s17 }
0x63d6   : > { %v5373_v42 = vpop.permute.xlu0 %5372 }
0x63d7   : > { %v5375_v11 = vadd.f32 %v5373_v42, %v5344_v28 }
0x63d9   : > { %v5376_v47 = vadd.f32 %v5375_v11, %v7163_v29 }
0x63db   : > { %5387 = vrot.lane.b32.xlu0 %v5376_v47, %s6825_s16  ;;  %5379 = vrot.lane.b32.xlu1 %v5376_v47, %s6823_s21 }
0x644d   : > { %v5380_v17 = vpop.permute.xlu1 %5379  ;;  %v5388_v57 = vpop.permute.xlu0 %5387 }
0x644e   : > { %v5382_v58 = vsel %vm4729_vm14, %v5380_v17, %v8294_v20  ;;  %5506 = vst.msk [vmem:[%s7048_s13 + $0x8] sm:$0xff] %vm2922_vm12, %v5380_v17 }
0x644f   : > { %5384 = vrot.lane.b32.xlu2 %v5382_v58, %s6824_s17 }
0x64a9   : > { %v5385_v36 = vpop.permute.xlu2 %5384 }
0x64aa   : > { %v5390_v39 = vsel %vm851_vm3, %v5385_v36, %v5388_v57 }
0x64ab   : > { %6160 = vmatmul.msk.f32.vlgmr.msrb.gmra.mxu1 %vm644_vm1, %v5390_v39 }
0x64ac   : > { %5730 = vmatpush.msrb.mxu1 %v8226_v30 }
0x64ae   : > { %5731 = vmatpush.msrb.mxu1 %v8229_v56 }
0x64b0   : > { %5732 = vmatpush.msrb.mxu1 %v8232_v37 }
0x64b2   : > { %5733 = vmatpush.msrb.mxu1 %v8235_v32 }
0x6528   : > { %v5411_v19 = vpop.f32.mrf.mxu1 }
0x6529   : > { %v5412_v15 = vadd.f32 %v8314_v38, %v5411_v19 }
0x652b   : > { %5434 = vrot.lane.b32.xlu1 %v5412_v15, %s6826_s19  ;;  %v6161_v59 = vmul.f32 -1.442695, %v5412_v15 }
0x652d   : > { %6427 = vpow2.f32 %v6161_v59 }
0x6533   : > { %v6428_v0 = vpop.eup %6427 }
0x6534   : > { %v5417_v6 = vadd.f32 1.0, %v6428_v0 }
0x6536   : > { %6429 = vrcp.f32 %v5417_v6  ;;  %v5429_v56 = vand.u32 2147483648, %v5417_v6  ;;  %vm5423_vm15 = vweird.f32 %v5417_v6  ;;  %v5427_v37 = vand.u32 2147483647, %v5417_v6 }
0x6538   : > { %v5430_v24 = vor.u32 1.1754944e-38, %v5429_v56  ;;  %vm5428_vm9 = vcmp.eq.f32.partialorder %v5427_v37, 8.507059e+37 }
0x653c   : > { %v6430_v26 = vpop.eup %6429 }
0x653d   : > { %v5419_v46 = vmul.f32 %v6430_v26, %v5417_v6  ;;  %vm5424_vm12 = vweird.f32 %v6430_v26 }
0x653e   : > { %vm5425_vm8 = vmor %vm5423_vm15, %vm5424_vm12 }
0x653f   : > { %v5420_v18 = vsub.f32 1.0, %v5419_v46 }
0x6541   : > { %v5421_v30 = vmul.f32 %v6430_v26, %v5420_v18 }
0x6543   : > { %v5422_v60 = vadd.f32 %v6430_v26, %v5421_v30 }
0x6545   : > { %v5426_v32 = vsel %vm5425_vm8, %v6430_v26, %v5422_v60 }
0x6546   : > { %v5431_v33 = vsel %vm5428_vm9, %v5430_v24, %v5426_v32 }
0x6547   : > { %v5444_v43 = vsub.f32 1.0, %v5431_v33  ;;  %v5450_v52 = vmul.f32 %v5431_v33, %v5388_v57 }
0x659d   : > { %v5435_v50 = vpop.permute.xlu1 %5434 }
0x659e   : > { %v5437_v31 = vmul.f32 %v5435_v50, %v5431_v33 }
0x65a0   : > { %5439 = vrot.lane.b32.xlu2 %v5437_v31, %s6824_s17 }
0x65fa   : > { %v5440_v14 = vpop.permute.xlu2 %5439 }
0x65fb   : > { %v5442_v55 = vadd.f32 %v5440_v14, %v5412_v15 }
0x65fd   : > { %6431 = vtanh.f32 %v5442_v55 }
0x6603   : > { %v6432_v62 = vpop.eup %6431 }
0x6604   : > { %5446 = vrot.lane.b32.xlu0 %v6432_v62, %s6825_s16 }
0x660c   : > { %5574 = vperm.xlu0 %6338, %v5507_v53  }
0x6676   : > { %v5447_v45 = vpop.permute.xlu0 %5446 }
0x6677   : > { %v5449_v13 = vmul.f32 %v5447_v45, %v5444_v43 }
0x6679   : > { %v5451_v21 = vadd.f32 %v5450_v52, %v5449_v13 }
0x667b   : > { %5453 = vrot.lane.b32.xlu1 %v5451_v21, %s6825_s16 }
0x667e   : > { %v5575_v34 = vpop.permute.xlu0 %5574 }
0x667f   : > { %v5579_v3 = vmul.f32 %v5575_v34, %v5575_v34 }
0x6681   : > { %v5586_v5 = vmul.f32 %v5579_v3, %v5575_v34 }
0x66ed   : > { %v5454_v16 = vpop.permute.xlu1 %5453 }
0x66ee   : > { %6162 = vmatmul.msk.f32.vlgmr.msrb.gmra.mxu2 %vm851_vm3, %v5454_v16 }
0x66ef   : > { %5795 = vmatpush.msrb.mxu2 %v8322_v40 }
0x66f1   : > { %5796 = vmatpush.msrb.mxu2 %v8325_v4 }
0x6771   : > { %v5474_v48 = vpop.f32.mrf.mxu2 }
0x6772   : > { %v5478_v61 = vadd.f32 %v5474_v48, %v7235_v35  ;;  %v5477_v40 = vadd.f32 %v8347_v27, %v5474_v48 }
0x6774   : > { %v5479_v49 = vmax.f32 %v5478_v61, 0.0 }
0x6776   : > { %5481 = vrot.lane.b32.xlu2 %v5479_v49, %s6822_s30 }
0x67d0   : > { %v5482_v8 = vpop.permute.xlu2 %5481 }
0x67d1   : > { %6163 = vmatmul.msk.f32.vlgmr.msrb.gmra.mxu3 %vm644_vm1, %v5482_v8 }
0x67d2   : > { %5821 = vmatpush.msrb.mxu3 %v8332_v7  ;;  %v5593_v7 = vmul.f32 %v5586_v5, %v5575_v34 }
0x67d4   : > { %5822 = vmatpush.msrb.mxu3 %v8335_v12  ;;  %v5600_v1 = vmul.f32 %v5593_v7, %v5575_v34 }
0x67d6   : > { %5823 = vmatpush.msrb.mxu3 %v8338_v25  ;;  %v5603_v12 = vmul.f32 %v5600_v1, %v5575_v34 }
0x67d8   : > { %5824 = vmatpush.msrb.mxu3 %v8341_v23  ;;  %v5610_v54 = vmul.f32 %v5603_v12, %v5575_v34 }
0x67da   : > { %v5617_v25 = vmul.f32 %v5610_v54, %v5575_v34 }
0x67dc   : > { %v5624_v22 = vmul.f32 %v5617_v25, %v5575_v34 }
0x67de   : > { %v5627_v9 = vmul.f32 %v5624_v22, %v5575_v34 }
0x67e0   : > { %v5634_v42 = vmul.f32 %v5627_v9, %v5575_v34 }
0x67e2   : > { %v5641_v36 = vmul.f32 %v5634_v42, %v5575_v34 }
0x6854   : > { %v5502_v4 = vpop.f32.mrf.mxu3 }
0x6855   : > { %v5505_v41 = vadd.f32 %v5502_v4, %v5477_v40 }
0x6857   : > { %6164 = vmatmul.msk.f32.vlgmr.msra.gmra.mxu0 %vm644_vm1, %v5505_v41  ;;  %6165 = vmatmul.msk.f32.vlgmr.msra.gmra.mxu1 %vm644_vm1, %v5505_v41 }
0x6858   : > { %6166 = vmatmul.msk.f32.vlgmr.msra.gmra.mxu2 %vm644_vm1, %v5505_v41 }
0x68d4   : > { %v5529_v51 = vpop.f32.mrf.mxu0  ;;  %v5549_v23 = vpop.f32.mrf.mxu1 }
0x68d5   : > { %v5580_v2 = vmul.f32 %v5579_v3, %v5529_v51  ;;  %v5587_v63 = vmul.f32 %v5586_v5, %v5529_v51  ;;  %v5611_v28 = vmul.f32 %v5610_v54, %v5549_v23  ;;  %v5594_v11 = vmul.f32 %v5593_v7, %v5529_v51 }
0x68d6   : > { %v5604_v47 = vmul.f32 %v5603_v12, %v5549_v23  ;;  %v5618_v58 = vmul.f32 %v5617_v25, %v5549_v23  ;;  %v5577_v19 = vmul.f32 %v5575_v34, %v5529_v51  ;;  %v5601_v18 = vmul.f32 %v5600_v1, %v5549_v23 }
0x68d7   : > { %5589 = vrot.lane.b32.xlu2 %v5587_v63, %s6823_s21  ;;  %5582 = vrot.lane.b32.xlu1 %v5580_v2, %s6822_s30 }
0x68d8   : > { %5613 = vrot.lane.b32.xlu0 %v5611_v28, %s6823_s21  ;;  %v5578_v0 = vadd.f32 %v5577_v19, %v5505_v41 }
0x68db   : > { %v5569_v44 = vpop.f32.mrf.mxu2 }
0x68dc   : > { %v5635_v17 = vmul.f32 %v5634_v42, %v5569_v44  ;;  %v5628_v57 = vmul.f32 %v5627_v9, %v5569_v44  ;;  %v5642_v39 = vmul.f32 %v5641_v36, %v5569_v44  ;;  %v5625_v33 = vmul.f32 %v5624_v22, %v5569_v44 }
0x68df   : > { %5606 = vrot.lane.b32.xlu2 %v5604_v47, %s6822_s30  ;;  %5596 = vrot.lane.b32.xlu1 %v5594_v11, %s6824_s17 }
0x68e0   : > { %5637 = vrot.lane.b32.xlu0 %v5635_v17, %s6823_s21  ;;  %s6179_s21 = sshll.u32 %s6801_s28, 4 }
0x68e7   : > { %5630 = vrot.lane.b32.xlu2 %v5628_v57, %s6822_s30  ;;  %5620 = vrot.lane.b32.xlu1 %v5618_v58, %s6824_s17 }
0x68ef   : > { %5644 = vrot.lane.b32.xlu1 %v5642_v39, %s6824_s17 }
0x6931   : > { %v5590_v15 = vpop.permute.xlu2 %5589 }
0x6939   : > { %v5607_v60 = vpop.permute.xlu2 %5606 }
0x6941   : > { %v5631_v55 = vpop.permute.xlu2 %5630 }
0x6949   : > { %v5583_v59 = vpop.permute.xlu1 %5582 }
0x694a   : > { %v5585_v6 = vadd.f32 %v5583_v59, %v5578_v0  ;;  %v5614_v37 = vpop.permute.xlu0 %5613 }
0x694c   : > { %v5592_v26 = vadd.f32 %v5590_v15, %v5585_v6 }
0x6951   : > { %v5597_v46 = vpop.permute.xlu1 %5596 }
0x6952   : > { %v5599_v30 = vadd.f32 %v5597_v46, %v5592_v26  ;;  %v5638_v43 = vpop.permute.xlu0 %5637 }
0x6954   : > { %v5602_v56 = vadd.f32 %v5601_v18, %v5599_v30 }
0x6956   : > { %v5609_v32 = vadd.f32 %v5607_v60, %v5602_v56 }
0x6958   : > { %v5616_v24 = vadd.f32 %v5614_v37, %v5609_v32 }
0x6959   : > { %v5621_v50 = vpop.permute.xlu1 %5620 }
0x695a   : > { %v5623_v31 = vadd.f32 %v5621_v50, %v5616_v24 }
0x695c   : > { %v5626_v14 = vadd.f32 %v5625_v33, %v5623_v31 }
0x695e   : > { %v5633_v62 = vadd.f32 %v5631_v55, %v5626_v14 }
0x6960   : > { %v5640_v45 = vadd.f32 %v5638_v43, %v5633_v62 }
0x6961   : > { %v5645_v52 = vpop.permute.xlu1 %5644 }
0x6962   : > { %v5647_v13 = vadd.f32 %v5645_v52, %v5640_v45 }
0x6964   : > { %6167 = vmatmul.msk.f32.vlgmr.msra.gmra.mxu3 %vm644_vm1, %v5647_v13 }
0x69e7   : > { %v5668_v21 = vpop.f32.mrf.mxu3 }
0x69e8   : > { %v5671_v16 = vmax.f32 %v5668_v21, 0.0 }
0x69ea   : > { %6168 = vmatmul.msk.f32.vlgmr.msrb.gmra.mxu0 %vm644_vm1, %v5671_v16 }
0x6a67   : > { %v5692_v48 = vpop.f32.mrf.mxu0 }
0x6a68   : > { %5696 = vrot.lane.b32.xlu2 %v5692_v48, %s6824_s17 }
0x6ac2   : > { %v5697_v61 = vpop.permute.xlu2 %5696 }
0x6ac3   : > { %v5699_v49 = vadd.f32 %v5697_v61, %v5668_v21 }
0x6ac5   : > { %v5700_v53 = vadd.f32 %v5699_v49, %v7163_v29 }
0x6ac7   : > { %5711 = vrot.lane.b32.xlu2 %v5700_v53, %s6825_s16  ;;  %5703 = vrot.lane.b32.xlu0 %v5700_v53, %s6826_s19 }
0x6b21   : > { %v5712_v40 = vpop.permute.xlu2 %5711 }
0x6b39   : > { %v5704_v10 = vpop.permute.xlu0 %5703 }
0x6b3a   : > { %v5706_v8 = vsel %vm4729_vm14, %v5704_v10, %v8294_v20  ;;  %5830 = vst.msk [vmem:[%s7048_s13 + $0x8] sm:$0xff] %vm3247_vm6, %v5704_v10 }
0x6b3b   : > { %5708 = vrot.lane.b32.xlu1 %v5706_v8, %s6830_s22  ;;  %s8606_s22 = sld [smem:[#allocation30_spill]] }
0x6b41   : > { %s5846_s18 = scalar_lea.hbm %s8606_s22, %s6179_s21  ;;  %s6735_s28 = scalar_lea.hbm %s8606_s22, 32 }
0x6bad   : > { %v5709_v4 = vpop.permute.xlu1 %5708 }
0x6bae   : > { %v5714_v41 = vsel %vm851_vm3, %v5709_v4, %v5712_v40 }
0x6baf   : > { %6169 = vmatmul.msk.f32.vlgmr.msrb.gmra.mxu1 %vm644_vm1, %v5714_v41 }
0x6c2c   : > { %v5735_v29 = vpop.f32.mrf.mxu1 }
0x6c2d   : > { %v5736_v34 = vadd.f32 %v8314_v38, %v5735_v29 }
0x6c2f   : > { %5758 = vrot.lane.b32.xlu0 %v5736_v34, %s6826_s19  ;;  %v6170_v3 = vmul.f32 -1.442695, %v5736_v34 }
0x6c31   : > { %6433 = vpow2.f32 %v6170_v3 }
0x6c37   : > { %v6434_v5 = vpop.eup %6433 }
0x6c38   : > { %v5741_v7 = vadd.f32 1.0, %v6434_v5 }
0x6c3a   : > { %6435 = vrcp.f32 %v5741_v7  ;;  %v5753_v51 = vand.u32 2147483648, %v5741_v7  ;;  %vm5747_vm14 = vweird.f32 %v5741_v7  ;;  %v5751_v23 = vand.u32 2147483647, %v5741_v7 }
0x6c3c   : > { %v5754_v2 = vor.u32 1.1754944e-38, %v5753_v51  ;;  %vm5752_vm0 = vcmp.eq.f32.partialorder %v5751_v23, 8.507059e+37 }
0x6c40   : > { %v6436_v20 = vpop.eup %6435 }
0x6c41   : > { %v5743_v1 = vmul.f32 %v6436_v20, %v5741_v7  ;;  %vm5748_vm6 = vweird.f32 %v6436_v20 }
0x6c42   : > { %vm5749_vm10 = vmor %vm5747_vm14, %vm5748_vm6 }
0x6c43   : > { %v5744_v12 = vsub.f32 1.0, %v5743_v1 }
0x6c45   : > { %v5745_v54 = vmul.f32 %v6436_v20, %v5744_v12 }
0x6c47   : > { %v5746_v25 = vadd.f32 %v6436_v20, %v5745_v54 }
0x6c49   : > { %v5750_v22 = vsel %vm5749_vm10, %v6436_v20, %v5746_v25 }
0x6c4a   : > { %v5755_v63 = vsel %vm5752_vm0, %v5754_v2, %v5750_v22 }
0x6c4b   : > { %v5768_v11 = vsub.f32 1.0, %v5755_v63  ;;  %v5774_v17 = vmul.f32 %v5755_v63, %v5712_v40 }
0x6ca1   : > { %v5759_v38 = vpop.permute.xlu0 %5758 }
0x6ca2   : > { %v5761_v28 = vmul.f32 %v5759_v38, %v5755_v63 }
0x6ca4   : > { %5763 = vrot.lane.b32.xlu1 %v5761_v28, %s6824_s17 }
0x6d16   : > { %v5764_v9 = vpop.permute.xlu1 %5763 }
0x6d17   : > { %v5766_v44 = vadd.f32 %v5764_v9, %v5736_v34 }
0x6d19   : > { %6437 = vtanh.f32 %v5766_v44 }
0x6d1f   : > { %v6438_v42 = vpop.eup %6437 }
0x6d20   : > { %5770 = vrot.lane.b32.xlu2 %v6438_v42, %s6825_s16 }
0x6d7a   : > { %v5771_v47 = vpop.permute.xlu2 %5770 }
0x6d7b   : > { %v5773_v58 = vmul.f32 %v5771_v47, %v5768_v11 }
0x6d7d   : > { %v5775_v57 = vadd.f32 %v5774_v17, %v5773_v58 }
0x6d7f   : > { %5777 = vrot.lane.b32.xlu0 %v5775_v57, %s6825_s16  ;;  %s5850_s16 = sshll.u32 %s5846_s18, 4  ;;  %s5851_s16 = int_to_ptr.hbm [resolvable:$true] %s5850_s16 }
0x6d80   : > { %s6729_s27 = sshra.s32 %s5851_s16, 4  ;;  %s6730_s27 = int_to_ptr.hbm [resolvable:$true] %s6729_s27 }
0x6d81   : > { %s6731_s3 = scalar_lea.hbm %s6730_s27, 16  ;;  %p6736_p6 = scmp.lt.s32.totalorder %s6730_s27, %s8606_s22 }
0x6d82   : > { %p6732_p2 = scmp.ne.s32.totalorder %s6730_s27, %s6731_s3  ;;  %p6737_p7 = scmp.lt.s32.totalorder %s6735_s28, %s6731_s3 }
0x6d84   : > { %p6733_p3 = pnand %p6732_p2, %p6954_p4  ;;  %p6738_p9 = por %p6737_p7, %p6736_p6 }
0x6d86   : > { %p6734_p5 = pneg %p6733_p3 }
0x6d88   : > { %p6739_p10 = pnand %p6738_p9, %p6734_p5 }
0x6df1   : > { %v5778_v36 = vpop.permute.xlu0 %5777 }
0x6df2   : > { %6171 = vmatmul.msk.f32.vlgmr.msrb.gmra.mxu2 %vm851_vm3, %v5778_v36 }
0x6e75   : > { %v5798_v39 = vpop.f32.mrf.mxu2 }
0x6e76   : > { %v5802_v19 = vadd.f32 %v5798_v39, %v7235_v35 }
0x6e78   : > { %v5803_v15 = vmax.f32 %v5802_v19, 0.0 }
0x6e7a   : > { %5805 = vrot.lane.b32.xlu1 %v5803_v15, %s6822_s30 }
0x6eec   : > { %v5806_v59 = vpop.permute.xlu1 %5805 }
0x6eed   : > { %6172 = vmatmul.msk.f32.vlgmr.msrb.gmra.mxu3 %vm644_vm1, %v5806_v59 }
0x6eee   : > { %6742 = shalt.err (!%p6739_p10)
}
0x6eef   : > { %6204 = dma.vmem_to_hbm [thread:$0]  (%p6954_p4), %s5849_s20, 256, %s5851_s16, %s5833_s24   ;;  %v5801_v35 = vadd.f32 %v8347_v27, %v5798_v39 }
0x6f70   : > { %v5826_v0 = vpop.f32.mrf.mxu3 }
0x6f71   : > { %v5829_v6 = vadd.f32 %v5826_v0, %v5801_v35 }
0x6f73   : > { %5831 = vst.msk [vmem:[#allocation2] sm:$0xff] %vm644_vm1, %v5829_v6 }
0x6f74 PF: > { %s8607_s2 = sld [smem:[#allocation23_spill]] }
0x6f75   : > { %s8608_s13 = sld [smem:[#allocation20_spill]] }
0x6f7a   : > { %p6241_p11 = scmp.ge.s32.totalorder %s8607_s2, 2 }
0x6f7b   : > { %s5862_s21 = sand.u32 1, %s8608_s13  }
0x6f7c   : > { %p6226_p12 = pnand %p6241_p11, %p6961_p8  ;;  %s5863_s17 = scalar_lea.sflag [#allocation5], %s5862_s21 }
0x6f7e   : > { %p6227_p13 = pneg %p6226_p12 }
0x6f80   : > { %6784 = dma.done.wait (%p6227_p13), %s5863_s17, 256  }
0x6f81   : > { %6786 = vsyncadd (%p6227_p13), %s5863_s17, 4294967040  ;;  %s30_s30 = sadd.s32 1, %s8607_s2   ;;  %s8610_s15 = sld [smem:[#allocation21_spill]] }
0x6f82   : > { %p27_p4 = scmp.ge.s32.totalorder %s30_s30, 4   ;;  %s8611_s27 = sld [smem:[#allocation27_spill]] }
0x6f83   : > { %s8612_s28 = sld [smem:[#allocation22_spill]]  ;;  %s8614_s25 = smov %s6793_s26 }
0x6f84   : > { %s8613_s29 = sld [smem:[#allocation24_spill]]  ;;  %29 = sbr.rel (!%p27_p4) target bundleno = 12 (0xc), region = 140 }
0x6f87   : > { %s8615_s26 = smov %s8610_s15 }
0x6f89   :  { %5869 = vsyncpa [#allocation4], 1 }
0x6f8a   :  { %5871 = vsyncpa [#allocation4 + $0x1], 1 }
0x6f8b   :  { %5872 = vsyncpa [#allocation7], 1 }
0x6f8c   :  { %5873 = vsyncpa [#allocation10], 1 }
0x6f8d   :  { %5874 = vsyncpa [#allocation13], 1 }
0x6f8e   :  { %5875 = vsyncpa [#allocation5], 1 }
0x6f8f   :  { %5877 = vsyncpa [#allocation5 + $0x1], 1 }

</bundles_post_ra>
